<compile_context>
chip_gen: v6e
topology: v6e:2x2x1
jax: 0.10.0
libtpu: 0.0.40
codegen_flags: <defaults>
</compile_context>

<pallas_src>
import jax
import jax.numpy as jnp
import numpy as np
from jax.experimental import pallas as pl
from jax.experimental.pallas import tpu as pltpu

# Small, module-consistent shapes.
H = W = 16          # spatial
CIN = 3             # RGB input
CIN_PAD = 8         # channels zero-padded to 8 so conv1_1 is a clean K=8 matmul
C1 = 64             # VGG16 conv1_1 / conv1_2 channels
KH = KW = 3
H2, W2 = H // 2, W // 2

IMAGENET_MEAN = (0.485, 0.456, 0.406)
IMAGENET_STD = (0.229, 0.224, 0.225)

_TAPS = tuple((dy, dx) for dy in range(KH) for dx in range(KW))


def vgg_stem_kernel(img_ref, scale_ref, offset_ref, w1_ref, b1_ref,
                    w2_ref, b2_ref, out_ref, pad0_ref, pad1_ref):
  """Standardize + conv3x3(3->64) + ReLU + conv3x3(64->64) + ReLU + maxpool2x2.

  img_ref:   (BB, H, W, CIN_PAD)  float32 in [0, 255], channels 3..7 are zero
  scale_ref: (1, CIN_PAD)  = 1 / (255 * std)  (0 on padded channels)
  offset_ref:(1, CIN_PAD)  = -mean / std      (0 on padded channels)
  w1_ref:    (KH*KW, CIN_PAD, C1)  tap-major conv1_1 weights (padded rows = 0)
  b1_ref:    (1, C1)
  w2_ref:    (KH*KW, C1, C1)       tap-major conv1_2 weights
  b2_ref:    (1, C1)
  out_ref:   (BB, H2, W2, C1)
  pad0_ref:  (BB, H+2, W+2, CIN_PAD)  VMEM scratch (padded standardized image)
  pad1_ref:  (BB, H+2, W+2, C1)       VMEM scratch (padded conv1 activations)
  """
  bb = img_ref.shape[0]          # images handled in this grid step
  m = bb * H * W                 # matmul M dimension (batch folded in)

  # ---- ImageConversion (standardize). Zero padding happens AFTER
  # standardization, exactly like PyTorch (the pad lives inside the conv). ----
  x = (img_ref[...] * scale_ref[...].reshape(1, 1, 1, CIN_PAD)
       + offset_ref[...].reshape(1, 1, 1, CIN_PAD))        # (BB, H, W, CIN_PAD)

  # Zero-fill the padded scratch buffers, then write the interiors.
  pad0_ref[...] = jnp.zeros(pad0_ref.shape, pad0_ref.dtype)
  pad0_ref[:, 1:H + 1, 1:W + 1, :] = x

  # ---- conv1_1 on the MXU: 9 shifted (M, 8) x (8, 64) matmuls. ----
  acc1 = jnp.zeros((m, C1), jnp.float32)
  for k, (dy, dx) in enumerate(_TAPS):
    patch = pad0_ref[:, dy:dy + H, dx:dx + W, :].reshape(m, CIN_PAD)
    acc1 = acc1 + jnp.dot(patch, w1_ref[k],
                          preferred_element_type=jnp.float32)
  a1 = jnp.maximum(acc1 + b1_ref[...], 0.0)                 # (M, C1)

  pad1_ref[...] = jnp.zeros(pad1_ref.shape, pad1_ref.dtype)
  pad1_ref[:, 1:H + 1, 1:W + 1, :] = a1.reshape(bb, H, W, C1)

  # ---- conv1_2 on the MXU: 9 shifted (M, 64) x (64, 64) matmuls. ----
  acc2 = jnp.zeros((m, C1), jnp.float32)
  for k, (dy, dx) in enumerate(_TAPS):
    patch = pad1_ref[:, dy:dy + H, dx:dx + W, :].reshape(m, C1)
    acc2 = acc2 + jnp.dot(patch, w2_ref[k],
                          preferred_element_type=jnp.float32)
  f = jnp.maximum(acc2 + b2_ref[...], 0.0).reshape(bb, H, W, C1)

  # ---- MaxPool2d(kernel=2, stride=2) ----
  f = f.reshape(bb, H2, 2, W, C1)                           # split H (major dim)
  t = jnp.maximum(f[:, :, 0], f[:, :, 1])                   # pool over rows
  t = t.reshape(bb, H2, W2, 2, C1)                          # split W (sublane)
  out_ref[...] = jnp.maximum(t[:, :, :, 0, :], t[:, :, :, 1, :])  # pool cols


def imagenet_backbone_vgg16(image_hwc_u8, params, batch_block=None):
  """image_hwc_u8: (B, H, W, 3) uint8-valued image. Returns NCHW features.

  batch_block=None processes the whole batch in a single grid step (best on
  single-TC v5e/v6e).  On v7x, pass batch_block=B//2 to give each TensorCore a
  block via the "parallel" grid axis.
  """
  w1, b1, w2, b2 = params
  b_sz = image_hwc_u8.shape[0]
  if batch_block is None:
    batch_block = b_sz
  assert b_sz % batch_block == 0
  bb = batch_block
  n_steps = b_sz // bb

  mean = jnp.array(IMAGENET_MEAN, jnp.float32)
  std = jnp.array(IMAGENET_STD, jnp.float32)
  scale = jnp.zeros((1, CIN_PAD), jnp.float32).at[0, :CIN].set(
      1.0 / (255.0 * std))
  offset = jnp.zeros((1, CIN_PAD), jnp.float32).at[0, :CIN].set(-mean / std)

  # Layout plumbing only (no compute hoisted): f32 cast, zero-pad channels to
  # 8, tap-major flattening of the HWIO conv weights.
  image_f32 = jnp.pad(image_hwc_u8.astype(jnp.float32),
                      ((0, 0), (0, 0), (0, 0), (0, CIN_PAD - CIN)))
  w1p = jnp.zeros((KH * KW, CIN_PAD, C1), jnp.float32).at[:, :CIN, :].set(
      w1.reshape(KH * KW, CIN, C1))
  w2f = w2.reshape(KH * KW, C1, C1)
  b1r = b1.reshape(1, C1)
  b2r = b2.reshape(1, C1)

  out_nhwc = pl.pallas_call(
      vgg_stem_kernel,
      out_shape=jax.ShapeDtypeStruct((b_sz, H2, W2, C1), jnp.float32),
      grid_spec=pltpu.PrefetchScalarGridSpec(
          num_scalar_prefetch=0,
          grid=(n_steps,),
          in_specs=[
              pl.BlockSpec((bb, H, W, CIN_PAD), lambda i: (i, 0, 0, 0)),
              pl.BlockSpec((1, CIN_PAD), lambda i: (0, 0)),
              pl.BlockSpec((1, CIN_PAD), lambda i: (0, 0)),
              pl.BlockSpec((KH * KW, CIN_PAD, C1), lambda i: (0, 0, 0)),
              pl.BlockSpec((1, C1), lambda i: (0, 0)),
              pl.BlockSpec((KH * KW, C1, C1), lambda i: (0, 0, 0)),
              pl.BlockSpec((1, C1), lambda i: (0, 0)),
          ],
          out_specs=pl.BlockSpec((bb, H2, W2, C1), lambda i: (i, 0, 0, 0)),
          scratch_shapes=[
              pltpu.VMEM((bb, H + 2, W + 2, CIN_PAD), jnp.float32),
              pltpu.VMEM((bb, H + 2, W + 2, C1), jnp.float32),
          ],
      ),
      compiler_params=pltpu.CompilerParams(
          dimension_semantics=("parallel",)),
  )(image_f32, scale, offset, w1p, b1r, w2f, b2r)

  # Match PyTorch's NCHW output convention (pure layout glue).
  return jnp.transpose(out_nhwc, (0, 3, 1, 2))


def _reference(image_hwc_u8, params):
  """Pure-JAX reference of the same forward pass (returns NCHW)."""
  w1, b1, w2, b2 = params
  mean = jnp.array(IMAGENET_MEAN, jnp.float32)
  std = jnp.array(IMAGENET_STD, jnp.float32)
  x = image_hwc_u8.astype(jnp.float32) / 255.0
  x = (x - mean.reshape(1, 1, 1, CIN)) / std.reshape(1, 1, 1, CIN)

  dn = jax.lax.conv_dimension_numbers(x.shape, w1.shape,
                                      ("NHWC", "HWIO", "NHWC"))
  y = jax.lax.conv_general_dilated(x, w1, (1, 1), "SAME",
                                   dimension_numbers=dn,
                                   precision=jax.lax.Precision.HIGHEST)
  y = jnp.maximum(y + b1.reshape(1, 1, 1, C1), 0.0)
  dn2 = jax.lax.conv_dimension_numbers(y.shape, w2.shape,
                                       ("NHWC", "HWIO", "NHWC"))
  y = jax.lax.conv_general_dilated(y, w2, (1, 1), "SAME",
                                   dimension_numbers=dn2,
                                   precision=jax.lax.Precision.HIGHEST)
  y = jnp.maximum(y + b2.reshape(1, 1, 1, C1), 0.0)
  y = jax.lax.reduce_window(y, -jnp.inf, jax.lax.max,
                            (1, 2, 2, 1), (1, 2, 2, 1), "VALID")
  return jnp.transpose(y, (0, 3, 1, 2))


if __name__ == "__main__":
  key = jax.random.PRNGKey(0)
  k_img, k_w1, k_b1, k_w2, k_b2 = jax.random.split(key, 5)

  B = 2
  # The module expects a 0-255 8-bit image in HWC.
  image = jax.random.randint(k_img, (B, H, W, CIN), 0, 256,
                             dtype=jnp.int32).astype(jnp.uint8)

  # Deterministic synthetic "VGG16 block 1" weights (HWIO).
  w1 = 0.05 * jax.random.normal(k_w1, (KH, KW, CIN, C1), jnp.float32)
  b1 = 0.05 * jax.random.normal(k_b1, (C1,), jnp.float32)
  w2 = 0.05 * jax.random.normal(k_w2, (KH, KW, C1, C1), jnp.float32)
  b2 = 0.05 * jax.random.normal(k_b2, (C1,), jnp.float32)
  params = (w1, b1, w2, b2)

  out = imagenet_backbone_vgg16(image, params)
  out = jax.block_until_ready(out)
  assert out.shape == (B, C1, H2, W2) and out.dtype == jnp.float32

  ref = jax.block_until_ready(_reference(image, params))
  np.testing.assert_allclose(np.asarray(out), np.asarray(ref),
                             rtol=1e-2, atol=1e-2)

  print("KERNEL_OK")
</pallas_src>

<mosaic_0001>
module attributes {stable_mosaic.version = 11 : i64} {
  func.func @vgg_stem_kernel(%arg0: i32, %arg1: memref<2x16x16x8xf32, #tpu.memory_space<vmem>>, %arg2: memref<1x8xf32, #tpu.memory_space<vmem>>, %arg3: memref<1x8xf32, #tpu.memory_space<vmem>>, %arg4: memref<9x8x64xf32, #tpu.memory_space<vmem>>, %arg5: memref<1x64xf32, #tpu.memory_space<vmem>>, %arg6: memref<9x64x64xf32, #tpu.memory_space<vmem>>, %arg7: memref<1x64xf32, #tpu.memory_space<vmem>>, %arg8: memref<2x8x8x64xf32, #tpu.memory_space<vmem>>, %arg9: memref<2x18x18x8xf32, #tpu.memory_space<vmem>>, %arg10: memref<2x18x18x64xf32, #tpu.memory_space<vmem>>) attributes {dimension_semantics = [#tpu.dimension_semantics<parallel>], iteration_bounds = array<i64: 1>, scalar_prefetch = 0 : i64, scratch_operands = 2 : i64, tpu.core_type = #tpu.core_type<tc>, window_params = [{transform_indices = @transform_0, window_bounds = array<i64: 2, 16, 16, 8>}, {pipeline_mode = #tpu.pipeline_mode<synchronous>, transform_indices = @transform_1, window_bounds = array<i64: 1, 8>}, {pipeline_mode = #tpu.pipeline_mode<synchronous>, transform_indices = @transform_2, window_bounds = array<i64: 1, 8>}, {pipeline_mode = #tpu.pipeline_mode<synchronous>, transform_indices = @transform_3, window_bounds = array<i64: 9, 8, 64>}, {pipeline_mode = #tpu.pipeline_mode<synchronous>, transform_indices = @transform_4, window_bounds = array<i64: 1, 64>}, {pipeline_mode = #tpu.pipeline_mode<synchronous>, transform_indices = @transform_5, window_bounds = array<i64: 9, 64, 64>}, {pipeline_mode = #tpu.pipeline_mode<synchronous>, transform_indices = @transform_6, window_bounds = array<i64: 1, 64>}, {transform_indices = @transform_7, window_bounds = array<i64: 2, 8, 8, 64>}]} {
    %c0 = arith.constant 0 : index
    %c0_0 = arith.constant 0 : index
    %c0_1 = arith.constant 0 : index
    %c0_2 = arith.constant 0 : index
    %0 = vector.load %arg1[%c0, %c0_0, %c0_1, %c0_2] : memref<2x16x16x8xf32, #tpu.memory_space<vmem>>, vector<2x16x16x8xf32>
    %c0_3 = arith.constant 0 : index
    %c0_4 = arith.constant 0 : index
    %1 = vector.load %arg2[%c0_3, %c0_4] : memref<1x8xf32, #tpu.memory_space<vmem>>, vector<1x8xf32>
    %2 = vector.shape_cast %1 : vector<1x8xf32> to vector<1x1x1x8xf32>
    %3 = vector.broadcast %2 : vector<1x1x1x8xf32> to vector<2x16x16x8xf32>
    %4 = arith.mulf %0, %3 : vector<2x16x16x8xf32>
    %c0_5 = arith.constant 0 : index
    %c0_6 = arith.constant 0 : index
    %5 = vector.load %arg3[%c0_5, %c0_6] : memref<1x8xf32, #tpu.memory_space<vmem>>, vector<1x8xf32>
    %6 = vector.shape_cast %5 : vector<1x8xf32> to vector<1x1x1x8xf32>
    %7 = vector.broadcast %6 : vector<1x1x1x8xf32> to vector<2x16x16x8xf32>
    %8 = arith.addf %4, %7 : vector<2x16x16x8xf32>
    %cst = arith.constant 0.000000e+00 : f32
    %9 = vector.broadcast %cst : f32 to vector<2x18x18x8xf32>
    %c0_7 = arith.constant 0 : index
    %c0_8 = arith.constant 0 : index
    %c0_9 = arith.constant 0 : index
    %c0_10 = arith.constant 0 : index
    %10 = vector.load %arg9[%c0_7, %c0_8, %c0_9, %c0_10] : memref<2x18x18x8xf32, #tpu.memory_space<vmem>>, vector<2x18x18x8xf32>
    tpu.vector_store %arg9[%c0_7, %c0_8, %c0_9, %c0_10], %9 {strides = array<i32>} : memref<2x18x18x8xf32, #tpu.memory_space<vmem>>, vector<2x18x18x8xf32>,
    %c0_11 = arith.constant 0 : index
    %c1 = arith.constant 1 : index
    %c1_12 = arith.constant 1 : index
    %c0_13 = arith.constant 0 : index
    %11 = vector.load %arg9[%c0_11, %c1, %c1_12, %c0_13] : memref<2x18x18x8xf32, #tpu.memory_space<vmem>>, vector<2x16x16x8xf32>
    tpu.vector_store %arg9[%c0_11, %c1, %c1_12, %c0_13], %8 {strides = array<i32>} : memref<2x18x18x8xf32, #tpu.memory_space<vmem>>, vector<2x16x16x8xf32>,
    %cst_14 = arith.constant 0.000000e+00 : f32
    %12 = vector.broadcast %cst_14 : f32 to vector<512x64xf32>
    %c0_15 = arith.constant 0 : index
    %c0_16 = arith.constant 0 : index
    %c0_17 = arith.constant 0 : index
    %c0_18 = arith.constant 0 : index
    %13 = vector.load %arg9[%c0_15, %c0_16, %c0_17, %c0_18] : memref<2x18x18x8xf32, #tpu.memory_space<vmem>>, vector<2x16x16x8xf32>
    %14 = vector.shape_cast %13 : vector<2x16x16x8xf32> to vector<512x8xf32>
    %c0_19 = arith.constant 0 : index
    %c0_20 = arith.constant 0 : index
    %c0_21 = arith.constant 0 : index
    %15 = vector.load %arg4[%c0_19, %c0_20, %c0_21] : memref<9x8x64xf32, #tpu.memory_space<vmem>>, vector<1x8x64xf32>
    %16 = vector.shape_cast %15 : vector<1x8x64xf32> to vector<8x64xf32>
    %cst_22 = arith.constant dense<0.000000e+00> : vector<512x64xf32>
    %17 = tpu.matmul %14, %16, %cst_22 {dimension_numbers = #tpu.dot_dimension_numbers<[1], [0], [0], [1], [0, 0, 1, 1], [], []>} : vector<512x8xf32>, vector<8x64xf32>, vector<512x64xf32> -> vector<512x64xf32>
    %18 = arith.addf %12, %17 : vector<512x64xf32>
    %c0_23 = arith.constant 0 : index
    %c0_24 = arith.constant 0 : index
    %c1_25 = arith.constant 1 : index
    %c0_26 = arith.constant 0 : index
    %19 = vector.load %arg9[%c0_23, %c0_24, %c1_25, %c0_26] : memref<2x18x18x8xf32, #tpu.memory_space<vmem>>, vector<2x16x16x8xf32>
    %20 = vector.shape_cast %19 : vector<2x16x16x8xf32> to vector<512x8xf32>
    %c1_27 = arith.constant 1 : index
    %c0_28 = arith.constant 0 : index
    %c0_29 = arith.constant 0 : index
    %21 = vector.load %arg4[%c1_27, %c0_28, %c0_29] : memref<9x8x64xf32, #tpu.memory_space<vmem>>, vector<1x8x64xf32>
    %22 = vector.shape_cast %21 : vector<1x8x64xf32> to vector<8x64xf32>
    %cst_30 = arith.constant dense<0.000000e+00> : vector<512x64xf32>
    %23 = tpu.matmul %20, %22, %cst_30 {dimension_numbers = #tpu.dot_dimension_numbers<[1], [0], [0], [1], [0, 0, 1, 1], [], []>} : vector<512x8xf32>, vector<8x64xf32>, vector<512x64xf32> -> vector<512x64xf32>
    %24 = arith.addf %18, %23 : vector<512x64xf32>
    %c0_31 = arith.constant 0 : index
    %c0_32 = arith.constant 0 : index
    %c2 = arith.constant 2 : index
    %c0_33 = arith.constant 0 : index
    %25 = vector.load %arg9[%c0_31, %c0_32, %c2, %c0_33] : memref<2x18x18x8xf32, #tpu.memory_space<vmem>>, vector<2x16x16x8xf32>
    %26 = vector.shape_cast %25 : vector<2x16x16x8xf32> to vector<512x8xf32>
    %c2_34 = arith.constant 2 : index
    %c0_35 = arith.constant 0 : index
    %c0_36 = arith.constant 0 : index
    %27 = vector.load %arg4[%c2_34, %c0_35, %c0_36] : memref<9x8x64xf32, #tpu.memory_space<vmem>>, vector<1x8x64xf32>
    %28 = vector.shape_cast %27 : vector<1x8x64xf32> to vector<8x64xf32>
    %cst_37 = arith.constant dense<0.000000e+00> : vector<512x64xf32>
    %29 = tpu.matmul %26, %28, %cst_37 {dimension_numbers = #tpu.dot_dimension_numbers<[1], [0], [0], [1], [0, 0, 1, 1], [], []>} : vector<512x8xf32>, vector<8x64xf32>, vector<512x64xf32> -> vector<512x64xf32>
    %30 = arith.addf %24, %29 : vector<512x64xf32>
    %c0_38 = arith.constant 0 : index
    %c1_39 = arith.constant 1 : index
    %c0_40 = arith.constant 0 : index
    %c0_41 = arith.constant 0 : index
    %31 = vector.load %arg9[%c0_38, %c1_39, %c0_40, %c0_41] : memref<2x18x18x8xf32, #tpu.memory_space<vmem>>, vector<2x16x16x8xf32>
    %32 = vector.shape_cast %31 : vector<2x16x16x8xf32> to vector<512x8xf32>
    %c3 = arith.constant 3 : index
    %c0_42 = arith.constant 0 : index
    %c0_43 = arith.constant 0 : index
    %33 = vector.load %arg4[%c3, %c0_42, %c0_43] : memref<9x8x64xf32, #tpu.memory_space<vmem>>, vector<1x8x64xf32>
    %34 = vector.shape_cast %33 : vector<1x8x64xf32> to vector<8x64xf32>
    %cst_44 = arith.constant dense<0.000000e+00> : vector<512x64xf32>
    %35 = tpu.matmul %32, %34, %cst_44 {dimension_numbers = #tpu.dot_dimension_numbers<[1], [0], [0], [1], [0, 0, 1, 1], [], []>} : vector<512x8xf32>, vector<8x64xf32>, vector<512x64xf32> -> vector<512x64xf32>
    %36 = arith.addf %30, %35 : vector<512x64xf32>
    %c0_45 = arith.constant 0 : index
    %c1_46 = arith.constant 1 : index
    %c1_47 = arith.constant 1 : index
    %c0_48 = arith.constant 0 : index
    %37 = vector.load %arg9[%c0_45, %c1_46, %c1_47, %c0_48] : memref<2x18x18x8xf32, #tpu.memory_space<vmem>>, vector<2x16x16x8xf32>
    %38 = vector.shape_cast %37 : vector<2x16x16x8xf32> to vector<512x8xf32>
    %c4 = arith.constant 4 : index
    %c0_49 = arith.constant 0 : index
    %c0_50 = arith.constant 0 : index
    %39 = vector.load %arg4[%c4, %c0_49, %c0_50] : memref<9x8x64xf32, #tpu.memory_space<vmem>>, vector<1x8x64xf32>
    %40 = vector.shape_cast %39 : vector<1x8x64xf32> to vector<8x64xf32>
    %cst_51 = arith.constant dense<0.000000e+00> : vector<512x64xf32>
    %41 = tpu.matmul %38, %40, %cst_51 {dimension_numbers = #tpu.dot_dimension_numbers<[1], [0], [0], [1], [0, 0, 1, 1], [], []>} : vector<512x8xf32>, vector<8x64xf32>, vector<512x64xf32> -> vector<512x64xf32>
    %42 = arith.addf %36, %41 : vector<512x64xf32>
    %c0_52 = arith.constant 0 : index
    %c1_53 = arith.constant 1 : index
    %c2_54 = arith.constant 2 : index
    %c0_55 = arith.constant 0 : index
    %43 = vector.load %arg9[%c0_52, %c1_53, %c2_54, %c0_55] : memref<2x18x18x8xf32, #tpu.memory_space<vmem>>, vector<2x16x16x8xf32>
    %44 = vector.shape_cast %43 : vector<2x16x16x8xf32> to vector<512x8xf32>
    %c5 = arith.constant 5 : index
    %c0_56 = arith.constant 0 : index
    %c0_57 = arith.constant 0 : index
    %45 = vector.load %arg4[%c5, %c0_56, %c0_57] : memref<9x8x64xf32, #tpu.memory_space<vmem>>, vector<1x8x64xf32>
    %46 = vector.shape_cast %45 : vector<1x8x64xf32> to vector<8x64xf32>
    %cst_58 = arith.constant dense<0.000000e+00> : vector<512x64xf32>
    %47 = tpu.matmul %44, %46, %cst_58 {dimension_numbers = #tpu.dot_dimension_numbers<[1], [0], [0], [1], [0, 0, 1, 1], [], []>} : vector<512x8xf32>, vector<8x64xf32>, vector<512x64xf32> -> vector<512x64xf32>
    %48 = arith.addf %42, %47 : vector<512x64xf32>
    %c0_59 = arith.constant 0 : index
    %c2_60 = arith.constant 2 : index
    %c0_61 = arith.constant 0 : index
    %c0_62 = arith.constant 0 : index
    %49 = vector.load %arg9[%c0_59, %c2_60, %c0_61, %c0_62] : memref<2x18x18x8xf32, #tpu.memory_space<vmem>>, vector<2x16x16x8xf32>
    %50 = vector.shape_cast %49 : vector<2x16x16x8xf32> to vector<512x8xf32>
    %c6 = arith.constant 6 : index
    %c0_63 = arith.constant 0 : index
    %c0_64 = arith.constant 0 : index
    %51 = vector.load %arg4[%c6, %c0_63, %c0_64] : memref<9x8x64xf32, #tpu.memory_space<vmem>>, vector<1x8x64xf32>
    %52 = vector.shape_cast %51 : vector<1x8x64xf32> to vector<8x64xf32>
    %cst_65 = arith.constant dense<0.000000e+00> : vector<512x64xf32>
    %53 = tpu.matmul %50, %52, %cst_65 {dimension_numbers = #tpu.dot_dimension_numbers<[1], [0], [0], [1], [0, 0, 1, 1], [], []>} : vector<512x8xf32>, vector<8x64xf32>, vector<512x64xf32> -> vector<512x64xf32>
    %54 = arith.addf %48, %53 : vector<512x64xf32>
    %c0_66 = arith.constant 0 : index
    %c2_67 = arith.constant 2 : index
    %c1_68 = arith.constant 1 : index
    %c0_69 = arith.constant 0 : index
    %55 = vector.load %arg9[%c0_66, %c2_67, %c1_68, %c0_69] : memref<2x18x18x8xf32, #tpu.memory_space<vmem>>, vector<2x16x16x8xf32>
    %56 = vector.shape_cast %55 : vector<2x16x16x8xf32> to vector<512x8xf32>
    %c7 = arith.constant 7 : index
    %c0_70 = arith.constant 0 : index
    %c0_71 = arith.constant 0 : index
    %57 = vector.load %arg4[%c7, %c0_70, %c0_71] : memref<9x8x64xf32, #tpu.memory_space<vmem>>, vector<1x8x64xf32>
    %58 = vector.shape_cast %57 : vector<1x8x64xf32> to vector<8x64xf32>
    %cst_72 = arith.constant dense<0.000000e+00> : vector<512x64xf32>
    %59 = tpu.matmul %56, %58, %cst_72 {dimension_numbers = #tpu.dot_dimension_numbers<[1], [0], [0], [1], [0, 0, 1, 1], [], []>} : vector<512x8xf32>, vector<8x64xf32>, vector<512x64xf32> -> vector<512x64xf32>
    %60 = arith.addf %54, %59 : vector<512x64xf32>
    %c0_73 = arith.constant 0 : index
    %c2_74 = arith.constant 2 : index
    %c2_75 = arith.constant 2 : index
    %c0_76 = arith.constant 0 : index
    %61 = vector.load %arg9[%c0_73, %c2_74, %c2_75, %c0_76] : memref<2x18x18x8xf32, #tpu.memory_space<vmem>>, vector<2x16x16x8xf32>
    %62 = vector.shape_cast %61 : vector<2x16x16x8xf32> to vector<512x8xf32>
    %c8 = arith.constant 8 : index
    %c0_77 = arith.constant 0 : index
    %c0_78 = arith.constant 0 : index
    %63 = vector.load %arg4[%c8, %c0_77, %c0_78] : memref<9x8x64xf32, #tpu.memory_space<vmem>>, vector<1x8x64xf32>
    %64 = vector.shape_cast %63 : vector<1x8x64xf32> to vector<8x64xf32>
    %cst_79 = arith.constant dense<0.000000e+00> : vector<512x64xf32>
    %65 = tpu.matmul %62, %64, %cst_79 {dimension_numbers = #tpu.dot_dimension_numbers<[1], [0], [0], [1], [0, 0, 1, 1], [], []>} : vector<512x8xf32>, vector<8x64xf32>, vector<512x64xf32> -> vector<512x64xf32>
    %66 = arith.addf %60, %65 : vector<512x64xf32>
    %c0_80 = arith.constant 0 : index
    %c0_81 = arith.constant 0 : index
    %67 = vector.load %arg5[%c0_80, %c0_81] : memref<1x64xf32, #tpu.memory_space<vmem>>, vector<1x64xf32>
    %68 = vector.broadcast %67 : vector<1x64xf32> to vector<512x64xf32>
    %69 = arith.addf %66, %68 : vector<512x64xf32>
    %cst_82 = arith.constant 0.000000e+00 : f32
    %70 = vector.broadcast %cst_82 : f32 to vector<512x64xf32>
    %71 = arith.maximumf %69, %70 : vector<512x64xf32>
    %cst_83 = arith.constant 0.000000e+00 : f32
    %72 = vector.broadcast %cst_83 : f32 to vector<2x18x18x64xf32>
    %c0_84 = arith.constant 0 : index
    %c0_85 = arith.constant 0 : index
    %c0_86 = arith.constant 0 : index
    %c0_87 = arith.constant 0 : index
    %73 = vector.load %arg10[%c0_84, %c0_85, %c0_86, %c0_87] : memref<2x18x18x64xf32, #tpu.memory_space<vmem>>, vector<2x18x18x64xf32>
    tpu.vector_store %arg10[%c0_84, %c0_85, %c0_86, %c0_87], %72 {strides = array<i32>} : memref<2x18x18x64xf32, #tpu.memory_space<vmem>>, vector<2x18x18x64xf32>,
    %74 = vector.shape_cast %71 : vector<512x64xf32> to vector<2x16x16x64xf32>
    %c0_88 = arith.constant 0 : index
    %c1_89 = arith.constant 1 : index
    %c1_90 = arith.constant 1 : index
    %c0_91 = arith.constant 0 : index
    %75 = vector.load %arg10[%c0_88, %c1_89, %c1_90, %c0_91] : memref<2x18x18x64xf32, #tpu.memory_space<vmem>>, vector<2x16x16x64xf32>
    tpu.vector_store %arg10[%c0_88, %c1_89, %c1_90, %c0_91], %74 {strides = array<i32>} : memref<2x18x18x64xf32, #tpu.memory_space<vmem>>, vector<2x16x16x64xf32>,
    %cst_92 = arith.constant 0.000000e+00 : f32
    %76 = vector.broadcast %cst_92 : f32 to vector<512x64xf32>
    %c0_93 = arith.constant 0 : index
    %c0_94 = arith.constant 0 : index
    %c0_95 = arith.constant 0 : index
    %c0_96 = arith.constant 0 : index
    %77 = vector.load %arg10[%c0_93, %c0_94, %c0_95, %c0_96] : memref<2x18x18x64xf32, #tpu.memory_space<vmem>>, vector<2x16x16x64xf32>
    %78 = vector.shape_cast %77 : vector<2x16x16x64xf32> to vector<512x64xf32>
    %c0_97 = arith.constant 0 : index
    %c0_98 = arith.constant 0 : index
    %c0_99 = arith.constant 0 : index
    %79 = vector.load %arg6[%c0_97, %c0_98, %c0_99] : memref<9x64x64xf32, #tpu.memory_space<vmem>>, vector<1x64x64xf32>
    %80 = vector.shape_cast %79 : vector<1x64x64xf32> to vector<64x64xf32>
    %cst_100 = arith.constant dense<0.000000e+00> : vector<512x64xf32>
    %81 = tpu.matmul %78, %80, %cst_100 {dimension_numbers = #tpu.dot_dimension_numbers<[1], [0], [0], [1], [0, 0, 1, 1], [], []>} : vector<512x64xf32>, vector<64x64xf32>, vector<512x64xf32> -> vector<512x64xf32>
    %82 = arith.addf %76, %81 : vector<512x64xf32>
    %c0_101 = arith.constant 0 : index
    %c0_102 = arith.constant 0 : index
    %c1_103 = arith.constant 1 : index
    %c0_104 = arith.constant 0 : index
    %83 = vector.load %arg10[%c0_101, %c0_102, %c1_103, %c0_104] : memref<2x18x18x64xf32, #tpu.memory_space<vmem>>, vector<2x16x16x64xf32>
    %84 = vector.shape_cast %83 : vector<2x16x16x64xf32> to vector<512x64xf32>
    %c1_105 = arith.constant 1 : index
    %c0_106 = arith.constant 0 : index
    %c0_107 = arith.constant 0 : index
    %85 = vector.load %arg6[%c1_105, %c0_106, %c0_107] : memref<9x64x64xf32, #tpu.memory_space<vmem>>, vector<1x64x64xf32>
    %86 = vector.shape_cast %85 : vector<1x64x64xf32> to vector<64x64xf32>
    %cst_108 = arith.constant dense<0.000000e+00> : vector<512x64xf32>
    %87 = tpu.matmul %84, %86, %cst_108 {dimension_numbers = #tpu.dot_dimension_numbers<[1], [0], [0], [1], [0, 0, 1, 1], [], []>} : vector<512x64xf32>, vector<64x64xf32>, vector<512x64xf32> -> vector<512x64xf32>
    %88 = arith.addf %82, %87 : vector<512x64xf32>
    %c0_109 = arith.constant 0 : index
    %c0_110 = arith.constant 0 : index
    %c2_111 = arith.constant 2 : index
    %c0_112 = arith.constant 0 : index
    %89 = vector.load %arg10[%c0_109, %c0_110, %c2_111, %c0_112] : memref<2x18x18x64xf32, #tpu.memory_space<vmem>>, vector<2x16x16x64xf32>
    %90 = vector.shape_cast %89 : vector<2x16x16x64xf32> to vector<512x64xf32>
    %c2_113 = arith.constant 2 : index
    %c0_114 = arith.constant 0 : index
    %c0_115 = arith.constant 0 : index
    %91 = vector.load %arg6[%c2_113, %c0_114, %c0_115] : memref<9x64x64xf32, #tpu.memory_space<vmem>>, vector<1x64x64xf32>
    %92 = vector.shape_cast %91 : vector<1x64x64xf32> to vector<64x64xf32>
    %cst_116 = arith.constant dense<0.000000e+00> : vector<512x64xf32>
    %93 = tpu.matmul %90, %92, %cst_116 {dimension_numbers = #tpu.dot_dimension_numbers<[1], [0], [0], [1], [0, 0, 1, 1], [], []>} : vector<512x64xf32>, vector<64x64xf32>, vector<512x64xf32> -> vector<512x64xf32>
    %94 = arith.addf %88, %93 : vector<512x64xf32>
    %c0_117 = arith.constant 0 : index
    %c1_118 = arith.constant 1 : index
    %c0_119 = arith.constant 0 : index
    %c0_120 = arith.constant 0 : index
    %95 = vector.load %arg10[%c0_117, %c1_118, %c0_119, %c0_120] : memref<2x18x18x64xf32, #tpu.memory_space<vmem>>, vector<2x16x16x64xf32>
    %96 = vector.shape_cast %95 : vector<2x16x16x64xf32> to vector<512x64xf32>
    %c3_121 = arith.constant 3 : index
    %c0_122 = arith.constant 0 : index
    %c0_123 = arith.constant 0 : index
    %97 = vector.load %arg6[%c3_121, %c0_122, %c0_123] : memref<9x64x64xf32, #tpu.memory_space<vmem>>, vector<1x64x64xf32>
    %98 = vector.shape_cast %97 : vector<1x64x64xf32> to vector<64x64xf32>
    %cst_124 = arith.constant dense<0.000000e+00> : vector<512x64xf32>
    %99 = tpu.matmul %96, %98, %cst_124 {dimension_numbers = #tpu.dot_dimension_numbers<[1], [0], [0], [1], [0, 0, 1, 1], [], []>} : vector<512x64xf32>, vector<64x64xf32>, vector<512x64xf32> -> vector<512x64xf32>
    %100 = arith.addf %94, %99 : vector<512x64xf32>
    %c0_125 = arith.constant 0 : index
    %c1_126 = arith.constant 1 : index
    %c1_127 = arith.constant 1 : index
    %c0_128 = arith.constant 0 : index
    %101 = vector.load %arg10[%c0_125, %c1_126, %c1_127, %c0_128] : memref<2x18x18x64xf32, #tpu.memory_space<vmem>>, vector<2x16x16x64xf32>
    %102 = vector.shape_cast %101 : vector<2x16x16x64xf32> to vector<512x64xf32>
    %c4_129 = arith.constant 4 : index
    %c0_130 = arith.constant 0 : index
    %c0_131 = arith.constant 0 : index
    %103 = vector.load %arg6[%c4_129, %c0_130, %c0_131] : memref<9x64x64xf32, #tpu.memory_space<vmem>>, vector<1x64x64xf32>
    %104 = vector.shape_cast %103 : vector<1x64x64xf32> to vector<64x64xf32>
    %cst_132 = arith.constant dense<0.000000e+00> : vector<512x64xf32>
    %105 = tpu.matmul %102, %104, %cst_132 {dimension_numbers = #tpu.dot_dimension_numbers<[1], [0], [0], [1], [0, 0, 1, 1], [], []>} : vector<512x64xf32>, vector<64x64xf32>, vector<512x64xf32> -> vector<512x64xf32>
    %106 = arith.addf %100, %105 : vector<512x64xf32>
    %c0_133 = arith.constant 0 : index
    %c1_134 = arith.constant 1 : index
    %c2_135 = arith.constant 2 : index
    %c0_136 = arith.constant 0 : index
    %107 = vector.load %arg10[%c0_133, %c1_134, %c2_135, %c0_136] : memref<2x18x18x64xf32, #tpu.memory_space<vmem>>, vector<2x16x16x64xf32>
    %108 = vector.shape_cast %107 : vector<2x16x16x64xf32> to vector<512x64xf32>
    %c5_137 = arith.constant 5 : index
    %c0_138 = arith.constant 0 : index
    %c0_139 = arith.constant 0 : index
    %109 = vector.load %arg6[%c5_137, %c0_138, %c0_139] : memref<9x64x64xf32, #tpu.memory_space<vmem>>, vector<1x64x64xf32>
    %110 = vector.shape_cast %109 : vector<1x64x64xf32> to vector<64x64xf32>
    %cst_140 = arith.constant dense<0.000000e+00> : vector<512x64xf32>
    %111 = tpu.matmul %108, %110, %cst_140 {dimension_numbers = #tpu.dot_dimension_numbers<[1], [0], [0], [1], [0, 0, 1, 1], [], []>} : vector<512x64xf32>, vector<64x64xf32>, vector<512x64xf32> -> vector<512x64xf32>
    %112 = arith.addf %106, %111 : vector<512x64xf32>
    %c0_141 = arith.constant 0 : index
    %c2_142 = arith.constant 2 : index
    %c0_143 = arith.constant 0 : index
    %c0_144 = arith.constant 0 : index
    %113 = vector.load %arg10[%c0_141, %c2_142, %c0_143, %c0_144] : memref<2x18x18x64xf32, #tpu.memory_space<vmem>>, vector<2x16x16x64xf32>
    %114 = vector.shape_cast %113 : vector<2x16x16x64xf32> to vector<512x64xf32>
    %c6_145 = arith.constant 6 : index
    %c0_146 = arith.constant 0 : index
    %c0_147 = arith.constant 0 : index
    %115 = vector.load %arg6[%c6_145, %c0_146, %c0_147] : memref<9x64x64xf32, #tpu.memory_space<vmem>>, vector<1x64x64xf32>
    %116 = vector.shape_cast %115 : vector<1x64x64xf32> to vector<64x64xf32>
    %cst_148 = arith.constant dense<0.000000e+00> : vector<512x64xf32>
    %117 = tpu.matmul %114, %116, %cst_148 {dimension_numbers = #tpu.dot_dimension_numbers<[1], [0], [0], [1], [0, 0, 1, 1], [], []>} : vector<512x64xf32>, vector<64x64xf32>, vector<512x64xf32> -> vector<512x64xf32>
    %118 = arith.addf %112, %117 : vector<512x64xf32>
    %c0_149 = arith.constant 0 : index
    %c2_150 = arith.constant 2 : index
    %c1_151 = arith.constant 1 : index
    %c0_152 = arith.constant 0 : index
    %119 = vector.load %arg10[%c0_149, %c2_150, %c1_151, %c0_152] : memref<2x18x18x64xf32, #tpu.memory_space<vmem>>, vector<2x16x16x64xf32>
    %120 = vector.shape_cast %119 : vector<2x16x16x64xf32> to vector<512x64xf32>
    %c7_153 = arith.constant 7 : index
    %c0_154 = arith.constant 0 : index
    %c0_155 = arith.constant 0 : index
    %121 = vector.load %arg6[%c7_153, %c0_154, %c0_155] : memref<9x64x64xf32, #tpu.memory_space<vmem>>, vector<1x64x64xf32>
    %122 = vector.shape_cast %121 : vector<1x64x64xf32> to vector<64x64xf32>
    %cst_156 = arith.constant dense<0.000000e+00> : vector<512x64xf32>
    %123 = tpu.matmul %120, %122, %cst_156 {dimension_numbers = #tpu.dot_dimension_numbers<[1], [0], [0], [1], [0, 0, 1, 1], [], []>} : vector<512x64xf32>, vector<64x64xf32>, vector<512x64xf32> -> vector<512x64xf32>
    %124 = arith.addf %118, %123 : vector<512x64xf32>
    %c0_157 = arith.constant 0 : index
    %c2_158 = arith.constant 2 : index
    %c2_159 = arith.constant 2 : index
    %c0_160 = arith.constant 0 : index
    %125 = vector.load %arg10[%c0_157, %c2_158, %c2_159, %c0_160] : memref<2x18x18x64xf32, #tpu.memory_space<vmem>>, vector<2x16x16x64xf32>
    %126 = vector.shape_cast %125 : vector<2x16x16x64xf32> to vector<512x64xf32>
    %c8_161 = arith.constant 8 : index
    %c0_162 = arith.constant 0 : index
    %c0_163 = arith.constant 0 : index
    %127 = vector.load %arg6[%c8_161, %c0_162, %c0_163] : memref<9x64x64xf32, #tpu.memory_space<vmem>>, vector<1x64x64xf32>
    %128 = vector.shape_cast %127 : vector<1x64x64xf32> to vector<64x64xf32>
    %cst_164 = arith.constant dense<0.000000e+00> : vector<512x64xf32>
    %129 = tpu.matmul %126, %128, %cst_164 {dimension_numbers = #tpu.dot_dimension_numbers<[1], [0], [0], [1], [0, 0, 1, 1], [], []>} : vector<512x64xf32>, vector<64x64xf32>, vector<512x64xf32> -> vector<512x64xf32>
    %130 = arith.addf %124, %129 : vector<512x64xf32>
    %c0_165 = arith.constant 0 : index
    %c0_166 = arith.constant 0 : index
    %131 = vector.load %arg7[%c0_165, %c0_166] : memref<1x64xf32, #tpu.memory_space<vmem>>, vector<1x64xf32>
    %132 = vector.broadcast %131 : vector<1x64xf32> to vector<512x64xf32>
    %133 = arith.addf %130, %132 : vector<512x64xf32>
    %cst_167 = arith.constant 0.000000e+00 : f32
    %134 = vector.broadcast %cst_167 : f32 to vector<512x64xf32>
    %135 = arith.maximumf %133, %134 : vector<512x64xf32>
    %136 = vector.shape_cast %135 : vector<512x64xf32> to vector<2x16x16x64xf32>
    %137 = vector.shape_cast %136 : vector<2x16x16x64xf32> to vector<2x8x2x16x64xf32>
    %138 = vector.extract_strided_slice %137 {offsets = [0, 0, 0, 0, 0], sizes = [2, 8, 1, 16, 64], strides = [1, 1, 1, 1, 1]} : vector<2x8x2x16x64xf32> to vector<2x8x1x16x64xf32>
    %139 = vector.shape_cast %138 : vector<2x8x1x16x64xf32> to vector<2x8x16x64xf32>
    %140 = vector.extract_strided_slice %137 {offsets = [0, 0, 1, 0, 0], sizes = [2, 8, 1, 16, 64], strides = [1, 1, 1, 1, 1]} : vector<2x8x2x16x64xf32> to vector<2x8x1x16x64xf32>
    %141 = vector.shape_cast %140 : vector<2x8x1x16x64xf32> to vector<2x8x16x64xf32>
    %142 = arith.maximumf %139, %141 : vector<2x8x16x64xf32>
    %143 = vector.shape_cast %142 : vector<2x8x16x64xf32> to vector<2x8x8x2x64xf32>
    %144 = vector.extract_strided_slice %143 {offsets = [0, 0, 0, 0, 0], sizes = [2, 8, 8, 1, 64], strides = [1, 1, 1, 1, 1]} : vector<2x8x8x2x64xf32> to vector<2x8x8x1x64xf32>
    %145 = vector.shape_cast %144 : vector<2x8x8x1x64xf32> to vector<2x8x8x64xf32>
    %146 = vector.extract_strided_slice %143 {offsets = [0, 0, 0, 1, 0], sizes = [2, 8, 8, 1, 64], strides = [1, 1, 1, 1, 1]} : vector<2x8x8x2x64xf32> to vector<2x8x8x1x64xf32>
    %147 = vector.shape_cast %146 : vector<2x8x8x1x64xf32> to vector<2x8x8x64xf32>
    %148 = arith.maximumf %145, %147 : vector<2x8x8x64xf32>
    %c0_168 = arith.constant 0 : index
    %c0_169 = arith.constant 0 : index
    %c0_170 = arith.constant 0 : index
    %c0_171 = arith.constant 0 : index
    %149 = vector.load %arg8[%c0_168, %c0_169, %c0_170, %c0_171] : memref<2x8x8x64xf32, #tpu.memory_space<vmem>>, vector<2x8x8x64xf32>
    tpu.vector_store %arg8[%c0_168, %c0_169, %c0_170, %c0_171], %148 {strides = array<i32>} : memref<2x8x8x64xf32, #tpu.memory_space<vmem>>, vector<2x8x8x64xf32>,
    return
  }
  func.func @transform_0(%arg0: i32) -> (i32, i32, i32, i32) {
    %c0_i32 = arith.constant 0 : i32
    %c0_i32_0 = arith.constant 0 : i32
    %c0_i32_1 = arith.constant 0 : i32
    %c0_i32_2 = arith.constant 0 : i32
    return %arg0, %c0_i32, %c0_i32_0, %c0_i32_1 : i32, i32, i32, i32
  }
  func.func @transform_1(%arg0: i32) -> (i32, i32) {
    %c0_i32 = arith.constant 0 : i32
    %c0_i32_0 = arith.constant 0 : i32
    %c0_i32_1 = arith.constant 0 : i32
    return %c0_i32, %c0_i32_0 : i32, i32
  }
  func.func @transform_2(%arg0: i32) -> (i32, i32) {
    %c0_i32 = arith.constant 0 : i32
    %c0_i32_0 = arith.constant 0 : i32
    %c0_i32_1 = arith.constant 0 : i32
    return %c0_i32, %c0_i32_0 : i32, i32
  }
  func.func @transform_3(%arg0: i32) -> (i32, i32, i32) {
    %c0_i32 = arith.constant 0 : i32
    %c0_i32_0 = arith.constant 0 : i32
    %c0_i32_1 = arith.constant 0 : i32
    %c0_i32_2 = arith.constant 0 : i32
    return %c0_i32, %c0_i32_0, %c0_i32_1 : i32, i32, i32
  }
  func.func @transform_4(%arg0: i32) -> (i32, i32) {
    %c0_i32 = arith.constant 0 : i32
    %c0_i32_0 = arith.constant 0 : i32
    %c0_i32_1 = arith.constant 0 : i32
    return %c0_i32, %c0_i32_0 : i32, i32
  }
  func.func @transform_5(%arg0: i32) -> (i32, i32, i32) {
    %c0_i32 = arith.constant 0 : i32
    %c0_i32_0 = arith.constant 0 : i32
    %c0_i32_1 = arith.constant 0 : i32
    %c0_i32_2 = arith.constant 0 : i32
    return %c0_i32, %c0_i32_0, %c0_i32_1 : i32, i32, i32
  }
  func.func @transform_6(%arg0: i32) -> (i32, i32) {
    %c0_i32 = arith.constant 0 : i32
    %c0_i32_0 = arith.constant 0 : i32
    %c0_i32_1 = arith.constant 0 : i32
    return %c0_i32, %c0_i32_0 : i32, i32
  }
  func.func @transform_7(%arg0: i32) -> (i32, i32, i32, i32) {
    %c0_i32 = arith.constant 0 : i32
    %c0_i32_0 = arith.constant 0 : i32
    %c0_i32_1 = arith.constant 0 : i32
    %c0_i32_2 = arith.constant 0 : i32
    return %arg0, %c0_i32, %c0_i32_0, %c0_i32_1 : i32, i32, i32, i32
  }
}

</mosaic_0001>

<bundles_post_ra>
// kernel: tpu_custom_call.1
= control target key start
LH: loop header
LB: loop body
LE: loop exit
PB: predicated region body
PF: predicated region fallthrough
CT: control target
= control target key end

     0   :  { %vm233_vm0 = vcmask 64512   ;;  %vm236_vm1 = vcmask 58368   ;;  %v26169_v3 = vmov 0.0   ;;  %s26161_s0 = inlined_call_operand.vmem [shape: f32[2,16,16,8], index: 0, kind: input, shape index: {}]   ;;  %s26162_s1 = inlined_call_operand.vmem [shape: f32[1,8], index: 1, kind: input, shape index: {}]   ;;  %s26163_s2 = inlined_call_operand.vmem [shape: f32[1,8], index: 2, kind: input, shape index: {}]   ;;  %s26164_s3 = inlined_call_operand.vmem [shape: f32[9,8,64], index: 3, kind: input, shape index: {}]   ;;  %s26165_s4 = inlined_call_operand.vmem [shape: f32[1,64], index: 4, kind: input, shape index: {}]   ;;  %s26166_s5 = inlined_call_operand.vmem [shape: f32[9,64,64], index: 5, kind: input, shape index: {}]   ;;  %s26167_s6 = inlined_call_operand.vmem [shape: f32[1,64], index: 6, kind: input, shape index: {}]   ;;  %s26168_s7 = inlined_call_operand.hbm [shape: f32[2,8,8,64], index: 7, kind: output, shape index: {}]  }
   0x1   :  { %v20013_v0 = vld [vmem:[%s26164_s3 + $0x8] sm:$0xff]  ;;  %v20018_v1 = vld [vmem:[%s26164_s3] sm:$0xff]  ;;  %v20023_v2 = vld [vmem:[%s26164_s3 + $0x10] sm:$0xff]  ;;  %234 = vst.msk [vmem:[#allocation2] sm:$0xff] %vm233_vm0, %v26169_v3 }
   0x2   :  { %18030 = vmatprep.subr.mxu0 %v20013_v0  ;;  %18128 = vmatprep.subr.mxu1 %v20018_v1  ;;  %235 = vst.msk [vmem:[#allocation2 + $0x8] sm:$0xff] %vm233_vm0, %v26169_v3  ;;  %238 = vst.msk [vmem:[#allocation2 + $0x18] sm:$0xff] %vm233_vm0, %v26169_v3  ;;  %v27_v4 = vld [vmem:[%s26161_s0] sm:$0xff]  ;;  %v28_v8 = vld [vmem:[%s26161_s0 + $0x8] sm:$0xff] }
   0x3   :  { %239 = vst.msk [vmem:[#allocation2 + $0x20] sm:$0xff] %vm233_vm0, %v26169_v3  ;;  %241 = vst.msk [vmem:[#allocation2 + $0x30] sm:$0xff] %vm233_vm0, %v26169_v3  ;;  %v20249_v5 = vld [vmem:[%s26162_s1] ss:$0 sm:$0xff]  ;;  %18031 = vmatpush3.msra.mxu0 %v20013_v0  ;;  %18129 = vmatpush3.msra.mxu1 %v20018_v1  ;;  %v29_v9 = vld [vmem:[%s26161_s0 + $0x10] sm:$0xff] }
   0x4   :  { %242 = vst.msk [vmem:[#allocation2 + $0x38] sm:$0xff] %vm233_vm0, %v26169_v3  ;;  %244 = vst.msk [vmem:[#allocation2 + $0x48] sm:$0xff] %vm233_vm0, %v26169_v3  ;;  %v20254_v6 = vld [vmem:[%s26163_s2] ss:$0 sm:$0xff]  ;;  %v98_v7 = vmul.f32 %v20249_v5, %v27_v4  ;;  %v30_v10 = vld [vmem:[%s26161_s0 + $0x18] sm:$0xff]  ;;  %18226 = vmatprep.subr.mxu0 %v20023_v2  ;;  %v99_v11 = vmul.f32 %v20249_v5, %v28_v8  ;;  %v100_v12 = vmul.f32 %v20249_v5, %v29_v9 }
   0x5   :  { %245 = vst.msk [vmem:[#allocation2 + $0x50] sm:$0xff] %vm233_vm0, %v26169_v3  ;;  %247 = vst.msk [vmem:[#allocation2 + $0x60] sm:$0xff] %vm233_vm0, %v26169_v3  ;;  %v101_v13 = vmul.f32 %v20249_v5, %v30_v10  ;;  %v31_v14 = vld [vmem:[%s26161_s0 + $0x20] sm:$0xff]  ;;  %v32_v15 = vld [vmem:[%s26161_s0 + $0x28] sm:$0xff] }
   0x6   :  { %248 = vst.msk [vmem:[#allocation2 + $0x68] sm:$0xff] %vm233_vm0, %v26169_v3  ;;  %250 = vst.msk [vmem:[#allocation2 + $0x78] sm:$0xff] %vm233_vm0, %v26169_v3  ;;  %v33_v16 = vld [vmem:[%s26161_s0 + $0x30] sm:$0xff]  ;;  %v169_v17 = vadd.f32 %v20254_v6, %v98_v7  ;;  %v102_v18 = vmul.f32 %v20249_v5, %v31_v14  ;;  %v103_v19 = vmul.f32 %v20249_v5, %v32_v15  ;;  %v34_v21 = vld [vmem:[%s26161_s0 + $0x38] sm:$0xff] }
   0x7   :  { %251 = vst.msk [vmem:[#allocation2 + $0x80] sm:$0xff] %vm233_vm0, %v26169_v3  ;;  %253 = vst.msk [vmem:[#allocation2 + $0x90] sm:$0xff] %vm233_vm0, %v26169_v3  ;;  %v104_v20 = vmul.f32 %v20249_v5, %v33_v16  ;;  %v35_v22 = vld [vmem:[%s26161_s0 + $0x40] sm:$0xff]  ;;  %v36_v23 = vld [vmem:[%s26161_s0 + $0x48] sm:$0xff]  ;;  %v170_v24 = vadd.f32 %v20254_v6, %v99_v11  ;;  %v171_v25 = vadd.f32 %v20254_v6, %v100_v12 }
   0x8   :  { %254 = vst.msk [vmem:[#allocation2 + $0x98] sm:$0xff] %vm233_vm0, %v26169_v3  ;;  %256 = vst.msk [vmem:[#allocation2 + $0xa8] sm:$0xff] %vm233_vm0, %v26169_v3  ;;  %v172_v26 = vadd.f32 %v20254_v6, %v101_v13  ;;  %v105_v27 = vmul.f32 %v20249_v5, %v34_v21  ;;  %v37_v28 = vld [vmem:[%s26161_s0 + $0x50] sm:$0xff]  ;;  %v38_v29 = vld [vmem:[%s26161_s0 + $0x58] sm:$0xff]  ;;  %v173_v31 = vadd.f32 %v20254_v6, %v102_v18 }
   0x9   :  { %257 = vst.msk [vmem:[#allocation2 + $0xb0] sm:$0xff] %vm233_vm0, %v26169_v3  ;;  %259 = vst.msk [vmem:[#allocation2 + $0xc0] sm:$0xff] %vm233_vm0, %v26169_v3  ;;  %v39_v30 = vld [vmem:[%s26161_s0 + $0x60] sm:$0xff]  ;;  %v174_v32 = vadd.f32 %v20254_v6, %v103_v19  ;;  %v175_v33 = vadd.f32 %v20254_v6, %v104_v20  ;;  %v106_v34 = vmul.f32 %v20249_v5, %v35_v22  ;;  %v40_v35 = vld [vmem:[%s26161_s0 + $0x68] sm:$0xff] }
   0xa   :  { %260 = vst.msk [vmem:[#allocation2 + $0xc8] sm:$0xff] %vm233_vm0, %v26169_v3  ;;  %262 = vst.msk [vmem:[#allocation2 + $0xd8] sm:$0xff] %vm233_vm0, %v26169_v3  ;;  %v41_v36 = vld [vmem:[%s26161_s0 + $0x70] sm:$0xff]  ;;  %v42_v37 = vld [vmem:[%s26161_s0 + $0x78] sm:$0xff]  ;;  %v176_v38 = vadd.f32 %v20254_v6, %v105_v27  ;;  %v107_v39 = vmul.f32 %v20249_v5, %v36_v23  ;;  %v108_v40 = vmul.f32 %v20249_v5, %v37_v28 }
   0xb   :  { %263 = vst.msk [vmem:[#allocation2 + $0xe0] sm:$0xff] %vm233_vm0, %v26169_v3  ;;  %265 = vst.msk [vmem:[#allocation2 + $0xf0] sm:$0xff] %vm233_vm0, %v26169_v3  ;;  %v109_v41 = vmul.f32 %v20249_v5, %v38_v29  ;;  %v43_v42 = vld [vmem:[%s26161_s0 + $0x80] sm:$0xff]  ;;  %v44_v43 = vld [vmem:[%s26161_s0 + $0x88] sm:$0xff]  ;;  %v177_v48 = vadd.f32 %v20254_v6, %v106_v34  ;;  %v110_v49 = vmul.f32 %v20249_v5, %v39_v30 }
   0xc   :  { %266 = vst.msk [vmem:[#allocation2 + $0xf8] sm:$0xff] %vm233_vm0, %v26169_v3  ;;  %268 = vst.msk [vmem:[#allocation2 + $0x108] sm:$0xff] %vm233_vm0, %v26169_v3  ;;  %v45_v44 = vld [vmem:[%s26161_s0 + $0x90] sm:$0xff]  ;;  %v473_v45 = vld [vmem:[#allocation2 + $0x1] sm:$0xff]  ;;  %v111_v50 = vmul.f32 %v20249_v5, %v40_v35  ;;  %v112_v51 = vmul.f32 %v20249_v5, %v41_v36  ;;  %v178_v53 = vadd.f32 %v20254_v6, %v107_v39 }
   0xd   :  { %269 = vst.msk [vmem:[#allocation2 + $0x110] sm:$0xff] %vm233_vm0, %v26169_v3  ;;  %271 = vst.msk [vmem:[#allocation2 + $0x120] sm:$0xff] %vm233_vm0, %v26169_v3  ;;  %v408_v46 = vld [vmem:[#allocation2] sm:$0xff]  ;;  %18032 = vmatprep.mubr.msk.f32.mxu0 %vm233_vm0, %v473_v45  ;;  %v409_v52 = vld [vmem:[#allocation2 + $0x8] sm:$0xff]  ;;  %v179_v54 = vadd.f32 %v20254_v6, %v108_v40  ;;  %v180_v55 = vadd.f32 %v20254_v6, %v109_v41  ;;  %v181_v58 = vadd.f32 %v20254_v6, %v110_v49 }
   0xe   :  { %272 = vst.msk [vmem:[#allocation2 + $0x128] sm:$0xff] %vm233_vm0, %v26169_v3  ;;  %274 = vst.msk [vmem:[#allocation2 + $0x138] sm:$0xff] %vm233_vm0, %v26169_v3  ;;  %18130 = vmatprep.mubr.msk.f32.mxu1 %vm233_vm0, %v408_v46  ;;  %v46_v56 = vld [vmem:[%s26161_s0 + $0x98] sm:$0xff]  ;;  %v47_v57 = vld [vmem:[%s26161_s0 + $0xa0] sm:$0xff]  ;;  %v182_v59 = vadd.f32 %v20254_v6, %v111_v50  ;;  %v183_v60 = vadd.f32 %v20254_v6, %v112_v51  ;;  %v113_v63 = vmul.f32 %v20249_v5, %v42_v37 }
   0xf   :  { %275 = vst.msk [vmem:[#allocation2 + $0x140] sm:$0xff] %vm233_vm0, %v26169_v3  ;;  %277 = vst.msk [vmem:[#allocation2 + $0x150] sm:$0xff] %vm233_vm0, %v26169_v3  ;;  %18131 = vmatmul.mubr.msk.f32.vlgmr.msra.gmra.mxu1 %vm233_vm0, %v409_v52  ;;  %v48_v61 = vld [vmem:[%s26161_s0 + $0xa8] sm:$0xff]  ;;  %v49_v62 = vld [vmem:[%s26161_s0 + $0xb0] sm:$0xff]  ;;  %v114_v0 = vmul.f32 %v20249_v5, %v43_v42  ;;  %v115_v1 = vmul.f32 %v20249_v5, %v44_v43  ;;  %v116_v4 = vmul.f32 %v20249_v5, %v45_v44 }
  0x10   :  { %278 = vst.msk [vmem:[#allocation2 + $0x158] sm:$0xff] %vm233_vm0, %v26169_v3  ;;  %280 = vst.msk [vmem:[#allocation2 + $0x168] sm:$0xff] %vm233_vm0, %v26169_v3  ;;  %v50_v7 = vld [vmem:[%s26161_s0 + $0xb8] sm:$0xff]  ;;  %v52_v8 = vld [vmem:[%s26161_s0 + $0xc8] sm:$0xff]  ;;  %v117_v9 = vmul.f32 %v20249_v5, %v46_v56  ;;  %v118_v10 = vmul.f32 %v20249_v5, %v47_v57  ;;  %v119_v11 = vmul.f32 %v20249_v5, %v48_v61 }
  0x11   :  { %281 = vst.msk [vmem:[#allocation2 + $0x170] sm:$0xff] %vm233_vm0, %v26169_v3  ;;  %283 = vst.msk [vmem:[#allocation2 + $0x180] sm:$0xff] %vm233_vm0, %v26169_v3  ;;  %v120_v12 = vmul.f32 %v20249_v5, %v49_v62  ;;  %v53_v13 = vld [vmem:[%s26161_s0 + $0xd0] sm:$0xff]  ;;  %v54_v14 = vld [vmem:[%s26161_s0 + $0xd8] sm:$0xff]  ;;  %v184_v18 = vadd.f32 %v20254_v6, %v113_v63  ;;  %v185_v19 = vadd.f32 %v20254_v6, %v114_v0 }
  0x12   :  { %284 = vst.msk [vmem:[#allocation2 + $0x188] sm:$0xff] %vm233_vm0, %v26169_v3  ;;  %286 = vst.msk [vmem:[#allocation2 + $0x198] sm:$0xff] %vm233_vm0, %v26169_v3  ;;  %v55_v15 = vld [vmem:[%s26161_s0 + $0xe0] sm:$0xff]  ;;  %v186_v20 = vadd.f32 %v20254_v6, %v115_v1  ;;  %v187_v21 = vadd.f32 %v20254_v6, %v116_v4  ;;  %v56_v22 = vld [vmem:[%s26161_s0 + $0xe8] sm:$0xff]  ;;  %v189_v27 = vadd.f32 %v20254_v6, %v118_v10 }
  0x13   :  { %287 = vst.msk [vmem:[#allocation2 + $0x1a0] sm:$0xff] %vm233_vm0, %v26169_v3  ;;  %289 = vst.msk [vmem:[#allocation2 + $0x1b0] sm:$0xff] %vm233_vm0, %v26169_v3  ;;  %v190_v28 = vadd.f32 %v20254_v6, %v119_v11  ;;  %v191_v30 = vadd.f32 %v20254_v6, %v120_v12  ;;  %v123_v35 = vmul.f32 %v20249_v5, %v52_v8  ;;  %v61_v12 = vld [vmem:[%s26161_s0 + $0x110] sm:$0xff] }
  0x14   :  { %290 = vst.msk [vmem:[#allocation2 + $0x1b8] sm:$0xff] %vm233_vm0, %v26169_v3  ;;  %292 = vst.msk [vmem:[#allocation2 + $0x1c8] sm:$0xff] %vm233_vm0, %v26169_v3  ;;  %v124_v36 = vmul.f32 %v20249_v5, %v53_v13  ;;  %v125_v37 = vmul.f32 %v20249_v5, %v54_v14  ;;  %v126_v42 = vmul.f32 %v20249_v5, %v55_v15  ;;  %v62_v13 = vld [vmem:[%s26161_s0 + $0x118] sm:$0xff]  ;;  %v63_v14 = vld [vmem:[%s26161_s0 + $0x120] sm:$0xff] }
  0x15   :  { %293 = vst.msk [vmem:[#allocation2 + $0x1d0] sm:$0xff] %vm233_vm0, %v26169_v3  ;;  %295 = vst.msk [vmem:[#allocation2 + $0x1e0] sm:$0xff] %vm233_vm0, %v26169_v3  ;;  %v127_v43 = vmul.f32 %v20249_v5, %v56_v22  ;;  %v194_v44 = vadd.f32 %v20254_v6, %v123_v35  ;;  %v132_v15 = vmul.f32 %v20249_v5, %v61_v12  ;;  %v78_v12 = vld [vmem:[%s26161_s0 + $0x198] sm:$0xff] }
  0x16   :  { %296 = vst.msk [vmem:[#allocation2 + $0x1e8] sm:$0xff] %vm233_vm0, %v26169_v3  ;;  %298 = vst.msk [vmem:[#allocation2 + $0x1f8] sm:$0xff] %vm233_vm0, %v26169_v3  ;;  %v195_v45 = vadd.f32 %v20254_v6, %v124_v36  ;;  %v196_v46 = vadd.f32 %v20254_v6, %v125_v37  ;;  %v70_v36 = vld [vmem:[%s26161_s0 + $0x158] sm:$0xff]  ;;  %v71_v37 = vld [vmem:[%s26161_s0 + $0x160] sm:$0xff] }
  0x17   :  { %299 = vst.msk [vmem:[#allocation2 + $0x200] sm:$0xff] %vm233_vm0, %v26169_v3  ;;  %301 = vst.msk [vmem:[#allocation2 + $0x210] sm:$0xff] %vm233_vm0, %v26169_v3 }
  0x18   :  { %302 = vst.msk [vmem:[#allocation2 + $0x218] sm:$0xff] %vm233_vm0, %v26169_v3  ;;  %304 = vst.msk [vmem:[#allocation2 + $0x228] sm:$0xff] %vm233_vm0, %v26169_v3 }
  0x19   :  { %305 = vst.msk [vmem:[#allocation2 + $0x230] sm:$0xff] %vm233_vm0, %v26169_v3  ;;  %307 = vst.msk [vmem:[#allocation2 + $0x240] sm:$0xff] %vm233_vm0, %v26169_v3 }
  0x1a   :  { %308 = vst.msk [vmem:[#allocation2 + $0x248] sm:$0xff] %vm233_vm0, %v26169_v3  ;;  %310 = vst.msk [vmem:[#allocation2 + $0x258] sm:$0xff] %vm233_vm0, %v26169_v3 }
  0x1b   :  { %311 = vst.msk [vmem:[#allocation2 + $0x260] sm:$0xff] %vm233_vm0, %v26169_v3  ;;  %313 = vst.msk [vmem:[#allocation2 + $0x270] sm:$0xff] %vm233_vm0, %v26169_v3 }
  0x1c   :  { %314 = vst.msk [vmem:[#allocation2 + $0x278] sm:$0xff] %vm233_vm0, %v26169_v3  ;;  %316 = vst.msk [vmem:[#allocation2 + $0x288] sm:$0xff] %vm233_vm0, %v26169_v3 }
  0x1d   :  { %317 = vst.msk [vmem:[#allocation2 + $0x290] sm:$0xff] %vm233_vm0, %v26169_v3  ;;  %319 = vst.msk [vmem:[#allocation2 + $0x2a0] sm:$0xff] %vm233_vm0, %v26169_v3 }
  0x1e   :  { %320 = vst.msk [vmem:[#allocation2 + $0x2a8] sm:$0xff] %vm233_vm0, %v26169_v3  ;;  %322 = vst.msk [vmem:[#allocation2 + $0x2b8] sm:$0xff] %vm233_vm0, %v26169_v3 }
  0x1f   :  { %323 = vst.msk [vmem:[#allocation2 + $0x2c0] sm:$0xff] %vm233_vm0, %v26169_v3  ;;  %325 = vst.msk [vmem:[#allocation2 + $0x2d0] sm:$0xff] %vm233_vm0, %v26169_v3 }
  0x20   :  { %326 = vst.msk [vmem:[#allocation2 + $0x2d8] sm:$0xff] %vm233_vm0, %v26169_v3  ;;  %328 = vst.msk [vmem:[#allocation2 + $0x2e8] sm:$0xff] %vm233_vm0, %v26169_v3 }
  0x21   :  { %329 = vst.msk [vmem:[#allocation2 + $0x2f0] sm:$0xff] %vm233_vm0, %v26169_v3  ;;  %331 = vst.msk [vmem:[#allocation2 + $0x300] sm:$0xff] %vm233_vm0, %v26169_v3 }
  0x22   :  { %332 = vst.msk [vmem:[#allocation2 + $0x308] sm:$0xff] %vm233_vm0, %v26169_v3  ;;  %334 = vst.msk [vmem:[#allocation2 + $0x318] sm:$0xff] %vm233_vm0, %v26169_v3 }
  0x23   :  { %335 = vst.msk [vmem:[#allocation2 + $0x320] sm:$0xff] %vm233_vm0, %v26169_v3  ;;  %337 = vst.msk [vmem:[#allocation2 + $0x330] sm:$0xff] %vm233_vm0, %v26169_v3 }
  0x24   :  { %338 = vst.msk [vmem:[#allocation2 + $0x338] sm:$0xff] %vm233_vm0, %v26169_v3  ;;  %340 = vst.msk [vmem:[#allocation2 + $0x348] sm:$0xff] %vm233_vm0, %v26169_v3 }
  0x25   :  { %341 = vst.msk [vmem:[#allocation2 + $0x350] sm:$0xff] %vm233_vm0, %v26169_v3  ;;  %344 = vst.msk [vmem:[#allocation2 + $0x19] sm:$0xff] %vm233_vm0, %v169_v17 }
  0x26   :  { %237 = vst.msk [vmem:[#allocation2 + $0x10] sm:$0x3] %vm236_vm1, %v26169_v3  ;;  %240 = vst.msk [vmem:[#allocation2 + $0x28] sm:$0x3] %vm236_vm1, %v26169_v3 }
  0x27   :  { %243 = vst.msk [vmem:[#allocation2 + $0x40] sm:$0x3] %vm236_vm1, %v26169_v3  ;;  %246 = vst.msk [vmem:[#allocation2 + $0x58] sm:$0x3] %vm236_vm1, %v26169_v3 }
  0x28   :  { %249 = vst.msk [vmem:[#allocation2 + $0x70] sm:$0x3] %vm236_vm1, %v26169_v3  ;;  %252 = vst.msk [vmem:[#allocation2 + $0x88] sm:$0x3] %vm236_vm1, %v26169_v3 }
  0x29   :  { %255 = vst.msk [vmem:[#allocation2 + $0xa0] sm:$0x3] %vm236_vm1, %v26169_v3  ;;  %258 = vst.msk [vmem:[#allocation2 + $0xb8] sm:$0x3] %vm236_vm1, %v26169_v3 }
  0x2a   :  { %261 = vst.msk [vmem:[#allocation2 + $0xd0] sm:$0x3] %vm236_vm1, %v26169_v3  ;;  %264 = vst.msk [vmem:[#allocation2 + $0xe8] sm:$0x3] %vm236_vm1, %v26169_v3 }
  0x2b   :  { %267 = vst.msk [vmem:[#allocation2 + $0x100] sm:$0x3] %vm236_vm1, %v26169_v3  ;;  %270 = vst.msk [vmem:[#allocation2 + $0x118] sm:$0x3] %vm236_vm1, %v26169_v3 }
  0x2c   :  { %273 = vst.msk [vmem:[#allocation2 + $0x130] sm:$0x3] %vm236_vm1, %v26169_v3  ;;  %276 = vst.msk [vmem:[#allocation2 + $0x148] sm:$0x3] %vm236_vm1, %v26169_v3  ;;  %v475_v16 = vld [vmem:[#allocation2 + $0x19] sm:$0xff] }
  0x2d   :  { %279 = vst.msk [vmem:[#allocation2 + $0x160] sm:$0x3] %vm236_vm1, %v26169_v3  ;;  %282 = vst.msk [vmem:[#allocation2 + $0x178] sm:$0x3] %vm236_vm1, %v26169_v3  ;;  %v474_v47 = vld [vmem:[#allocation2 + $0x9] sm:$0xff]  ;;  %v20401_v17 = vld [vmem:[#allocation2 + $0x18] sm:$0xff] }
  0x2e   :  { %285 = vst.msk [vmem:[#allocation2 + $0x190] sm:$0x3] %vm236_vm1, %v26169_v3  ;;  %288 = vst.msk [vmem:[#allocation2 + $0x1a8] sm:$0x3] %vm236_vm1, %v26169_v3  ;;  %18033 = vmatmul.mubr.msk.f32.vlgmr.msra.gmra.mxu0 %vm233_vm0, %v474_v47  ;;  %18133 = vmatprep.mubr.msk.f32.mxu1 %vm233_vm0, %v20401_v17  ;;  %v197_v47 = vadd.f32 %v20254_v6, %v126_v42 }
  0x2f   :  { %291 = vst.msk [vmem:[#allocation2 + $0x1c0] sm:$0x3] %vm236_vm1, %v26169_v3  ;;  %294 = vst.msk [vmem:[#allocation2 + $0x1d8] sm:$0x3] %vm236_vm1, %v26169_v3  ;;  %18227 = vmatpush3.msra.mxu0 %v20023_v2  ;;  %v51_v2 = vld [vmem:[%s26161_s0 + $0xc0] sm:$0xff]  ;;  %18035 = vmatprep.mubr.msk.f32.mxu0 %vm233_vm0, %v475_v16  ;;  %v133_v16 = vmul.f32 %v20249_v5, %v62_v13 }
  0x30   :  { %297 = vst.msk [vmem:[#allocation2 + $0x1f0] sm:$0x3] %vm236_vm1, %v26169_v3  ;;  %300 = vst.msk [vmem:[#allocation2 + $0x208] sm:$0x3] %vm236_vm1, %v26169_v3  ;;  %v79_v13 = vld [vmem:[%s26161_s0 + $0x1a0] sm:$0xff] }
  0x31   :  { %303 = vst.msk [vmem:[#allocation2 + $0x220] sm:$0x3] %vm236_vm1, %v26169_v3  ;;  %306 = vst.msk [vmem:[#allocation2 + $0x238] sm:$0x3] %vm236_vm1, %v26169_v3 }
  0x32   :  { %309 = vst.msk [vmem:[#allocation2 + $0x250] sm:$0x3] %vm236_vm1, %v26169_v3  ;;  %312 = vst.msk [vmem:[#allocation2 + $0x268] sm:$0x3] %vm236_vm1, %v26169_v3 }
  0x33   :  { %315 = vst.msk [vmem:[#allocation2 + $0x280] sm:$0x3] %vm236_vm1, %v26169_v3  ;;  %318 = vst.msk [vmem:[#allocation2 + $0x298] sm:$0x3] %vm236_vm1, %v26169_v3 }
  0x34   :  { %321 = vst.msk [vmem:[#allocation2 + $0x2b0] sm:$0x3] %vm236_vm1, %v26169_v3  ;;  %324 = vst.msk [vmem:[#allocation2 + $0x2c8] sm:$0x3] %vm236_vm1, %v26169_v3 }
  0x35   :  { %327 = vst.msk [vmem:[#allocation2 + $0x2e0] sm:$0x3] %vm236_vm1, %v26169_v3  ;;  %330 = vst.msk [vmem:[#allocation2 + $0x2f8] sm:$0x3] %vm236_vm1, %v26169_v3 }
  0x36   :  { %333 = vst.msk [vmem:[#allocation2 + $0x310] sm:$0x3] %vm236_vm1, %v26169_v3  ;;  %336 = vst.msk [vmem:[#allocation2 + $0x328] sm:$0x3] %vm236_vm1, %v26169_v3 }
  0x37   :  { %339 = vst.msk [vmem:[#allocation2 + $0x340] sm:$0x3] %vm236_vm1, %v26169_v3  ;;  %342 = vst.msk [vmem:[#allocation2 + $0x358] sm:$0x3] %vm236_vm1, %v26169_v3 }
  0x38   :  { %345 = vst.msk [vmem:[#allocation2 + $0x21] sm:$0xff] %vm233_vm0, %v170_v24  ;;  %346 = vst.msk [vmem:[#allocation2 + $0x31] sm:$0xff] %vm233_vm0, %v171_v25 }
  0x39   :  { %347 = vst.msk [vmem:[#allocation2 + $0x39] sm:$0xff] %vm233_vm0, %v172_v26  ;;  %348 = vst.msk [vmem:[#allocation2 + $0x49] sm:$0xff] %vm233_vm0, %v173_v31  ;;  %v188_v26 = vadd.f32 %v20254_v6, %v117_v9  ;;  %v121_v31 = vmul.f32 %v20249_v5, %v50_v7  ;;  %v59_v7 = vld [vmem:[%s26161_s0 + $0x100] sm:$0xff] }
  0x3a   :  { %349 = vst.msk [vmem:[#allocation2 + $0x51] sm:$0xff] %vm233_vm0, %v174_v32  ;;  %350 = vst.msk [vmem:[#allocation2 + $0x61] sm:$0xff] %vm233_vm0, %v175_v33  ;;  %v122_v32 = vmul.f32 %v20249_v5, %v51_v2  ;;  %v60_v2 = vld [vmem:[%s26161_s0 + $0x108] sm:$0xff]  ;;  %v130_v10 = vmul.f32 %v20249_v5, %v59_v7 }
  0x3b   :  { %351 = vst.msk [vmem:[#allocation2 + $0x69] sm:$0xff] %vm233_vm0, %v176_v38  ;;  %352 = vst.msk [vmem:[#allocation2 + $0x79] sm:$0xff] %vm233_vm0, %v177_v48  ;;  %v192_v40 = vadd.f32 %v20254_v6, %v121_v31  ;;  %v198_v48 = vadd.f32 %v20254_v6, %v127_v43  ;;  %v131_v11 = vmul.f32 %v20249_v5, %v60_v2  ;;  %v73_v43 = vld [vmem:[%s26161_s0 + $0x170] sm:$0xff] }
  0x3c   :  { %353 = vst.msk [vmem:[#allocation2 + $0x81] sm:$0xff] %vm233_vm0, %v178_v53  ;;  %354 = vst.msk [vmem:[#allocation2 + $0x91] sm:$0xff] %vm233_vm0, %v179_v54  ;;  %v193_v41 = vadd.f32 %v20254_v6, %v122_v32  ;;  %v201_v22 = vadd.f32 %v20254_v6, %v130_v10  ;;  %v203_v31 = vadd.f32 %v20254_v6, %v132_v15 }
  0x3d   :  { %355 = vst.msk [vmem:[#allocation2 + $0x99] sm:$0xff] %vm233_vm0, %v180_v55  ;;  %356 = vst.msk [vmem:[#allocation2 + $0xa9] sm:$0xff] %vm233_vm0, %v181_v58  ;;  %v204_v32 = vadd.f32 %v20254_v6, %v133_v16 }
  0x3e   :  { %357 = vst.msk [vmem:[#allocation2 + $0xb1] sm:$0xff] %vm233_vm0, %v182_v59  ;;  %358 = vst.msk [vmem:[#allocation2 + $0xc1] sm:$0xff] %vm233_vm0, %v183_v60 }
  0x3f   :  { %v476_v23 = vld [vmem:[#allocation2 + $0x21] sm:$0xff]  ;;  %v477_v25 = vld [vmem:[#allocation2 + $0x31] sm:$0xff]  ;;  %359 = vst.msk [vmem:[#allocation2 + $0xc9] sm:$0xff] %vm233_vm0, %v184_v18  ;;  %360 = vst.msk [vmem:[#allocation2 + $0xd9] sm:$0xff] %vm233_vm0, %v185_v19  ;;  %v134_v18 = vmul.f32 %v20249_v5, %v63_v14 }
  0x40   :  { %v20413_v24 = vld [vmem:[#allocation2 + $0x20] sm:$0xff]  ;;  %18036 = vmatmul.mubr.msk.f32.gmra.mxu0 %vm233_vm0, %v476_v23  ;;  %v20421_v29 = vld [vmem:[#allocation2 + $0x30] sm:$0xff]  ;;  %361 = vst.msk [vmem:[#allocation2 + $0xe1] sm:$0xff] %vm233_vm0, %v186_v20  ;;  %362 = vst.msk [vmem:[#allocation2 + $0xf1] sm:$0xff] %vm233_vm0, %v187_v21  ;;  %v202_v23 = vadd.f32 %v20254_v6, %v131_v11 }
  0x41   :  { %18134 = vmatmul.mubr.msk.f32.gmra.mxu1 %vm233_vm0, %v20413_v24  ;;  %18038 = vmatprep.mubr.msk.f32.mxu0 %vm233_vm0, %v477_v25  ;;  %v478_v33 = vld [vmem:[#allocation2 + $0x39] sm:$0xff]  ;;  %363 = vst.msk [vmem:[#allocation2 + $0xf9] sm:$0xff] %vm233_vm0, %v188_v26  ;;  %364 = vst.msk [vmem:[#allocation2 + $0x109] sm:$0xff] %vm233_vm0, %v189_v27  ;;  %v479_v38 = vld [vmem:[#allocation2 + $0x49] sm:$0xff] }
  0x42   :  { %18136 = vmatprep.mubr.msk.f32.mxu1 %vm233_vm0, %v20421_v29  ;;  %v20433_v34 = vld [vmem:[#allocation2 + $0x38] sm:$0xff]  ;;  %365 = vst.msk [vmem:[#allocation2 + $0x111] sm:$0xff] %vm233_vm0, %v190_v28  ;;  %v20441_v39 = vld [vmem:[#allocation2 + $0x48] sm:$0xff]  ;;  %366 = vst.msk [vmem:[#allocation2 + $0x121] sm:$0xff] %vm233_vm0, %v191_v30 }
  0x43   :  { %367 = vst.msk [vmem:[#allocation2 + $0x129] sm:$0xff] %vm233_vm0, %v192_v40  ;;  %368 = vst.msk [vmem:[#allocation2 + $0x139] sm:$0xff] %vm233_vm0, %v193_v41  ;;  %v480_v49 = vld [vmem:[#allocation2 + $0x51] sm:$0xff]  ;;  %v481_v51 = vld [vmem:[#allocation2 + $0x61] sm:$0xff] }
  0x44   :  { %18039 = vmatmul.mubr.msk.f32.gmra.mxu0 %vm233_vm0, %v478_v33  ;;  %v20461_v50 = vld [vmem:[#allocation2 + $0x50] sm:$0xff]  ;;  %369 = vst.msk [vmem:[#allocation2 + $0x141] sm:$0xff] %vm233_vm0, %v194_v44  ;;  %370 = vst.msk [vmem:[#allocation2 + $0x151] sm:$0xff] %vm233_vm0, %v195_v45  ;;  %v20466_v52 = vld [vmem:[#allocation2 + $0x60] sm:$0xff]  ;;  %v205_v33 = vadd.f32 %v20254_v6, %v134_v18 }
  0x45   :  { %18137 = vmatmul.mubr.msk.f32.gmra.mxu1 %vm233_vm0, %v20433_v34  ;;  %18041 = vmatprep.mubr.msk.f32.mxu0 %vm233_vm0, %v479_v38  ;;  %371 = vst.msk [vmem:[#allocation2 + $0x159] sm:$0xff] %vm233_vm0, %v196_v46  ;;  %372 = vst.msk [vmem:[#allocation2 + $0x169] sm:$0xff] %vm233_vm0, %v197_v47  ;;  %v482_v53 = vld [vmem:[#allocation2 + $0x69] sm:$0xff]  ;;  %v483_v55 = vld [vmem:[#allocation2 + $0x79] sm:$0xff] }
  0x46   :  { %18139 = vmatprep.mubr.msk.f32.mxu1 %vm233_vm0, %v20441_v39  ;;  %373 = vst.msk [vmem:[#allocation2 + $0x171] sm:$0xff] %vm233_vm0, %v198_v48  ;;  %v20476_v54 = vld [vmem:[#allocation2 + $0x68] sm:$0xff]  ;;  %v20478_v56 = vld [vmem:[#allocation2 + $0x78] sm:$0xff]  ;;  %v20486_v58 = vld [vmem:[#allocation2 + $0x80] sm:$0xff] }
  0x47   :  { %v484_v57 = vld [vmem:[#allocation2 + $0x81] sm:$0xff]  ;;  %v485_v59 = vld [vmem:[#allocation2 + $0x91] sm:$0xff]  ;;  %v486_v61 = vld [vmem:[#allocation2 + $0x99] sm:$0xff]  ;;  %376 = vst.msk [vmem:[#allocation2 + $0x1c9] sm:$0xff] %vm233_vm0, %v201_v22 }
  0x48   :  { %18042 = vmatmul.mubr.msk.f32.gmra.mxu0 %vm233_vm0, %v480_v49  ;;  %v20488_v60 = vld [vmem:[#allocation2 + $0x90] sm:$0xff]  ;;  %v20496_v62 = vld [vmem:[#allocation2 + $0x98] sm:$0xff]  ;;  %v20498_v0 = vld [vmem:[#allocation2 + $0xa8] sm:$0xff]  ;;  %377 = vst.msk [vmem:[#allocation2 + $0x1d1] sm:$0xff] %vm233_vm0, %v202_v23 }
  0x49   :  { %18140 = vmatmul.mubr.msk.f32.gmra.mxu1 %vm233_vm0, %v20461_v50  ;;  %18044 = vmatprep.mubr.msk.f32.mxu0 %vm233_vm0, %v481_v51  ;;  %v487_v63 = vld [vmem:[#allocation2 + $0xa9] sm:$0xff]  ;;  %v488_v1 = vld [vmem:[#allocation2 + $0xb1] sm:$0xff]  ;;  %v489_v8 = vld [vmem:[#allocation2 + $0xc1] sm:$0xff]  ;;  %378 = vst.msk [vmem:[#allocation2 + $0x1e1] sm:$0xff] %vm233_vm0, %v203_v31 }
  0x4a   :  { %18142 = vmatprep.mubr.msk.f32.mxu1 %vm233_vm0, %v20466_v52  ;;  %v20500_v4 = vld [vmem:[#allocation2 + $0xb0] sm:$0xff]  ;;  %v20511_v9 = vld [vmem:[#allocation2 + $0xc0] sm:$0xff]  ;;  %v64_v19 = vld [vmem:[%s26161_s0 + $0x128] sm:$0xff]  ;;  %379 = vst.msk [vmem:[#allocation2 + $0x1e9] sm:$0xff] %vm233_vm0, %v204_v32 }
  0x4b   :  { %v65_v20 = vld [vmem:[%s26161_s0 + $0x130] sm:$0xff]  ;;  %v66_v21 = vld [vmem:[%s26161_s0 + $0x138] sm:$0xff]  ;;  %v135_v25 = vmul.f32 %v20249_v5, %v64_v19  ;;  %v67_v27 = vld [vmem:[%s26161_s0 + $0x140] sm:$0xff]  ;;  %380 = vst.msk [vmem:[#allocation2 + $0x1f9] sm:$0xff] %vm233_vm0, %v205_v33  ;;  %v149_v33 = vmul.f32 %v20249_v5, %v78_v12 }
  0x4c   :  { %18045 = vmatmul.mubr.msk.f32.gmra.mxu0 %vm233_vm0, %v482_v53  ;;  %v136_v26 = vmul.f32 %v20249_v5, %v65_v20  ;;  %v68_v28 = vld [vmem:[%s26161_s0 + $0x148] sm:$0xff]  ;;  %v69_v30 = vld [vmem:[%s26161_s0 + $0x150] sm:$0xff]  ;;  %v137_v35 = vmul.f32 %v20249_v5, %v66_v21  ;;  %v138_v42 = vmul.f32 %v20249_v5, %v67_v27  ;;  %v74_v44 = vld [vmem:[%s26161_s0 + $0x178] sm:$0xff] }
  0x4d   :  { %18143 = vmatmul.mubr.msk.f32.gmra.mxu1 %vm233_vm0, %v20476_v54  ;;  %18047 = vmatprep.mubr.msk.f32.mxu0 %vm233_vm0, %v483_v55  ;;  %v72_v38 = vld [vmem:[%s26161_s0 + $0x168] sm:$0xff]  ;;  %v206_v40 = vadd.f32 %v20254_v6, %v135_v25  ;;  %v491_v47 = vld [vmem:[#allocation2 + $0xd9] sm:$0xff]  ;;  %v139_v49 = vmul.f32 %v20249_v5, %v68_v28  ;;  %v140_v51 = vmul.f32 %v20249_v5, %v69_v30  ;;  %v77_v11 = vld [vmem:[%s26161_s0 + $0x190] sm:$0xff] }
  0x4e   :  { %18145 = vmatprep.mubr.msk.f32.mxu1 %vm233_vm0, %v20478_v56  ;;  %v207_v41 = vadd.f32 %v20254_v6, %v136_v26  ;;  %v490_v45 = vld [vmem:[#allocation2 + $0xc9] sm:$0xff]  ;;  %v208_v48 = vadd.f32 %v20254_v6, %v137_v35  ;;  %v20590_v53 = vld [vmem:[#allocation2 + $0xd8] sm:$0xff]  ;;  %v209_v55 = vadd.f32 %v20254_v6, %v138_v42  ;;  %v145_v10 = vmul.f32 %v20249_v5, %v74_v44  ;;  %v492_v21 = vld [vmem:[#allocation2 + $0xe1] sm:$0xff] }
  0x4f   :  { %v20582_v46 = vld [vmem:[#allocation2 + $0xc8] sm:$0xff]  ;;  %381 = vst.msk [vmem:[#allocation2 + $0x201] sm:$0xff] %vm233_vm0, %v206_v40  ;;  %v210_v7 = vadd.f32 %v20254_v6, %v139_v49  ;;  %v211_v2 = vadd.f32 %v20254_v6, %v140_v51  ;;  %v81_v19 = vld [vmem:[%s26161_s0 + $0x1b0] sm:$0xff]  ;;  %v82_v20 = vld [vmem:[%s26161_s0 + $0x1b8] sm:$0xff]  ;;  %v148_v32 = vmul.f32 %v20249_v5, %v77_v11  ;;  %v150_v35 = vmul.f32 %v20249_v5, %v79_v13 }
  0x50   :  { %18048 = vmatmul.mubr.msk.f32.gmra.mxu0 %vm233_vm0, %v484_v57  ;;  %382 = vst.msk [vmem:[#allocation2 + $0x211] sm:$0xff] %vm233_vm0, %v207_v41  ;;  %v141_v57 = vmul.f32 %v20249_v5, %v70_v36  ;;  %383 = vst.msk [vmem:[#allocation2 + $0x219] sm:$0xff] %vm233_vm0, %v208_v48  ;;  %v80_v18 = vld [vmem:[%s26161_s0 + $0x1a8] sm:$0xff]  ;;  %v20637_v22 = vld [vmem:[#allocation2 + $0xe0] sm:$0xff]  ;;  %v216_v25 = vadd.f32 %v20254_v6, %v145_v10  ;;  %v152_v40 = vmul.f32 %v20249_v5, %v81_v19 }
  0x51   :  { %18146 = vmatmul.mubr.msk.f32.gmra.mxu1 %vm233_vm0, %v20486_v58  ;;  %18050 = vmatprep.mubr.msk.f32.mxu0 %vm233_vm0, %v485_v59  ;;  %v142_v59 = vmul.f32 %v20249_v5, %v71_v37  ;;  %384 = vst.msk [vmem:[#allocation2 + $0x229] sm:$0xff] %vm233_vm0, %v209_v55  ;;  %385 = vst.msk [vmem:[#allocation2 + $0x231] sm:$0xff] %vm233_vm0, %v210_v7  ;;  %v15637_v27 = vld [vmem:[%s26164_s3 + $0x18] sm:$0xff]  ;;  %v20647_v30 = vld [vmem:[#allocation2 + $0xf0] sm:$0xff]  ;;  %v153_v41 = vmul.f32 %v20249_v5, %v82_v20 }
  0x52   :  { %18148 = vmatprep.mubr.msk.f32.mxu1 %vm233_vm0, %v20488_v60  ;;  %v212_v14 = vadd.f32 %v20254_v6, %v141_v57  ;;  %386 = vst.msk [vmem:[#allocation2 + $0x241] sm:$0xff] %vm233_vm0, %v211_v2  ;;  %v493_v28 = vld [vmem:[#allocation2 + $0xf1] sm:$0xff]  ;;  %v83_v36 = vld [vmem:[%s26161_s0 + $0x1c0] sm:$0xff]  ;;  %18324 = vmatprep.subr.mxu1 %v15637_v27  ;;  %391 = vst.msk [vmem:[#allocation2 + $0x279] sm:$0xff] %vm233_vm0, %v216_v25  ;;  %v220_v48 = vadd.f32 %v20254_v6, %v149_v33 }
  0x53   :  { %v213_v15 = vadd.f32 %v20254_v6, %v142_v59  ;;  %v84_v42 = vld [vmem:[%s26161_s0 + $0x1c8] sm:$0xff]  ;;  %18325 = vmatpush3.msra.mxu1 %v15637_v27  ;;  %v20674_v44 = vld [vmem:[%s26164_s3 + $0x20] sm:$0xff]  ;;  %v86_v49 = vld [vmem:[%s26161_s0 + $0x1d8] sm:$0xff]  ;;  %v154_v10 = vmul.f32 %v20249_v5, %v83_v36 }
  0x54   :  { %18051 = vmatmul.mubr.msk.f32.gmra.mxu0 %vm233_vm0, %v486_v61  ;;  %v143_v61 = vmul.f32 %v20249_v5, %v72_v38  ;;  %387 = vst.msk [vmem:[#allocation2 + $0x249] sm:$0xff] %vm233_vm0, %v212_v14  ;;  %v151_v38 = vmul.f32 %v20249_v5, %v80_v18  ;;  %v87_v51 = vld [vmem:[%s26161_s0 + $0x1e0] sm:$0xff]  ;;  %v88_v55 = vld [vmem:[%s26161_s0 + $0x1e8] sm:$0xff]  ;;  %v20694_v59 = vld [vmem:[#allocation2 + $0xf8] sm:$0xff]  ;;  %v155_v11 = vmul.f32 %v20249_v5, %v84_v42 }
  0x55   :  { %18149 = vmatmul.mubr.msk.f32.gmra.mxu1 %vm233_vm0, %v20496_v62  ;;  %18053 = vmatprep.mubr.msk.f32.mxu0 %vm233_vm0, %v487_v63  ;;  %v75_v63 = vld [vmem:[%s26161_s0 + $0x180] sm:$0xff]  ;;  %388 = vst.msk [vmem:[#allocation2 + $0x259] sm:$0xff] %vm233_vm0, %v213_v15  ;;  %v495_v7 = vld [vmem:[#allocation2 + $0x109] sm:$0xff]  ;;  %395 = vst.msk [vmem:[#allocation2 + $0x2a9] sm:$0xff] %vm233_vm0, %v220_v48  ;;  %v157_v13 = vmul.f32 %v20249_v5, %v86_v49  ;;  %v158_v14 = vmul.f32 %v20249_v5, %v87_v51 }
  0x56   :  { %18151 = vmatprep.mubr.msk.f32.mxu1 %vm233_vm0, %v20498_v0  ;;  %v214_v16 = vadd.f32 %v20254_v6, %v143_v61  ;;  %v146_v26 = vmul.f32 %v20249_v5, %v75_v63  ;;  %v494_v57 = vld [vmem:[#allocation2 + $0xf9] sm:$0xff]  ;;  %v221_v61 = vadd.f32 %v20254_v6, %v150_v35  ;;  %v222_v63 = vadd.f32 %v20254_v6, %v151_v38  ;;  %v20700_v2 = vld [vmem:[#allocation2 + $0x108] sm:$0xff]  ;;  %v496_v20 = vld [vmem:[#allocation2 + $0x111] sm:$0xff] }
  0x57   :  { %18422 = vmatprep.subr.mxu0 %v20674_v44  ;;  %v159_v15 = vmul.f32 %v20249_v5, %v88_v55  ;;  %v226_v18 = vadd.f32 %v20254_v6, %v155_v11  ;;  %v229_v25 = vadd.f32 %v20254_v6, %v158_v14  ;;  %v497_v27 = vld [vmem:[#allocation2 + $0x121] sm:$0xff]  ;;  %v499_v33 = vld [vmem:[#allocation2 + $0x139] sm:$0xff]  ;;  %v501_v38 = vld [vmem:[#allocation2 + $0x151] sm:$0xff] }
  0x58   :  { %18054 = vmatmul.mubr.msk.f32.gmra.mxu0 %vm233_vm0, %v488_v1  ;;  %v76_v1 = vld [vmem:[%s26161_s0 + $0x188] sm:$0xff]  ;;  %389 = vst.msk [vmem:[#allocation2 + $0x261] sm:$0xff] %vm233_vm0, %v214_v16  ;;  %v217_v37 = vadd.f32 %v20254_v6, %v146_v26  ;;  %396 = vst.msk [vmem:[#allocation2 + $0x2b9] sm:$0xff] %vm233_vm0, %v221_v61  ;;  %v225_v16 = vadd.f32 %v20254_v6, %v154_v10  ;;  %v20747_v35 = vld [vmem:[#allocation2 + $0x138] sm:$0xff] }
  0x59   :  { %18152 = vmatmul.mubr.msk.f32.gmra.mxu1 %vm233_vm0, %v20500_v4  ;;  %18056 = vmatprep.mubr.msk.f32.mxu0 %vm233_vm0, %v489_v8  ;;  %v144_v8 = vmul.f32 %v20249_v5, %v73_v43  ;;  %v147_v31 = vmul.f32 %v20249_v5, %v76_v1  ;;  %v85_v43 = vld [vmem:[%s26161_s0 + $0x1d0] sm:$0xff]  ;;  %v223_v1 = vadd.f32 %v20254_v6, %v152_v40  ;;  %v500_v36 = vld [vmem:[#allocation2 + $0x141] sm:$0xff]  ;;  %v20765_v42 = vld [vmem:[#allocation2 + $0x158] sm:$0xff] }
  0x5a   :  { %18154 = vmatprep.mubr.msk.f32.mxu1 %vm233_vm0, %v20511_v9  ;;  %392 = vst.msk [vmem:[#allocation2 + $0x289] sm:$0xff] %vm233_vm0, %v217_v37  ;;  %v156_v12 = vmul.f32 %v20249_v5, %v85_v43  ;;  %397 = vst.msk [vmem:[#allocation2 + $0x2c1] sm:$0xff] %vm233_vm0, %v222_v63  ;;  %v230_v26 = vadd.f32 %v20254_v6, %v159_v15  ;;  %v20755_v37 = vld [vmem:[#allocation2 + $0x140] sm:$0xff]  ;;  %v20757_v40 = vld [vmem:[#allocation2 + $0x150] sm:$0xff] }
  0x5b   :  { %v215_v23 = vadd.f32 %v20254_v6, %v144_v8  ;;  %v224_v8 = vadd.f32 %v20254_v6, %v153_v41  ;;  %398 = vst.msk [vmem:[#allocation2 + $0x2d1] sm:$0xff] %vm233_vm0, %v223_v1  ;;  %400 = vst.msk [vmem:[#allocation2 + $0x2e9] sm:$0xff] %vm233_vm0, %v225_v16  ;;  %v502_v41 = vld [vmem:[#allocation2 + $0x159] sm:$0xff]  ;;  %v503_v43 = vld [vmem:[#allocation2 + $0x169] sm:$0xff] }
  0x5c   :  { %18057 = vmatmul.mubr.msk.f32.gmra.mxu0 %vm233_vm0, %v490_v45  ;;  %v218_v45 = vadd.f32 %v20254_v6, %v147_v31  ;;  %v227_v19 = vadd.f32 %v20254_v6, %v156_v12  ;;  %401 = vst.msk [vmem:[#allocation2 + $0x2f1] sm:$0xff] %vm233_vm0, %v226_v18  ;;  %404 = vst.msk [vmem:[#allocation2 + $0x319] sm:$0xff] %vm233_vm0, %v229_v25  ;;  %v498_v31 = vld [vmem:[#allocation2 + $0x129] sm:$0xff]  ;;  %v505_v49 = vld [vmem:[#allocation2 + $0x1b1] sm:$0xff] }
  0x5d   :  { %18155 = vmatmul.mubr.msk.f32.gmra.mxu1 %vm233_vm0, %v20582_v46  ;;  %18059 = vmatprep.mubr.msk.f32.mxu0 %vm233_vm0, %v491_v47  ;;  %390 = vst.msk [vmem:[#allocation2 + $0x271] sm:$0xff] %vm233_vm0, %v215_v23  ;;  %v219_v47 = vadd.f32 %v20254_v6, %v148_v32  ;;  %399 = vst.msk [vmem:[#allocation2 + $0x2d9] sm:$0xff] %vm233_vm0, %v224_v8  ;;  %v228_v23 = vadd.f32 %v20254_v6, %v157_v13  ;;  %v20745_v32 = vld [vmem:[#allocation2 + $0x128] sm:$0xff]  ;;  %v20775_v48 = vld [vmem:[#allocation2 + $0x170] sm:$0xff] }
  0x5e   :  { %18157 = vmatprep.mubr.msk.f32.mxu1 %vm233_vm0, %v20590_v53  ;;  %393 = vst.msk [vmem:[#allocation2 + $0x291] sm:$0xff] %vm233_vm0, %v218_v45  ;;  %402 = vst.msk [vmem:[#allocation2 + $0x301] sm:$0xff] %vm233_vm0, %v227_v19  ;;  %v20767_v45 = vld [vmem:[#allocation2 + $0x168] sm:$0xff]  ;;  %v440_v51 = vld [vmem:[#allocation2 + $0x1b0] sm:$0xff] }
  0x5f   :  { %394 = vst.msk [vmem:[#allocation2 + $0x2a1] sm:$0xff] %vm233_vm0, %v219_v47  ;;  %403 = vst.msk [vmem:[#allocation2 + $0x309] sm:$0xff] %vm233_vm0, %v228_v23  ;;  %v504_v47 = vld [vmem:[#allocation2 + $0x171] sm:$0xff]  ;;  %v506_v55 = vld [vmem:[#allocation2 + $0x1b9] sm:$0xff] }
  0x60   :  { %18060 = vmatmul.mubr.msk.f32.gmra.mxu0 %vm233_vm0, %v492_v21  ;;  %v20726_v21 = vld [vmem:[#allocation2 + $0x110] sm:$0xff]  ;;  %405 = vst.msk [vmem:[#allocation2 + $0x321] sm:$0xff] %vm233_vm0, %v230_v26  ;;  %v20782_v63 = vld [vmem:[#allocation2 + $0x1c8] sm:$0xff]  ;;  %v58_v11 = vld [vmem:[%s26161_s0 + $0xf8] sm:$0xff] }
  0x61   :  { %18158 = vmatmul.mubr.msk.f32.gmra.mxu1 %vm233_vm0, %v20637_v22  ;;  %18062 = vmatprep.mubr.msk.f32.mxu0 %vm233_vm0, %v493_v28  ;;  %v20731_v28 = vld [vmem:[#allocation2 + $0x120] sm:$0xff]  ;;  %v507_v61 = vld [vmem:[#allocation2 + $0x1c9] sm:$0xff]  ;;  %v129_v14 = vmul.f32 %v20249_v5, %v58_v11 }
  0x62   :  { %18160 = vmatprep.mubr.msk.f32.mxu1 %vm233_vm0, %v20647_v30  ;;  %v57_v1 = vld [vmem:[%s26161_s0 + $0xf0] sm:$0xff]  ;;  %v509_v12 = vld [vmem:[#allocation2 + $0x1e1] sm:$0xff] }
  0x63   :  { %v20792_v8 = vld [vmem:[#allocation2 + $0x1d0] sm:$0xff]  ;;  %v128_v10 = vmul.f32 %v20249_v5, %v57_v1  ;;  %v20798_v13 = vld [vmem:[#allocation2 + $0x1e0] sm:$0xff] }
  0x64   :  { %18063 = vmatmul.mubr.msk.f32.gmra.mxu0 %vm233_vm0, %v494_v57  ;;  %v441_v57 = vld [vmem:[#allocation2 + $0x1b8] sm:$0xff] }
  0x65   :  { %18161 = vmatmul.mubr.msk.f32.gmra.mxu1 %vm233_vm0, %v20694_v59  ;;  %18065 = vmatprep.mubr.msk.f32.mxu0 %vm233_vm0, %v495_v7  ;;  %v508_v7 = vld [vmem:[#allocation2 + $0x1d1] sm:$0xff] }
  0x66   :  { %18163 = vmatprep.mubr.msk.f32.mxu1 %vm233_vm0, %v20700_v2 }
  0x68   :  { %18066 = vmatmul.mubr.msk.f32.gmra.mxu0 %vm233_vm0, %v496_v20 }
  0x69   :  { %18164 = vmatmul.mubr.msk.f32.gmra.mxu1 %vm233_vm0, %v20726_v21  ;;  %18068 = vmatprep.mubr.msk.f32.mxu0 %vm233_vm0, %v497_v27 }
  0x6a   :  { %18166 = vmatprep.mubr.msk.f32.mxu1 %vm233_vm0, %v20731_v28 }
  0x6c   :  { %18069 = vmatmul.mubr.msk.f32.gmra.mxu0 %vm233_vm0, %v498_v31 }
  0x6d   :  { %18167 = vmatmul.mubr.msk.f32.gmra.mxu1 %vm233_vm0, %v20745_v32  ;;  %18071 = vmatprep.mubr.msk.f32.mxu0 %vm233_vm0, %v499_v33 }
  0x6e   :  { %18169 = vmatprep.mubr.msk.f32.mxu1 %vm233_vm0, %v20747_v35 }
  0x70   :  { %18072 = vmatmul.mubr.msk.f32.gmra.mxu0 %vm233_vm0, %v500_v36 }
  0x71   :  { %18170 = vmatmul.mubr.msk.f32.gmra.mxu1 %vm233_vm0, %v20755_v37  ;;  %18074 = vmatprep.mubr.msk.f32.mxu0 %vm233_vm0, %v501_v38 }
  0x72   :  { %18172 = vmatprep.mubr.msk.f32.mxu1 %vm233_vm0, %v20757_v40 }
  0x74   :  { %18075 = vmatmul.mubr.msk.f32.gmra.mxu0 %vm233_vm0, %v502_v41 }
  0x75   :  { %18173 = vmatmul.mubr.msk.f32.gmra.mxu1 %vm233_vm0, %v20765_v42  ;;  %18077 = vmatprep.mubr.msk.f32.mxu0 %vm233_vm0, %v503_v43 }
  0x76   :  { %18175 = vmatprep.mubr.msk.f32.mxu1 %vm233_vm0, %v20767_v45 }
  0x78   :  { %18078 = vmatmul.mubr.msk.f32.gmra.mxu0 %vm233_vm0, %v504_v47 }
  0x79   :  { %18176 = vmatmul.mubr.msk.f32.gmra.mxu1 %vm233_vm0, %v20775_v48  ;;  %18080 = vmatprep.mubr.msk.f32.mxu0 %vm233_vm0, %v505_v49 }
  0x7a   :  { %18178 = vmatprep.mubr.msk.f32.mxu1 %vm233_vm0, %v440_v51 }
  0x7c   :  { %18081 = vmatmul.mubr.msk.f32.gmra.mxu0 %vm233_vm0, %v506_v55 }
  0x7d   :  { %18179 = vmatmul.mubr.msk.f32.gmra.mxu1 %vm233_vm0, %v441_v57  ;;  %18083 = vmatprep.mubr.msk.f32.mxu0 %vm233_vm0, %v507_v61 }
  0x7e   :  { %18181 = vmatprep.mubr.msk.f32.mxu1 %vm233_vm0, %v20782_v63 }
  0x7f   :  { %12 = vsyncpa [#allocation5], 0  ;;  %v199_v15 = vadd.f32 %v20254_v6, %v128_v10  ;;  %v200_v16 = vadd.f32 %v20254_v6, %v129_v14  ;;  %v510_v18 = vld [vmem:[#allocation2 + $0x1e9] sm:$0xff]  ;;  %v511_v20 = vld [vmem:[#allocation2 + $0x1f9] sm:$0xff]  ;;  %vm6778_vm2 = vcmask 523264   ;;  %vm6781_vm3 = vcmask 517120  }
  0x80   :  { %18084 = vmatmul.mubr.msk.f32.gmra.mxu0 %vm233_vm0, %v508_v7  ;;  %v20809_v19 = vld [vmem:[#allocation2 + $0x1e8] sm:$0xff]  ;;  %v20812_v23 = vld [vmem:[#allocation2 + $0x1f8] sm:$0xff]  ;;  %v20821_v26 = vld [vmem:[#allocation2 + $0x200] sm:$0xff]  ;;  %vm15274_vm4 = vcmask 1041409   ;;  %vm15276_vm5 = vcmask 1042434   ;;  %vm15278_vm6 = vcmask 1043459  }
  0x81   :  { %18182 = vmatmul.mubr.msk.f32.gmra.mxu1 %vm233_vm0, %v20792_v8  ;;  %18086 = vmatprep.mubr.msk.f32.mxu0 %vm233_vm0, %v509_v12  ;;  %374 = vst.msk [vmem:[#allocation2 + $0x181] sm:$0xff] %vm233_vm0, %v199_v15  ;;  %375 = vst.msk [vmem:[#allocation2 + $0x189] sm:$0xff] %vm233_vm0, %v200_v16  ;;  %v512_v25 = vld [vmem:[#allocation2 + $0x201] sm:$0xff]  ;;  %v513_v27 = vld [vmem:[#allocation2 + $0x211] sm:$0xff]  ;;  %vm15280_vm7 = vcmask 1044484   ;;  %vm15282_vm8 = vcmask 1045509  }
  0x82   :  { %18184 = vmatprep.mubr.msk.f32.mxu1 %vm233_vm0, %v20798_v13  ;;  %v20823_v31 = vld [vmem:[#allocation2 + $0x210] sm:$0xff]  ;;  %v514_v33 = vld [vmem:[#allocation2 + $0x219] sm:$0xff]  ;;  %v20833_v41 = vld [vmem:[#allocation2 + $0x228] sm:$0xff]  ;;  %vm15284_vm9 = vcmask 1046534   ;;  %vm15286_vm10 = vcmask 1047559  }
  0x83   :  { %v20831_v36 = vld [vmem:[#allocation2 + $0x218] sm:$0xff]  ;;  %v515_v38 = vld [vmem:[#allocation2 + $0x229] sm:$0xff]  ;;  %v517_v49 = vld [vmem:[#allocation2 + $0x241] sm:$0xff] }
  0x84   :  { %18087 = vmatmul.mubr.msk.f32.gmra.mxu0 %vm233_vm0, %v510_v18  ;;  %v516_v43 = vld [vmem:[#allocation2 + $0x231] sm:$0xff]  ;;  %v20843_v51 = vld [vmem:[#allocation2 + $0x240] sm:$0xff]  ;;  %v518_v55 = vld [vmem:[#allocation2 + $0x249] sm:$0xff] }
  0x85   :  { %18185 = vmatmul.mubr.msk.f32.gmra.mxu1 %vm233_vm0, %v20809_v19  ;;  %18089 = vmatprep.mubr.msk.f32.mxu0 %vm233_vm0, %v511_v20  ;;  %v20841_v47 = vld [vmem:[#allocation2 + $0x230] sm:$0xff]  ;;  %v20851_v57 = vld [vmem:[#allocation2 + $0x248] sm:$0xff]  ;;  %v519_v61 = vld [vmem:[#allocation2 + $0x259] sm:$0xff] }
  0x86   :  { %18187 = vmatprep.mubr.msk.f32.mxu1 %vm233_vm0, %v20812_v23  ;;  %v20853_v1 = vld [vmem:[#allocation2 + $0x258] sm:$0xff]  ;;  %v520_v7 = vld [vmem:[#allocation2 + $0x261] sm:$0xff]  ;;  %v20863_v12 = vld [vmem:[#allocation2 + $0x270] sm:$0xff] }
  0x87   :  { %v20861_v10 = vld [vmem:[#allocation2 + $0x260] sm:$0xff]  ;;  %v521_v11 = vld [vmem:[#allocation2 + $0x271] sm:$0xff]  ;;  %v523_v16 = vld [vmem:[#allocation2 + $0x289] sm:$0xff] }
  0x88   :  { %18090 = vmatmul.mubr.msk.f32.gmra.mxu0 %vm233_vm0, %v512_v25  ;;  %v522_v14 = vld [vmem:[#allocation2 + $0x279] sm:$0xff]  ;;  %v20873_v18 = vld [vmem:[#allocation2 + $0x288] sm:$0xff]  ;;  %v524_v20 = vld [vmem:[#allocation2 + $0x291] sm:$0xff] }
  0x89   :  { %18188 = vmatmul.mubr.msk.f32.gmra.mxu1 %vm233_vm0, %v20821_v26  ;;  %18092 = vmatprep.mubr.msk.f32.mxu0 %vm233_vm0, %v513_v27  ;;  %v20871_v15 = vld [vmem:[#allocation2 + $0x278] sm:$0xff]  ;;  %v20881_v25 = vld [vmem:[#allocation2 + $0x290] sm:$0xff]  ;;  %v525_v27 = vld [vmem:[#allocation2 + $0x2a1] sm:$0xff] }
  0x8a   :  { %18190 = vmatprep.mubr.msk.f32.mxu1 %vm233_vm0, %v20823_v31 }
  0x8c   :  { %18093 = vmatmul.mubr.msk.f32.gmra.mxu0 %vm233_vm0, %v514_v33  ;;  %v20883_v33 = vld [vmem:[#allocation2 + $0x2a0] sm:$0xff] }
  0x8d   :  { %18191 = vmatmul.mubr.msk.f32.gmra.mxu1 %vm233_vm0, %v20831_v36  ;;  %18095 = vmatprep.mubr.msk.f32.mxu0 %vm233_vm0, %v515_v38  ;;  %v526_v38 = vld [vmem:[#allocation2 + $0x2a9] sm:$0xff] }
  0x8e   :  { %18193 = vmatprep.mubr.msk.f32.mxu1 %vm233_vm0, %v20833_v41 }
  0x90   :  { %18096 = vmatmul.mubr.msk.f32.gmra.mxu0 %vm233_vm0, %v516_v43  ;;  %v20891_v43 = vld [vmem:[#allocation2 + $0x2a8] sm:$0xff] }
  0x91   :  { %18194 = vmatmul.mubr.msk.f32.gmra.mxu1 %vm233_vm0, %v20841_v47  ;;  %18098 = vmatprep.mubr.msk.f32.mxu0 %vm233_vm0, %v517_v49  ;;  %v527_v49 = vld [vmem:[#allocation2 + $0x2b9] sm:$0xff] }
  0x92   :  { %18196 = vmatprep.mubr.msk.f32.mxu1 %vm233_vm0, %v20843_v51 }
  0x94   :  { %18099 = vmatmul.mubr.msk.f32.gmra.mxu0 %vm233_vm0, %v518_v55  ;;  %v20893_v55 = vld [vmem:[#allocation2 + $0x2b8] sm:$0xff] }
  0x95   :  { %18197 = vmatmul.mubr.msk.f32.gmra.mxu1 %vm233_vm0, %v20851_v57  ;;  %18101 = vmatprep.mubr.msk.f32.mxu0 %vm233_vm0, %v519_v61  ;;  %26218 = vst [vmem:[#allocation7_spill] sm:$0xff] %v20893_v55  ;;  %v528_v61 = vld [vmem:[#allocation2 + $0x2c1] sm:$0xff] }
  0x96   :  { %18199 = vmatprep.mubr.msk.f32.mxu1 %vm233_vm0, %v20853_v1 }
  0x98   :  { %18102 = vmatmul.mubr.msk.f32.gmra.mxu0 %vm233_vm0, %v520_v7  ;;  %v20901_v7 = vld [vmem:[#allocation2 + $0x2c0] sm:$0xff] }
  0x99   :  { %18200 = vmatmul.mubr.msk.f32.gmra.mxu1 %vm233_vm0, %v20861_v10  ;;  %18104 = vmatprep.mubr.msk.f32.mxu0 %vm233_vm0, %v521_v11  ;;  %26219 = vst [vmem:[#allocation8_spill] sm:$0xff] %v20901_v7  ;;  %v529_v11 = vld [vmem:[#allocation2 + $0x2d1] sm:$0xff] }
  0x9a   :  { %18202 = vmatprep.mubr.msk.f32.mxu1 %vm233_vm0, %v20863_v12 }
  0x9c   :  { %18105 = vmatmul.mubr.msk.f32.gmra.mxu0 %vm233_vm0, %v522_v14  ;;  %v20903_v14 = vld [vmem:[#allocation2 + $0x2d0] sm:$0xff] }
  0x9d   :  { %18203 = vmatmul.mubr.msk.f32.gmra.mxu1 %vm233_vm0, %v20871_v15  ;;  %18107 = vmatprep.mubr.msk.f32.mxu0 %vm233_vm0, %v523_v16  ;;  %26220 = vst [vmem:[#allocation9_spill] sm:$0xff] %v20903_v14  ;;  %v530_v16 = vld [vmem:[#allocation2 + $0x2d9] sm:$0xff] }
  0x9e   :  { %18205 = vmatprep.mubr.msk.f32.mxu1 %vm233_vm0, %v20873_v18 }
  0xa0   :  { %18108 = vmatmul.mubr.msk.f32.gmra.mxu0 %vm233_vm0, %v524_v20  ;;  %v20911_v20 = vld [vmem:[#allocation2 + $0x2d8] sm:$0xff] }
  0xa1   :  { %18206 = vmatmul.mubr.msk.f32.gmra.mxu1 %vm233_vm0, %v20881_v25  ;;  %18110 = vmatprep.mubr.msk.f32.mxu0 %vm233_vm0, %v525_v27  ;;  %26221 = vst [vmem:[#allocation10_spill] sm:$0xff] %v20911_v20  ;;  %v531_v27 = vld [vmem:[#allocation2 + $0x2e9] sm:$0xff] }
  0xa2   :  { %18208 = vmatprep.mubr.msk.f32.mxu1 %vm233_vm0, %v20883_v33 }
  0xa4   :  { %18111 = vmatmul.mubr.msk.f32.gmra.mxu0 %vm233_vm0, %v526_v38  ;;  %v20913_v38 = vld [vmem:[#allocation2 + $0x2e8] sm:$0xff] }
  0xa5   :  { %18209 = vmatmul.mubr.msk.f32.gmra.mxu1 %vm233_vm0, %v20891_v43  ;;  %18113 = vmatprep.mubr.msk.f32.mxu0 %vm233_vm0, %v527_v49  ;;  %26222 = vst [vmem:[#allocation11_spill] sm:$0xff] %v20913_v38  ;;  %v89_v49 = vld [vmem:[%s26161_s0 + $0x1f0] sm:$0xff] }
  0xa6   :  { %18211 = vmatprep.mubr.msk.f32.mxu1 %vm233_vm0, %v20893_v55  ;;  %v160_v3 = vmul.f32 %v20249_v5, %v89_v49  ;;  %v534_v49 = vld [vmem:[#allocation2 + $0x309] sm:$0xff] }
  0xa8   :  { %18114 = vmatmul.mubr.msk.f32.gmra.mxu0 %vm233_vm0, %v528_v61  ;;  %v532_v61 = vld [vmem:[#allocation2 + $0x2f1] sm:$0xff]  ;;  %v231_v55 = vadd.f32 %v20254_v6, %v160_v3  ;;  %v536_v3 = vld [vmem:[#allocation2 + $0x321] sm:$0xff] }
  0xa9   :  { %18212 = vmatmul.mubr.msk.f32.gmra.mxu1 %vm233_vm0, %v20901_v7  ;;  %18116 = vmatprep.mubr.msk.f32.mxu0 %vm233_vm0, %v529_v11  ;;  %v20924_v11 = vld [vmem:[#allocation2 + $0x2f0] sm:$0xff] }
  0xaa   :  { %18214 = vmatprep.mubr.msk.f32.mxu1 %vm233_vm0, %v20903_v14  ;;  %v533_v14 = vld [vmem:[#allocation2 + $0x301] sm:$0xff]  ;;  %406 = vst.msk [vmem:[#allocation2 + $0x331] sm:$0xff] %vm233_vm0, %v231_v55  ;;  %v1694_v55 = vld [vmem:[#allocation2 + $0xa] sm:$0xff] }
  0xac   :  { %18117 = vmatmul.mubr.msk.f32.gmra.mxu0 %vm233_vm0, %v530_v16  ;;  %v90_v16 = vld [vmem:[%s26161_s0 + $0x1f8] sm:$0xff] }
  0xad   :  { %18215 = vmatmul.mubr.msk.f32.gmra.mxu1 %vm233_vm0, %v20911_v20  ;;  %18119 = vmatprep.mubr.msk.f32.mxu0 %vm233_vm0, %v531_v27  ;;  %v20930_v20 = vld [vmem:[#allocation2 + $0x300] sm:$0xff]  ;;  %v161_v7 = vmul.f32 %v20249_v5, %v90_v16  ;;  %v20944_v16 = vld [vmem:[#allocation2 + $0x318] sm:$0xff] }
  0xae   :  { %18217 = vmatprep.mubr.msk.f32.mxu1 %vm233_vm0, %v20913_v38  ;;  %v20941_v38 = vld [vmem:[#allocation2 + $0x308] sm:$0xff]  ;;  %v535_v5 = vld [vmem:[#allocation2 + $0x319] sm:$0xff] }
  0xaf   :  { %v232_v27 = vadd.f32 %v20254_v6, %v161_v7  ;;  %v20953_v6 = vld [vmem:[#allocation2 + $0x320] sm:$0xff] }
  0xb0   :  { %18120 = vmatmul.mubr.msk.f32.gmra.mxu0 %vm233_vm0, %v532_v61  ;;  %v1693_v7 = vld [vmem:[#allocation2 + $0x2] sm:$0xff]  ;;  %v20964_v61 = vld [vmem:[#allocation2 + $0x1a] sm:$0xff] }
  0xb1   :  { %18218 = vmatmul.mubr.msk.f32.gmra.mxu1 %vm233_vm0, %v20924_v11  ;;  %18122 = vmatprep.mubr.msk.f32.mxu0 %vm233_vm0, %v533_v14  ;;  %407 = vst.msk [vmem:[#allocation2 + $0x339] sm:$0xff] %vm233_vm0, %v232_v27  ;;  %v15767_v14 = vld [vmem:[%s26164_s3 + $0x28] sm:$0xff]  ;;  %v20972_v27 = vld [vmem:[%s26164_s3 + $0x30] sm:$0xff] }
  0xb2   :  { %18220 = vmatprep.mubr.msk.f32.mxu1 %vm233_vm0, %v20930_v20  ;;  %18520 = vmatprep.subr.mxu1 %v15767_v14 }
  0xb4   :  { %18123 = vmatmul.mubr.msk.f32.gmra.mxu0 %vm233_vm0, %v534_v49  ;;  %v20981_v49 = vld [vmem:[#allocation2 + $0x32] sm:$0xff] }
  0xb5   :  { %18221 = vmatmul.mubr.msk.f32.gmra.mxu1 %vm233_vm0, %v20941_v38  ;;  %18125 = vmatprep.mubr.msk.f32.mxu0 %vm233_vm0, %v535_v5  ;;  %v2430_v5 = vld [vmem:[#allocation2 + $0x180] sm:$0xff] }
  0xb6   :  { %18223 = vmatprep.mubr.msk.f32.mxu1 %vm233_vm0, %v20944_v16 }
  0xb8   :  { %18126 = vmatmul.mubr.msk.f32.gmra.mxu0 %vm233_vm0, %v536_v3  ;;  %v1725_v3 = vld [vmem:[#allocation2 + $0x1b2] sm:$0xff] }
  0xb9   :  { %18224 = vmatmul.mubr.msk.f32.gmra.mxu1 %vm233_vm0, %v20953_v6  ;;  %18228 = vmatprep.mubr.msk.f32.mxu0 %vm233_vm0, %v1693_v7 }
  0xba   :  { %18326 = vmatprep.mubr.msk.f32.mxu1 %vm233_vm0, %v20401_v17  ;;  %v20977_v17 = vld [vmem:[#allocation2 + $0x22] sm:$0xff] }
  0xbc   :  { %18229 = vmatmul.mubr.msk.f32.vlgmr.msra.gmra.mxu0 %vm233_vm0, %v1694_v55 }
  0xbd   :  { %18327 = vmatmul.mubr.msk.f32.vlgmr.msra.gmra.mxu1 %vm233_vm0, %v20413_v24  ;;  %18423 = vmatpush3.msra.mxu0 %v20674_v44  ;;  %v20990_v24 = vld [vmem:[#allocation2 + $0x3a] sm:$0xff]  ;;  %v21006_v44 = vld [vmem:[#allocation2 + $0x62] sm:$0xff] }
  0xbe   :  { %18231 = vmatprep.mubr.msk.f32.mxu0 %vm233_vm0, %v20964_v61  ;;  %18329 = vmatprep.mubr.msk.f32.mxu1 %vm233_vm0, %v20421_v29  ;;  %v20994_v29 = vld [vmem:[#allocation2 + $0x4a] sm:$0xff] }
  0xbf   :  { %18521 = vmatpush3.msra.mxu1 %v15767_v14  ;;  %18618 = vmatprep.subr.mxu0 %v20972_v27 }
  0xc0   :  { %18232 = vmatmul.mubr.msk.f32.gmra.mxu0 %vm233_vm0, %v20977_v17 }
  0xc1   :  { %18330 = vmatmul.mubr.msk.f32.gmra.mxu1 %vm233_vm0, %v20433_v34  ;;  %18234 = vmatprep.mubr.msk.f32.mxu0 %vm233_vm0, %v20981_v49  ;;  %v21002_v34 = vld [vmem:[#allocation2 + $0x52] sm:$0xff] }
  0xc2   :  { %18332 = vmatprep.mubr.msk.f32.mxu1 %vm233_vm0, %v20441_v39  ;;  %v21014_v39 = vld [vmem:[#allocation2 + $0x6a] sm:$0xff] }
  0xc4   :  { %18235 = vmatmul.mubr.msk.f32.gmra.mxu0 %vm233_vm0, %v20990_v24 }
  0xc5   :  { %18333 = vmatmul.mubr.msk.f32.gmra.mxu1 %vm233_vm0, %v20461_v50  ;;  %18237 = vmatprep.mubr.msk.f32.mxu0 %vm233_vm0, %v20994_v29  ;;  %v21018_v50 = vld [vmem:[#allocation2 + $0x7a] sm:$0xff] }
  0xc6   :  { %18335 = vmatprep.mubr.msk.f32.mxu1 %vm233_vm0, %v20466_v52  ;;  %v21026_v52 = vld [vmem:[#allocation2 + $0x82] sm:$0xff] }
  0xc8   :  { %18238 = vmatmul.mubr.msk.f32.gmra.mxu0 %vm233_vm0, %v21002_v34 }
  0xc9   :  { %18336 = vmatmul.mubr.msk.f32.gmra.mxu1 %vm233_vm0, %v20476_v54  ;;  %18240 = vmatprep.mubr.msk.f32.mxu0 %vm233_vm0, %v21006_v44  ;;  %v21030_v54 = vld [vmem:[#allocation2 + $0x92] sm:$0xff] }
  0xca   :  { %18338 = vmatprep.mubr.msk.f32.mxu1 %vm233_vm0, %v20478_v56  ;;  %v21038_v56 = vld [vmem:[#allocation2 + $0x9a] sm:$0xff] }
  0xcc   :  { %18241 = vmatmul.mubr.msk.f32.gmra.mxu0 %vm233_vm0, %v21014_v39 }
  0xcd   :  { %18339 = vmatmul.mubr.msk.f32.gmra.mxu1 %vm233_vm0, %v20486_v58  ;;  %18243 = vmatprep.mubr.msk.f32.mxu0 %vm233_vm0, %v21018_v50  ;;  %v21042_v58 = vld [vmem:[#allocation2 + $0xaa] sm:$0xff] }
  0xce   :  { %18341 = vmatprep.mubr.msk.f32.mxu1 %vm233_vm0, %v20488_v60  ;;  %v21050_v60 = vld [vmem:[#allocation2 + $0xb2] sm:$0xff] }
  0xcf   :  { %v18132_v55 = vpop.f32.mrf.mxu1 }
  0xd0   :  { %18244 = vmatmul.mubr.msk.f32.gmra.mxu0 %vm233_vm0, %v21026_v52 }
  0xd1   :  { %18342 = vmatmul.mubr.msk.f32.gmra.mxu1 %vm233_vm0, %v20496_v62  ;;  %18246 = vmatprep.mubr.msk.f32.mxu0 %vm233_vm0, %v21030_v54  ;;  %v21054_v62 = vld [vmem:[#allocation2 + $0xc2] sm:$0xff] }
  0xd2   :  { %18344 = vmatprep.mubr.msk.f32.mxu1 %vm233_vm0, %v20498_v0  ;;  %v21062_v0 = vld [vmem:[#allocation2 + $0xca] sm:$0xff] }
  0xd4   :  { %18247 = vmatmul.mubr.msk.f32.gmra.mxu0 %vm233_vm0, %v21038_v56 }
  0xd5   :  { %18345 = vmatmul.mubr.msk.f32.gmra.mxu1 %vm233_vm0, %v20500_v4  ;;  %18249 = vmatprep.mubr.msk.f32.mxu0 %vm233_vm0, %v21042_v58  ;;  %v21066_v4 = vld [vmem:[#allocation2 + $0xda] sm:$0xff] }
  0xd6   :  { %18347 = vmatprep.mubr.msk.f32.mxu1 %vm233_vm0, %v20511_v9  ;;  %v21074_v9 = vld [vmem:[#allocation2 + $0xe2] sm:$0xff] }
  0xd8   :  { %18250 = vmatmul.mubr.msk.f32.gmra.mxu0 %vm233_vm0, %v21050_v60 }
  0xd9   :  { %18348 = vmatmul.mubr.msk.f32.gmra.mxu1 %vm233_vm0, %v20582_v46  ;;  %18252 = vmatprep.mubr.msk.f32.mxu0 %vm233_vm0, %v21054_v62  ;;  %v21078_v46 = vld [vmem:[#allocation2 + $0xf2] sm:$0xff] }
  0xda   :  { %18350 = vmatprep.mubr.msk.f32.mxu1 %vm233_vm0, %v20590_v53  ;;  %v21086_v53 = vld [vmem:[#allocation2 + $0xfa] sm:$0xff] }
  0xdc   :  { %18253 = vmatmul.mubr.msk.f32.gmra.mxu0 %vm233_vm0, %v21062_v0 }
  0xdd   :  { %18351 = vmatmul.mubr.msk.f32.gmra.mxu1 %vm233_vm0, %v20637_v22  ;;  %18255 = vmatprep.mubr.msk.f32.mxu0 %vm233_vm0, %v21066_v4  ;;  %v21090_v22 = vld [vmem:[#allocation2 + $0x10a] sm:$0xff] }
  0xde   :  { %18353 = vmatprep.mubr.msk.f32.mxu1 %vm233_vm0, %v20647_v30  ;;  %v21098_v30 = vld [vmem:[#allocation2 + $0x112] sm:$0xff] }
  0xe0   :  { %18256 = vmatmul.mubr.msk.f32.gmra.mxu0 %vm233_vm0, %v21074_v9 }
  0xe1   :  { %18354 = vmatmul.mubr.msk.f32.gmra.mxu1 %vm233_vm0, %v20694_v59  ;;  %18258 = vmatprep.mubr.msk.f32.mxu0 %vm233_vm0, %v21078_v46  ;;  %v21102_v59 = vld [vmem:[#allocation2 + $0x122] sm:$0xff] }
  0xe2   :  { %18356 = vmatprep.mubr.msk.f32.mxu1 %vm233_vm0, %v20700_v2  ;;  %v21110_v2 = vld [vmem:[#allocation2 + $0x12a] sm:$0xff] }
  0xe4   :  { %18259 = vmatmul.mubr.msk.f32.gmra.mxu0 %vm233_vm0, %v21086_v53 }
  0xe5   :  { %18357 = vmatmul.mubr.msk.f32.gmra.mxu1 %vm233_vm0, %v20726_v21  ;;  %18261 = vmatprep.mubr.msk.f32.mxu0 %vm233_vm0, %v21090_v22  ;;  %v21114_v21 = vld [vmem:[#allocation2 + $0x13a] sm:$0xff] }
  0xe6   :  { %18359 = vmatprep.mubr.msk.f32.mxu1 %vm233_vm0, %v20731_v28  ;;  %v21122_v28 = vld [vmem:[#allocation2 + $0x142] sm:$0xff] }
  0xe8   :  { %18262 = vmatmul.mubr.msk.f32.gmra.mxu0 %vm233_vm0, %v21098_v30 }
  0xe9   :  { %18360 = vmatmul.mubr.msk.f32.gmra.mxu1 %vm233_vm0, %v20745_v32  ;;  %18264 = vmatprep.mubr.msk.f32.mxu0 %vm233_vm0, %v21102_v59  ;;  %v21126_v32 = vld [vmem:[#allocation2 + $0x152] sm:$0xff] }
  0xea   :  { %18362 = vmatprep.mubr.msk.f32.mxu1 %vm233_vm0, %v20747_v35  ;;  %v21134_v35 = vld [vmem:[#allocation2 + $0x15a] sm:$0xff] }
  0xec   :  { %18265 = vmatmul.mubr.msk.f32.gmra.mxu0 %vm233_vm0, %v21110_v2 }
  0xed   :  { %18363 = vmatmul.mubr.msk.f32.gmra.mxu1 %vm233_vm0, %v20755_v37  ;;  %18267 = vmatprep.mubr.msk.f32.mxu0 %vm233_vm0, %v21114_v21  ;;  %v21138_v37 = vld [vmem:[#allocation2 + $0x16a] sm:$0xff] }
  0xee   :  { %18365 = vmatprep.mubr.msk.f32.mxu1 %vm233_vm0, %v20757_v40  ;;  %v21146_v40 = vld [vmem:[#allocation2 + $0x172] sm:$0xff]  ;;  %v18034_v7 = vpop.f32.mrf.mxu0 }
  0xef   :  { %26223 = vst [vmem:[#allocation12_spill] sm:$0xff] %v21146_v40  ;;  %v21157_v14 = vadd.f32 %v18132_v55, %v18034_v7 }
  0xf0   :  { %18268 = vmatmul.mubr.msk.f32.gmra.mxu0 %vm233_vm0, %v21122_v28 }
  0xf1   :  { %18366 = vmatmul.mubr.msk.f32.gmra.mxu1 %vm233_vm0, %v20765_v42  ;;  %18270 = vmatprep.mubr.msk.f32.mxu0 %vm233_vm0, %v21126_v32  ;;  %v2431_v42 = vld [vmem:[#allocation2 + $0x188] sm:$0xff]  ;;  %26224 = vst [vmem:[#allocation13_spill] sm:$0xff] %v21157_v14 }
  0xf2   :  { %18368 = vmatprep.mubr.msk.f32.mxu1 %vm233_vm0, %v20767_v45  ;;  %v1726_v45 = vld [vmem:[#allocation2 + $0x1ba] sm:$0xff] }
  0xf4   :  { %18271 = vmatmul.mubr.msk.f32.gmra.mxu0 %vm233_vm0, %v21134_v35 }
  0xf5   :  { %18369 = vmatmul.mubr.msk.f32.gmra.mxu1 %vm233_vm0, %v20775_v48  ;;  %18273 = vmatprep.mubr.msk.f32.mxu0 %vm233_vm0, %v21138_v37  ;;  %v21155_v48 = vld [vmem:[#allocation2 + $0x1ca] sm:$0xff] }
  0xf6   :  { %18371 = vmatprep.mubr.msk.f32.mxu1 %vm233_vm0, %v2430_v5  ;;  %v797_v5 = vpop.f32.mrf.mxu0 }
  0xf8   :  { %18274 = vmatmul.mubr.msk.f32.gmra.mxu0 %vm233_vm0, %v21146_v40  ;;  %v1374_v40 = vpop.f32.mrf.mxu1 }
  0xf9   :  { %18372 = vmatmul.mubr.msk.f32.gmra.mxu1 %vm233_vm0, %v2431_v42  ;;  %18276 = vmatprep.mubr.msk.f32.mxu0 %vm233_vm0, %v1725_v3  ;;  %v21164_v42 = vld [vmem:[#allocation2 + $0x1d2] sm:$0xff]  ;;  %v21170_v3 = vld [vmem:[#allocation2 + $0x1e2] sm:$0xff] }
  0xfa   :  { %18374 = vmatprep.mubr.msk.f32.mxu1 %vm233_vm0, %v20782_v63  ;;  %26225 = vst [vmem:[#allocation14_spill] sm:$0xff] %v21164_v42  ;;  %v21168_v63 = vadd.f32 %v1374_v40, %v797_v5  ;;  %v21184_v5 = vld [vmem:[#allocation2 + $0x1fa] sm:$0xff] }
  0xfc   :  { %18277 = vmatmul.mubr.msk.f32.gmra.mxu0 %vm233_vm0, %v1726_v45  ;;  %26226 = vst [vmem:[#allocation15_spill] sm:$0xff] %v21168_v63  ;;  %v21180_v45 = vld [vmem:[#allocation2 + $0x1ea] sm:$0xff] }
  0xfd   :  { %18375 = vmatmul.mubr.msk.f32.gmra.mxu1 %vm233_vm0, %v20792_v8  ;;  %18279 = vmatprep.mubr.msk.f32.mxu0 %vm233_vm0, %v21155_v48 }
  0xfe   :  { %18377 = vmatprep.mubr.msk.f32.mxu1 %vm233_vm0, %v20798_v13 }
 0x100   :  { %v18037_v7 = vpop.f32.mrf.mxu0  ;;  %18280 = vmatmul.mubr.msk.f32.gmra.mxu0 %vm233_vm0, %v21164_v42 }
 0x101   :  { %v18135_v55 = vpop.f32.mrf.mxu1  ;;  %18378 = vmatmul.mubr.msk.f32.gmra.mxu1 %vm233_vm0, %v20809_v19  ;;  %18282 = vmatprep.mubr.msk.f32.mxu0 %vm233_vm0, %v21170_v3 }
 0x102   :  { %v21176_v8 = vadd.f32 %v18135_v55, %v18037_v7  ;;  %18380 = vmatprep.mubr.msk.f32.mxu1 %vm233_vm0, %v20812_v23  ;;  %v807_v13 = vpop.f32.mrf.mxu0  ;;  %v21196_v23 = vld [vmem:[#allocation2 + $0x202] sm:$0xff] }
 0x103   :  { %v1384_v40 = vpop.f32.mrf.mxu1 }
 0x104   :  { %26227 = vst [vmem:[#allocation16_spill] sm:$0xff] %v21176_v8  ;;  %v21186_v63 = vadd.f32 %v1384_v40, %v807_v13  ;;  %v18040_v14 = vpop.f32.mrf.mxu0  ;;  %18283 = vmatmul.mubr.msk.f32.gmra.mxu0 %vm233_vm0, %v21180_v45  ;;  %v21200_v13 = vld [vmem:[#allocation2 + $0x212] sm:$0xff] }
 0x105   :  { %v18138_v42 = vpop.f32.mrf.mxu1  ;;  %18381 = vmatmul.mubr.msk.f32.gmra.mxu1 %vm233_vm0, %v20821_v26  ;;  %18285 = vmatprep.mubr.msk.f32.mxu0 %vm233_vm0, %v21184_v5 }
 0x106   :  { %26228 = vst [vmem:[#allocation17_spill] sm:$0xff] %v21186_v63  ;;  %v21192_v19 = vadd.f32 %v18138_v42, %v18040_v14  ;;  %18383 = vmatprep.mubr.msk.f32.mxu1 %vm233_vm0, %v20823_v31  ;;  %v817_v7 = vpop.f32.mrf.mxu0  ;;  %v21212_v31 = vld [vmem:[#allocation2 + $0x21a] sm:$0xff] }
 0x107   :  { %v1394_v55 = vpop.f32.mrf.mxu1 }
 0x108   :  { %26229 = vst [vmem:[#allocation18_spill] sm:$0xff] %v21192_v19  ;;  %v21202_v40 = vadd.f32 %v1394_v55, %v817_v7  ;;  %v18043_v63 = vpop.f32.mrf.mxu0  ;;  %18286 = vmatmul.mubr.msk.f32.gmra.mxu0 %vm233_vm0, %v21196_v23  ;;  %v21216_v7 = vld [vmem:[#allocation2 + $0x22a] sm:$0xff] }
 0x109   :  { %v18141_v8 = vpop.f32.mrf.mxu1  ;;  %18384 = vmatmul.mubr.msk.f32.gmra.mxu1 %vm233_vm0, %v20831_v36  ;;  %18288 = vmatprep.mubr.msk.f32.mxu0 %vm233_vm0, %v21200_v13 }
 0x10a   :  { %26230 = vst [vmem:[#allocation19_spill] sm:$0xff] %v21202_v40  ;;  %v21208_v26 = vadd.f32 %v18141_v8, %v18043_v63  ;;  %18386 = vmatprep.mubr.msk.f32.mxu1 %vm233_vm0, %v20833_v41  ;;  %v827_v14 = vpop.f32.mrf.mxu0  ;;  %v21228_v41 = vld [vmem:[#allocation2 + $0x232] sm:$0xff] }
 0x10b   :  { %v1404_v42 = vpop.f32.mrf.mxu1 }
 0x10c   :  { %26231 = vst [vmem:[#allocation20_spill] sm:$0xff] %v21208_v26  ;;  %v21218_v55 = vadd.f32 %v1404_v42, %v827_v14  ;;  %v18046_v40 = vpop.f32.mrf.mxu0  ;;  %18289 = vmatmul.mubr.msk.f32.gmra.mxu0 %vm233_vm0, %v21212_v31  ;;  %v21232_v14 = vld [vmem:[#allocation2 + $0x242] sm:$0xff] }
 0x10d   :  { %v18144_v19 = vpop.f32.mrf.mxu1  ;;  %18387 = vmatmul.mubr.msk.f32.gmra.mxu1 %vm233_vm0, %v20841_v47  ;;  %18291 = vmatprep.mubr.msk.f32.mxu0 %vm233_vm0, %v21216_v7 }
 0x10e   :  { %26232 = vst [vmem:[#allocation21_spill] sm:$0xff] %v21218_v55  ;;  %v21224_v36 = vadd.f32 %v18144_v19, %v18046_v40  ;;  %18389 = vmatprep.mubr.msk.f32.mxu1 %vm233_vm0, %v20843_v51  ;;  %v837_v63 = vpop.f32.mrf.mxu0  ;;  %v21244_v51 = vld [vmem:[#allocation2 + $0x24a] sm:$0xff] }
 0x10f   :  { %v1414_v8 = vpop.f32.mrf.mxu1 }
 0x110   :  { %26233 = vst [vmem:[#allocation22_spill] sm:$0xff] %v21224_v36  ;;  %v21234_v42 = vadd.f32 %v1414_v8, %v837_v63  ;;  %v18049_v55 = vpop.f32.mrf.mxu0  ;;  %18292 = vmatmul.mubr.msk.f32.gmra.mxu0 %vm233_vm0, %v21228_v41  ;;  %v21248_v63 = vld [vmem:[#allocation2 + $0x25a] sm:$0xff] }
 0x111   :  { %v18147_v26 = vpop.f32.mrf.mxu1  ;;  %18390 = vmatmul.mubr.msk.f32.gmra.mxu1 %vm233_vm0, %v20851_v57  ;;  %18294 = vmatprep.mubr.msk.f32.mxu0 %vm233_vm0, %v21232_v14 }
 0x112   :  { %26234 = vst [vmem:[#allocation23_spill] sm:$0xff] %v21234_v42  ;;  %v21240_v47 = vadd.f32 %v18147_v26, %v18049_v55  ;;  %18392 = vmatprep.mubr.msk.f32.mxu1 %vm233_vm0, %v20853_v1  ;;  %v847_v19 = vpop.f32.mrf.mxu0  ;;  %v21260_v1 = vld [vmem:[#allocation2 + $0x262] sm:$0xff] }
 0x113   :  { %v1424_v40 = vpop.f32.mrf.mxu1 }
 0x114   :  { %26235 = vst [vmem:[#allocation24_spill] sm:$0xff] %v21240_v47  ;;  %v21250_v8 = vadd.f32 %v1424_v40, %v847_v19  ;;  %v18052_v42 = vpop.f32.mrf.mxu0  ;;  %18295 = vmatmul.mubr.msk.f32.gmra.mxu0 %vm233_vm0, %v21244_v51  ;;  %v21264_v19 = vld [vmem:[#allocation2 + $0x272] sm:$0xff] }
 0x115   :  { %v18150_v36 = vpop.f32.mrf.mxu1  ;;  %18393 = vmatmul.mubr.msk.f32.gmra.mxu1 %vm233_vm0, %v20861_v10  ;;  %18297 = vmatprep.mubr.msk.f32.mxu0 %vm233_vm0, %v21248_v63 }
 0x116   :  { %26236 = vst [vmem:[#allocation25_spill] sm:$0xff] %v21250_v8  ;;  %v21256_v57 = vadd.f32 %v18150_v36, %v18052_v42  ;;  %18395 = vmatprep.mubr.msk.f32.mxu1 %vm233_vm0, %v20863_v12  ;;  %v857_v26 = vpop.f32.mrf.mxu0  ;;  %v21276_v12 = vld [vmem:[#allocation2 + $0x27a] sm:$0xff] }
 0x117   :  { %v1434_v55 = vpop.f32.mrf.mxu1 }
 0x118   :  { %26237 = vst [vmem:[#allocation26_spill] sm:$0xff] %v21256_v57  ;;  %v21266_v40 = vadd.f32 %v1434_v55, %v857_v26  ;;  %v18055_v8 = vpop.f32.mrf.mxu0  ;;  %18298 = vmatmul.mubr.msk.f32.gmra.mxu0 %vm233_vm0, %v21260_v1  ;;  %v21280_v26 = vld [vmem:[#allocation2 + $0x28a] sm:$0xff] }
 0x119   :  { %v18153_v47 = vpop.f32.mrf.mxu1  ;;  %18396 = vmatmul.mubr.msk.f32.gmra.mxu1 %vm233_vm0, %v20871_v15  ;;  %18300 = vmatprep.mubr.msk.f32.mxu0 %vm233_vm0, %v21264_v19 }
 0x11a   :  { %26238 = vst [vmem:[#allocation27_spill] sm:$0xff] %v21266_v40  ;;  %v21272_v10 = vadd.f32 %v18153_v47, %v18055_v8  ;;  %18398 = vmatprep.mubr.msk.f32.mxu1 %vm233_vm0, %v20873_v18  ;;  %v867_v36 = vpop.f32.mrf.mxu0  ;;  %v21292_v18 = vld [vmem:[#allocation2 + $0x292] sm:$0xff] }
 0x11b   :  { %v1444_v42 = vpop.f32.mrf.mxu1  ;;  %26242 = vst [vmem:[#allocation31_spill] sm:$0xff] %v21292_v18 }
 0x11c   :  { %26239 = vst [vmem:[#allocation28_spill] sm:$0xff] %v21272_v10  ;;  %v21282_v55 = vadd.f32 %v1444_v42, %v867_v36  ;;  %v18058_v40 = vpop.f32.mrf.mxu0  ;;  %18301 = vmatmul.mubr.msk.f32.gmra.mxu0 %vm233_vm0, %v21276_v12  ;;  %v21296_v36 = vld [vmem:[#allocation2 + $0x2a2] sm:$0xff] }
 0x11d   :  { %v18156_v57 = vpop.f32.mrf.mxu1  ;;  %18399 = vmatmul.mubr.msk.f32.gmra.mxu1 %vm233_vm0, %v20881_v25  ;;  %18303 = vmatprep.mubr.msk.f32.mxu0 %vm233_vm0, %v21280_v26  ;;  %26243 = vst [vmem:[#allocation32_spill] sm:$0xff] %v21296_v36 }
 0x11e   :  { %26240 = vst [vmem:[#allocation29_spill] sm:$0xff] %v21282_v55  ;;  %v21288_v15 = vadd.f32 %v18156_v57, %v18058_v40  ;;  %18401 = vmatprep.mubr.msk.f32.mxu1 %vm233_vm0, %v20883_v33  ;;  %v877_v47 = vpop.f32.mrf.mxu0  ;;  %v21308_v33 = vld [vmem:[#allocation2 + $0x2aa] sm:$0xff]  ;;  %v26247_v57 = vld [vmem:[#allocation7_spill] sm:$0xff] }
 0x11f   :  { %v1454_v8 = vpop.f32.mrf.mxu1  ;;  %26246 = vst [vmem:[#allocation35_spill] sm:$0xff] %v21308_v33 }
 0x120   :  { %26241 = vst [vmem:[#allocation30_spill] sm:$0xff] %v21288_v15  ;;  %v21298_v42 = vadd.f32 %v1454_v8, %v877_v47  ;;  %v18061_v55 = vpop.f32.mrf.mxu0  ;;  %18304 = vmatmul.mubr.msk.f32.gmra.mxu0 %vm233_vm0, %v21292_v18  ;;  %v21312_v8 = vld [vmem:[#allocation2 + $0x2ba] sm:$0xff] }
 0x121   :  { %v18159_v10 = vpop.f32.mrf.mxu1  ;;  %18402 = vmatmul.mubr.msk.f32.gmra.mxu1 %vm233_vm0, %v20891_v43  ;;  %18306 = vmatprep.mubr.msk.f32.mxu0 %vm233_vm0, %v21296_v36  ;;  %26248 = vst [vmem:[#allocation7_spill] sm:$0xff] %v21312_v8  ;;  %v26250_v43 = vld [vmem:[#allocation8_spill] sm:$0xff] }
 0x122   :  { %26244 = vst [vmem:[#allocation33_spill] sm:$0xff] %v21298_v42  ;;  %v21304_v25 = vadd.f32 %v18159_v10, %v18061_v55  ;;  %18404 = vmatprep.mubr.msk.f32.mxu1 %vm233_vm0, %v26247_v57  ;;  %v887_v40 = vpop.f32.mrf.mxu0  ;;  %v21324_v55 = vld [vmem:[#allocation2 + $0x2c2] sm:$0xff]  ;;  %v26253_v57 = vld [vmem:[#allocation9_spill] sm:$0xff] }
 0x123   :  { %v1464_v47 = vpop.f32.mrf.mxu1  ;;  %26252 = vst [vmem:[#allocation37_spill] sm:$0xff] %v21324_v55 }
 0x124   :  { %26245 = vst [vmem:[#allocation34_spill] sm:$0xff] %v21304_v25  ;;  %v21314_v42 = vadd.f32 %v1464_v47, %v887_v40  ;;  %v18064_v15 = vpop.f32.mrf.mxu0  ;;  %18307 = vmatmul.mubr.msk.f32.gmra.mxu0 %vm233_vm0, %v21308_v33 }
 0x125   :  { %v18162_v18 = vpop.f32.mrf.mxu1  ;;  %18405 = vmatmul.mubr.msk.f32.gmra.mxu1 %vm233_vm0, %v26250_v43  ;;  %18309 = vmatprep.mubr.msk.f32.mxu0 %vm233_vm0, %v21312_v8  ;;  %v21340_v43 = vld [vmem:[#allocation2 + $0x2da] sm:$0xff] }
 0x126   :  { %26249 = vst [vmem:[#allocation36_spill] sm:$0xff] %v21314_v42  ;;  %v21320_v10 = vadd.f32 %v18162_v18, %v18064_v15  ;;  %18407 = vmatprep.mubr.msk.f32.mxu1 %vm233_vm0, %v26253_v57  ;;  %v897_v40 = vpop.f32.mrf.mxu0  ;;  %v21328_v42 = vld [vmem:[#allocation2 + $0x2d2] sm:$0xff]  ;;  %v26257_v57 = vld [vmem:[#allocation11_spill] sm:$0xff] }
 0x127   :  { %v1474_v47 = vpop.f32.mrf.mxu1  ;;  %v26255_v15 = vld [vmem:[#allocation10_spill] sm:$0xff] }
 0x128   :  { %26251 = vst [vmem:[#allocation8_spill] sm:$0xff] %v21320_v10  ;;  %v21330_v25 = vadd.f32 %v1474_v47, %v897_v40  ;;  %v18067_v33 = vpop.f32.mrf.mxu0  ;;  %18310 = vmatmul.mubr.msk.f32.gmra.mxu0 %vm233_vm0, %v21324_v55 }
 0x129   :  { %v18165_v36 = vpop.f32.mrf.mxu1  ;;  %18408 = vmatmul.mubr.msk.f32.gmra.mxu1 %vm233_vm0, %v26255_v15  ;;  %18312 = vmatprep.mubr.msk.f32.mxu0 %vm233_vm0, %v21328_v42 }
 0x12a   :  { %26254 = vst [vmem:[#allocation9_spill] sm:$0xff] %v21330_v25  ;;  %v21336_v18 = vadd.f32 %v18165_v36, %v18067_v33  ;;  %18410 = vmatprep.mubr.msk.f32.mxu1 %vm233_vm0, %v26257_v57  ;;  %v907_v40 = vpop.f32.mrf.mxu0  ;;  %v21344_v25 = vld [vmem:[#allocation2 + $0x2ea] sm:$0xff]  ;;  %v21356_v33 = vld [vmem:[#allocation2 + $0x2f2] sm:$0xff] }
 0x12b   :  { %v1484_v47 = vpop.f32.mrf.mxu1  ;;  %26260 = vst [vmem:[#allocation39_spill] sm:$0xff] %v21356_v33 }
 0x12c   :  { %26256 = vst [vmem:[#allocation10_spill] sm:$0xff] %v21336_v18  ;;  %v21346_v10 = vadd.f32 %v1484_v47, %v907_v40  ;;  %v18070_v55 = vpop.f32.mrf.mxu0  ;;  %18313 = vmatmul.mubr.msk.f32.gmra.mxu0 %vm233_vm0, %v21340_v43  ;;  %v21360_v40 = vld [vmem:[#allocation2 + $0x302] sm:$0xff] }
 0x12d   :  { %v18168_v8 = vpop.f32.mrf.mxu1  ;;  %18411 = vmatmul.mubr.msk.f32.gmra.mxu1 %vm233_vm0, %v20924_v11  ;;  %18315 = vmatprep.mubr.msk.f32.mxu0 %vm233_vm0, %v21344_v25 }
 0x12e   :  { %26258 = vst [vmem:[#allocation11_spill] sm:$0xff] %v21346_v10  ;;  %v21352_v36 = vadd.f32 %v18168_v8, %v18070_v55  ;;  %18413 = vmatprep.mubr.msk.f32.mxu1 %vm233_vm0, %v20930_v20  ;;  %v917_v15 = vpop.f32.mrf.mxu0  ;;  %v21372_v20 = vld [vmem:[#allocation2 + $0x30a] sm:$0xff] }
 0x12f   :  { %v1494_v57 = vpop.f32.mrf.mxu1  ;;  %26263 = vst [vmem:[#allocation42_spill] sm:$0xff] %v21372_v20 }
 0x130   :  { %26259 = vst [vmem:[#allocation38_spill] sm:$0xff] %v21352_v36  ;;  %v21362_v47 = vadd.f32 %v1494_v57, %v917_v15  ;;  %v18073_v10 = vpop.f32.mrf.mxu0  ;;  %18316 = vmatmul.mubr.msk.f32.gmra.mxu0 %vm233_vm0, %v21356_v33  ;;  %v21376_v15 = vld [vmem:[#allocation2 + $0x31a] sm:$0xff]  ;;  %v2462_v57 = vld [vmem:[#allocation2 + $0x330] sm:$0xff] }
 0x131   :  { %v18171_v18 = vpop.f32.mrf.mxu1  ;;  %18414 = vmatmul.mubr.msk.f32.gmra.mxu1 %vm233_vm0, %v20941_v38  ;;  %18318 = vmatprep.mubr.msk.f32.mxu0 %vm233_vm0, %v21360_v40 }
 0x132   :  { %26261 = vst [vmem:[#allocation40_spill] sm:$0xff] %v21362_v47  ;;  %v21368_v11 = vadd.f32 %v18171_v18, %v18073_v10  ;;  %18416 = vmatprep.mubr.msk.f32.mxu1 %vm233_vm0, %v20944_v16  ;;  %v927_v8 = vpop.f32.mrf.mxu0  ;;  %v21388_v16 = vld [vmem:[#allocation2 + $0x322] sm:$0xff]  ;;  %v2463_v10 = vld [vmem:[#allocation2 + $0x338] sm:$0xff] }
 0x133   :  { %v1504_v55 = vpop.f32.mrf.mxu1 }
 0x134   :  { %26262 = vst [vmem:[#allocation41_spill] sm:$0xff] %v21368_v11  ;;  %v21378_v47 = vadd.f32 %v1504_v55, %v927_v8  ;;  %v18076_v36 = vpop.f32.mrf.mxu0  ;;  %18319 = vmatmul.mubr.msk.f32.gmra.mxu0 %vm233_vm0, %v21372_v20  ;;  %v3107_v55 = vld [vmem:[#allocation2 + $0x19] sm:$0xff] }
 0x135   :  { %v18174_v33 = vpop.f32.mrf.mxu1  ;;  %18417 = vmatmul.mubr.msk.f32.gmra.mxu1 %vm233_vm0, %v20953_v6  ;;  %18321 = vmatprep.mubr.msk.f32.mxu0 %vm233_vm0, %v21376_v15 }
 0x136   :  { %26264 = vst [vmem:[#allocation43_spill] sm:$0xff] %v21378_v47  ;;  %v21384_v38 = vadd.f32 %v18174_v33, %v18076_v36  ;;  %18419 = vmatprep.mubr.msk.f32.mxu1 %vm233_vm0, %v2462_v57  ;;  %v937_v18 = vpop.f32.mrf.mxu0  ;;  %v3108_v36 = vld [vmem:[#allocation2 + $0x21] sm:$0xff]  ;;  %v15897_v33 = vld [vmem:[%s26164_s3 + $0x38] sm:$0xff] }
 0x137   :  { %v1514_v8 = vpop.f32.mrf.mxu1  ;;  %18716 = vmatprep.subr.mxu1 %v15897_v33 }
 0x138   :  { %v21391_v47 = vadd.f32 %v1514_v8, %v937_v18  ;;  %v18079_v11 = vpop.f32.mrf.mxu0  ;;  %18322 = vmatmul.mubr.msk.f32.gmra.mxu0 %vm233_vm0, %v21388_v16  ;;  %v21404_v8 = vld [vmem:[#allocation2 + $0x31] sm:$0xff] }
 0x139   :  { %v18177_v20 = vpop.f32.mrf.mxu1  ;;  %18420 = vmatmul.mubr.msk.f32.gmra.mxu1 %vm233_vm0, %v2463_v10  ;;  %18424 = vmatprep.mubr.msk.f32.mxu0 %vm233_vm0, %v3107_v55  ;;  %v21421_v55 = vld [vmem:[#allocation2 + $0x39] sm:$0xff] }
 0x13a   :  { %26265 = vst [vmem:[#allocation44_spill] sm:$0xff] %v21391_v47  ;;  %v21396_v6 = vadd.f32 %v18177_v20, %v18079_v11  ;;  %18522 = vmatprep.mubr.msk.f32.mxu1 %vm233_vm0, %v20964_v61  ;;  %v947_v57 = vpop.f32.mrf.mxu0  ;;  %v21414_v61 = vld [vmem:[%s26164_s3 + $0x40] sm:$0xff] }
 0x13b   :  { %v1524_v18 = vpop.f32.mrf.mxu1  ;;  %26266 = vst [vmem:[#allocation45_spill] sm:$0xff] %v21414_v61 }
 0x13c   :  { %v21406_v47 = vadd.f32 %v1524_v18, %v947_v57  ;;  %v18082_v10 = vpop.f32.mrf.mxu0  ;;  %18425 = vmatmul.mubr.msk.f32.vlgmr.msra.gmra.mxu0 %vm233_vm0, %v3108_v36 }
 0x13d   :  { %v18180_v11 = vpop.f32.mrf.mxu1  ;;  %18523 = vmatmul.mubr.msk.f32.vlgmr.msra.gmra.mxu1 %vm233_vm0, %v20977_v17  ;;  %18619 = vmatpush3.msra.mxu0 %v20972_v27  ;;  %v21425_v17 = vld [vmem:[#allocation2 + $0x49] sm:$0xff] }
 0x13e   :  { %v21416_v20 = vadd.f32 %v18180_v11, %v18082_v10  ;;  %18427 = vmatprep.mubr.msk.f32.mxu0 %vm233_vm0, %v21404_v8  ;;  %v957_v57 = vpop.f32.mrf.mxu0  ;;  %18525 = vmatprep.mubr.msk.f32.mxu1 %vm233_vm0, %v20981_v49  ;;  %v21438_v49 = vld [vmem:[#allocation2 + $0x51] sm:$0xff] }
 0x13f   :  { %v1534_v18 = vpop.f32.mrf.mxu1  ;;  %18717 = vmatpush3.msra.mxu1 %v15897_v33  ;;  %18814 = vmatprep.subr.mxu0 %v21414_v61 }
 0x140   :  { %26267 = vst [vmem:[#allocation46_spill] sm:$0xff] %v21416_v20  ;;  %v21427_v36 = vadd.f32 %v1534_v18, %v957_v57  ;;  %v18085_v10 = vpop.f32.mrf.mxu0  ;;  %18428 = vmatmul.mubr.msk.f32.gmra.mxu0 %vm233_vm0, %v21421_v55  ;;  %v21442_v18 = vld [vmem:[#allocation2 + $0x61] sm:$0xff] }
 0x141   :  { %v18183_v11 = vpop.f32.mrf.mxu1  ;;  %18526 = vmatmul.mubr.msk.f32.gmra.mxu1 %vm233_vm0, %v20990_v24  ;;  %18430 = vmatprep.mubr.msk.f32.mxu0 %vm233_vm0, %v21425_v17 }
 0x142   :  { %26268 = vst [vmem:[#allocation47_spill] sm:$0xff] %v21427_v36  ;;  %v21434_v27 = vadd.f32 %v18183_v11, %v18085_v10  ;;  %18528 = vmatprep.mubr.msk.f32.mxu1 %vm233_vm0, %v20994_v29  ;;  %v967_v33 = vpop.f32.mrf.mxu0  ;;  %v21454_v29 = vld [vmem:[#allocation2 + $0x69] sm:$0xff] }
 0x143   :  { %v1544_v57 = vpop.f32.mrf.mxu1 }
 0x144   :  { %26269 = vst [vmem:[#allocation48_spill] sm:$0xff] %v21434_v27  ;;  %v21444_v36 = vadd.f32 %v1544_v57, %v967_v33  ;;  %v18088_v61 = vpop.f32.mrf.mxu0  ;;  %18431 = vmatmul.mubr.msk.f32.gmra.mxu0 %vm233_vm0, %v21438_v49  ;;  %v21458_v33 = vld [vmem:[#allocation2 + $0x79] sm:$0xff] }
 0x145   :  { %v18186_v20 = vpop.f32.mrf.mxu1  ;;  %18529 = vmatmul.mubr.msk.f32.gmra.mxu1 %vm233_vm0, %v21002_v34  ;;  %18433 = vmatprep.mubr.msk.f32.mxu0 %vm233_vm0, %v21442_v18 }
 0x146   :  { %26270 = vst [vmem:[#allocation49_spill] sm:$0xff] %v21444_v36  ;;  %v21450_v24 = vadd.f32 %v18186_v20, %v18088_v61  ;;  %18531 = vmatprep.mubr.msk.f32.mxu1 %vm233_vm0, %v21006_v44  ;;  %v977_v10 = vpop.f32.mrf.mxu0  ;;  %v21470_v44 = vld [vmem:[#allocation2 + $0x81] sm:$0xff] }
 0x147   :  { %v1554_v11 = vpop.f32.mrf.mxu1 }
 0x148   :  { %26271 = vst [vmem:[#allocation50_spill] sm:$0xff] %v21450_v24  ;;  %v21460_v57 = vadd.f32 %v1554_v11, %v977_v10  ;;  %v18091_v36 = vpop.f32.mrf.mxu0  ;;  %18434 = vmatmul.mubr.msk.f32.gmra.mxu0 %vm233_vm0, %v21454_v29  ;;  %v21474_v10 = vld [vmem:[#allocation2 + $0x91] sm:$0xff] }
 0x149   :  { %v18189_v27 = vpop.f32.mrf.mxu1  ;;  %18532 = vmatmul.mubr.msk.f32.gmra.mxu1 %vm233_vm0, %v21014_v39  ;;  %18436 = vmatprep.mubr.msk.f32.mxu0 %vm233_vm0, %v21458_v33 }
 0x14a   :  { %26272 = vst [vmem:[#allocation51_spill] sm:$0xff] %v21460_v57  ;;  %v21466_v34 = vadd.f32 %v18189_v27, %v18091_v36  ;;  %18534 = vmatprep.mubr.msk.f32.mxu1 %vm233_vm0, %v21018_v50  ;;  %v987_v61 = vpop.f32.mrf.mxu0  ;;  %v21486_v50 = vld [vmem:[#allocation2 + $0x99] sm:$0xff] }
 0x14b   :  { %v1564_v20 = vpop.f32.mrf.mxu1 }
 0x14c   :  { %26273 = vst [vmem:[#allocation52_spill] sm:$0xff] %v21466_v34  ;;  %v21476_v11 = vadd.f32 %v1564_v20, %v987_v61  ;;  %v18094_v57 = vpop.f32.mrf.mxu0  ;;  %18437 = vmatmul.mubr.msk.f32.gmra.mxu0 %vm233_vm0, %v21470_v44  ;;  %v21490_v61 = vld [vmem:[#allocation2 + $0xa9] sm:$0xff] }
 0x14d   :  { %v18192_v24 = vpop.f32.mrf.mxu1  ;;  %18535 = vmatmul.mubr.msk.f32.gmra.mxu1 %vm233_vm0, %v21026_v52  ;;  %18439 = vmatprep.mubr.msk.f32.mxu0 %vm233_vm0, %v21474_v10 }
 0x14e   :  { %26274 = vst [vmem:[#allocation53_spill] sm:$0xff] %v21476_v11  ;;  %v21482_v39 = vadd.f32 %v18192_v24, %v18094_v57  ;;  %18537 = vmatprep.mubr.msk.f32.mxu1 %vm233_vm0, %v21030_v54  ;;  %v997_v36 = vpop.f32.mrf.mxu0  ;;  %v21502_v54 = vld [vmem:[#allocation2 + $0xb1] sm:$0xff] }
 0x14f   :  { %v1574_v27 = vpop.f32.mrf.mxu1 }
 0x150   :  { %26275 = vst [vmem:[#allocation54_spill] sm:$0xff] %v21482_v39  ;;  %v21492_v20 = vadd.f32 %v1574_v27, %v997_v36  ;;  %v18097_v11 = vpop.f32.mrf.mxu0  ;;  %18440 = vmatmul.mubr.msk.f32.gmra.mxu0 %vm233_vm0, %v21486_v50  ;;  %v21506_v36 = vld [vmem:[#allocation2 + $0xc1] sm:$0xff] }
 0x151   :  { %v18195_v34 = vpop.f32.mrf.mxu1  ;;  %18538 = vmatmul.mubr.msk.f32.gmra.mxu1 %vm233_vm0, %v21038_v56  ;;  %18442 = vmatprep.mubr.msk.f32.mxu0 %vm233_vm0, %v21490_v61 }
 0x152   :  { %26276 = vst [vmem:[#allocation55_spill] sm:$0xff] %v21492_v20  ;;  %v21498_v52 = vadd.f32 %v18195_v34, %v18097_v11  ;;  %18540 = vmatprep.mubr.msk.f32.mxu1 %vm233_vm0, %v21042_v58  ;;  %v1007_v24 = vpop.f32.mrf.mxu0  ;;  %v21518_v58 = vld [vmem:[#allocation2 + $0xc9] sm:$0xff] }
 0x153   :  { %v1584_v57 = vpop.f32.mrf.mxu1 }
 0x154   :  { %26277 = vst [vmem:[#allocation56_spill] sm:$0xff] %v21498_v52  ;;  %v21508_v27 = vadd.f32 %v1584_v57, %v1007_v24  ;;  %v18100_v20 = vpop.f32.mrf.mxu0  ;;  %18443 = vmatmul.mubr.msk.f32.gmra.mxu0 %vm233_vm0, %v21502_v54  ;;  %v21522_v24 = vld [vmem:[#allocation2 + $0xd9] sm:$0xff] }
 0x155   :  { %v18198_v39 = vpop.f32.mrf.mxu1  ;;  %18541 = vmatmul.mubr.msk.f32.gmra.mxu1 %vm233_vm0, %v21050_v60  ;;  %18445 = vmatprep.mubr.msk.f32.mxu0 %vm233_vm0, %v21506_v36 }
 0x156   :  { %26278 = vst [vmem:[#allocation57_spill] sm:$0xff] %v21508_v27  ;;  %v21514_v56 = vadd.f32 %v18198_v39, %v18100_v20  ;;  %18543 = vmatprep.mubr.msk.f32.mxu1 %vm233_vm0, %v21054_v62  ;;  %v1017_v34 = vpop.f32.mrf.mxu0  ;;  %v21534_v62 = vld [vmem:[#allocation2 + $0xe1] sm:$0xff] }
 0x157   :  { %v1594_v11 = vpop.f32.mrf.mxu1 }
 0x158   :  { %26279 = vst [vmem:[#allocation58_spill] sm:$0xff] %v21514_v56  ;;  %v21524_v57 = vadd.f32 %v1594_v11, %v1017_v34  ;;  %v18103_v27 = vpop.f32.mrf.mxu0  ;;  %18446 = vmatmul.mubr.msk.f32.gmra.mxu0 %vm233_vm0, %v21518_v58  ;;  %v21538_v34 = vld [vmem:[#allocation2 + $0xf1] sm:$0xff] }
 0x159   :  { %v18201_v52 = vpop.f32.mrf.mxu1  ;;  %18544 = vmatmul.mubr.msk.f32.gmra.mxu1 %vm233_vm0, %v21062_v0  ;;  %18448 = vmatprep.mubr.msk.f32.mxu0 %vm233_vm0, %v21522_v24 }
 0x15a   :  { %26280 = vst [vmem:[#allocation59_spill] sm:$0xff] %v21524_v57  ;;  %v21530_v60 = vadd.f32 %v18201_v52, %v18103_v27  ;;  %18546 = vmatprep.mubr.msk.f32.mxu1 %vm233_vm0, %v21066_v4  ;;  %v1027_v39 = vpop.f32.mrf.mxu0  ;;  %v21550_v4 = vld [vmem:[#allocation2 + $0xf9] sm:$0xff] }
 0x15b   :  { %v1604_v20 = vpop.f32.mrf.mxu1 }
 0x15c   :  { %26281 = vst [vmem:[#allocation60_spill] sm:$0xff] %v21530_v60  ;;  %v21540_v11 = vadd.f32 %v1604_v20, %v1027_v39  ;;  %v18106_v57 = vpop.f32.mrf.mxu0  ;;  %18449 = vmatmul.mubr.msk.f32.gmra.mxu0 %vm233_vm0, %v21534_v62  ;;  %v21554_v39 = vld [vmem:[#allocation2 + $0x109] sm:$0xff] }
 0x15d   :  { %v18204_v56 = vpop.f32.mrf.mxu1  ;;  %18547 = vmatmul.mubr.msk.f32.gmra.mxu1 %vm233_vm0, %v21074_v9  ;;  %18451 = vmatprep.mubr.msk.f32.mxu0 %vm233_vm0, %v21538_v34 }
 0x15e   :  { %26282 = vst [vmem:[#allocation61_spill] sm:$0xff] %v21540_v11  ;;  %v21546_v0 = vadd.f32 %v18204_v56, %v18106_v57  ;;  %18549 = vmatprep.mubr.msk.f32.mxu1 %vm233_vm0, %v21078_v46  ;;  %v1037_v52 = vpop.f32.mrf.mxu0  ;;  %v21566_v46 = vld [vmem:[#allocation2 + $0x111] sm:$0xff] }
 0x15f   :  { %v1614_v27 = vpop.f32.mrf.mxu1 }
 0x160   :  { %26283 = vst [vmem:[#allocation62_spill] sm:$0xff] %v21546_v0  ;;  %v21556_v20 = vadd.f32 %v1614_v27, %v1037_v52  ;;  %v18109_v11 = vpop.f32.mrf.mxu0  ;;  %18452 = vmatmul.mubr.msk.f32.gmra.mxu0 %vm233_vm0, %v21550_v4  ;;  %v21570_v52 = vld [vmem:[#allocation2 + $0x121] sm:$0xff] }
 0x161   :  { %v18207_v60 = vpop.f32.mrf.mxu1  ;;  %18550 = vmatmul.mubr.msk.f32.gmra.mxu1 %vm233_vm0, %v21086_v53  ;;  %18454 = vmatprep.mubr.msk.f32.mxu0 %vm233_vm0, %v21554_v39 }
 0x162   :  { %26284 = vst [vmem:[#allocation63_spill] sm:$0xff] %v21556_v20  ;;  %v21562_v9 = vadd.f32 %v18207_v60, %v18109_v11  ;;  %18552 = vmatprep.mubr.msk.f32.mxu1 %vm233_vm0, %v21090_v22  ;;  %v1047_v56 = vpop.f32.mrf.mxu0  ;;  %v21582_v22 = vld [vmem:[#allocation2 + $0x129] sm:$0xff] }
 0x163   :  { %v1624_v57 = vpop.f32.mrf.mxu1 }
 0x164   :  { %26285 = vst [vmem:[#allocation64_spill] sm:$0xff] %v21562_v9  ;;  %v21572_v27 = vadd.f32 %v1624_v57, %v1047_v56  ;;  %v18112_v20 = vpop.f32.mrf.mxu0  ;;  %18455 = vmatmul.mubr.msk.f32.gmra.mxu0 %vm233_vm0, %v21566_v46  ;;  %v21586_v56 = vld [vmem:[#allocation2 + $0x139] sm:$0xff] }
 0x165   :  { %v18210_v0 = vpop.f32.mrf.mxu1  ;;  %18553 = vmatmul.mubr.msk.f32.gmra.mxu1 %vm233_vm0, %v21098_v30  ;;  %18457 = vmatprep.mubr.msk.f32.mxu0 %vm233_vm0, %v21570_v52 }
 0x166   :  { %26286 = vst [vmem:[#allocation65_spill] sm:$0xff] %v21572_v27  ;;  %v21578_v53 = vadd.f32 %v18210_v0, %v18112_v20  ;;  %18555 = vmatprep.mubr.msk.f32.mxu1 %vm233_vm0, %v21102_v59  ;;  %v1057_v60 = vpop.f32.mrf.mxu0  ;;  %v21598_v59 = vld [vmem:[#allocation2 + $0x141] sm:$0xff] }
 0x167   :  { %v1634_v11 = vpop.f32.mrf.mxu1 }
 0x168   :  { %26287 = vst [vmem:[#allocation66_spill] sm:$0xff] %v21578_v53  ;;  %v21588_v57 = vadd.f32 %v1634_v11, %v1057_v60  ;;  %v18115_v27 = vpop.f32.mrf.mxu0  ;;  %18458 = vmatmul.mubr.msk.f32.gmra.mxu0 %vm233_vm0, %v21582_v22  ;;  %v21602_v60 = vld [vmem:[#allocation2 + $0x151] sm:$0xff] }
 0x169   :  { %v18213_v9 = vpop.f32.mrf.mxu1  ;;  %18556 = vmatmul.mubr.msk.f32.gmra.mxu1 %vm233_vm0, %v21110_v2  ;;  %18460 = vmatprep.mubr.msk.f32.mxu0 %vm233_vm0, %v21586_v56 }
 0x16a   :  { %26288 = vst [vmem:[#allocation67_spill] sm:$0xff] %v21588_v57  ;;  %v21594_v30 = vadd.f32 %v18213_v9, %v18115_v27  ;;  %18558 = vmatprep.mubr.msk.f32.mxu1 %vm233_vm0, %v21114_v21  ;;  %v1067_v0 = vpop.f32.mrf.mxu0  ;;  %v21614_v21 = vld [vmem:[#allocation2 + $0x159] sm:$0xff] }
 0x16b   :  { %v1644_v20 = vpop.f32.mrf.mxu1  ;;  %26292 = vst [vmem:[#allocation71_spill] sm:$0xff] %v21614_v21 }
 0x16c   :  { %26289 = vst [vmem:[#allocation68_spill] sm:$0xff] %v21594_v30  ;;  %v21604_v11 = vadd.f32 %v1644_v20, %v1067_v0  ;;  %v18118_v57 = vpop.f32.mrf.mxu0  ;;  %18461 = vmatmul.mubr.msk.f32.gmra.mxu0 %vm233_vm0, %v21598_v59  ;;  %v21618_v0 = vld [vmem:[#allocation2 + $0x169] sm:$0xff] }
 0x16d   :  { %v18216_v53 = vpop.f32.mrf.mxu1  ;;  %18559 = vmatmul.mubr.msk.f32.gmra.mxu1 %vm233_vm0, %v21122_v28  ;;  %18463 = vmatprep.mubr.msk.f32.mxu0 %vm233_vm0, %v21602_v60  ;;  %26293 = vst [vmem:[#allocation72_spill] sm:$0xff] %v21618_v0 }
 0x16e   :  { %26290 = vst [vmem:[#allocation69_spill] sm:$0xff] %v21604_v11  ;;  %v21610_v2 = vadd.f32 %v18216_v53, %v18118_v57  ;;  %18561 = vmatprep.mubr.msk.f32.mxu1 %vm233_vm0, %v21126_v32  ;;  %v1077_v9 = vpop.f32.mrf.mxu0  ;;  %v21630_v32 = vld [vmem:[#allocation2 + $0x171] sm:$0xff] }
 0x16f   :  { %v1654_v27 = vpop.f32.mrf.mxu1  ;;  %26296 = vst [vmem:[#allocation75_spill] sm:$0xff] %v21630_v32 }
 0x170   :  { %26291 = vst [vmem:[#allocation70_spill] sm:$0xff] %v21610_v2  ;;  %v21620_v20 = vadd.f32 %v1654_v27, %v1077_v9  ;;  %v18121_v11 = vpop.f32.mrf.mxu0  ;;  %18464 = vmatmul.mubr.msk.f32.gmra.mxu0 %vm233_vm0, %v21614_v21  ;;  %v21634_v9 = vld [vmem:[#allocation2 + $0x181] sm:$0xff] }
 0x171   :  { %v18219_v30 = vpop.f32.mrf.mxu1  ;;  %18562 = vmatmul.mubr.msk.f32.gmra.mxu1 %vm233_vm0, %v21134_v35  ;;  %18466 = vmatprep.mubr.msk.f32.mxu0 %vm233_vm0, %v21618_v0  ;;  %v3844_v27 = vld [vmem:[#allocation2 + $0x182] sm:$0xff] }
 0x172   :  { %26294 = vst [vmem:[#allocation73_spill] sm:$0xff] %v21620_v20  ;;  %v21626_v28 = vadd.f32 %v18219_v30, %v18121_v11  ;;  %18564 = vmatprep.mubr.msk.f32.mxu1 %vm233_vm0, %v21138_v37  ;;  %v1087_v53 = vpop.f32.mrf.mxu0  ;;  %v26298_v35 = vld [vmem:[#allocation12_spill] sm:$0xff] }
 0x173   :  { %v1664_v57 = vpop.f32.mrf.mxu1  ;;  %v21646_v37 = vld [vmem:[#allocation2 + $0x189] sm:$0xff] }
 0x174   :  { %26295 = vst [vmem:[#allocation74_spill] sm:$0xff] %v21626_v28  ;;  %v21636_v20 = vadd.f32 %v1664_v57, %v1087_v53  ;;  %v18124_v2 = vpop.f32.mrf.mxu0  ;;  %18467 = vmatmul.mubr.msk.f32.gmra.mxu0 %vm233_vm0, %v21630_v32  ;;  %26300 = vst [vmem:[#allocation77_spill] sm:$0xff] %v21646_v37  ;;  %v3845_v11 = vld [vmem:[#allocation2 + $0x18a] sm:$0xff] }
 0x175   :  { %v18222_v21 = vpop.f32.mrf.mxu1  ;;  %18565 = vmatmul.mubr.msk.f32.gmra.mxu1 %vm233_vm0, %v26298_v35  ;;  %18469 = vmatprep.mubr.msk.f32.mxu0 %vm233_vm0, %v21634_v9 }
 0x176   :  { %26297 = vst [vmem:[#allocation76_spill] sm:$0xff] %v21636_v20  ;;  %v21642_v30 = vadd.f32 %v18222_v21, %v18124_v2  ;;  %18567 = vmatprep.mubr.msk.f32.mxu1 %vm233_vm0, %v3844_v27  ;;  %v1097_v53 = vpop.f32.mrf.mxu0  ;;  %v3139_v20 = vld [vmem:[#allocation2 + $0x1c9] sm:$0xff]  ;;  %v3140_v21 = vld [vmem:[#allocation2 + $0x1d1] sm:$0xff] }
 0x177   :  { %v1674_v57 = vpop.f32.mrf.mxu1 }
 0x178   :  { %26299 = vst [vmem:[#allocation12_spill] sm:$0xff] %v21642_v30  ;;  %v21649_v28 = vadd.f32 %v1674_v57, %v1097_v53  ;;  %v18127_v0 = vpop.f32.mrf.mxu0  ;;  %18470 = vmatmul.mubr.msk.f32.gmra.mxu0 %vm233_vm0, %v21646_v37  ;;  %v21659_v30 = vld [vmem:[#allocation2 + $0x1e1] sm:$0xff]  ;;  %v26305_v37 = vld [vmem:[#allocation14_spill] sm:$0xff] }
 0x179   :  { %v18225_v32 = vpop.f32.mrf.mxu1  ;;  %18568 = vmatmul.mubr.msk.f32.gmra.mxu1 %vm233_vm0, %v3845_v11  ;;  %18472 = vmatprep.mubr.msk.f32.mxu0 %vm233_vm0, %v3139_v20  ;;  %26303 = vst [vmem:[#allocation80_spill] sm:$0xff] %v21659_v30  ;;  %v21669_v20 = vld [vmem:[#allocation2 + $0x1e9] sm:$0xff] }
 0x17a   :  { %26301 = vst [vmem:[#allocation78_spill] sm:$0xff] %v21649_v28  ;;  %v21654_v2 = vadd.f32 %v18225_v32, %v18127_v0  ;;  %18570 = vmatprep.mubr.msk.f32.mxu1 %vm233_vm0, %v21155_v48  ;;  %v1107_v27 = vpop.f32.mrf.mxu0  ;;  %v26306_v0 = vld [vmem:[#allocation13_spill] sm:$0xff]  ;;  %26307 = vst [vmem:[#allocation14_spill] sm:$0xff] %v21669_v20 }
 0x17b   :  { %v1684_v35 = vpop.f32.mrf.mxu1 }
 0x17c   :  { %26302 = vst [vmem:[#allocation79_spill] sm:$0xff] %v21654_v2  ;;  %v21661_v53 = vadd.f32 %v1684_v35, %v1107_v27  ;;  %v18230_v57 = vpop.f32.mrf.mxu0  ;;  %18473 = vmatmul.mubr.msk.f32.gmra.mxu0 %vm233_vm0, %v3140_v21  ;;  %v21673_v27 = vld [vmem:[#allocation2 + $0x1f9] sm:$0xff] }
 0x17d   :  { %v18328_v28 = vpop.f32.mrf.mxu1  ;;  %18571 = vmatmul.mubr.msk.f32.gmra.mxu1 %vm233_vm0, %v26305_v37  ;;  %v2337_v32 = vadd.f32 %v18230_v57, %v26306_v0  ;;  %18475 = vmatprep.mubr.msk.f32.mxu0 %vm233_vm0, %v21659_v30  ;;  %v26308_v35 = vld [vmem:[#allocation15_spill] sm:$0xff]  ;;  %v26310_v57 = vld [vmem:[#allocation16_spill] sm:$0xff] }
 0x17e   :  { %26304 = vst [vmem:[#allocation81_spill] sm:$0xff] %v21661_v53  ;;  %18573 = vmatprep.mubr.msk.f32.mxu1 %vm233_vm0, %v21170_v3  ;;  %v2017_v48 = vpop.f32.mrf.mxu0  ;;  %v21687_v3 = vld [vmem:[#allocation2 + $0x201] sm:$0xff] }
 0x17f   :  { %v2724_v11 = vpop.f32.mrf.mxu1  ;;  %v2336_v21 = vadd.f32 %v2017_v48, %v26308_v35  ;;  %v21676_v53 = vadd.f32 %v18328_v28, %v2337_v32  ;;  %26311 = vst [vmem:[#allocation15_spill] sm:$0xff] %v21687_v3  ;;  %v21691_v48 = vld [vmem:[#allocation2 + $0x211] sm:$0xff] }
 0x180   :  { %v18233_v2 = vpop.f32.mrf.mxu0  ;;  %18476 = vmatmul.mubr.msk.f32.gmra.mxu0 %vm233_vm0, %v21669_v20  ;;  %v26312_v35 = vld [vmem:[#allocation17_spill] sm:$0xff] }
 0x181   :  { %26309 = vst [vmem:[#allocation13_spill] sm:$0xff] %v21676_v53  ;;  %v18331_v37 = vpop.f32.mrf.mxu1  ;;  %18574 = vmatmul.mubr.msk.f32.gmra.mxu1 %vm233_vm0, %v21180_v45  ;;  %v2339_v0 = vadd.f32 %v18233_v2, %v26310_v57  ;;  %v21683_v30 = vadd.f32 %v2724_v11, %v2336_v21  ;;  %18478 = vmatprep.mubr.msk.f32.mxu0 %vm233_vm0, %v21673_v27  ;;  %v26314_v11 = vld [vmem:[#allocation18_spill] sm:$0xff] }
 0x182   :  { %18576 = vmatprep.mubr.msk.f32.mxu1 %vm233_vm0, %v21184_v5  ;;  %v2027_v28 = vpop.f32.mrf.mxu0  ;;  %v21705_v5 = vld [vmem:[#allocation2 + $0x219] sm:$0xff] }
 0x183   :  { %v2734_v32 = vpop.f32.mrf.mxu1  ;;  %v2338_v53 = vadd.f32 %v2027_v28, %v26312_v35  ;;  %v21694_v20 = vadd.f32 %v18331_v37, %v2339_v0  ;;  %26315 = vst [vmem:[#allocation17_spill] sm:$0xff] %v21705_v5  ;;  %v21709_v28 = vld [vmem:[#allocation2 + $0x229] sm:$0xff]  ;;  %v26316_v35 = vld [vmem:[#allocation19_spill] sm:$0xff] }
 0x184   :  { %v18236_v45 = vpop.f32.mrf.mxu0  ;;  %18479 = vmatmul.mubr.msk.f32.gmra.mxu0 %vm233_vm0, %v21687_v3 }
 0x185   :  { %26313 = vst [vmem:[#allocation16_spill] sm:$0xff] %v21694_v20  ;;  %v18334_v2 = vpop.f32.mrf.mxu1  ;;  %18577 = vmatmul.mubr.msk.f32.gmra.mxu1 %vm233_vm0, %v21196_v23  ;;  %v2341_v21 = vadd.f32 %v18236_v45, %v26314_v11  ;;  %v21701_v57 = vadd.f32 %v2734_v32, %v2338_v53  ;;  %18481 = vmatprep.mubr.msk.f32.mxu0 %vm233_vm0, %v21691_v48  ;;  %v26318_v32 = vld [vmem:[#allocation20_spill] sm:$0xff] }
 0x186   :  { %18579 = vmatprep.mubr.msk.f32.mxu1 %vm233_vm0, %v21200_v13  ;;  %v2037_v37 = vpop.f32.mrf.mxu0  ;;  %v21723_v13 = vld [vmem:[#allocation2 + $0x231] sm:$0xff] }
 0x187   :  { %v2744_v0 = vpop.f32.mrf.mxu1  ;;  %v2340_v20 = vadd.f32 %v2037_v37, %v26316_v35  ;;  %v21712_v3 = vadd.f32 %v18334_v2, %v2341_v21  ;;  %26319 = vst [vmem:[#allocation19_spill] sm:$0xff] %v21723_v13  ;;  %v21727_v37 = vld [vmem:[#allocation2 + $0x241] sm:$0xff]  ;;  %v26320_v35 = vld [vmem:[#allocation21_spill] sm:$0xff] }
 0x188   :  { %v18239_v23 = vpop.f32.mrf.mxu0  ;;  %18482 = vmatmul.mubr.msk.f32.gmra.mxu0 %vm233_vm0, %v21705_v5 }
 0x189   :  { %26317 = vst [vmem:[#allocation18_spill] sm:$0xff] %v21712_v3  ;;  %v18337_v53 = vpop.f32.mrf.mxu1  ;;  %18580 = vmatmul.mubr.msk.f32.gmra.mxu1 %vm233_vm0, %v21212_v31  ;;  %v2343_v45 = vadd.f32 %v18239_v23, %v26318_v32  ;;  %v21719_v11 = vadd.f32 %v2744_v0, %v2340_v20  ;;  %18484 = vmatprep.mubr.msk.f32.mxu0 %vm233_vm0, %v21709_v28  ;;  %v26322_v0 = vld [vmem:[#allocation22_spill] sm:$0xff] }
 0x18a   :  { %18582 = vmatprep.mubr.msk.f32.mxu1 %vm233_vm0, %v21216_v7  ;;  %v2047_v2 = vpop.f32.mrf.mxu0  ;;  %v21741_v7 = vld [vmem:[#allocation2 + $0x249] sm:$0xff] }
 0x18b   :  { %v2754_v21 = vpop.f32.mrf.mxu1  ;;  %v2342_v3 = vadd.f32 %v2047_v2, %v26320_v35  ;;  %v21730_v5 = vadd.f32 %v18337_v53, %v2343_v45  ;;  %26323 = vst [vmem:[#allocation21_spill] sm:$0xff] %v21741_v7  ;;  %v21745_v2 = vld [vmem:[#allocation2 + $0x259] sm:$0xff] }
 0x18c   :  { %v18242_v31 = vpop.f32.mrf.mxu0  ;;  %18485 = vmatmul.mubr.msk.f32.gmra.mxu0 %vm233_vm0, %v21723_v13  ;;  %v26324_v35 = vld [vmem:[#allocation23_spill] sm:$0xff] }
 0x18d   :  { %26321 = vst [vmem:[#allocation20_spill] sm:$0xff] %v21730_v5  ;;  %v18340_v20 = vpop.f32.mrf.mxu1  ;;  %18583 = vmatmul.mubr.msk.f32.gmra.mxu1 %vm233_vm0, %v21228_v41  ;;  %v2345_v23 = vadd.f32 %v18242_v31, %v26322_v0  ;;  %v21737_v32 = vadd.f32 %v2754_v21, %v2342_v3  ;;  %18487 = vmatprep.mubr.msk.f32.mxu0 %vm233_vm0, %v21727_v37  ;;  %v26326_v21 = vld [vmem:[#allocation24_spill] sm:$0xff] }
 0x18e   :  { %18585 = vmatprep.mubr.msk.f32.mxu1 %vm233_vm0, %v21232_v14  ;;  %v2057_v53 = vpop.f32.mrf.mxu0  ;;  %v21759_v14 = vld [vmem:[#allocation2 + $0x261] sm:$0xff] }
 0x18f   :  { %v2764_v45 = vpop.f32.mrf.mxu1  ;;  %v2344_v5 = vadd.f32 %v2057_v53, %v26324_v35  ;;  %v21748_v13 = vadd.f32 %v18340_v20, %v2345_v23  ;;  %26327 = vst [vmem:[#allocation23_spill] sm:$0xff] %v21759_v14  ;;  %v21763_v53 = vld [vmem:[#allocation2 + $0x271] sm:$0xff] }
 0x190   :  { %v18245_v41 = vpop.f32.mrf.mxu0  ;;  %18488 = vmatmul.mubr.msk.f32.gmra.mxu0 %vm233_vm0, %v21741_v7  ;;  %v26328_v35 = vld [vmem:[#allocation25_spill] sm:$0xff] }
 0x191   :  { %26325 = vst [vmem:[#allocation22_spill] sm:$0xff] %v21748_v13  ;;  %v18343_v3 = vpop.f32.mrf.mxu1  ;;  %18586 = vmatmul.mubr.msk.f32.gmra.mxu1 %vm233_vm0, %v21244_v51  ;;  %v2347_v31 = vadd.f32 %v18245_v41, %v26326_v21  ;;  %v21755_v0 = vadd.f32 %v2764_v45, %v2344_v5  ;;  %18490 = vmatprep.mubr.msk.f32.mxu0 %vm233_vm0, %v21745_v2  ;;  %v26330_v45 = vld [vmem:[#allocation26_spill] sm:$0xff] }
 0x192   :  { %18588 = vmatprep.mubr.msk.f32.mxu1 %vm233_vm0, %v21248_v63  ;;  %v2067_v20 = vpop.f32.mrf.mxu0  ;;  %v21777_v63 = vld [vmem:[#allocation2 + $0x279] sm:$0xff] }
 0x193   :  { %v2774_v23 = vpop.f32.mrf.mxu1  ;;  %v2346_v13 = vadd.f32 %v2067_v20, %v26328_v35  ;;  %v21766_v7 = vadd.f32 %v18343_v3, %v2347_v31  ;;  %26331 = vst [vmem:[#allocation25_spill] sm:$0xff] %v21777_v63  ;;  %v21781_v20 = vld [vmem:[#allocation2 + $0x289] sm:$0xff]  ;;  %v26333_v35 = vld [vmem:[#allocation27_spill] sm:$0xff] }
 0x194   :  { %v18248_v51 = vpop.f32.mrf.mxu0  ;;  %18491 = vmatmul.mubr.msk.f32.gmra.mxu0 %vm233_vm0, %v21759_v14  ;;  %26332 = vst [vmem:[#allocation26_spill] sm:$0xff] %v21781_v20 }
 0x195   :  { %26329 = vst [vmem:[#allocation24_spill] sm:$0xff] %v21766_v7  ;;  %v18346_v5 = vpop.f32.mrf.mxu1  ;;  %18589 = vmatmul.mubr.msk.f32.gmra.mxu1 %vm233_vm0, %v21260_v1  ;;  %v2349_v41 = vadd.f32 %v18248_v51, %v26330_v45  ;;  %v21773_v21 = vadd.f32 %v2774_v23, %v2346_v13  ;;  %18493 = vmatprep.mubr.msk.f32.mxu0 %vm233_vm0, %v21763_v53  ;;  %v26335_v23 = vld [vmem:[#allocation28_spill] sm:$0xff] }
 0x196   :  { %18591 = vmatprep.mubr.msk.f32.mxu1 %vm233_vm0, %v21264_v19  ;;  %v2077_v3 = vpop.f32.mrf.mxu0  ;;  %v21795_v19 = vld [vmem:[#allocation2 + $0x291] sm:$0xff] }
 0x197   :  { %v2784_v31 = vpop.f32.mrf.mxu1  ;;  %v2348_v7 = vadd.f32 %v2077_v3, %v26333_v35  ;;  %v21784_v14 = vadd.f32 %v18346_v5, %v2349_v41  ;;  %26337 = vst [vmem:[#allocation82_spill] sm:$0xff] %v21795_v19  ;;  %v21799_v3 = vld [vmem:[#allocation2 + $0x2a1] sm:$0xff]  ;;  %v26339_v35 = vld [vmem:[#allocation29_spill] sm:$0xff] }
 0x198   :  { %v18251_v1 = vpop.f32.mrf.mxu0  ;;  %18494 = vmatmul.mubr.msk.f32.gmra.mxu0 %vm233_vm0, %v21777_v63  ;;  %26338 = vst [vmem:[#allocation83_spill] sm:$0xff] %v21799_v3 }
 0x199   :  { %26334 = vst [vmem:[#allocation27_spill] sm:$0xff] %v21784_v14  ;;  %v18349_v13 = vpop.f32.mrf.mxu1  ;;  %18592 = vmatmul.mubr.msk.f32.gmra.mxu1 %vm233_vm0, %v21276_v12  ;;  %v2351_v51 = vadd.f32 %v18251_v1, %v26335_v23  ;;  %v21791_v45 = vadd.f32 %v2784_v31, %v2348_v7  ;;  %18496 = vmatprep.mubr.msk.f32.mxu0 %vm233_vm0, %v21781_v20  ;;  %v26341_v31 = vld [vmem:[#allocation31_spill] sm:$0xff]  ;;  %v26342_v1 = vld [vmem:[#allocation30_spill] sm:$0xff] }
 0x19a   :  { %18594 = vmatprep.mubr.msk.f32.mxu1 %vm233_vm0, %v21280_v26  ;;  %v2087_v5 = vpop.f32.mrf.mxu0  ;;  %v21813_v26 = vld [vmem:[#allocation2 + $0x2a9] sm:$0xff] }
 0x19b   :  { %26336 = vst [vmem:[#allocation28_spill] sm:$0xff] %v21791_v45  ;;  %v2794_v41 = vpop.f32.mrf.mxu1  ;;  %v2350_v14 = vadd.f32 %v2087_v5, %v26339_v35  ;;  %v21802_v63 = vadd.f32 %v18349_v13, %v2351_v51  ;;  %26344 = vst [vmem:[#allocation30_spill] sm:$0xff] %v21813_v26  ;;  %v26345_v5 = vld [vmem:[#allocation32_spill] sm:$0xff]  ;;  %v21817_v35 = vld [vmem:[#allocation2 + $0x2b9] sm:$0xff] }
 0x19c   :  { %v18254_v12 = vpop.f32.mrf.mxu0  ;;  %18497 = vmatmul.mubr.msk.f32.gmra.mxu0 %vm233_vm0, %v21795_v19 }
 0x19d   :  { %26340 = vst [vmem:[#allocation29_spill] sm:$0xff] %v21802_v63  ;;  %v18352_v7 = vpop.f32.mrf.mxu1  ;;  %18595 = vmatmul.mubr.msk.f32.gmra.mxu1 %vm233_vm0, %v26341_v31  ;;  %v2353_v23 = vadd.f32 %v18254_v12, %v26342_v1  ;;  %v21809_v45 = vadd.f32 %v2794_v41, %v2350_v14  ;;  %18499 = vmatprep.mubr.msk.f32.mxu0 %vm233_vm0, %v21799_v3  ;;  %v26346_v63 = vld [vmem:[#allocation33_spill] sm:$0xff]  ;;  %v26348_v41 = vld [vmem:[#allocation35_spill] sm:$0xff]  ;;  %v26349_v12 = vld [vmem:[#allocation34_spill] sm:$0xff] }
 0x19e   :  { %18597 = vmatprep.mubr.msk.f32.mxu1 %vm233_vm0, %v26345_v5  ;;  %v2097_v13 = vpop.f32.mrf.mxu0  ;;  %v21831_v5 = vld [vmem:[#allocation2 + $0x2c1] sm:$0xff] }
 0x19f   :  { %26343 = vst [vmem:[#allocation31_spill] sm:$0xff] %v21809_v45  ;;  %v2804_v51 = vpop.f32.mrf.mxu1  ;;  %v2352_v19 = vadd.f32 %v2097_v13, %v26346_v63  ;;  %v21820_v20 = vadd.f32 %v18352_v7, %v2353_v23  ;;  %26351 = vst [vmem:[#allocation35_spill] sm:$0xff] %v21831_v5  ;;  %v26352_v63 = vld [vmem:[#allocation7_spill] sm:$0xff]  ;;  %v21835_v13 = vld [vmem:[#allocation2 + $0x2d1] sm:$0xff] }
 0x1a0   :  { %v18257_v31 = vpop.f32.mrf.mxu0  ;;  %18500 = vmatmul.mubr.msk.f32.gmra.mxu0 %vm233_vm0, %v21813_v26 }
 0x1a1   :  { %26347 = vst [vmem:[#allocation32_spill] sm:$0xff] %v21820_v20  ;;  %v18355_v14 = vpop.f32.mrf.mxu1  ;;  %18598 = vmatmul.mubr.msk.f32.gmra.mxu1 %vm233_vm0, %v26348_v41  ;;  %v2355_v1 = vadd.f32 %v18257_v31, %v26349_v12  ;;  %v21827_v45 = vadd.f32 %v2804_v51, %v2352_v19  ;;  %18502 = vmatprep.mubr.msk.f32.mxu0 %vm233_vm0, %v21817_v35  ;;  %v26353_v20 = vld [vmem:[#allocation36_spill] sm:$0xff]  ;;  %v26355_v51 = vld [vmem:[#allocation37_spill] sm:$0xff] }
 0x1a2   :  { %18600 = vmatprep.mubr.msk.f32.mxu1 %vm233_vm0, %v26352_v63  ;;  %v2107_v7 = vpop.f32.mrf.mxu0  ;;  %v26356_v31 = vld [vmem:[#allocation8_spill] sm:$0xff]  ;;  %v21849_v63 = vld [vmem:[#allocation2 + $0x2d9] sm:$0xff] }
 0x1a3   :  { %26350 = vst [vmem:[#allocation33_spill] sm:$0xff] %v21827_v45  ;;  %v2814_v23 = vpop.f32.mrf.mxu1  ;;  %v2354_v26 = vadd.f32 %v2107_v7, %v26353_v20  ;;  %v21838_v3 = vadd.f32 %v18355_v14, %v2355_v1  ;;  %26357 = vst [vmem:[#allocation7_spill] sm:$0xff] %v21849_v63  ;;  %v21853_v1 = vld [vmem:[#allocation2 + $0x2e9] sm:$0xff] }
 0x1a4   :  { %v18260_v41 = vpop.f32.mrf.mxu0  ;;  %18503 = vmatmul.mubr.msk.f32.gmra.mxu0 %vm233_vm0, %v21831_v5  ;;  %v26358_v7 = vld [vmem:[#allocation9_spill] sm:$0xff] }
 0x1a5   :  { %26354 = vst [vmem:[#allocation34_spill] sm:$0xff] %v21838_v3  ;;  %v18358_v19 = vpop.f32.mrf.mxu1  ;;  %18601 = vmatmul.mubr.msk.f32.gmra.mxu1 %vm233_vm0, %v26355_v51  ;;  %v2357_v12 = vadd.f32 %v18260_v41, %v26356_v31  ;;  %v21845_v45 = vadd.f32 %v2814_v23, %v2354_v26  ;;  %18505 = vmatprep.mubr.msk.f32.mxu0 %vm233_vm0, %v21835_v13  ;;  %v26360_v23 = vld [vmem:[#allocation10_spill] sm:$0xff] }
 0x1a6   :  { %18603 = vmatprep.mubr.msk.f32.mxu1 %vm233_vm0, %v21328_v42  ;;  %v2117_v20 = vpop.f32.mrf.mxu0  ;;  %v21867_v42 = vld [vmem:[#allocation2 + $0x2f1] sm:$0xff] }
 0x1a7   :  { %v2824_v14 = vpop.f32.mrf.mxu1  ;;  %v2356_v3 = vadd.f32 %v2117_v20, %v26358_v7  ;;  %v21856_v5 = vadd.f32 %v18358_v19, %v2357_v12  ;;  %26362 = vst [vmem:[#allocation8_spill] sm:$0xff] %v21867_v42  ;;  %v21871_v20 = vld [vmem:[#allocation2 + $0x301] sm:$0xff] }
 0x1a8   :  { %v18263_v51 = vpop.f32.mrf.mxu0  ;;  %18506 = vmatmul.mubr.msk.f32.gmra.mxu0 %vm233_vm0, %v21849_v63  ;;  %v26363_v7 = vld [vmem:[#allocation11_spill] sm:$0xff] }
 0x1a9   :  { %26359 = vst [vmem:[#allocation36_spill] sm:$0xff] %v21856_v5  ;;  %v18361_v26 = vpop.f32.mrf.mxu1  ;;  %18604 = vmatmul.mubr.msk.f32.gmra.mxu1 %vm233_vm0, %v21340_v43  ;;  %v2359_v41 = vadd.f32 %v18263_v51, %v26360_v23  ;;  %v21863_v31 = vadd.f32 %v2824_v14, %v2356_v3  ;;  %18508 = vmatprep.mubr.msk.f32.mxu0 %vm233_vm0, %v21853_v1  ;;  %v26365_v14 = vld [vmem:[#allocation39_spill] sm:$0xff]  ;;  %v26366_v51 = vld [vmem:[#allocation38_spill] sm:$0xff] }
 0x1aa   :  { %18606 = vmatprep.mubr.msk.f32.mxu1 %vm233_vm0, %v21344_v25  ;;  %v2127_v19 = vpop.f32.mrf.mxu0  ;;  %v21885_v25 = vld [vmem:[#allocation2 + $0x309] sm:$0xff] }
 0x1ab   :  { %26361 = vst [vmem:[#allocation37_spill] sm:$0xff] %v21863_v31  ;;  %v2834_v12 = vpop.f32.mrf.mxu1  ;;  %v2358_v5 = vadd.f32 %v2127_v19, %v26363_v7  ;;  %v21874_v63 = vadd.f32 %v18361_v26, %v2359_v41  ;;  %26368 = vst [vmem:[#allocation11_spill] sm:$0xff] %v21885_v25  ;;  %v21889_v19 = vld [vmem:[#allocation2 + $0x319] sm:$0xff]  ;;  %v26369_v7 = vld [vmem:[#allocation40_spill] sm:$0xff] }
 0x1ac   :  { %v18266_v43 = vpop.f32.mrf.mxu0  ;;  %18509 = vmatmul.mubr.msk.f32.gmra.mxu0 %vm233_vm0, %v21867_v42 }
 0x1ad   :  { %26364 = vst [vmem:[#allocation9_spill] sm:$0xff] %v21874_v63  ;;  %v18364_v3 = vpop.f32.mrf.mxu1  ;;  %18607 = vmatmul.mubr.msk.f32.gmra.mxu1 %vm233_vm0, %v26365_v14  ;;  %v2361_v23 = vadd.f32 %v18266_v43, %v26366_v51  ;;  %v21881_v31 = vadd.f32 %v2834_v12, %v2358_v5  ;;  %18511 = vmatprep.mubr.msk.f32.mxu0 %vm233_vm0, %v21871_v20  ;;  %v26371_v12 = vld [vmem:[#allocation42_spill] sm:$0xff]  ;;  %v26372_v43 = vld [vmem:[#allocation41_spill] sm:$0xff] }
 0x1ae   :  { %18609 = vmatprep.mubr.msk.f32.mxu1 %vm233_vm0, %v21360_v40  ;;  %v2137_v26 = vpop.f32.mrf.mxu0  ;;  %v21903_v40 = vld [vmem:[#allocation2 + $0x321] sm:$0xff] }
 0x1af   :  { %26367 = vst [vmem:[#allocation10_spill] sm:$0xff] %v21881_v31  ;;  %v2844_v41 = vpop.f32.mrf.mxu1  ;;  %v2360_v63 = vadd.f32 %v2137_v26, %v26369_v7  ;;  %v21892_v42 = vadd.f32 %v18364_v3, %v2361_v23  ;;  %26374 = vst [vmem:[#allocation40_spill] sm:$0xff] %v21903_v40  ;;  %v21907_v26 = vld [vmem:[#allocation2 + $0x331] sm:$0xff] }
 0x1b0   :  { %v18269_v14 = vpop.f32.mrf.mxu0  ;;  %18512 = vmatmul.mubr.msk.f32.gmra.mxu0 %vm233_vm0, %v21885_v25  ;;  %v3876_v7 = vld [vmem:[#allocation2 + $0x332] sm:$0xff] }
 0x1b1   :  { %26370 = vst [vmem:[#allocation39_spill] sm:$0xff] %v21892_v42  ;;  %v18367_v5 = vpop.f32.mrf.mxu1  ;;  %18610 = vmatmul.mubr.msk.f32.gmra.mxu1 %vm233_vm0, %v26371_v12  ;;  %v2363_v51 = vadd.f32 %v18269_v14, %v26372_v43  ;;  %v21899_v31 = vadd.f32 %v2844_v41, %v2360_v63  ;;  %18514 = vmatprep.mubr.msk.f32.mxu0 %vm233_vm0, %v21889_v19  ;;  %v26375_v42 = vld [vmem:[#allocation43_spill] sm:$0xff] }
 0x1b2   :  { %18612 = vmatprep.mubr.msk.f32.mxu1 %vm233_vm0, %v21376_v15  ;;  %v2147_v3 = vpop.f32.mrf.mxu0  ;;  %v21921_v43 = vld [vmem:[#allocation2 + $0x339] sm:$0xff] }
 0x1b3   :  { %26373 = vst [vmem:[#allocation38_spill] sm:$0xff] %v21899_v31  ;;  %v2854_v23 = vpop.f32.mrf.mxu1  ;;  %v2362_v25 = vadd.f32 %v2147_v3, %v26375_v42  ;;  %v21910_v12 = vadd.f32 %v18367_v5, %v2363_v51  ;;  %v3877_v42 = vld [vmem:[#allocation2 + $0x33a] sm:$0xff]  ;;  %v4522_v3 = vld [vmem:[#allocation2 + $0x30] sm:$0xff] }
 0x1b4   :  { %v18272_v14 = vpop.f32.mrf.mxu0  ;;  %18515 = vmatmul.mubr.msk.f32.gmra.mxu0 %vm233_vm0, %v21903_v40 }
 0x1b5   :  { %26376 = vst [vmem:[#allocation42_spill] sm:$0xff] %v21910_v12  ;;  %v18370_v63 = vpop.f32.mrf.mxu1  ;;  %18613 = vmatmul.mubr.msk.f32.gmra.mxu1 %vm233_vm0, %v21388_v16  ;;  %v2365_v41 = vadd.f32 %v18272_v14, %v21384_v38  ;;  %v21917_v15 = vadd.f32 %v2854_v23, %v2362_v25  ;;  %18517 = vmatprep.mubr.msk.f32.mxu0 %vm233_vm0, %v21907_v26  ;;  %v26377_v12 = vld [vmem:[#allocation44_spill] sm:$0xff] }
 0x1b6   :  { %18615 = vmatprep.mubr.msk.f32.mxu1 %vm233_vm0, %v3876_v7  ;;  %v2157_v5 = vpop.f32.mrf.mxu0  ;;  %v4523_v7 = vld [vmem:[#allocation2 + $0x38] sm:$0xff] }
 0x1b7   :  { %v2864_v51 = vpop.f32.mrf.mxu1  ;;  %v2364_v40 = vadd.f32 %v2157_v5, %v26377_v12  ;;  %v21925_v31 = vadd.f32 %v18370_v63, %v2365_v41  ;;  %v4524_v63 = vld [vmem:[#allocation2 + $0x48] sm:$0xff] }
 0x1b8   :  { %v18275_v16 = vpop.f32.mrf.mxu0  ;;  %18518 = vmatmul.mubr.msk.f32.gmra.mxu0 %vm233_vm0, %v21921_v43 }
 0x1b9   :  { %26378 = vst [vmem:[#allocation41_spill] sm:$0xff] %v21925_v31  ;;  %v18373_v38 = vpop.f32.mrf.mxu1  ;;  %18616 = vmatmul.mubr.msk.f32.gmra.mxu1 %vm233_vm0, %v3877_v42  ;;  %v2367_v25 = vadd.f32 %v18275_v16, %v21396_v6  ;;  %v21931_v23 = vadd.f32 %v2864_v51, %v2364_v40  ;;  %18620 = vmatprep.mubr.msk.f32.mxu0 %vm233_vm0, %v4522_v3  ;;  %v26379_v6 = vld [vmem:[#allocation46_spill] sm:$0xff]  ;;  %v26380_v3 = vld [vmem:[#allocation45_spill] sm:$0xff] }
 0x1ba   :  { %18718 = vmatprep.mubr.msk.f32.mxu1 %vm233_vm0, %v21404_v8  ;;  %v2167_v12 = vpop.f32.mrf.mxu0  ;;  %v4525_v8 = vld [vmem:[#allocation2 + $0x50] sm:$0xff] }
 0x1bb   :  { %v2874_v14 = vpop.f32.mrf.mxu1  ;;  %v2366_v41 = vadd.f32 %v2167_v12, %v21406_v47  ;;  %v21937_v5 = vadd.f32 %v18373_v38, %v2367_v25  ;;  %v4526_v38 = vld [vmem:[#allocation2 + $0x60] sm:$0xff] }
 0x1bc   :  { %v18278_v31 = vpop.f32.mrf.mxu0  ;;  %18621 = vmatmul.mubr.msk.f32.vlgmr.msra.gmra.mxu0 %vm233_vm0, %v4523_v7  ;;  %v26381_v25 = vld [vmem:[#allocation47_spill] sm:$0xff] }
 0x1bd   :  { %v18376_v42 = vpop.f32.mrf.mxu1  ;;  %18719 = vmatmul.mubr.msk.f32.vlgmr.msra.gmra.mxu1 %vm233_vm0, %v21421_v55  ;;  %v2369_v40 = vadd.f32 %v18278_v31, %v26379_v6  ;;  %v21943_v51 = vadd.f32 %v2874_v14, %v2366_v41  ;;  %18815 = vmatpush3.msra.mxu0 %v26380_v3  ;;  %v26382_v14 = vld [vmem:[#allocation48_spill] sm:$0xff]  ;;  %v26383_v3 = vld [vmem:[#allocation49_spill] sm:$0xff] }
 0x1be   :  { %18623 = vmatprep.mubr.msk.f32.mxu0 %vm233_vm0, %v4524_v63  ;;  %v2177_v16 = vpop.f32.mrf.mxu0  ;;  %18721 = vmatprep.mubr.msk.f32.mxu1 %vm233_vm0, %v21425_v17  ;;  %v4527_v6 = vld [vmem:[#allocation2 + $0x68] sm:$0xff] }
 0x1bf   :  { %v2884_v47 = vpop.f32.mrf.mxu1  ;;  %v2368_v7 = vadd.f32 %v2177_v16, %v26381_v25  ;;  %v21950_v12 = vadd.f32 %v18376_v42, %v2369_v40  ;;  %v4528_v40 = vld [vmem:[#allocation2 + $0x78] sm:$0xff] }
 0x1c0   :  { %v18281_v55 = vpop.f32.mrf.mxu0  ;;  %18624 = vmatmul.mubr.msk.f32.gmra.mxu0 %vm233_vm0, %v4525_v8 }
 0x1c1   :  { %v18379_v31 = vpop.f32.mrf.mxu1  ;;  %18722 = vmatmul.mubr.msk.f32.gmra.mxu1 %vm233_vm0, %v21438_v49  ;;  %v2371_v63 = vadd.f32 %v18281_v55, %v26382_v14  ;;  %v21956_v41 = vadd.f32 %v2884_v47, %v2368_v7  ;;  %18626 = vmatprep.mubr.msk.f32.mxu0 %vm233_vm0, %v4526_v38  ;;  %v26384_v47 = vld [vmem:[#allocation50_spill] sm:$0xff]  ;;  %v4530_v14 = vld [vmem:[#allocation2 + $0x90] sm:$0xff] }
 0x1c2   :  { %18724 = vmatprep.mubr.msk.f32.mxu1 %vm233_vm0, %v21442_v18  ;;  %v2187_v17 = vpop.f32.mrf.mxu0  ;;  %v4529_v18 = vld [vmem:[#allocation2 + $0x80] sm:$0xff] }
 0x1c3   :  { %v2894_v42 = vpop.f32.mrf.mxu1  ;;  %v2370_v16 = vadd.f32 %v2187_v17, %v26383_v3  ;;  %v21962_v8 = vadd.f32 %v18379_v31, %v2371_v63  ;;  %v26385_v63 = vld [vmem:[#allocation51_spill] sm:$0xff] }
 0x1c4   :  { %v18284_v25 = vpop.f32.mrf.mxu0  ;;  %18627 = vmatmul.mubr.msk.f32.gmra.mxu0 %vm233_vm0, %v4527_v6 }
 0x1c5   :  { %v18382_v49 = vpop.f32.mrf.mxu1  ;;  %18725 = vmatmul.mubr.msk.f32.gmra.mxu1 %vm233_vm0, %v21454_v29  ;;  %v2373_v38 = vadd.f32 %v18284_v25, %v26384_v47  ;;  %v21968_v7 = vadd.f32 %v2894_v42, %v2370_v16  ;;  %18629 = vmatprep.mubr.msk.f32.mxu0 %vm233_vm0, %v4528_v40  ;;  %v26386_v42 = vld [vmem:[#allocation52_spill] sm:$0xff] }
 0x1c6   :  { %18727 = vmatprep.mubr.msk.f32.mxu1 %vm233_vm0, %v21458_v33  ;;  %v2197_v55 = vpop.f32.mrf.mxu0  ;;  %v4531_v33 = vld [vmem:[#allocation2 + $0x98] sm:$0xff]  ;;  %v4532_v47 = vld [vmem:[#allocation2 + $0xa8] sm:$0xff] }
 0x1c7   :  { %v2904_v31 = vpop.f32.mrf.mxu1  ;;  %v2372_v17 = vadd.f32 %v2197_v55, %v26385_v63  ;;  %v21974_v6 = vadd.f32 %v18382_v49, %v2373_v38  ;;  %v26387_v38 = vld [vmem:[#allocation53_spill] sm:$0xff] }
 0x1c8   :  { %v18287_v3 = vpop.f32.mrf.mxu0  ;;  %18630 = vmatmul.mubr.msk.f32.gmra.mxu0 %vm233_vm0, %v4529_v18 }
 0x1c9   :  { %v18385_v29 = vpop.f32.mrf.mxu1  ;;  %18728 = vmatmul.mubr.msk.f32.gmra.mxu1 %vm233_vm0, %v21470_v44  ;;  %v2375_v40 = vadd.f32 %v18287_v3, %v26386_v42  ;;  %v21980_v16 = vadd.f32 %v2904_v31, %v2372_v17  ;;  %18632 = vmatprep.mubr.msk.f32.mxu0 %vm233_vm0, %v4530_v14  ;;  %v26388_v31 = vld [vmem:[#allocation54_spill] sm:$0xff]  ;;  %v4534_v42 = vld [vmem:[#allocation2 + $0xc0] sm:$0xff] }
 0x1ca   :  { %18730 = vmatprep.mubr.msk.f32.mxu1 %vm233_vm0, %v21474_v10  ;;  %v2207_v25 = vpop.f32.mrf.mxu0  ;;  %v4533_v10 = vld [vmem:[#allocation2 + $0xb0] sm:$0xff] }
 0x1cb   :  { %v2914_v49 = vpop.f32.mrf.mxu1  ;;  %v2374_v55 = vadd.f32 %v2207_v25, %v26387_v38  ;;  %v21986_v18 = vadd.f32 %v18385_v29, %v2375_v40  ;;  %v26389_v40 = vld [vmem:[#allocation55_spill] sm:$0xff] }
 0x1cc   :  { %v18290_v63 = vpop.f32.mrf.mxu0  ;;  %18633 = vmatmul.mubr.msk.f32.gmra.mxu0 %vm233_vm0, %v4531_v33 }
 0x1cd   :  { %v18388_v44 = vpop.f32.mrf.mxu1  ;;  %18731 = vmatmul.mubr.msk.f32.gmra.mxu1 %vm233_vm0, %v21486_v50  ;;  %v2377_v14 = vadd.f32 %v18290_v63, %v26388_v31  ;;  %v21992_v17 = vadd.f32 %v2914_v49, %v2374_v55  ;;  %18635 = vmatprep.mubr.msk.f32.mxu0 %vm233_vm0, %v4532_v47  ;;  %v26390_v49 = vld [vmem:[#allocation56_spill] sm:$0xff]  ;;  %v4536_v31 = vld [vmem:[#allocation2 + $0xd8] sm:$0xff] }
 0x1ce   :  { %18733 = vmatprep.mubr.msk.f32.mxu1 %vm233_vm0, %v21490_v61  ;;  %v2217_v3 = vpop.f32.mrf.mxu0  ;;  %v4535_v61 = vld [vmem:[#allocation2 + $0xc8] sm:$0xff] }
 0x1cf   :  { %v2924_v29 = vpop.f32.mrf.mxu1  ;;  %v2376_v25 = vadd.f32 %v2217_v3, %v26389_v40  ;;  %v21998_v33 = vadd.f32 %v18388_v44, %v2377_v14  ;;  %v26391_v14 = vld [vmem:[#allocation57_spill] sm:$0xff] }
 0x1d0   :  { %v18293_v38 = vpop.f32.mrf.mxu0  ;;  %18636 = vmatmul.mubr.msk.f32.gmra.mxu0 %vm233_vm0, %v4533_v10 }
 0x1d1   :  { %v18391_v50 = vpop.f32.mrf.mxu1  ;;  %18734 = vmatmul.mubr.msk.f32.gmra.mxu1 %vm233_vm0, %v21502_v54  ;;  %v2379_v47 = vadd.f32 %v18293_v38, %v26390_v49  ;;  %v22004_v55 = vadd.f32 %v2924_v29, %v2376_v25  ;;  %18638 = vmatprep.mubr.msk.f32.mxu0 %vm233_vm0, %v4534_v42  ;;  %v26392_v29 = vld [vmem:[#allocation58_spill] sm:$0xff]  ;;  %v4538_v49 = vld [vmem:[#allocation2 + $0xf0] sm:$0xff] }
 0x1d2   :  { %18736 = vmatprep.mubr.msk.f32.mxu1 %vm233_vm0, %v21506_v36  ;;  %v2227_v63 = vpop.f32.mrf.mxu0  ;;  %v4537_v36 = vld [vmem:[#allocation2 + $0xe0] sm:$0xff] }
 0x1d3   :  { %v2934_v44 = vpop.f32.mrf.mxu1  ;;  %v2378_v3 = vadd.f32 %v2227_v63, %v26391_v14  ;;  %v22010_v10 = vadd.f32 %v18391_v50, %v2379_v47  ;;  %v26393_v47 = vld [vmem:[#allocation59_spill] sm:$0xff] }
 0x1d4   :  { %v18296_v40 = vpop.f32.mrf.mxu0  ;;  %18639 = vmatmul.mubr.msk.f32.gmra.mxu0 %vm233_vm0, %v4535_v61 }
 0x1d5   :  { %v18394_v54 = vpop.f32.mrf.mxu1  ;;  %18737 = vmatmul.mubr.msk.f32.gmra.mxu1 %vm233_vm0, %v21518_v58  ;;  %v2381_v42 = vadd.f32 %v18296_v40, %v26392_v29  ;;  %v22016_v25 = vadd.f32 %v2934_v44, %v2378_v3  ;;  %18641 = vmatprep.mubr.msk.f32.mxu0 %vm233_vm0, %v4536_v31  ;;  %v26394_v44 = vld [vmem:[#allocation60_spill] sm:$0xff] }
 0x1d6   :  { %18739 = vmatprep.mubr.msk.f32.mxu1 %vm233_vm0, %v21522_v24  ;;  %v2237_v38 = vpop.f32.mrf.mxu0  ;;  %v4539_v24 = vld [vmem:[#allocation2 + $0xf8] sm:$0xff]  ;;  %v4540_v29 = vld [vmem:[#allocation2 + $0x108] sm:$0xff] }
 0x1d7   :  { %v2944_v50 = vpop.f32.mrf.mxu1  ;;  %v2380_v63 = vadd.f32 %v2237_v38, %v26393_v47  ;;  %v22022_v61 = vadd.f32 %v18394_v54, %v2381_v42  ;;  %v26395_v42 = vld [vmem:[#allocation61_spill] sm:$0xff] }
 0x1d8   :  { %v18299_v14 = vpop.f32.mrf.mxu0  ;;  %18642 = vmatmul.mubr.msk.f32.gmra.mxu0 %vm233_vm0, %v4537_v36 }
 0x1d9   :  { %v18397_v58 = vpop.f32.mrf.mxu1  ;;  %18740 = vmatmul.mubr.msk.f32.gmra.mxu1 %vm233_vm0, %v21534_v62  ;;  %v2383_v31 = vadd.f32 %v18299_v14, %v26394_v44  ;;  %v22028_v3 = vadd.f32 %v2944_v50, %v2380_v63  ;;  %18644 = vmatprep.mubr.msk.f32.mxu0 %vm233_vm0, %v4538_v49  ;;  %v26396_v50 = vld [vmem:[#allocation62_spill] sm:$0xff]  ;;  %v4542_v44 = vld [vmem:[#allocation2 + $0x120] sm:$0xff] }
 0x1da   :  { %18742 = vmatprep.mubr.msk.f32.mxu1 %vm233_vm0, %v21538_v34  ;;  %v2247_v40 = vpop.f32.mrf.mxu0  ;;  %v4541_v34 = vld [vmem:[#allocation2 + $0x110] sm:$0xff] }
 0x1db   :  { %v2954_v54 = vpop.f32.mrf.mxu1  ;;  %v2382_v38 = vadd.f32 %v2247_v40, %v26395_v42  ;;  %v22034_v36 = vadd.f32 %v18397_v58, %v2383_v31  ;;  %v26397_v31 = vld [vmem:[#allocation63_spill] sm:$0xff] }
 0x1dc   :  { %v18302_v47 = vpop.f32.mrf.mxu0  ;;  %18645 = vmatmul.mubr.msk.f32.gmra.mxu0 %vm233_vm0, %v4539_v24 }
 0x1dd   :  { %v18400_v62 = vpop.f32.mrf.mxu1  ;;  %18743 = vmatmul.mubr.msk.f32.gmra.mxu1 %vm233_vm0, %v21550_v4  ;;  %v2385_v49 = vadd.f32 %v18302_v47, %v26396_v50  ;;  %v22040_v63 = vadd.f32 %v2954_v54, %v2382_v38  ;;  %18647 = vmatprep.mubr.msk.f32.mxu0 %vm233_vm0, %v4540_v29  ;;  %v26398_v54 = vld [vmem:[#allocation64_spill] sm:$0xff]  ;;  %v4544_v50 = vld [vmem:[#allocation2 + $0x138] sm:$0xff] }
 0x1de   :  { %18745 = vmatprep.mubr.msk.f32.mxu1 %vm233_vm0, %v21554_v39  ;;  %v2257_v14 = vpop.f32.mrf.mxu0  ;;  %v4543_v39 = vld [vmem:[#allocation2 + $0x128] sm:$0xff] }
 0x1df   :  { %v2964_v58 = vpop.f32.mrf.mxu1  ;;  %v2384_v40 = vadd.f32 %v2257_v14, %v26397_v31  ;;  %v22046_v24 = vadd.f32 %v18400_v62, %v2385_v49  ;;  %v26399_v49 = vld [vmem:[#allocation65_spill] sm:$0xff] }
 0x1e0   :  { %v18305_v42 = vpop.f32.mrf.mxu0  ;;  %18648 = vmatmul.mubr.msk.f32.gmra.mxu0 %vm233_vm0, %v4541_v34 }
 0x1e1   :  { %v18403_v4 = vpop.f32.mrf.mxu1  ;;  %18746 = vmatmul.mubr.msk.f32.gmra.mxu1 %vm233_vm0, %v21566_v46  ;;  %v2387_v29 = vadd.f32 %v18305_v42, %v26398_v54  ;;  %v22052_v38 = vadd.f32 %v2964_v58, %v2384_v40  ;;  %18650 = vmatprep.mubr.msk.f32.mxu0 %vm233_vm0, %v4542_v44  ;;  %v26400_v58 = vld [vmem:[#allocation66_spill] sm:$0xff]  ;;  %v4546_v54 = vld [vmem:[#allocation2 + $0x150] sm:$0xff] }
 0x1e2   :  { %18748 = vmatprep.mubr.msk.f32.mxu1 %vm233_vm0, %v21570_v52  ;;  %v2267_v47 = vpop.f32.mrf.mxu0  ;;  %v4545_v52 = vld [vmem:[#allocation2 + $0x140] sm:$0xff] }
 0x1e3   :  { %v2974_v62 = vpop.f32.mrf.mxu1  ;;  %v2386_v14 = vadd.f32 %v2267_v47, %v26399_v49  ;;  %v22058_v34 = vadd.f32 %v18403_v4, %v2387_v29  ;;  %v26401_v29 = vld [vmem:[#allocation67_spill] sm:$0xff] }
 0x1e4   :  { %v18308_v31 = vpop.f32.mrf.mxu0  ;;  %18651 = vmatmul.mubr.msk.f32.gmra.mxu0 %vm233_vm0, %v4543_v39 }
 0x1e5   :  { %v18406_v46 = vpop.f32.mrf.mxu1  ;;  %18749 = vmatmul.mubr.msk.f32.gmra.mxu1 %vm233_vm0, %v21582_v22  ;;  %v2389_v44 = vadd.f32 %v18308_v31, %v26400_v58  ;;  %v22064_v40 = vadd.f32 %v2974_v62, %v2386_v14  ;;  %18653 = vmatprep.mubr.msk.f32.mxu0 %vm233_vm0, %v4544_v50  ;;  %v26402_v62 = vld [vmem:[#allocation68_spill] sm:$0xff] }
 0x1e6   :  { %18751 = vmatprep.mubr.msk.f32.mxu1 %vm233_vm0, %v21586_v56  ;;  %v2277_v42 = vpop.f32.mrf.mxu0  ;;  %v4547_v56 = vld [vmem:[#allocation2 + $0x158] sm:$0xff]  ;;  %v4548_v58 = vld [vmem:[#allocation2 + $0x168] sm:$0xff] }
 0x1e7   :  { %v2984_v4 = vpop.f32.mrf.mxu1  ;;  %v2388_v47 = vadd.f32 %v2277_v42, %v26401_v29  ;;  %v22070_v39 = vadd.f32 %v18406_v46, %v2389_v44  ;;  %v26404_v44 = vld [vmem:[#allocation69_spill] sm:$0xff] }
 0x1e8   :  { %v18311_v49 = vpop.f32.mrf.mxu0  ;;  %18654 = vmatmul.mubr.msk.f32.gmra.mxu0 %vm233_vm0, %v4545_v52 }
 0x1e9   :  { %v18409_v22 = vpop.f32.mrf.mxu1  ;;  %18752 = vmatmul.mubr.msk.f32.gmra.mxu1 %vm233_vm0, %v21598_v59  ;;  %v2391_v50 = vadd.f32 %v18311_v49, %v26402_v62  ;;  %v22076_v14 = vadd.f32 %v2984_v4, %v2388_v47  ;;  %18656 = vmatprep.mubr.msk.f32.mxu0 %vm233_vm0, %v4546_v54  ;;  %v26406_v49 = vld [vmem:[#allocation71_spill] sm:$0xff]  ;;  %v26407_v4 = vld [vmem:[#allocation70_spill] sm:$0xff]  ;;  %v26409_v62 = vld [vmem:[#allocation72_spill] sm:$0xff] }
 0x1ea   :  { %18754 = vmatprep.mubr.msk.f32.mxu1 %vm233_vm0, %v21602_v60  ;;  %v2287_v31 = vpop.f32.mrf.mxu0  ;;  %v4549_v60 = vld [vmem:[#allocation2 + $0x170] sm:$0xff] }
 0x1eb   :  { %26403 = vst [vmem:[#allocation43_spill] sm:$0xff] %v22076_v14  ;;  %v2994_v46 = vpop.f32.mrf.mxu1  ;;  %v2390_v42 = vadd.f32 %v2287_v31, %v26404_v44  ;;  %v22082_v52 = vadd.f32 %v18409_v22, %v2391_v50  ;;  %v4550_v50 = vld [vmem:[#allocation2 + $0x180] sm:$0xff]  ;;  %v26410_v44 = vld [vmem:[#allocation73_spill] sm:$0xff] }
 0x1ec   :  { %v18314_v29 = vpop.f32.mrf.mxu0  ;;  %18657 = vmatmul.mubr.msk.f32.gmra.mxu0 %vm233_vm0, %v4547_v56 }
 0x1ed   :  { %26405 = vst [vmem:[#allocation44_spill] sm:$0xff] %v22082_v52  ;;  %v18412_v59 = vpop.f32.mrf.mxu1  ;;  %18755 = vmatmul.mubr.msk.f32.gmra.mxu1 %vm233_vm0, %v26406_v49  ;;  %v2393_v54 = vadd.f32 %v18314_v29, %v26407_v4  ;;  %v22088_v47 = vadd.f32 %v2994_v46, %v2390_v42  ;;  %18659 = vmatprep.mubr.msk.f32.mxu0 %vm233_vm0, %v4548_v58  ;;  %v26412_v29 = vld [vmem:[#allocation75_spill] sm:$0xff]  ;;  %v26413_v46 = vld [vmem:[#allocation74_spill] sm:$0xff]  ;;  %v4551_v4 = vld [vmem:[#allocation2 + $0x188] sm:$0xff] }
 0x1ee   :  { %18757 = vmatprep.mubr.msk.f32.mxu1 %vm233_vm0, %v26409_v62  ;;  %v2297_v31 = vpop.f32.mrf.mxu0 }
 0x1ef   :  { %26408 = vst [vmem:[#allocation46_spill] sm:$0xff] %v22088_v47  ;;  %v3004_v22 = vpop.f32.mrf.mxu1  ;;  %v2392_v52 = vadd.f32 %v2297_v31, %v26410_v44  ;;  %v22094_v56 = vadd.f32 %v18412_v59, %v2393_v54  ;;  %v4552_v54 = vld [vmem:[#allocation2 + $0x198] sm:$0xff]  ;;  %v26415_v44 = vld [vmem:[#allocation76_spill] sm:$0xff] }
 0x1f0   :  { %v18317_v14 = vpop.f32.mrf.mxu0  ;;  %18660 = vmatmul.mubr.msk.f32.gmra.mxu0 %vm233_vm0, %v4549_v60  ;;  %v5259_v31 = vld [vmem:[#allocation2 + $0x199] sm:$0xff] }
 0x1f1   :  { %26411 = vst [vmem:[#allocation45_spill] sm:$0xff] %v22094_v56  ;;  %v18415_v49 = vpop.f32.mrf.mxu1  ;;  %18758 = vmatmul.mubr.msk.f32.gmra.mxu1 %vm233_vm0, %v26412_v29  ;;  %v2395_v58 = vadd.f32 %v18317_v14, %v26413_v46  ;;  %v22100_v42 = vadd.f32 %v3004_v22, %v2392_v52  ;;  %18662 = vmatprep.mubr.msk.f32.mxu0 %vm233_vm0, %v4550_v50  ;;  %v26417_v52 = vld [vmem:[#allocation77_spill] sm:$0xff]  ;;  %v26418_v22 = vld [vmem:[#allocation12_spill] sm:$0xff] }
 0x1f2   :  { %18760 = vmatprep.mubr.msk.f32.mxu1 %vm233_vm0, %v21634_v9  ;;  %v2307_v62 = vpop.f32.mrf.mxu0  ;;  %v4553_v9 = vld [vmem:[#allocation2 + $0x1a0] sm:$0xff] }
 0x1f3   :  { %26414 = vst [vmem:[#allocation47_spill] sm:$0xff] %v22100_v42  ;;  %v3014_v59 = vpop.f32.mrf.mxu1  ;;  %v2394_v60 = vadd.f32 %v2307_v62, %v26415_v44  ;;  %v22106_v56 = vadd.f32 %v18415_v49, %v2395_v58  ;;  %v5260_v46 = vld [vmem:[#allocation2 + $0x1a1] sm:$0xff]  ;;  %v26419_v44 = vld [vmem:[#allocation78_spill] sm:$0xff] }
 0x1f4   :  { %v18320_v47 = vpop.f32.mrf.mxu0  ;;  %18663 = vmatmul.mubr.msk.f32.gmra.mxu0 %vm233_vm0, %v4551_v4  ;;  %v4554_v58 = vld [vmem:[#allocation2 + $0x1e0] sm:$0xff] }
 0x1f5   :  { %26416 = vst [vmem:[#allocation48_spill] sm:$0xff] %v22106_v56  ;;  %v18418_v14 = vpop.f32.mrf.mxu1  ;;  %18761 = vmatmul.mubr.msk.f32.gmra.mxu1 %vm233_vm0, %v26417_v52  ;;  %v2397_v50 = vadd.f32 %v18320_v47, %v26418_v22  ;;  %v22112_v29 = vadd.f32 %v3014_v59, %v2394_v60  ;;  %18665 = vmatprep.mubr.msk.f32.mxu0 %vm233_vm0, %v4552_v54  ;;  %v26421_v47 = vld [vmem:[#allocation79_spill] sm:$0xff]  ;;  %v26422_v60 = vld [vmem:[#allocation80_spill] sm:$0xff] }
 0x1f6   :  { %18763 = vmatprep.mubr.msk.f32.mxu1 %vm233_vm0, %v5259_v31  ;;  %v2317_v62 = vpop.f32.mrf.mxu0  ;;  %v4555_v31 = vld [vmem:[#allocation2 + $0x1e8] sm:$0xff] }
 0x1f7   :  { %v3024_v49 = vpop.f32.mrf.mxu1  ;;  %v2396_v56 = vadd.f32 %v2317_v62, %v26419_v44  ;;  %v22117_v4 = vadd.f32 %v18418_v14, %v2397_v50  ;;  %v4556_v14 = vld [vmem:[#allocation2 + $0x1f8] sm:$0xff]  ;;  %v26423_v50 = vld [vmem:[#allocation81_spill] sm:$0xff] }
 0x1f8   :  { %v18323_v42 = vpop.f32.mrf.mxu0  ;;  %18666 = vmatmul.mubr.msk.f32.gmra.mxu0 %vm233_vm0, %v4553_v9 }
 0x1f9   :  { %26420 = vst [vmem:[#allocation49_spill] sm:$0xff] %v22117_v4  ;;  %v18421_v52 = vpop.f32.mrf.mxu1  ;;  %18764 = vmatmul.mubr.msk.f32.gmra.mxu1 %vm233_vm0, %v5260_v46  ;;  %v2399_v59 = vadd.f32 %v18323_v42, %v26421_v47  ;;  %v22122_v54 = vadd.f32 %v3024_v49, %v2396_v56  ;;  %18668 = vmatprep.mubr.msk.f32.mxu0 %vm233_vm0, %v4554_v58  ;;  %v26424_v42 = vld [vmem:[#allocation14_spill] sm:$0xff]  ;;  %v26425_v49 = vld [vmem:[#allocation13_spill] sm:$0xff]  ;;  %v4557_v47 = vld [vmem:[#allocation2 + $0x200] sm:$0xff] }
 0x1fa   :  { %18766 = vmatprep.mubr.msk.f32.mxu1 %vm233_vm0, %v26422_v60  ;;  %v2327_v22 = vpop.f32.mrf.mxu0 }
 0x1fb   :  { %v3034_v62 = vpop.f32.mrf.mxu1  ;;  %v2398_v44 = vadd.f32 %v2327_v22, %v26423_v50  ;;  %v22128_v4 = vadd.f32 %v18421_v52, %v2399_v59  ;;  %v4558_v59 = vld [vmem:[#allocation2 + $0x210] sm:$0xff] }
 0x1fc   :  { %v18426_v9 = vpop.f32.mrf.mxu0  ;;  %18669 = vmatmul.mubr.msk.f32.gmra.mxu0 %vm233_vm0, %v4555_v31 }
 0x1fd   :  { %v18524_v46 = vpop.f32.mrf.mxu1  ;;  %18767 = vmatmul.mubr.msk.f32.gmra.mxu1 %vm233_vm0, %v26424_v42  ;;  %v22133_v56 = vadd.f32 %v3034_v62, %v2398_v44  ;;  %v3751_v58 = vadd.f32 %v18426_v9, %v26425_v49  ;;  %18671 = vmatprep.mubr.msk.f32.mxu0 %vm233_vm0, %v4556_v14  ;;  %v26426_v44 = vld [vmem:[#allocation15_spill] sm:$0xff]  ;;  %v26427_v9 = vld [vmem:[#allocation16_spill] sm:$0xff] }
 0x1fe   :  { %18769 = vmatprep.mubr.msk.f32.mxu1 %vm233_vm0, %v21673_v27  ;;  %v3431_v60 = vpop.f32.mrf.mxu0  ;;  %v4559_v27 = vld [vmem:[#allocation2 + $0x218] sm:$0xff]  ;;  %v4560_v49 = vld [vmem:[#allocation2 + $0x228] sm:$0xff] }
 0x1ff   :  { %v4138_v52 = vpop.f32.mrf.mxu1  ;;  %v3750_v22 = vadd.f32 %v3431_v60, %v21683_v30  ;;  %v22140_v31 = vadd.f32 %v18524_v46, %v3751_v58 }
 0x200   :  { %v18429_v50 = vpop.f32.mrf.mxu0  ;;  %18672 = vmatmul.mubr.msk.f32.gmra.mxu0 %vm233_vm0, %v4557_v47 }
 0x201   :  { %v18527_v62 = vpop.f32.mrf.mxu1  ;;  %18770 = vmatmul.mubr.msk.f32.gmra.mxu1 %vm233_vm0, %v26426_v44  ;;  %v3753_v14 = vadd.f32 %v18429_v50, %v26427_v9  ;;  %v22146_v42 = vadd.f32 %v4138_v52, %v3750_v22  ;;  %18674 = vmatprep.mubr.msk.f32.mxu0 %vm233_vm0, %v4558_v59  ;;  %v26428_v50 = vld [vmem:[#allocation17_spill] sm:$0xff]  ;;  %v26429_v52 = vld [vmem:[#allocation18_spill] sm:$0xff]  ;;  %v4562_v9 = vld [vmem:[#allocation2 + $0x240] sm:$0xff] }
 0x202   :  { %18772 = vmatprep.mubr.msk.f32.mxu1 %vm233_vm0, %v21691_v48  ;;  %v3441_v30 = vpop.f32.mrf.mxu0  ;;  %v4561_v48 = vld [vmem:[#allocation2 + $0x230] sm:$0xff] }
 0x203   :  { %v4148_v46 = vpop.f32.mrf.mxu1  ;;  %v3752_v58 = vadd.f32 %v3441_v30, %v21701_v57  ;;  %v22152_v47 = vadd.f32 %v18527_v62, %v3753_v14 }
 0x204   :  { %v18432_v60 = vpop.f32.mrf.mxu0  ;;  %18675 = vmatmul.mubr.msk.f32.gmra.mxu0 %vm233_vm0, %v4559_v27 }
 0x205   :  { %v18530_v44 = vpop.f32.mrf.mxu1  ;;  %18773 = vmatmul.mubr.msk.f32.gmra.mxu1 %vm233_vm0, %v26428_v50  ;;  %v3755_v59 = vadd.f32 %v18432_v60, %v26429_v52  ;;  %v22158_v22 = vadd.f32 %v4148_v46, %v3752_v58  ;;  %18677 = vmatprep.mubr.msk.f32.mxu0 %vm233_vm0, %v4560_v49  ;;  %v26430_v60 = vld [vmem:[#allocation19_spill] sm:$0xff]  ;;  %v26431_v46 = vld [vmem:[#allocation20_spill] sm:$0xff] }
 0x206   :  { %18775 = vmatprep.mubr.msk.f32.mxu1 %vm233_vm0, %v21709_v28  ;;  %v3451_v57 = vpop.f32.mrf.mxu0  ;;  %v4563_v28 = vld [vmem:[#allocation2 + $0x248] sm:$0xff] }
 0x207   :  { %v4158_v62 = vpop.f32.mrf.mxu1  ;;  %v3754_v14 = vadd.f32 %v3451_v57, %v21719_v11  ;;  %v22164_v27 = vadd.f32 %v18530_v44, %v3755_v59  ;;  %v16035_v11 = vld [vmem:[%s26166_s5 + $0x78] sm:$0xff] }
 0x208   :  { %v18435_v30 = vpop.f32.mrf.mxu0  ;;  %18678 = vmatmul.mubr.msk.f32.gmra.mxu0 %vm233_vm0, %v4561_v48  ;;  %v4564_v59 = vld [vmem:[#allocation2 + $0x258] sm:$0xff]  ;;  %18912 = vmatprep.subr.mxu1 %v16035_v11 }
 0x209   :  { %v18533_v50 = vpop.f32.mrf.mxu1  ;;  %18776 = vmatmul.mubr.msk.f32.gmra.mxu1 %vm233_vm0, %v26430_v60  ;;  %v3757_v49 = vadd.f32 %v18435_v30, %v26431_v46  ;;  %v22170_v58 = vadd.f32 %v4158_v62, %v3754_v14  ;;  %18680 = vmatprep.mubr.msk.f32.mxu0 %vm233_vm0, %v4562_v9  ;;  %v26432_v14 = vld [vmem:[#allocation21_spill] sm:$0xff]  ;;  %v4565_v46 = vld [vmem:[#allocation2 + $0x260] sm:$0xff] }
 0x20a   :  { %18778 = vmatprep.mubr.msk.f32.mxu1 %vm233_vm0, %v21727_v37  ;;  %v3461_v44 = vpop.f32.mrf.mxu0  ;;  %18913 = vmatpush3.msra.mxu1 %v16035_v11  ;;  %v26433_v37 = vld [vmem:[#allocation22_spill] sm:$0xff] }
 0x20b   :  { %v4168_v52 = vpop.f32.mrf.mxu1  ;;  %v3756_v48 = vadd.f32 %v3461_v44, %v21737_v32  ;;  %v22179_v57 = vadd.f32 %v18533_v50, %v3757_v49  ;;  %v4566_v49 = vld [vmem:[#allocation2 + $0x270] sm:$0xff] }
 0x20c   :  { %v18438_v62 = vpop.f32.mrf.mxu0  ;;  %18681 = vmatmul.mubr.msk.f32.gmra.mxu0 %vm233_vm0, %v4563_v28 }
 0x20d   :  { %v18536_v9 = vpop.f32.mrf.mxu1  ;;  %18779 = vmatmul.mubr.msk.f32.gmra.mxu1 %vm233_vm0, %v26432_v14  ;;  %v3759_v30 = vadd.f32 %v18438_v62, %v26433_v37  ;;  %v22185_v60 = vadd.f32 %v4168_v52, %v3756_v48  ;;  %18683 = vmatprep.mubr.msk.f32.mxu0 %vm233_vm0, %v4564_v59  ;;  %v26434_v62 = vld [vmem:[#allocation23_spill] sm:$0xff]  ;;  %v26435_v52 = vld [vmem:[#allocation24_spill] sm:$0xff] }
 0x20e   :  { %18781 = vmatprep.mubr.msk.f32.mxu1 %vm233_vm0, %v21745_v2  ;;  %v3471_v32 = vpop.f32.mrf.mxu0  ;;  %v4567_v2 = vld [vmem:[#allocation2 + $0x278] sm:$0xff]  ;;  %v4568_v37 = vld [vmem:[#allocation2 + $0x288] sm:$0xff] }
 0x20f   :  { %v4178_v50 = vpop.f32.mrf.mxu1  ;;  %v3758_v11 = vadd.f32 %v3471_v32, %v21755_v0  ;;  %v22191_v28 = vadd.f32 %v18536_v9, %v3759_v30 }
 0x210   :  { %v18441_v44 = vpop.f32.mrf.mxu0  ;;  %18684 = vmatmul.mubr.msk.f32.gmra.mxu0 %vm233_vm0, %v4565_v46 }
 0x211   :  { %v18539_v14 = vpop.f32.mrf.mxu1  ;;  %18782 = vmatmul.mubr.msk.f32.gmra.mxu1 %vm233_vm0, %v26434_v62  ;;  %v3761_v59 = vadd.f32 %v18441_v44, %v26435_v52  ;;  %v22197_v48 = vadd.f32 %v4178_v50, %v3758_v11  ;;  %18686 = vmatprep.mubr.msk.f32.mxu0 %vm233_vm0, %v4566_v49  ;;  %v26438_v44 = vld [vmem:[#allocation25_spill] sm:$0xff]  ;;  %v26439_v50 = vld [vmem:[#allocation27_spill] sm:$0xff]  ;;  %v26440_v52 = vld [vmem:[#allocation26_spill] sm:$0xff] }
 0x212   :  { %18784 = vmatprep.mubr.msk.f32.mxu1 %vm233_vm0, %v21763_v53  ;;  %v3481_v0 = vpop.f32.mrf.mxu0  ;;  %v4569_v53 = vld [vmem:[#allocation2 + $0x290] sm:$0xff] }
 0x213   :  { %26436 = vst [vmem:[#allocation50_spill] sm:$0xff] %v22197_v48  ;;  %v4188_v9 = vpop.f32.mrf.mxu1  ;;  %v3760_v30 = vadd.f32 %v3481_v0, %v21773_v21  ;;  %v22203_v46 = vadd.f32 %v18539_v14, %v3761_v59  ;;  %v4570_v59 = vld [vmem:[#allocation2 + $0x2a0] sm:$0xff]  ;;  %v26441_v0 = vld [vmem:[#allocation28_spill] sm:$0xff] }
 0x214   :  { %v18444_v32 = vpop.f32.mrf.mxu0  ;;  %18687 = vmatmul.mubr.msk.f32.gmra.mxu0 %vm233_vm0, %v4567_v2 }
 0x215   :  { %26437 = vst [vmem:[#allocation51_spill] sm:$0xff] %v22203_v46  ;;  %v18542_v62 = vpop.f32.mrf.mxu1  ;;  %18785 = vmatmul.mubr.msk.f32.gmra.mxu1 %vm233_vm0, %v26438_v44  ;;  %v3763_v49 = vadd.f32 %v18444_v32, %v26439_v50  ;;  %v22209_v11 = vadd.f32 %v4188_v9, %v3760_v30  ;;  %18689 = vmatprep.mubr.msk.f32.mxu0 %vm233_vm0, %v4568_v37  ;;  %v26443_v32 = vld [vmem:[#allocation82_spill] sm:$0xff]  ;;  %v26444_v9 = vld [vmem:[#allocation29_spill] sm:$0xff]  ;;  %v4571_v50 = vld [vmem:[#allocation2 + $0x2a8] sm:$0xff] }
 0x216   :  { %18787 = vmatprep.mubr.msk.f32.mxu1 %vm233_vm0, %v26440_v52  ;;  %v3491_v21 = vpop.f32.mrf.mxu0  ;;  %v26446_v52 = vld [vmem:[#allocation83_spill] sm:$0xff] }
 0x217   :  { %v4198_v14 = vpop.f32.mrf.mxu1  ;;  %v3762_v46 = vadd.f32 %v3491_v21, %v26441_v0  ;;  %v22215_v2 = vadd.f32 %v18542_v62, %v3763_v49  ;;  %v16034_v62 = vld [vmem:[%s26166_s5 + $0x70] sm:$0xff]  ;;  %v4572_v21 = vld [vmem:[#allocation2 + $0x2b8] sm:$0xff]  ;;  %v26447_v0 = vld [vmem:[#allocation31_spill] sm:$0xff] }
 0x218   :  { %v18447_v48 = vpop.f32.mrf.mxu0  ;;  %18690 = vmatmul.mubr.msk.f32.gmra.mxu0 %vm233_vm0, %v4569_v53  ;;  %18914 = vmatprep.subr.mxu1 %v16034_v62 }
 0x219   :  { %26442 = vst [vmem:[#allocation52_spill] sm:$0xff] %v22215_v2  ;;  %v18545_v44 = vpop.f32.mrf.mxu1  ;;  %18788 = vmatmul.mubr.msk.f32.gmra.mxu1 %vm233_vm0, %v26443_v32  ;;  %v3765_v37 = vadd.f32 %v18447_v48, %v26444_v9  ;;  %v22221_v30 = vadd.f32 %v4198_v14, %v3762_v46  ;;  %18692 = vmatprep.mubr.msk.f32.mxu0 %vm233_vm0, %v4570_v59  ;;  %v26448_v14 = vld [vmem:[#allocation30_spill] sm:$0xff]  ;;  %v26449_v59 = vld [vmem:[#allocation32_spill] sm:$0xff] }
 0x21a   :  { %18790 = vmatprep.mubr.msk.f32.mxu1 %vm233_vm0, %v26446_v52  ;;  %v3501_v49 = vpop.f32.mrf.mxu0  ;;  %18915 = vmatpush3.msra.mxu1 %v16034_v62  ;;  %v4574_v62 = vld [vmem:[#allocation2 + $0x2d0] sm:$0xff] }
 0x21b   :  { %26445 = vst [vmem:[#allocation53_spill] sm:$0xff] %v22221_v30  ;;  %v4208_v53 = vpop.f32.mrf.mxu1  ;;  %v3764_v32 = vadd.f32 %v3501_v49, %v26447_v0  ;;  %v22230_v2 = vadd.f32 %v18545_v44, %v3765_v37  ;;  %v4573_v30 = vld [vmem:[#allocation2 + $0x2c0] sm:$0xff]  ;;  %v26450_v49 = vld [vmem:[#allocation33_spill] sm:$0xff] }
 0x21c   :  { %v18450_v48 = vpop.f32.mrf.mxu0  ;;  %18693 = vmatmul.mubr.msk.f32.gmra.mxu0 %vm233_vm0, %v4571_v50 }
 0x21d   :  { %v18548_v46 = vpop.f32.mrf.mxu1  ;;  %18791 = vmatmul.mubr.msk.f32.gmra.mxu1 %vm233_vm0, %v26448_v14  ;;  %v3767_v9 = vadd.f32 %v18450_v48, %v26449_v59  ;;  %v22236_v52 = vadd.f32 %v4208_v53, %v3764_v32  ;;  %18695 = vmatprep.mubr.msk.f32.mxu0 %vm233_vm0, %v4572_v21  ;;  %v26451_v32 = vld [vmem:[#allocation35_spill] sm:$0xff]  ;;  %v26452_v21 = vld [vmem:[#allocation34_spill] sm:$0xff] }
 0x21e   :  { %18793 = vmatprep.mubr.msk.f32.mxu1 %vm233_vm0, %v21817_v35  ;;  %v3511_v44 = vpop.f32.mrf.mxu0  ;;  %v4575_v35 = vld [vmem:[#allocation2 + $0x2d8] sm:$0xff] }
 0x21f   :  { %v22241_v37 = vpop.f32.mrf.mxu1  ;;  %v22244_v50 = vadd.f32 %v3511_v44, %v26450_v49  ;;  %v22246_v0 = vadd.f32 %v18548_v46, %v3767_v9  ;;  %v4576_v46 = vld [vmem:[#allocation2 + $0x2e8] sm:$0xff] }
 0x220   :  { %v18453_v14 = vpop.f32.mrf.mxu0  ;;  %18696 = vmatmul.mubr.msk.f32.gmra.mxu0 %vm233_vm0, %v4573_v30 }
 0x221   :  { %v18551_v53 = vpop.f32.mrf.mxu1  ;;  %18794 = vmatmul.mubr.msk.f32.gmra.mxu1 %vm233_vm0, %v26451_v32  ;;  %v3769_v48 = vadd.f32 %v18453_v14, %v26452_v21  ;;  %18698 = vmatprep.mubr.msk.f32.mxu0 %vm233_vm0, %v4574_v62  ;;  %v26455_v14 = vld [vmem:[#allocation7_spill] sm:$0xff]  ;;  %v26456_v62 = vld [vmem:[#allocation36_spill] sm:$0xff] }
 0x222   :  { %18796 = vmatprep.mubr.msk.f32.mxu1 %vm233_vm0, %v21835_v13  ;;  %v3521_v59 = vpop.f32.mrf.mxu0  ;;  %v4577_v13 = vld [vmem:[#allocation2 + $0x2f0] sm:$0xff] }
 0x223   :  { %v22255_v44 = vpop.f32.mrf.mxu1  ;;  %v22258_v9 = vadd.f32 %v3521_v59, %v21845_v45  ;;  %v22260_v30 = vadd.f32 %v18551_v53, %v3769_v48  ;;  %v4578_v53 = vld [vmem:[#allocation2 + $0x300] sm:$0xff]  ;;  %v26458_v48 = vld [vmem:[#allocation37_spill] sm:$0xff] }
 0x224   :  { %26453 = vst [vmem:[#allocation54_spill] sm:$0xff] %v22255_v44  ;;  %v18456_v49 = vpop.f32.mrf.mxu0  ;;  %18699 = vmatmul.mubr.msk.f32.gmra.mxu0 %vm233_vm0, %v4575_v35 }
 0x225   :  { %26454 = vst [vmem:[#allocation55_spill] sm:$0xff] %v22258_v9  ;;  %v18554_v32 = vpop.f32.mrf.mxu1  ;;  %18797 = vmatmul.mubr.msk.f32.gmra.mxu1 %vm233_vm0, %v26455_v14  ;;  %v3771_v21 = vadd.f32 %v18456_v49, %v26456_v62  ;;  %18701 = vmatprep.mubr.msk.f32.mxu0 %vm233_vm0, %v4576_v46  ;;  %v26460_v49 = vld [vmem:[#allocation8_spill] sm:$0xff]  ;;  %v26461_v46 = vld [vmem:[#allocation9_spill] sm:$0xff] }
 0x226   :  { %18799 = vmatprep.mubr.msk.f32.mxu1 %vm233_vm0, %v21853_v1  ;;  %v3531_v44 = vpop.f32.mrf.mxu0  ;;  %v4579_v1 = vld [vmem:[#allocation2 + $0x308] sm:$0xff] }
 0x227   :  { %v22269_v45 = vpop.f32.mrf.mxu1  ;;  %v22272_v59 = vadd.f32 %v3531_v44, %v26458_v48  ;;  %v22274_v35 = vadd.f32 %v18554_v32, %v3771_v21  ;;  %v16033_v44 = vld [vmem:[%s26166_s5 + $0x68] sm:$0xff]  ;;  %v26463_v48 = vld [vmem:[#allocation10_spill] sm:$0xff] }
 0x228   :  { %26457 = vst [vmem:[#allocation56_spill] sm:$0xff] %v22269_v45  ;;  %v18459_v9 = vpop.f32.mrf.mxu0  ;;  %18702 = vmatmul.mubr.msk.f32.gmra.mxu0 %vm233_vm0, %v4577_v13  ;;  %v4580_v13 = vld [vmem:[#allocation2 + $0x318] sm:$0xff]  ;;  %18916 = vmatprep.subr.mxu1 %v16033_v44 }
 0x229   :  { %26459 = vst [vmem:[#allocation57_spill] sm:$0xff] %v22272_v59  ;;  %v18557_v14 = vpop.f32.mrf.mxu1  ;;  %18800 = vmatmul.mubr.msk.f32.gmra.mxu1 %vm233_vm0, %v26460_v49  ;;  %v3773_v62 = vadd.f32 %v18459_v9, %v26461_v46  ;;  %18704 = vmatprep.mubr.msk.f32.mxu0 %vm233_vm0, %v4578_v53  ;;  %v26466_v46 = vld [vmem:[#allocation39_spill] sm:$0xff] }
 0x22a   :  { %18802 = vmatprep.mubr.msk.f32.mxu1 %vm233_vm0, %v21871_v20  ;;  %v3541_v32 = vpop.f32.mrf.mxu0  ;;  %18917 = vmatpush3.msra.mxu1 %v16033_v44  ;;  %v26465_v20 = vld [vmem:[#allocation11_spill] sm:$0xff] }
 0x22b   :  { %v22286_v21 = vpop.f32.mrf.mxu1  ;;  %v22289_v45 = vadd.f32 %v3541_v32, %v26463_v48  ;;  %v22291_v49 = vadd.f32 %v18557_v14, %v3773_v62  ;;  %v4582_v14 = vld [vmem:[#allocation2 + $0x330] sm:$0xff]  ;;  %v26468_v62 = vld [vmem:[#allocation38_spill] sm:$0xff] }
 0x22c   :  { %26462 = vst [vmem:[#allocation58_spill] sm:$0xff] %v22286_v21  ;;  %v18462_v9 = vpop.f32.mrf.mxu0  ;;  %18705 = vmatmul.mubr.msk.f32.gmra.mxu0 %vm233_vm0, %v4579_v1  ;;  %v4581_v21 = vld [vmem:[#allocation2 + $0x320] sm:$0xff] }
 0x22d   :  { %26464 = vst [vmem:[#allocation59_spill] sm:$0xff] %v22289_v45  ;;  %v18560_v53 = vpop.f32.mrf.mxu1  ;;  %18803 = vmatmul.mubr.msk.f32.gmra.mxu1 %vm233_vm0, %v26465_v20  ;;  %v3775_v59 = vadd.f32 %v18462_v9, %v26466_v46  ;;  %18707 = vmatprep.mubr.msk.f32.mxu0 %vm233_vm0, %v4580_v13  ;;  %v26470_v9 = vld [vmem:[#allocation40_spill] sm:$0xff]  ;;  %v26471_v13 = vld [vmem:[#allocation42_spill] sm:$0xff] }
 0x22e   :  { %18805 = vmatprep.mubr.msk.f32.mxu1 %vm233_vm0, %v21889_v19  ;;  %v3551_v32 = vpop.f32.mrf.mxu0  ;;  %v4583_v19 = vld [vmem:[#allocation2 + $0x338] sm:$0xff] }
 0x22f   :  { %v22300_v48 = vpop.f32.mrf.mxu1  ;;  %v22303_v44 = vadd.f32 %v3551_v32, %v26468_v62  ;;  %v22305_v1 = vadd.f32 %v18560_v53, %v3775_v59  ;;  %v4584_v59 = vld [vmem:[#allocation2 + $0x348] sm:$0xff] }
 0x230   :  { %26467 = vst [vmem:[#allocation60_spill] sm:$0xff] %v22300_v48  ;;  %v18465_v45 = vpop.f32.mrf.mxu0  ;;  %18708 = vmatmul.mubr.msk.f32.gmra.mxu0 %vm233_vm0, %v4581_v21  ;;  %v5291_v53 = vld [vmem:[#allocation2 + $0x349] sm:$0xff] }
 0x231   :  { %26469 = vst [vmem:[#allocation61_spill] sm:$0xff] %v22303_v44  ;;  %v18563_v20 = vpop.f32.mrf.mxu1  ;;  %18806 = vmatmul.mubr.msk.f32.gmra.mxu1 %vm233_vm0, %v26470_v9  ;;  %v3777_v46 = vadd.f32 %v18465_v45, %v26471_v13  ;;  %18710 = vmatprep.mubr.msk.f32.mxu0 %vm233_vm0, %v4582_v14  ;;  %v26474_v14 = vld [vmem:[#allocation41_spill] sm:$0xff] }
 0x232   :  { %18808 = vmatprep.mubr.msk.f32.mxu1 %vm233_vm0, %v21907_v26  ;;  %v3561_v48 = vpop.f32.mrf.mxu0  ;;  %v4585_v26 = vld [vmem:[#allocation2 + $0x350] sm:$0xff] }
 0x233   :  { %v22314_v32 = vpop.f32.mrf.mxu1  ;;  %v22317_v62 = vadd.f32 %v3561_v48, %v21917_v15  ;;  %v22319_v21 = vadd.f32 %v18563_v20, %v3777_v46  ;;  %v5292_v13 = vld [vmem:[#allocation2 + $0x351] sm:$0xff] }
 0x234   :  { %26472 = vst [vmem:[#allocation62_spill] sm:$0xff] %v22314_v32  ;;  %v18468_v44 = vpop.f32.mrf.mxu0  ;;  %18711 = vmatmul.mubr.msk.f32.gmra.mxu0 %vm233_vm0, %v4583_v19  ;;  %v5936_v48 = vld [vmem:[#allocation2 + $0x32] sm:$0xff] }
 0x235   :  { %26473 = vst [vmem:[#allocation63_spill] sm:$0xff] %v22317_v62  ;;  %v18566_v45 = vpop.f32.mrf.mxu1  ;;  %18809 = vmatmul.mubr.msk.f32.gmra.mxu1 %vm233_vm0, %v21921_v43  ;;  %v3779_v9 = vadd.f32 %v18468_v44, %v26474_v14  ;;  %18713 = vmatprep.mubr.msk.f32.mxu0 %vm233_vm0, %v4584_v59  ;;  %v5937_v59 = vld [vmem:[#allocation2 + $0x3a] sm:$0xff] }
 0x236   :  { %18811 = vmatprep.mubr.msk.f32.mxu1 %vm233_vm0, %v5291_v53  ;;  %v3571_v32 = vpop.f32.mrf.mxu0  ;;  %v16032_v53 = vld [vmem:[%s26166_s5 + $0x60] sm:$0xff] }
 0x237   :  { %v22327_v15 = vpop.f32.mrf.mxu1  ;;  %v22330_v20 = vadd.f32 %v3571_v32, %v21931_v23  ;;  %v22332_v46 = vadd.f32 %v18566_v45, %v3779_v9  ;;  %v5938_v32 = vld [vmem:[#allocation2 + $0x4a] sm:$0xff]  ;;  %18918 = vmatprep.subr.mxu1 %v16032_v53 }
 0x238   :  { %26475 = vst [vmem:[#allocation64_spill] sm:$0xff] %v22327_v15  ;;  %v18471_v19 = vpop.f32.mrf.mxu0  ;;  %18714 = vmatmul.mubr.msk.f32.gmra.mxu0 %vm233_vm0, %v4585_v26  ;;  %18919 = vmatpush3.msra.mxu1 %v16032_v53 }
 0x239   :  { %26476 = vst [vmem:[#allocation65_spill] sm:$0xff] %v22330_v20  ;;  %v18569_v43 = vpop.f32.mrf.mxu1  ;;  %18812 = vmatmul.mubr.msk.f32.gmra.mxu1 %vm233_vm0, %v5292_v13  ;;  %v3781_v44 = vadd.f32 %v18471_v19, %v21937_v5  ;;  %18816 = vmatprep.mubr.msk.f32.mxu0 %vm233_vm0, %v5936_v48  ;;  %v5939_v48 = vld [vmem:[#allocation2 + $0x52] sm:$0xff] }
 0x23a   :  { %v3581_v14 = vpop.f32.mrf.mxu0 }
 0x23b   :  { %v22341_v23 = vpop.f32.mrf.mxu1  ;;  %v22344_v45 = vadd.f32 %v3581_v14, %v21943_v51  ;;  %v22346_v9 = vadd.f32 %v18569_v43, %v3781_v44 }
 0x23c   :  { %26477 = vst [vmem:[#allocation66_spill] sm:$0xff] %v22341_v23  ;;  %v18474_v26 = vpop.f32.mrf.mxu0  ;;  %18817 = vmatmul.mubr.msk.f32.vlgmr.msra.gmra.mxu0 %vm233_vm0, %v5937_v59  ;;  %v5940_v23 = vld [vmem:[#allocation2 + $0x62] sm:$0xff] }
 0x23d   :  { %26478 = vst [vmem:[#allocation67_spill] sm:$0xff] %v22344_v45  ;;  %v18572_v5 = vpop.f32.mrf.mxu1  ;;  %v3783_v13 = vadd.f32 %v18474_v26, %v21950_v12  ;;  %18819 = vmatprep.mubr.msk.f32.mxu0 %vm233_vm0, %v5938_v32  ;;  %v5941_v12 = vld [vmem:[#allocation2 + $0x6a] sm:$0xff]  ;;  %v5942_v32 = vld [vmem:[#allocation2 + $0x7a] sm:$0xff] }
 0x23e   :  { %v3591_v19 = vpop.f32.mrf.mxu0 }
 0x23f   :  { %v22351_v15 = vpop.f32.mrf.mxu1  ;;  %v22354_v20 = vadd.f32 %v3591_v19, %v21956_v41  ;;  %v22356_v51 = vadd.f32 %v18572_v5, %v3783_v13 }
 0x240   :  { %26479 = vst [vmem:[#allocation68_spill] sm:$0xff] %v22351_v15  ;;  %v18477_v43 = vpop.f32.mrf.mxu0  ;;  %18820 = vmatmul.mubr.msk.f32.gmra.mxu0 %vm233_vm0, %v5939_v48 }
 0x241   :  { %26480 = vst [vmem:[#allocation69_spill] sm:$0xff] %v22354_v20  ;;  %v18575_v44 = vpop.f32.mrf.mxu1  ;;  %v3785_v59 = vadd.f32 %v18477_v43, %v21962_v8  ;;  %18822 = vmatprep.mubr.msk.f32.mxu0 %vm233_vm0, %v5940_v23  ;;  %v5943_v8 = vld [vmem:[#allocation2 + $0x82] sm:$0xff]  ;;  %v5944_v43 = vld [vmem:[#allocation2 + $0x92] sm:$0xff] }
 0x242   :  { %v3601_v53 = vpop.f32.mrf.mxu0 }
 0x243   :  { %v22361_v14 = vpop.f32.mrf.mxu1  ;;  %v22364_v26 = vadd.f32 %v3601_v53, %v21968_v7  ;;  %v22366_v41 = vadd.f32 %v18575_v44, %v3785_v59  ;;  %v16031_v53 = vld [vmem:[%s26166_s5 + $0x58] sm:$0xff] }
 0x244   :  { %26481 = vst [vmem:[#allocation71_spill] sm:$0xff] %v22361_v14  ;;  %v18480_v5 = vpop.f32.mrf.mxu0  ;;  %18823 = vmatmul.mubr.msk.f32.gmra.mxu0 %vm233_vm0, %v5941_v12  ;;  %18920 = vmatprep.subr.mxu1 %v16031_v53 }
 0x245   :  { %26482 = vst [vmem:[#allocation70_spill] sm:$0xff] %v22364_v26  ;;  %v18578_v13 = vpop.f32.mrf.mxu1  ;;  %v3787_v48 = vadd.f32 %v18480_v5, %v21974_v6  ;;  %18825 = vmatprep.mubr.msk.f32.mxu0 %vm233_vm0, %v5942_v32  ;;  %v5945_v6 = vld [vmem:[#allocation2 + $0x9a] sm:$0xff]  ;;  %18921 = vmatpush3.msra.mxu1 %v16031_v53 }
 0x246   :  { %v3611_v23 = vpop.f32.mrf.mxu0 }
 0x247   :  { %v22371_v19 = vpop.f32.mrf.mxu1  ;;  %v22374_v14 = vadd.f32 %v3611_v23, %v21980_v16  ;;  %v22376_v7 = vadd.f32 %v18578_v13, %v3787_v48  ;;  %v5946_v16 = vld [vmem:[#allocation2 + $0xaa] sm:$0xff] }
 0x248   :  { %26483 = vst [vmem:[#allocation72_spill] sm:$0xff] %v22371_v19  ;;  %v18483_v44 = vpop.f32.mrf.mxu0  ;;  %18826 = vmatmul.mubr.msk.f32.gmra.mxu0 %vm233_vm0, %v5943_v8 }
 0x249   :  { %26484 = vst [vmem:[#allocation73_spill] sm:$0xff] %v22374_v14  ;;  %v18581_v59 = vpop.f32.mrf.mxu1  ;;  %v3789_v12 = vadd.f32 %v18483_v44, %v21986_v18  ;;  %18828 = vmatprep.mubr.msk.f32.mxu0 %vm233_vm0, %v5944_v43  ;;  %v5947_v43 = vld [vmem:[#allocation2 + $0xb2] sm:$0xff] }
 0x24a   :  { %v3621_v32 = vpop.f32.mrf.mxu0 }
 0x24b   :  { %v22384_v5 = vpop.f32.mrf.mxu1  ;;  %v22387_v13 = vadd.f32 %v3621_v32, %v21992_v17  ;;  %v22389_v48 = vadd.f32 %v18581_v59, %v3789_v12 }
 0x24c   :  { %26485 = vst [vmem:[#allocation75_spill] sm:$0xff] %v22384_v5  ;;  %v18486_v8 = vpop.f32.mrf.mxu0  ;;  %18829 = vmatmul.mubr.msk.f32.gmra.mxu0 %vm233_vm0, %v5945_v6  ;;  %v5948_v5 = vld [vmem:[#allocation2 + $0xc2] sm:$0xff] }
 0x24d   :  { %26486 = vst [vmem:[#allocation74_spill] sm:$0xff] %v22387_v13  ;;  %v18584_v18 = vpop.f32.mrf.mxu1  ;;  %v3791_v23 = vadd.f32 %v18486_v8, %v21998_v33  ;;  %18831 = vmatprep.mubr.msk.f32.mxu0 %vm233_vm0, %v5946_v16  ;;  %v5949_v33 = vld [vmem:[#allocation2 + $0xca] sm:$0xff]  ;;  %v5950_v16 = vld [vmem:[#allocation2 + $0xda] sm:$0xff] }
 0x24e   :  { %v3631_v44 = vpop.f32.mrf.mxu0  ;;  %v26522_v13 = vld [vmem:[#allocation53_spill] sm:$0xff] }
 0x24f   :  { %v22394_v19 = vpop.f32.mrf.mxu1  ;;  %v22397_v14 = vadd.f32 %v3631_v44, %v22004_v55  ;;  %v22399_v17 = vadd.f32 %v18584_v18, %v3791_v23 }
 0x250   :  { %26487 = vst [vmem:[#allocation76_spill] sm:$0xff] %v22394_v19  ;;  %v18489_v59 = vpop.f32.mrf.mxu0  ;;  %18832 = vmatmul.mubr.msk.f32.gmra.mxu0 %vm233_vm0, %v5947_v43 }
 0x251   :  { %26488 = vst [vmem:[#allocation77_spill] sm:$0xff] %v22397_v14  ;;  %v18587_v12 = vpop.f32.mrf.mxu1  ;;  %v3793_v6 = vadd.f32 %v18489_v59, %v22010_v10  ;;  %18834 = vmatprep.mubr.msk.f32.mxu0 %vm233_vm0, %v5948_v5  ;;  %v5951_v10 = vld [vmem:[#allocation2 + $0xe2] sm:$0xff]  ;;  %v5952_v59 = vld [vmem:[#allocation2 + $0xf2] sm:$0xff] }
 0x252   :  { %v3641_v53 = vpop.f32.mrf.mxu0  ;;  %v26521_v14 = vld [vmem:[#allocation52_spill] sm:$0xff] }
 0x253   :  { %v22404_v32 = vpop.f32.mrf.mxu1  ;;  %v22407_v8 = vadd.f32 %v3641_v53, %v22016_v25  ;;  %v22409_v55 = vadd.f32 %v18587_v12, %v3793_v6  ;;  %v16030_v53 = vld [vmem:[%s26166_s5 + $0x50] sm:$0xff] }
 0x254   :  { %26489 = vst [vmem:[#allocation12_spill] sm:$0xff] %v22404_v32  ;;  %v18492_v18 = vpop.f32.mrf.mxu0  ;;  %18835 = vmatmul.mubr.msk.f32.gmra.mxu0 %vm233_vm0, %v5949_v33  ;;  %18922 = vmatprep.subr.mxu1 %v16030_v53 }
 0x255   :  { %26490 = vst [vmem:[#allocation78_spill] sm:$0xff] %v22407_v8  ;;  %v18590_v23 = vpop.f32.mrf.mxu1  ;;  %v3795_v43 = vadd.f32 %v18492_v18, %v22022_v61  ;;  %18837 = vmatprep.mubr.msk.f32.mxu0 %vm233_vm0, %v5950_v16  ;;  %v5953_v61 = vld [vmem:[#allocation2 + $0xfa] sm:$0xff]  ;;  %18923 = vmatpush3.msra.mxu1 %v16030_v53 }
 0x256   :  { %v3651_v5 = vpop.f32.mrf.mxu0 }
 0x257   :  { %v22414_v44 = vpop.f32.mrf.mxu1  ;;  %v22417_v32 = vadd.f32 %v3651_v5, %v22028_v3  ;;  %v22419_v25 = vadd.f32 %v18590_v23, %v3795_v43  ;;  %v5954_v3 = vld [vmem:[#allocation2 + $0x10a] sm:$0xff] }
 0x258   :  { %26491 = vst [vmem:[#allocation79_spill] sm:$0xff] %v22414_v44  ;;  %v18495_v12 = vpop.f32.mrf.mxu0  ;;  %18838 = vmatmul.mubr.msk.f32.gmra.mxu0 %vm233_vm0, %v5951_v10 }
 0x259   :  { %26492 = vst [vmem:[#allocation80_spill] sm:$0xff] %v22417_v32  ;;  %v18593_v6 = vpop.f32.mrf.mxu1  ;;  %v3797_v33 = vadd.f32 %v18495_v12, %v22034_v36  ;;  %18840 = vmatprep.mubr.msk.f32.mxu0 %vm233_vm0, %v5952_v59  ;;  %v5955_v59 = vld [vmem:[#allocation2 + $0x112] sm:$0xff] }
 0x25a   :  { %v3661_v16 = vpop.f32.mrf.mxu0 }
 0x25b   :  { %v22427_v18 = vpop.f32.mrf.mxu1  ;;  %v22430_v23 = vadd.f32 %v3661_v16, %v22040_v63  ;;  %v22432_v43 = vadd.f32 %v18593_v6, %v3797_v33 }
 0x25c   :  { %26493 = vst [vmem:[#allocation81_spill] sm:$0xff] %v22427_v18  ;;  %v18498_v10 = vpop.f32.mrf.mxu0  ;;  %18841 = vmatmul.mubr.msk.f32.gmra.mxu0 %vm233_vm0, %v5953_v61  ;;  %v5956_v18 = vld [vmem:[#allocation2 + $0x122] sm:$0xff] }
 0x25d   :  { %26494 = vst [vmem:[#allocation14_spill] sm:$0xff] %v22430_v23  ;;  %v18596_v36 = vpop.f32.mrf.mxu1  ;;  %v3799_v5 = vadd.f32 %v18498_v10, %v22046_v24  ;;  %18843 = vmatprep.mubr.msk.f32.mxu0 %vm233_vm0, %v5954_v3  ;;  %v5957_v24 = vld [vmem:[#allocation2 + $0x12a] sm:$0xff]  ;;  %v5958_v3 = vld [vmem:[#allocation2 + $0x13a] sm:$0xff] }
 0x25e   :  { %v3671_v12 = vpop.f32.mrf.mxu0  ;;  %v26508_v23 = vld [vmem:[#allocation47_spill] sm:$0xff] }
 0x25f   :  { %v22437_v44 = vpop.f32.mrf.mxu1  ;;  %v22440_v32 = vadd.f32 %v3671_v12, %v22052_v38  ;;  %v22442_v63 = vadd.f32 %v18596_v36, %v3799_v5 }
 0x260   :  { %26495 = vst [vmem:[#allocation13_spill] sm:$0xff] %v22437_v44  ;;  %v18501_v6 = vpop.f32.mrf.mxu0  ;;  %18844 = vmatmul.mubr.msk.f32.gmra.mxu0 %vm233_vm0, %v5955_v59 }
 0x261   :  { %26496 = vst [vmem:[#allocation15_spill] sm:$0xff] %v22440_v32  ;;  %v18599_v33 = vpop.f32.mrf.mxu1  ;;  %v3801_v61 = vadd.f32 %v18501_v6, %v22058_v34  ;;  %18846 = vmatprep.mubr.msk.f32.mxu0 %vm233_vm0, %v5956_v18  ;;  %v5959_v34 = vld [vmem:[#allocation2 + $0x142] sm:$0xff]  ;;  %v5960_v6 = vld [vmem:[#allocation2 + $0x152] sm:$0xff] }
 0x262   :  { %v3681_v53 = vpop.f32.mrf.mxu0 }
 0x263   :  { %v22447_v16 = vpop.f32.mrf.mxu1  ;;  %v22450_v10 = vadd.f32 %v3681_v53, %v22064_v40  ;;  %v22452_v38 = vadd.f32 %v18599_v33, %v3801_v61 }
 0x264   :  { %26497 = vst [vmem:[#allocation16_spill] sm:$0xff] %v22447_v16  ;;  %v18504_v36 = vpop.f32.mrf.mxu0  ;;  %18847 = vmatmul.mubr.msk.f32.gmra.mxu0 %vm233_vm0, %v5957_v24  ;;  %v26500_v16 = vld [vmem:[#allocation43_spill] sm:$0xff]  ;;  %v26502_v24 = vld [vmem:[#allocation44_spill] sm:$0xff] }
 0x265   :  { %26498 = vst [vmem:[#allocation17_spill] sm:$0xff] %v22450_v10  ;;  %v18602_v5 = vpop.f32.mrf.mxu1  ;;  %v3803_v59 = vadd.f32 %v18504_v36, %v22070_v39  ;;  %18849 = vmatprep.mubr.msk.f32.mxu0 %vm233_vm0, %v5958_v3  ;;  %v5961_v39 = vld [vmem:[#allocation2 + $0x15a] sm:$0xff]  ;;  %v16029_v3 = vld [vmem:[%s26166_s5 + $0x48] sm:$0xff] }
 0x266   :  { %v3691_v18 = vpop.f32.mrf.mxu0  ;;  %18924 = vmatprep.subr.mxu1 %v16029_v3 }
 0x267   :  { %v22457_v12 = vpop.f32.mrf.mxu1  ;;  %v22460_v44 = vadd.f32 %v3691_v18, %v26500_v16  ;;  %v22462_v40 = vadd.f32 %v18602_v5, %v3803_v59  ;;  %v5962_v16 = vld [vmem:[#allocation2 + $0x16a] sm:$0xff]  ;;  %v26504_v5 = vld [vmem:[#allocation46_spill] sm:$0xff]  ;;  %18925 = vmatpush3.msra.mxu1 %v16029_v3 }
 0x268   :  { %26499 = vst [vmem:[#allocation18_spill] sm:$0xff] %v22457_v12  ;;  %v18507_v33 = vpop.f32.mrf.mxu0  ;;  %18850 = vmatmul.mubr.msk.f32.gmra.mxu0 %vm233_vm0, %v5959_v34 }
 0x269   :  { %26501 = vst [vmem:[#allocation19_spill] sm:$0xff] %v22460_v44  ;;  %v18605_v61 = vpop.f32.mrf.mxu1  ;;  %v3805_v53 = vadd.f32 %v18507_v33, %v26502_v24  ;;  %18852 = vmatprep.mubr.msk.f32.mxu0 %vm233_vm0, %v5960_v6  ;;  %v26506_v33 = vld [vmem:[#allocation45_spill] sm:$0xff] }
 0x26a   :  { %v3701_v36 = vpop.f32.mrf.mxu0  ;;  %v5963_v44 = vld [vmem:[#allocation2 + $0x172] sm:$0xff] }
 0x26b   :  { %v22470_v12 = vpop.f32.mrf.mxu1  ;;  %v22473_v59 = vadd.f32 %v3701_v36, %v26504_v5  ;;  %v22475_v18 = vadd.f32 %v18605_v61, %v3805_v53  ;;  %v5965_v5 = vld [vmem:[#allocation2 + $0x18a] sm:$0xff] }
 0x26c   :  { %26503 = vst [vmem:[#allocation20_spill] sm:$0xff] %v22470_v12  ;;  %v18510_v34 = vpop.f32.mrf.mxu0  ;;  %18853 = vmatmul.mubr.msk.f32.gmra.mxu0 %vm233_vm0, %v5961_v39  ;;  %v5964_v12 = vld [vmem:[#allocation2 + $0x182] sm:$0xff] }
 0x26d   :  { %26505 = vst [vmem:[#allocation21_spill] sm:$0xff] %v22473_v59  ;;  %v18608_v6 = vpop.f32.mrf.mxu1  ;;  %v3807_v24 = vadd.f32 %v18510_v34, %v26506_v33  ;;  %18855 = vmatprep.mubr.msk.f32.mxu0 %vm233_vm0, %v5962_v16  ;;  %v26510_v39 = vld [vmem:[#allocation48_spill] sm:$0xff]  ;;  %v5966_v33 = vld [vmem:[#allocation2 + $0x19a] sm:$0xff] }
 0x26e   :  { %v3711_v10 = vpop.f32.mrf.mxu0 }
 0x26f   :  { %v22480_v32 = vpop.f32.mrf.mxu1  ;;  %v22483_v8 = vadd.f32 %v3711_v10, %v26508_v23  ;;  %v22485_v36 = vadd.f32 %v18608_v6, %v3807_v24 }
 0x270   :  { %26507 = vst [vmem:[#allocation22_spill] sm:$0xff] %v22480_v32  ;;  %v18513_v61 = vpop.f32.mrf.mxu0  ;;  %18856 = vmatmul.mubr.msk.f32.gmra.mxu0 %vm233_vm0, %v5963_v44  ;;  %v26513_v44 = vld [vmem:[#allocation49_spill] sm:$0xff] }
 0x271   :  { %26509 = vst [vmem:[#allocation23_spill] sm:$0xff] %v22483_v8  ;;  %v18611_v53 = vpop.f32.mrf.mxu1  ;;  %v3809_v3 = vadd.f32 %v18513_v61, %v26510_v39  ;;  %18858 = vmatprep.mubr.msk.f32.mxu0 %vm233_vm0, %v5964_v12  ;;  %v5967_v61 = vld [vmem:[#allocation2 + $0x1a2] sm:$0xff] }
 0x272   :  { %v3721_v16 = vpop.f32.mrf.mxu0  ;;  %v5968_v8 = vld [vmem:[#allocation2 + $0x1e2] sm:$0xff] }
 0x273   :  { %v22490_v34 = vpop.f32.mrf.mxu1  ;;  %v22493_v32 = vadd.f32 %v3721_v16, %v22112_v29  ;;  %v22495_v23 = vadd.f32 %v18611_v53, %v3809_v3  ;;  %v7024_v53 = vld [vmem:[%s26166_s5 + $0x38] sm:$0xff] }
 0x274   :  { %26511 = vst [vmem:[#allocation24_spill] sm:$0xff] %v22490_v34  ;;  %v18516_v10 = vpop.f32.mrf.mxu0  ;;  %18859 = vmatmul.mubr.msk.f32.gmra.mxu0 %vm233_vm0, %v5965_v5  ;;  %19024 = vmatprep.subr.mxu0 %v7024_v53 }
 0x275   :  { %26512 = vst [vmem:[#allocation25_spill] sm:$0xff] %v22493_v32  ;;  %v18614_v6 = vpop.f32.mrf.mxu1  ;;  %v3811_v24 = vadd.f32 %v18516_v10, %v26513_v44  ;;  %18861 = vmatprep.mubr.msk.f32.mxu0 %vm233_vm0, %v5966_v33  ;;  %v5969_v33 = vld [vmem:[#allocation2 + $0x1ea] sm:$0xff]  ;;  %19025 = vmatpush3.msra.mxu0 %v7024_v53 }
 0x276   :  { %v3731_v12 = vpop.f32.mrf.mxu0  ;;  %v7023_v10 = vld [vmem:[%s26166_s5 + $0x30] sm:$0xff] }
 0x277   :  { %v22500_v39 = vpop.f32.mrf.mxu1  ;;  %v22503_v34 = vadd.f32 %v3731_v12, %v22122_v54  ;;  %v22505_v29 = vadd.f32 %v18614_v6, %v3811_v24  ;;  %v16028_v54 = vld [vmem:[%s26166_s5 + $0x40] sm:$0xff]  ;;  %19026 = vmatprep.subr.mxu0 %v7023_v10 }
 0x278   :  { %26514 = vst [vmem:[#allocation27_spill] sm:$0xff] %v22500_v39  ;;  %v18519_v3 = vpop.f32.mrf.mxu0  ;;  %18862 = vmatmul.mubr.msk.f32.gmra.mxu0 %vm233_vm0, %v5967_v61  ;;  %v5970_v24 = vld [vmem:[#allocation2 + $0x1fa] sm:$0xff]  ;;  %18926 = vmatprep.subr.mxu1 %v16028_v54  ;;  %v7022_v61 = vld [vmem:[%s26166_s5 + $0x28] sm:$0xff] }
 0x279   :  { %26515 = vst [vmem:[#allocation26_spill] sm:$0xff] %v22503_v34  ;;  %v18617_v5 = vpop.f32.mrf.mxu1  ;;  %v3813_v16 = vadd.f32 %v18519_v3, %v22128_v4  ;;  %18864 = vmatprep.mubr.msk.f32.mxu0 %vm233_vm0, %v5968_v8  ;;  %18927 = vmatpush3.msra.mxu1 %v16028_v54 }
 0x27a   :  { %v3741_v6 = vpop.f32.mrf.mxu0  ;;  %19027 = vmatpush3.msra.mxu0 %v7023_v10  ;;  %v26518_v10 = vmov 0.0  }
 0x27b   :  { %v22519_v44 = vpop.f32.mrf.mxu1  ;;  %v22522_v4 = vadd.f32 %v3741_v6, %v22133_v56  ;;  %v22524_v8 = vadd.f32 %v18617_v5, %v3813_v16  ;;  %19028 = vmatprep.subr.mxu0 %v7022_v61  ;;  %v22536_v56 = vld [vmem:[#allocation2 + $0x202] sm:$0xff]  ;;  %6784 = vst.msk [vmem:[#allocation3 + $0x20] sm:$0xff] %vm6778_vm2, %v26518_v10  ;;  %6779 = vst.msk [vmem:[#allocation3] sm:$0xff] %vm6778_vm2, %v26518_v10 }
 0x27c   :  { %26516 = vst [vmem:[#allocation28_spill] sm:$0xff] %v22519_v44  ;;  %v18622_v12 = vpop.f32.mrf.mxu0  ;;  %18865 = vmatmul.mubr.msk.f32.gmra.mxu0 %vm233_vm0, %v5969_v33  ;;  %v22541_v5 = vld [vmem:[%s26166_s5 + $0x20] sm:$0xff]  ;;  %v22545_v33 = vld [vmem:[#allocation2 + $0x212] sm:$0xff]  ;;  %6780 = vst.msk [vmem:[#allocation3 + $0x8] sm:$0xff] %vm6778_vm2, %v26518_v10 }
 0x27d   :  { %26517 = vst [vmem:[#allocation82_spill] sm:$0xff] %v22522_v4  ;;  %v22530_v53 = vpop.f32.mrf.mxu1  ;;  %v22533_v3 = vadd.f32 %v18622_v12, %v22140_v31  ;;  %18867 = vmatprep.mubr.msk.f32.mxu0 %vm233_vm0, %v5970_v24  ;;  %19029 = vmatpush3.msra.mxu0 %v7022_v61  ;;  %6783 = vst.msk [vmem:[#allocation3 + $0x18] sm:$0xff] %vm6778_vm2, %v26518_v10  ;;  %v5973_v61 = vld [vmem:[#allocation2 + $0x21a] sm:$0xff]  ;;  %v7019_v12 = vld [vmem:[%s26166_s5 + $0x10] sm:$0xff] }
 0x27e   :  { %v4846_v16 = vpop.f32.mrf.mxu0  ;;  %19030 = vmatprep.subr.mxu0 %v22541_v5  ;;  %6786 = vst.msk [vmem:[#allocation3 + $0x30] sm:$0xff] %vm6778_vm2, %v26518_v10  ;;  %6787 = vst.msk [vmem:[#allocation3 + $0x38] sm:$0xff] %vm6778_vm2, %v26518_v10  ;;  %v5976_v44 = vld [vmem:[#allocation2 + $0x242] sm:$0xff] }
 0x27f   :  { %v22543_v54 = vpop.f32.mrf.mxu1  ;;  %v22549_v31 = vadd.f32 %v4846_v16, %v22146_v42  ;;  %6789 = vst.msk [vmem:[#allocation3 + $0x48] sm:$0xff] %vm6778_vm2, %v26518_v10  ;;  %6790 = vst.msk [vmem:[#allocation3 + $0x50] sm:$0xff] %vm6778_vm2, %v26518_v10  ;;  %19031 = vmatpush3.msra.mxu0 %v22541_v5  ;;  %v7020_v42 = vld [vmem:[%s26166_s5 + $0x18] sm:$0xff]  ;;  %v5974_v16 = vld [vmem:[#allocation2 + $0x22a] sm:$0xff] }
 0x280   :  { %6792 = vst.msk [vmem:[#allocation3 + $0x60] sm:$0xff] %vm6778_vm2, %v26518_v10  ;;  %6793 = vst.msk [vmem:[#allocation3 + $0x68] sm:$0xff] %vm6778_vm2, %v26518_v10  ;;  %v18625_v6 = vpop.f32.mrf.mxu0  ;;  %18868 = vmatmul.mubr.msk.f32.gmra.mxu0 %vm233_vm0, %v22536_v56  ;;  %19032 = vmatprep.subr.mxu0 %v7020_v42 }
 0x281   :  { %6795 = vst.msk [vmem:[#allocation3 + $0x78] sm:$0xff] %vm6778_vm2, %v26518_v10  ;;  %6796 = vst.msk [vmem:[#allocation3 + $0x80] sm:$0xff] %vm6778_vm2, %v26518_v10  ;;  %v22774_v24 = vadd.f32 %v18625_v6, %v22152_v47  ;;  %18870 = vmatprep.mubr.msk.f32.mxu0 %vm233_vm0, %v22545_v33  ;;  %19033 = vmatpush3.msra.mxu0 %v7020_v42  ;;  %v22781_v5 = vpop.f32.mrf.mxu1  ;;  %v7018_v47 = vld [vmem:[%s26166_s5 + $0x8] sm:$0xff]  ;;  %v5975_v6 = vld [vmem:[#allocation2 + $0x232] sm:$0xff] }
 0x282   :  { %6798 = vst.msk [vmem:[#allocation3 + $0x90] sm:$0xff] %vm6778_vm2, %v26518_v10  ;;  %6799 = vst.msk [vmem:[#allocation3 + $0x98] sm:$0xff] %vm6778_vm2, %v26518_v10  ;;  %v4856_v56 = vpop.f32.mrf.mxu0  ;;  %19034 = vmatprep.subr.mxu0 %v7019_v12 }
 0x283   :  { %6801 = vst.msk [vmem:[#allocation3 + $0xa8] sm:$0xff] %vm6778_vm2, %v26518_v10  ;;  %6802 = vst.msk [vmem:[#allocation3 + $0xb0] sm:$0xff] %vm6778_vm2, %v26518_v10  ;;  %19035 = vmatpush3.msra.mxu0 %v7019_v12  ;;  %v22797_v12 = vpop.f32.mrf.mxu1  ;;  %v7025_v4 = vld [vmem:[#allocation3 + $0x1] sm:$0xff] }
 0x284   :  { %6804 = vst.msk [vmem:[#allocation3 + $0xc0] sm:$0xff] %vm6778_vm2, %v26518_v10  ;;  %6805 = vst.msk [vmem:[#allocation3 + $0xc8] sm:$0xff] %vm6778_vm2, %v26518_v10  ;;  %v18628_v33 = vpop.f32.mrf.mxu0  ;;  %18871 = vmatmul.mubr.msk.f32.gmra.mxu0 %vm233_vm0, %v5973_v61  ;;  %19036 = vmatprep.subr.mxu0 %v7018_v47 }
 0x285   :  { %6807 = vst.msk [vmem:[#allocation3 + $0xd8] sm:$0xff] %vm6778_vm2, %v26518_v10  ;;  %6808 = vst.msk [vmem:[#allocation3 + $0xe0] sm:$0xff] %vm6778_vm2, %v26518_v10  ;;  %v22791_v42 = vadd.f32 %v18628_v33, %v22164_v27  ;;  %18873 = vmatprep.mubr.msk.f32.mxu0 %vm233_vm0, %v5974_v16  ;;  %19037 = vmatpush3.msra.mxu0 %v7018_v47  ;;  %v5977_v33 = vld [vmem:[#allocation2 + $0x24a] sm:$0xff]  ;;  %v22809_v39 = vpop.f32.mrf.mxu1 }
 0x286   :  { %6810 = vst.msk [vmem:[#allocation3 + $0xf0] sm:$0xff] %vm6778_vm2, %v26518_v10  ;;  %6811 = vst.msk [vmem:[#allocation3 + $0xf8] sm:$0xff] %vm6778_vm2, %v26518_v10  ;;  %18928 = vmatprep.mubr.msk.f32.mxu1 %vm6778_vm2, %v7025_v4 }
 0x287   :  { %6813 = vst.msk [vmem:[#allocation3 + $0x108] sm:$0xff] %vm6778_vm2, %v26518_v10  ;;  %6814 = vst.msk [vmem:[#allocation3 + $0x110] sm:$0xff] %vm6778_vm2, %v26518_v10 }
 0x288   :  { %6816 = vst.msk [vmem:[#allocation3 + $0x120] sm:$0xff] %vm6778_vm2, %v26518_v10  ;;  %6817 = vst.msk [vmem:[#allocation3 + $0x128] sm:$0xff] %vm6778_vm2, %v26518_v10  ;;  %18874 = vmatmul.mubr.msk.f32.gmra.mxu0 %vm233_vm0, %v5975_v6 }
 0x289   :  { %6819 = vst.msk [vmem:[#allocation3 + $0x138] sm:$0xff] %vm6778_vm2, %v26518_v10  ;;  %6820 = vst.msk [vmem:[#allocation3 + $0x140] sm:$0xff] %vm6778_vm2, %v26518_v10  ;;  %18876 = vmatprep.mubr.msk.f32.mxu0 %vm233_vm0, %v5976_v44 }
 0x28a   :  { %6822 = vst.msk [vmem:[#allocation3 + $0x150] sm:$0xff] %vm6778_vm2, %v26518_v10  ;;  %6823 = vst.msk [vmem:[#allocation3 + $0x158] sm:$0xff] %vm6778_vm2, %v26518_v10 }
 0x28b   :  { %6825 = vst.msk [vmem:[#allocation3 + $0x168] sm:$0xff] %vm6778_vm2, %v26518_v10  ;;  %6826 = vst.msk [vmem:[#allocation3 + $0x170] sm:$0xff] %vm6778_vm2, %v26518_v10 }
 0x28c   :  { %6828 = vst.msk [vmem:[#allocation3 + $0x180] sm:$0xff] %vm6778_vm2, %v26518_v10  ;;  %6829 = vst.msk [vmem:[#allocation3 + $0x188] sm:$0xff] %vm6778_vm2, %v26518_v10  ;;  %18877 = vmatmul.mubr.msk.f32.gmra.mxu0 %vm233_vm0, %v5977_v33 }
 0x28d   :  { %6831 = vst.msk [vmem:[#allocation3 + $0x198] sm:$0xff] %vm6778_vm2, %v26518_v10  ;;  %6832 = vst.msk [vmem:[#allocation3 + $0x1a0] sm:$0xff] %vm6778_vm2, %v26518_v10 }
 0x28e   :  { %6834 = vst.msk [vmem:[#allocation3 + $0x1b0] sm:$0xff] %vm6778_vm2, %v26518_v10  ;;  %6835 = vst.msk [vmem:[#allocation3 + $0x1b8] sm:$0xff] %vm6778_vm2, %v26518_v10 }
 0x28f   :  { %6837 = vst.msk [vmem:[#allocation3 + $0x1c8] sm:$0xff] %vm6778_vm2, %v26518_v10  ;;  %6838 = vst.msk [vmem:[#allocation3 + $0x1d0] sm:$0xff] %vm6778_vm2, %v26518_v10 }
 0x290   :  { %6840 = vst.msk [vmem:[#allocation3 + $0x1e0] sm:$0xff] %vm6778_vm2, %v26518_v10  ;;  %6841 = vst.msk [vmem:[#allocation3 + $0x1e8] sm:$0xff] %vm6778_vm2, %v26518_v10 }
 0x291   :  { %6843 = vst.msk [vmem:[#allocation3 + $0x1f8] sm:$0xff] %vm6778_vm2, %v26518_v10  ;;  %6844 = vst.msk [vmem:[#allocation3 + $0x200] sm:$0xff] %vm6778_vm2, %v26518_v10 }
 0x292   :  { %6846 = vst.msk [vmem:[#allocation3 + $0x210] sm:$0xff] %vm6778_vm2, %v26518_v10  ;;  %6847 = vst.msk [vmem:[#allocation3 + $0x218] sm:$0xff] %vm6778_vm2, %v26518_v10 }
 0x293   :  { %6849 = vst.msk [vmem:[#allocation3 + $0x228] sm:$0xff] %vm6778_vm2, %v26518_v10  ;;  %6850 = vst.msk [vmem:[#allocation3 + $0x230] sm:$0xff] %vm6778_vm2, %v26518_v10 }
 0x294   :  { %6852 = vst.msk [vmem:[#allocation3 + $0x240] sm:$0xff] %vm6778_vm2, %v26518_v10  ;;  %6853 = vst.msk [vmem:[#allocation3 + $0x248] sm:$0xff] %vm6778_vm2, %v26518_v10 }
 0x295   :  { %6855 = vst.msk [vmem:[#allocation3 + $0x258] sm:$0xff] %vm6778_vm2, %v26518_v10  ;;  %6856 = vst.msk [vmem:[#allocation3 + $0x260] sm:$0xff] %vm6778_vm2, %v26518_v10 }
 0x296   :  { %6858 = vst.msk [vmem:[#allocation3 + $0x270] sm:$0xff] %vm6778_vm2, %v26518_v10  ;;  %6859 = vst.msk [vmem:[#allocation3 + $0x278] sm:$0xff] %vm6778_vm2, %v26518_v10 }
 0x297   :  { %6861 = vst.msk [vmem:[#allocation3 + $0x288] sm:$0xff] %vm6778_vm2, %v26518_v10  ;;  %6862 = vst.msk [vmem:[#allocation3 + $0x290] sm:$0xff] %vm6778_vm2, %v26518_v10 }
 0x298   :  { %6864 = vst.msk [vmem:[#allocation3 + $0x2a0] sm:$0xff] %vm6778_vm2, %v26518_v10  ;;  %6865 = vst.msk [vmem:[#allocation3 + $0x2a8] sm:$0xff] %vm6778_vm2, %v26518_v10 }
 0x299   :  { %6867 = vst.msk [vmem:[#allocation3 + $0x2b8] sm:$0xff] %vm6778_vm2, %v26518_v10  ;;  %6868 = vst.msk [vmem:[#allocation3 + $0x2c0] sm:$0xff] %vm6778_vm2, %v26518_v10 }
 0x29a   :  { %6870 = vst.msk [vmem:[#allocation3 + $0x2d0] sm:$0xff] %vm6778_vm2, %v26518_v10  ;;  %6871 = vst.msk [vmem:[#allocation3 + $0x2d8] sm:$0xff] %vm6778_vm2, %v26518_v10 }
 0x29b   :  { %6873 = vst.msk [vmem:[#allocation3 + $0x2e8] sm:$0xff] %vm6778_vm2, %v26518_v10  ;;  %6874 = vst.msk [vmem:[#allocation3 + $0x2f0] sm:$0xff] %vm6778_vm2, %v26518_v10 }
 0x29c   :  { %6876 = vst.msk [vmem:[#allocation3 + $0x300] sm:$0xff] %vm6778_vm2, %v26518_v10  ;;  %6877 = vst.msk [vmem:[#allocation3 + $0x308] sm:$0xff] %vm6778_vm2, %v26518_v10 }
 0x29d   :  { %6879 = vst.msk [vmem:[#allocation3 + $0x318] sm:$0xff] %vm6778_vm2, %v26518_v10  ;;  %6880 = vst.msk [vmem:[#allocation3 + $0x320] sm:$0xff] %vm6778_vm2, %v26518_v10 }
 0x29e   :  { %6882 = vst.msk [vmem:[#allocation3 + $0x330] sm:$0xff] %vm6778_vm2, %v26518_v10  ;;  %6883 = vst.msk [vmem:[#allocation3 + $0x338] sm:$0xff] %vm6778_vm2, %v26518_v10 }
 0x29f   :  { %6885 = vst.msk [vmem:[#allocation3 + $0x348] sm:$0xff] %vm6778_vm2, %v26518_v10  ;;  %6886 = vst.msk [vmem:[#allocation3 + $0x350] sm:$0xff] %vm6778_vm2, %v26518_v10 }
 0x2a0   :  { %6785 = vst.msk [vmem:[#allocation3 + $0x28] sm:$0x3] %vm6781_vm3, %v26518_v10  ;;  %6782 = vst.msk [vmem:[#allocation3 + $0x10] sm:$0x3] %vm6781_vm3, %v26518_v10 }
 0x2a1   :  { %6788 = vst.msk [vmem:[#allocation3 + $0x40] sm:$0x3] %vm6781_vm3, %v26518_v10  ;;  %6791 = vst.msk [vmem:[#allocation3 + $0x58] sm:$0x3] %vm6781_vm3, %v26518_v10 }
 0x2a2   :  { %6794 = vst.msk [vmem:[#allocation3 + $0x70] sm:$0x3] %vm6781_vm3, %v26518_v10  ;;  %6797 = vst.msk [vmem:[#allocation3 + $0x88] sm:$0x3] %vm6781_vm3, %v26518_v10 }
 0x2a3   :  { %6800 = vst.msk [vmem:[#allocation3 + $0xa0] sm:$0x3] %vm6781_vm3, %v26518_v10  ;;  %6803 = vst.msk [vmem:[#allocation3 + $0xb8] sm:$0x3] %vm6781_vm3, %v26518_v10 }
 0x2a4   :  { %6806 = vst.msk [vmem:[#allocation3 + $0xd0] sm:$0x3] %vm6781_vm3, %v26518_v10  ;;  %6809 = vst.msk [vmem:[#allocation3 + $0xe8] sm:$0x3] %vm6781_vm3, %v26518_v10 }
 0x2a5   :  { %6812 = vst.msk [vmem:[#allocation3 + $0x100] sm:$0x3] %vm6781_vm3, %v26518_v10  ;;  %6815 = vst.msk [vmem:[#allocation3 + $0x118] sm:$0x3] %vm6781_vm3, %v26518_v10 }
 0x2a6   :  { %6818 = vst.msk [vmem:[#allocation3 + $0x130] sm:$0x3] %vm6781_vm3, %v26518_v10  ;;  %6821 = vst.msk [vmem:[#allocation3 + $0x148] sm:$0x3] %vm6781_vm3, %v26518_v10 }
 0x2a7   :  { %6824 = vst.msk [vmem:[#allocation3 + $0x160] sm:$0x3] %vm6781_vm3, %v26518_v10  ;;  %6827 = vst.msk [vmem:[#allocation3 + $0x178] sm:$0x3] %vm6781_vm3, %v26518_v10  ;;  %v7026_v27 = vld [vmem:[#allocation3 + $0x9] sm:$0xff] }
 0x2a8   :  { %6830 = vst.msk [vmem:[#allocation3 + $0x190] sm:$0x3] %vm6781_vm3, %v26518_v10  ;;  %6833 = vst.msk [vmem:[#allocation3 + $0x1a8] sm:$0x3] %vm6781_vm3, %v26518_v10  ;;  %18929 = vmatmul.mubr.msk.f32.vlgmr.msra.gmra.mxu1 %vm6778_vm2, %v7026_v27  ;;  %v5980_v27 = vld [vmem:[#allocation2 + $0x272] sm:$0xff] }
 0x2a9   :  { %6836 = vst.msk [vmem:[#allocation3 + $0x1c0] sm:$0x3] %vm6781_vm3, %v26518_v10  ;;  %6839 = vst.msk [vmem:[#allocation3 + $0x1d8] sm:$0x3] %vm6781_vm3, %v26518_v10 }
 0x2aa   :  { %6842 = vst.msk [vmem:[#allocation3 + $0x1f0] sm:$0x3] %vm6781_vm3, %v26518_v10  ;;  %6845 = vst.msk [vmem:[#allocation3 + $0x208] sm:$0x3] %vm6781_vm3, %v26518_v10 }
 0x2ab   :  { %6848 = vst.msk [vmem:[#allocation3 + $0x220] sm:$0x3] %vm6781_vm3, %v26518_v10  ;;  %6851 = vst.msk [vmem:[#allocation3 + $0x238] sm:$0x3] %vm6781_vm3, %v26518_v10 }
 0x2ac   :  { %6854 = vst.msk [vmem:[#allocation3 + $0x250] sm:$0x3] %vm6781_vm3, %v26518_v10  ;;  %6857 = vst.msk [vmem:[#allocation3 + $0x268] sm:$0x3] %vm6781_vm3, %v26518_v10 }
 0x2ad   :  { %6860 = vst.msk [vmem:[#allocation3 + $0x280] sm:$0x3] %vm6781_vm3, %v26518_v10  ;;  %6863 = vst.msk [vmem:[#allocation3 + $0x298] sm:$0x3] %vm6781_vm3, %v26518_v10 }
 0x2ae   :  { %6866 = vst.msk [vmem:[#allocation3 + $0x2b0] sm:$0x3] %vm6781_vm3, %v26518_v10  ;;  %6869 = vst.msk [vmem:[#allocation3 + $0x2c8] sm:$0x3] %vm6781_vm3, %v26518_v10 }
 0x2af   :  { %6872 = vst.msk [vmem:[#allocation3 + $0x2e0] sm:$0x3] %vm6781_vm3, %v26518_v10  ;;  %6875 = vst.msk [vmem:[#allocation3 + $0x2f8] sm:$0x3] %vm6781_vm3, %v26518_v10 }
 0x2b0   :  { %6878 = vst.msk [vmem:[#allocation3 + $0x310] sm:$0x3] %vm6781_vm3, %v26518_v10  ;;  %6881 = vst.msk [vmem:[#allocation3 + $0x328] sm:$0x3] %vm6781_vm3, %v26518_v10 }
 0x2b1   :  { %6884 = vst.msk [vmem:[#allocation3 + $0x340] sm:$0x3] %vm6781_vm3, %v26518_v10  ;;  %6887 = vst.msk [vmem:[#allocation3 + $0x358] sm:$0x3] %vm6781_vm3, %v26518_v10  ;;  %v22784_v10 = vadd.f32 %v4856_v56, %v22158_v22  ;;  %v7017_v22 = vld [vmem:[%s26166_s5] sm:$0xff]  ;;  %v4866_v56 = vpop.f32.mrf.mxu0 }
 0x2b2   :  { %19038 = vmatprep.subr.mxu0 %v7017_v22  ;;  %v22800_v61 = vadd.f32 %v4866_v56, %v22170_v58  ;;  %v5978_v58 = vld [vmem:[#allocation2 + $0x25a] sm:$0xff] }
 0x2b3   :  { %19039 = vmatpush3.msra.mxu0 %v7017_v22  ;;  %v18631_v16 = vpop.f32.mrf.mxu0  ;;  %18879 = vmatprep.mubr.msk.f32.mxu0 %vm233_vm0, %v5978_v58  ;;  %v22819_v22 = vpop.f32.mrf.mxu1  ;;  %v5981_v58 = vld [vmem:[#allocation2 + $0x27a] sm:$0xff] }
 0x2b4   :  { %v22806_v47 = vadd.f32 %v18631_v16, %v22179_v57  ;;  %v5979_v57 = vld [vmem:[#allocation2 + $0x262] sm:$0xff]  ;;  %v26519_v16 = vld [vmem:[#allocation50_spill] sm:$0xff] }
 0x2b5   :  { %v4876_v34 = vpop.f32.mrf.mxu0  ;;  %18880 = vmatmul.mubr.msk.f32.gmra.mxu0 %vm233_vm0, %v5979_v57 }
 0x2b6   :  { %v22812_v56 = vadd.f32 %v4876_v34, %v22185_v60  ;;  %v16171_v60 = vld [vmem:[%s26166_s5 + $0xb8] sm:$0xff]  ;;  %18882 = vmatprep.mubr.msk.f32.mxu0 %vm233_vm0, %v5980_v27 }
 0x2b7   :  { %v18634_v4 = vpop.f32.mrf.mxu0  ;;  %19136 = vmatprep.subr.mxu1 %v16171_v60 }
 0x2b8   :  { %v22816_v6 = vadd.f32 %v18634_v4, %v22191_v28  ;;  %v26520_v28 = vld [vmem:[#allocation51_spill] sm:$0xff]  ;;  %19137 = vmatpush3.msra.mxu1 %v16171_v60  ;;  %v22832_v4 = vpop.f32.mrf.mxu1 }
 0x2b9   :  { %v4886_v44 = vpop.f32.mrf.mxu0  ;;  %18883 = vmatmul.mubr.msk.f32.gmra.mxu0 %vm233_vm0, %v5981_v58  ;;  %v5984_v60 = vld [vmem:[#allocation2 + $0x2a2] sm:$0xff]  ;;  %v5986_v58 = vld [vmem:[#allocation2 + $0x2ba] sm:$0xff] }
 0x2ba   :  { %v22822_v32 = vadd.f32 %v4886_v44, %v26519_v16  ;;  %v5982_v44 = vld [vmem:[#allocation2 + $0x28a] sm:$0xff] }
 0x2bb   :  { %v18637_v34 = vpop.f32.mrf.mxu0  ;;  %18885 = vmatprep.mubr.msk.f32.mxu0 %vm233_vm0, %v5982_v44 }
 0x2bc   :  { %v22829_v33 = vadd.f32 %v18637_v34, %v26520_v28  ;;  %v5983_v34 = vld [vmem:[#allocation2 + $0x292] sm:$0xff]  ;;  %v22842_v28 = vpop.f32.mrf.mxu1 }
 0x2bd   :  { %v4896_v59 = vpop.f32.mrf.mxu0  ;;  %18886 = vmatmul.mubr.msk.f32.gmra.mxu0 %vm233_vm0, %v5983_v34 }
 0x2be   :  { %v22835_v16 = vadd.f32 %v4896_v59, %v22209_v11  ;;  %18888 = vmatprep.mubr.msk.f32.mxu0 %vm233_vm0, %v5984_v60  ;;  %v5988_v60 = vld [vmem:[#allocation2 + $0x2d2] sm:$0xff] }
 0x2bf   :  { %v18640_v19 = vpop.f32.mrf.mxu0 }
 0x2c0   :  { %v22839_v57 = vadd.f32 %v18640_v19, %v26521_v14  ;;  %v5985_v14 = vld [vmem:[#allocation2 + $0x2aa] sm:$0xff]  ;;  %v22852_v19 = vpop.f32.mrf.mxu1 }
 0x2c1   :  { %v4906_v27 = vpop.f32.mrf.mxu0  ;;  %18889 = vmatmul.mubr.msk.f32.gmra.mxu0 %vm233_vm0, %v5985_v14 }
 0x2c2   :  { %v22845_v26 = vadd.f32 %v4906_v27, %v26522_v13  ;;  %v4473_v13 = vadd.f32 %v22241_v37, %v22244_v50  ;;  %18891 = vmatprep.mubr.msk.f32.mxu0 %vm233_vm0, %v5986_v58  ;;  %v5989_v50 = vld [vmem:[#allocation2 + $0x2da] sm:$0xff] }
 0x2c3   :  { %v18643_v15 = vpop.f32.mrf.mxu0 }
 0x2c4   :  { %v22849_v11 = vadd.f32 %v18643_v15, %v22230_v2  ;;  %v5987_v2 = vld [vmem:[#allocation2 + $0x2c2] sm:$0xff]  ;;  %v22864_v15 = vpop.f32.mrf.mxu1 }
 0x2c5   :  { %v4916_v59 = vpop.f32.mrf.mxu0  ;;  %18892 = vmatmul.mubr.msk.f32.gmra.mxu0 %vm233_vm0, %v5987_v2  ;;  %v5991_v2 = vld [vmem:[#allocation2 + $0x2f2] sm:$0xff] }
 0x2c6   :  { %v22855_v44 = vadd.f32 %v4916_v59, %v22236_v52  ;;  %v16170_v52 = vld [vmem:[%s26166_s5 + $0xb0] sm:$0xff]  ;;  %18894 = vmatprep.mubr.msk.f32.mxu0 %vm233_vm0, %v5988_v60  ;;  %v5992_v60 = vld [vmem:[#allocation2 + $0x302] sm:$0xff] }
 0x2c7   :  { %v18646_v20 = vpop.f32.mrf.mxu0  ;;  %19138 = vmatprep.subr.mxu1 %v16170_v52  ;;  %v5990_v59 = vld [vmem:[#allocation2 + $0x2ea] sm:$0xff] }
 0x2c8   :  { %v22861_v34 = vadd.f32 %v18646_v20, %v22246_v0  ;;  %19139 = vmatpush3.msra.mxu1 %v16170_v52  ;;  %v22876_v0 = vpop.f32.mrf.mxu1 }
 0x2c9   :  { %v4926_v27 = vpop.f32.mrf.mxu0  ;;  %18895 = vmatmul.mubr.msk.f32.gmra.mxu0 %vm233_vm0, %v5989_v50  ;;  %v5993_v50 = vld [vmem:[#allocation2 + $0x30a] sm:$0xff] }
 0x2ca   :  { %v22866_v45 = vadd.f32 %v4926_v27, %v4473_v13  ;;  %18897 = vmatprep.mubr.msk.f32.mxu0 %vm233_vm0, %v5990_v59  ;;  %v5994_v59 = vld [vmem:[#allocation2 + $0x31a] sm:$0xff] }
 0x2cb   :  { %v18649_v14 = vpop.f32.mrf.mxu0 }
 0x2cc   :  { %v22873_v37 = vadd.f32 %v18649_v14, %v22260_v30  ;;  %v22885_v30 = vpop.f32.mrf.mxu1 }
 0x2cd   :  { %v22878_v20 = vpop.f32.mrf.mxu0  ;;  %18898 = vmatmul.mubr.msk.f32.gmra.mxu0 %vm233_vm0, %v5991_v2  ;;  %v5995_v2 = vld [vmem:[#allocation2 + $0x322] sm:$0xff] }
 0x2ce   :  { %26523 = vst [vmem:[#allocation29_spill] sm:$0xff] %v22873_v37  ;;  %18900 = vmatprep.mubr.msk.f32.mxu0 %vm233_vm0, %v5992_v60  ;;  %v22894_v62 = vpop.f32.mrf.mxu1  ;;  %v5996_v60 = vld [vmem:[#allocation2 + $0x332] sm:$0xff] }
 0x2cf   :  { %v18652_v58 = vpop.f32.mrf.mxu0 }
 0x2d0   :  { %v22882_v13 = vadd.f32 %v18652_v58, %v22274_v35 }
 0x2d1   :  { %v22887_v27 = vpop.f32.mrf.mxu0  ;;  %18901 = vmatmul.mubr.msk.f32.gmra.mxu0 %vm233_vm0, %v5993_v50 }
 0x2d2   :  { %26524 = vst [vmem:[#allocation83_spill] sm:$0xff] %v22882_v13  ;;  %26525 = vst [vmem:[#allocation31_spill] sm:$0xff] %v22887_v27  ;;  %18903 = vmatprep.mubr.msk.f32.mxu0 %vm233_vm0, %v5994_v59  ;;  %v22903_v27 = vpop.f32.mrf.mxu1 }
 0x2d3   :  { %v18655_v52 = vpop.f32.mrf.mxu0 }
 0x2d4   :  { %v22891_v14 = vadd.f32 %v18655_v52, %v22291_v49  ;;  %v16169_v52 = vld [vmem:[%s26166_s5 + $0xa8] sm:$0xff]  ;;  %v22915_v59 = vpop.f32.mrf.mxu1 }
 0x2d5   :  { %v22896_v35 = vpop.f32.mrf.mxu0  ;;  %18904 = vmatmul.mubr.msk.f32.gmra.mxu0 %vm233_vm0, %v5995_v2  ;;  %19140 = vmatprep.subr.mxu1 %v16169_v52  ;;  %v5999_v2 = vld [vmem:[#allocation2 + $0x352] sm:$0xff] }
 0x2d6   :  { %26526 = vst [vmem:[#allocation30_spill] sm:$0xff] %v22891_v14  ;;  %26527 = vst [vmem:[#allocation32_spill] sm:$0xff] %v22896_v35  ;;  %18906 = vmatprep.mubr.msk.f32.mxu0 %vm233_vm0, %v5996_v60  ;;  %19141 = vmatpush3.msra.mxu1 %v16169_v52  ;;  %v6953_v60 = vld [vmem:[#allocation3] sm:$0xff] }
 0x2d7   :  { %v18658_v58 = vpop.f32.mrf.mxu0 }
 0x2d8   :  { %v22900_v13 = vadd.f32 %v18658_v58, %v22305_v1  ;;  %v5997_v1 = vld [vmem:[#allocation2 + $0x33a] sm:$0xff] }
 0x2d9   :  { %v22905_v49 = vpop.f32.mrf.mxu0  ;;  %18907 = vmatmul.mubr.msk.f32.gmra.mxu0 %vm233_vm0, %v5997_v1  ;;  %v6954_v1 = vld [vmem:[#allocation3 + $0x8] sm:$0xff] }
 0x2da   :  { %26528 = vst [vmem:[#allocation33_spill] sm:$0xff] %v22900_v13  ;;  %26529 = vst [vmem:[#allocation35_spill] sm:$0xff] %v22905_v49  ;;  %v5998_v13 = vld [vmem:[#allocation2 + $0x34a] sm:$0xff] }
 0x2db   :  { %v18661_v14 = vpop.f32.mrf.mxu0  ;;  %18909 = vmatprep.mubr.msk.f32.mxu0 %vm233_vm0, %v5998_v13 }
 0x2dc   :  { %v22912_v50 = vadd.f32 %v18661_v14, %v22319_v21  ;;  %v22924_v21 = vpop.f32.mrf.mxu1 }
 0x2dd   :  { %v22917_v58 = vpop.f32.mrf.mxu0  ;;  %18910 = vmatmul.mubr.msk.f32.gmra.mxu0 %vm233_vm0, %v5999_v2 }
 0x2de   :  { %26530 = vst [vmem:[#allocation34_spill] sm:$0xff] %v22912_v50  ;;  %26531 = vst [vmem:[#allocation7_spill] sm:$0xff] %v22917_v58  ;;  %19040 = vmatprep.mubr.msk.f32.mxu0 %vm6778_vm2, %v6953_v60  ;;  %v22933_v58 = vpop.f32.mrf.mxu1 }
 0x2df   :  { %v18664_v49 = vpop.f32.mrf.mxu0 }
 0x2e0   :  { %v22921_v35 = vadd.f32 %v18664_v49, %v22332_v46 }
 0x2e1   :  { %v22926_v14 = vpop.f32.mrf.mxu0  ;;  %19041 = vmatmul.mubr.msk.f32.vlgmr.msra.gmra.mxu0 %vm6778_vm2, %v6954_v1 }
 0x2e2   :  { %26532 = vst [vmem:[#allocation36_spill] sm:$0xff] %v22921_v35  ;;  %26533 = vst [vmem:[#allocation37_spill] sm:$0xff] %v22926_v14  ;;  %v22941_v35 = vpop.f32.mrf.mxu1 }
 0x2e3   :  { %v18667_v52 = vpop.f32.mrf.mxu0 }
 0x2e4   :  { %v22930_v50 = vadd.f32 %v18667_v52, %v22346_v9  ;;  %v16168_v9 = vld [vmem:[%s26166_s5 + $0xa0] sm:$0xff]  ;;  %v22951_v52 = vpop.f32.mrf.mxu1 }
 0x2e5   :  { %v22935_v46 = vpop.f32.mrf.mxu0  ;;  %19142 = vmatprep.subr.mxu1 %v16168_v9 }
 0x2e6   :  { %26534 = vst [vmem:[#allocation8_spill] sm:$0xff] %v22930_v50  ;;  %26535 = vst [vmem:[#allocation9_spill] sm:$0xff] %v22935_v46  ;;  %19143 = vmatpush3.msra.mxu1 %v16168_v9 }
 0x2e7   :  { %v18670_v13 = vpop.f32.mrf.mxu0 }
 0x2e8   :  { %v22939_v49 = vadd.f32 %v18670_v13, %v22356_v51 }
 0x2e9   :  { %v22943_v14 = vpop.f32.mrf.mxu0 }
 0x2ea   :  { %26536 = vst [vmem:[#allocation10_spill] sm:$0xff] %v22939_v49  ;;  %26537 = vst [vmem:[#allocation11_spill] sm:$0xff] %v22943_v14  ;;  %v22958_v49 = vpop.f32.mrf.mxu1 }
 0x2eb   :  { %v18673_v2 = vpop.f32.mrf.mxu0 }
 0x2ec   :  { %v22949_v60 = vadd.f32 %v18673_v2, %v22366_v41  ;;  %v22965_v37 = vpop.f32.mrf.mxu1 }
 0x2ed   :  { %v22953_v1 = vpop.f32.mrf.mxu0 }
 0x2ee   :  { %26538 = vst [vmem:[#allocation39_spill] sm:$0xff] %v22949_v60  ;;  %26539 = vst [vmem:[#allocation38_spill] sm:$0xff] %v22953_v1  ;;  %v22972_v60 = vpop.f32.mrf.mxu1 }
 0x2ef   :  { %v18676_v51 = vpop.f32.mrf.mxu0 }
 0x2f0   :  { %v22956_v13 = vadd.f32 %v18676_v51, %v22376_v7  ;;  %v16167_v51 = vld [vmem:[%s26166_s5 + $0x98] sm:$0xff] }
 0x2f1   :  { %v22960_v14 = vpop.f32.mrf.mxu0  ;;  %19144 = vmatprep.subr.mxu1 %v16167_v51 }
 0x2f2   :  { %26540 = vst [vmem:[#allocation40_spill] sm:$0xff] %v22956_v13  ;;  %26541 = vst [vmem:[#allocation42_spill] sm:$0xff] %v22960_v14  ;;  %19145 = vmatpush3.msra.mxu1 %v16167_v51 }
 0x2f3   :  { %v18679_v50 = vpop.f32.mrf.mxu0 }
 0x2f4   :  { %v22963_v46 = vadd.f32 %v18679_v50, %v22389_v48  ;;  %v22982_v50 = vpop.f32.mrf.mxu1 }
 0x2f5   :  { %v22967_v41 = vpop.f32.mrf.mxu0 }
 0x2f6   :  { %26542 = vst [vmem:[#allocation41_spill] sm:$0xff] %v22963_v46  ;;  %26543 = vst [vmem:[#allocation43_spill] sm:$0xff] %v22967_v41 }
 0x2f7   :  { %v18682_v9 = vpop.f32.mrf.mxu0 }
 0x2f8   :  { %v22970_v2 = vadd.f32 %v18682_v9, %v22399_v17 }
 0x2f9   :  { %v22974_v7 = vpop.f32.mrf.mxu0 }
 0x2fa   :  { %26544 = vst [vmem:[#allocation44_spill] sm:$0xff] %v22970_v2  ;;  %26545 = vst [vmem:[#allocation46_spill] sm:$0xff] %v22974_v7  ;;  %v22989_v2 = vpop.f32.mrf.mxu1 }
 0x2fb   :  { %v18685_v13 = vpop.f32.mrf.mxu0 }
 0x2fc   :  { %v22980_v48 = vadd.f32 %v18685_v13, %v22409_v55  ;;  %v22996_v1 = vpop.f32.mrf.mxu1 }
 0x2fd   :  { %v22984_v46 = vpop.f32.mrf.mxu0 }
 0x2fe   :  { %26546 = vst [vmem:[#allocation45_spill] sm:$0xff] %v22980_v48  ;;  %26547 = vst [vmem:[#allocation47_spill] sm:$0xff] %v22984_v46  ;;  %v23003_v48 = vpop.f32.mrf.mxu1 }
 0x2ff   :  { %v18688_v17 = vpop.f32.mrf.mxu0 }
 0x300   :  { %v22987_v9 = vadd.f32 %v18688_v17, %v22419_v25  ;;  %v16166_v17 = vld [vmem:[%s26166_s5 + $0x90] sm:$0xff] }
 0x301   :  { %v22991_v7 = vpop.f32.mrf.mxu0  ;;  %19146 = vmatprep.subr.mxu1 %v16166_v17 }
 0x302   :  { %26548 = vst [vmem:[#allocation48_spill] sm:$0xff] %v22987_v9  ;;  %26549 = vst [vmem:[#allocation49_spill] sm:$0xff] %v22991_v7  ;;  %19147 = vmatpush3.msra.mxu1 %v16166_v17 }
 0x303   :  { %v18691_v41 = vpop.f32.mrf.mxu0 }
 0x304   :  { %v22994_v14 = vadd.f32 %v18691_v41, %v22432_v43  ;;  %v23013_v41 = vpop.f32.mrf.mxu1 }
 0x305   :  { %v22998_v55 = vpop.f32.mrf.mxu0 }
 0x306   :  { %26550 = vst [vmem:[#allocation50_spill] sm:$0xff] %v22994_v14  ;;  %26551 = vst [vmem:[#allocation51_spill] sm:$0xff] %v22998_v55 }
 0x307   :  { %v18694_v13 = vpop.f32.mrf.mxu0 }
 0x308   :  { %v23001_v51 = vadd.f32 %v18694_v13, %v22442_v63 }
 0x309   :  { %v23005_v25 = vpop.f32.mrf.mxu0 }
 0x30a   :  { %26552 = vst [vmem:[#allocation52_spill] sm:$0xff] %v23001_v51  ;;  %26553 = vst [vmem:[#allocation53_spill] sm:$0xff] %v23005_v25  ;;  %v23020_v51 = vpop.f32.mrf.mxu1 }
 0x30b   :  { %v18697_v9 = vpop.f32.mrf.mxu0 }
 0x30c   :  { %v23011_v43 = vadd.f32 %v18697_v9, %v22452_v38  ;;  %v23027_v46 = vpop.f32.mrf.mxu1 }
 0x30d   :  { %v23015_v14 = vpop.f32.mrf.mxu0 }
 0x30e   :  { %26554 = vst [vmem:[#allocation84_spill] sm:$0xff] %v23011_v43  ;;  %v23034_v43 = vpop.f32.mrf.mxu1 }
 0x30f   :  { %v18700_v63 = vpop.f32.mrf.mxu0 }
 0x310   :  { %v23018_v13 = vadd.f32 %v18700_v63, %v22462_v40  ;;  %v16165_v63 = vld [vmem:[%s26166_s5 + $0x88] sm:$0xff] }
 0x311   :  { %v23022_v25 = vpop.f32.mrf.mxu0  ;;  %19148 = vmatprep.subr.mxu1 %v16165_v63 }
 0x312   :  { %26555 = vst [vmem:[#allocation85_spill] sm:$0xff] %v23018_v13  ;;  %26556 = vst [vmem:[#allocation86_spill] sm:$0xff] %v23022_v25  ;;  %19149 = vmatpush3.msra.mxu1 %v16165_v63 }
 0x313   :  { %v18703_v55 = vpop.f32.mrf.mxu0 }
 0x314   :  { %v23025_v7 = vadd.f32 %v18703_v55, %v22475_v18  ;;  %v23044_v55 = vpop.f32.mrf.mxu1 }
 0x315   :  { %v23029_v38 = vpop.f32.mrf.mxu0 }
 0x316   :  { %26557 = vst [vmem:[#allocation87_spill] sm:$0xff] %v23025_v7  ;;  %26558 = vst [vmem:[#allocation88_spill] sm:$0xff] %v23029_v38 }
 0x317   :  { %v18706_v9 = vpop.f32.mrf.mxu0 }
 0x318   :  { %v23032_v17 = vadd.f32 %v18706_v9, %v22485_v36 }
 0x319   :  { %v23036_v40 = vpop.f32.mrf.mxu0 }
 0x31a   :  { %26559 = vst [vmem:[#allocation89_spill] sm:$0xff] %v23032_v17  ;;  %26560 = vst [vmem:[#allocation90_spill] sm:$0xff] %v23036_v40  ;;  %v23051_v17 = vpop.f32.mrf.mxu1 }
 0x31b   :  { %v18709_v13 = vpop.f32.mrf.mxu0 }
 0x31c   :  { %v23042_v18 = vadd.f32 %v18709_v13, %v22495_v23  ;;  %v16243_v23 = vld [vmem:[%s26166_s5 + $0xf8] sm:$0xff]  ;;  %v23061_v13 = vpop.f32.mrf.mxu1 }
 0x31d   :  { %v23046_v7 = vpop.f32.mrf.mxu0  ;;  %19248 = vmatprep.subr.mxu0 %v16243_v23 }
 0x31e   :  { %26561 = vst [vmem:[#allocation91_spill] sm:$0xff] %v23042_v18  ;;  %26562 = vst [vmem:[#allocation92_spill] sm:$0xff] %v23046_v7  ;;  %19249 = vmatpush3.msra.mxu0 %v16243_v23 }
 0x31f   :  { %v18712_v36 = vpop.f32.mrf.mxu0 }
 0x320   :  { %v23049_v9 = vadd.f32 %v18712_v36, %v22505_v29  ;;  %v5873_v29 = vadd.f32 %v22530_v53, %v22533_v3  ;;  %v16242_v36 = vld [vmem:[%s26166_s5 + $0xf0] sm:$0xff]  ;;  %v16241_v53 = vld [vmem:[%s26166_s5 + $0xe8] sm:$0xff]  ;;  %v23080_v3 = vpop.f32.mrf.mxu1 }
 0x321   :  { %v23053_v40 = vpop.f32.mrf.mxu0  ;;  %19250 = vmatprep.subr.mxu0 %v16242_v36 }
 0x322   :  { %26563 = vst [vmem:[#allocation93_spill] sm:$0xff] %v23049_v9  ;;  %26564 = vst [vmem:[#allocation94_spill] sm:$0xff] %v23053_v40  ;;  %19251 = vmatpush3.msra.mxu0 %v16242_v36 }
 0x323   :  { %v18715_v38 = vpop.f32.mrf.mxu0  ;;  %19252 = vmatprep.subr.mxu0 %v16241_v53 }
 0x324   :  { %v23056_v25 = vadd.f32 %v18715_v38, %v22524_v8  ;;  %v23073_v8 = vld [vmem:[%s26165_s4] ss:$0 sm:$0xff]  ;;  %v5872_v38 = vadd.f32 %v22543_v54, %v22549_v31  ;;  %19253 = vmatpush3.msra.mxu0 %v16241_v53 }
 0x325   :  { %v23063_v63 = vpop.f32.mrf.mxu0  ;;  %v16164_v54 = vld [vmem:[%s26166_s5 + $0x80] sm:$0xff] }
 0x326   :  { %26565 = vst [vmem:[#allocation95_spill] sm:$0xff] %v23056_v25  ;;  %26566 = vst [vmem:[#allocation96_spill] sm:$0xff] %v23063_v63  ;;  %v5875_v63 = vadd.f32 %v22781_v5, %v22774_v24  ;;  %v16240_v31 = vld [vmem:[%s26166_s5 + $0xe0] sm:$0xff]  ;;  %19150 = vmatprep.subr.mxu1 %v16164_v54 }
 0x327   :  { %v18818_v9 = vpop.f32.mrf.mxu0  ;;  %19254 = vmatprep.subr.mxu0 %v16240_v31  ;;  %19151 = vmatpush3.msra.mxu1 %v16164_v54  ;;  %v5876_v54 = vadd.f32 %v22819_v22, %v22800_v61 }
 0x328   :  { %v6580_v25 = vadd.f32 %v18818_v9, %v5873_v29  ;;  %v5874_v29 = vadd.f32 %v22797_v12, %v22784_v10  ;;  %19255 = vmatpush3.msra.mxu0 %v16240_v31  ;;  %v5877_v10 = vadd.f32 %v22809_v39, %v22791_v42  ;;  %v16237_v39 = vld [vmem:[%s26166_s5 + $0xc8] sm:$0xff] }
 0x329   :  { %v6260_v23 = vpop.f32.mrf.mxu0 }
 0x32a   :  { %v6651_v40 = vadd.f32 %v23073_v8, %v6580_v25  ;;  %v6579_v18 = vadd.f32 %v6260_v23, %v5872_v38  ;;  %v16239_v25 = vld [vmem:[%s26166_s5 + $0xd8] sm:$0xff]  ;;  %v23097_v38 = vpop.f32.mrf.mxu1  ;;  %v16238_v23 = vld [vmem:[%s26166_s5 + $0xd0] sm:$0xff] }
 0x32b   :  { %v18821_v9 = vpop.f32.mrf.mxu0  ;;  %19256 = vmatprep.subr.mxu0 %v16239_v25 }
 0x32c   :  { %v6715_v36 = vmax.f32 %v6651_v40, 0.0  ;;  %v6650_v24 = vadd.f32 %v23073_v8, %v6579_v18  ;;  %v6582_v5 = vadd.f32 %v18821_v9, %v5875_v63  ;;  %19257 = vmatpush3.msra.mxu0 %v16239_v25  ;;  %v23113_v42 = vpop.f32.mrf.mxu1  ;;  %v16315_v25 = vld [vmem:[%s26166_s5 + $0x138] sm:$0xff] }
 0x32d   :  { %v6270_v53 = vpop.f32.mrf.mxu0  ;;  %19258 = vmatprep.subr.mxu0 %v16238_v23  ;;  %19360 = vmatprep.subr.mxu1 %v16315_v25 }
 0x32e   :  { %6890 = vst.msk [vmem:[#allocation3 + $0x21] sm:$0xff] %vm6778_vm2, %v6715_v36  ;;  %v6714_v12 = vmax.f32 %v6650_v24, 0.0  ;;  %v6653_v40 = vadd.f32 %v23073_v8, %v6582_v5  ;;  %v6581_v18 = vadd.f32 %v6270_v53, %v5874_v29  ;;  %19259 = vmatpush3.msra.mxu0 %v16238_v23  ;;  %v5879_v36 = vadd.f32 %v22832_v4, %v22806_v47  ;;  %v16236_v5 = vld [vmem:[%s26166_s5 + $0xc0] sm:$0xff] }
 0x32f   :  { %v18824_v63 = vpop.f32.mrf.mxu0  ;;  %19260 = vmatprep.subr.mxu0 %v16237_v39  ;;  %v5878_v47 = vadd.f32 %v22842_v28, %v22812_v56 }
 0x330   :  { %6889 = vst.msk [vmem:[#allocation3 + $0x19] sm:$0xff] %vm6778_vm2, %v6714_v12  ;;  %v6717_v31 = vmax.f32 %v6653_v40, 0.0  ;;  %v6652_v9 = vadd.f32 %v23073_v8, %v6581_v18  ;;  %v6584_v7 = vadd.f32 %v18824_v63, %v5877_v10  ;;  %19261 = vmatpush3.msra.mxu0 %v16237_v39  ;;  %v23129_v10 = vpop.f32.mrf.mxu1  ;;  %v5881_v40 = vadd.f32 %v22852_v19, %v22816_v6 }
 0x331   :  { %v6280_v29 = vpop.f32.mrf.mxu0  ;;  %19262 = vmatprep.subr.mxu0 %v16236_v5  ;;  %v5880_v39 = vadd.f32 %v22864_v15, %v22822_v32  ;;  %v5883_v32 = vadd.f32 %v22876_v0, %v22829_v33 }
 0x332   :  { %6892 = vst.msk [vmem:[#allocation3 + $0x39] sm:$0xff] %vm6778_vm2, %v6717_v31  ;;  %v6716_v61 = vmax.f32 %v6652_v9, 0.0  ;;  %v6655_v22 = vadd.f32 %v23073_v8, %v6584_v7  ;;  %v6583_v24 = vadd.f32 %v6280_v29, %v5876_v54  ;;  %19263 = vmatpush3.msra.mxu0 %v16236_v5  ;;  %v23141_v19 = vpop.f32.mrf.mxu1 }
 0x333   :  { %v18827_v53 = vpop.f32.mrf.mxu0 }
 0x334   :  { %6891 = vst.msk [vmem:[#allocation3 + $0x31] sm:$0xff] %vm6778_vm2, %v6716_v61  ;;  %v6719_v4 = vmax.f32 %v6655_v22, 0.0  ;;  %v6654_v7 = vadd.f32 %v23073_v8, %v6583_v24  ;;  %v6586_v23 = vadd.f32 %v18827_v53, %v5879_v36  ;;  %v23155_v0 = vpop.f32.mrf.mxu1 }
 0x335   :  { %v6290_v12 = vpop.f32.mrf.mxu0  ;;  %v7028_v6 = vld [vmem:[#allocation3 + $0x21] sm:$0xff] }
 0x336   :  { %6894 = vst.msk [vmem:[#allocation3 + $0x51] sm:$0xff] %vm6778_vm2, %v6719_v4  ;;  %v6718_v18 = vmax.f32 %v6654_v7, 0.0  ;;  %v6657_v63 = vadd.f32 %v23073_v8, %v6586_v23  ;;  %v6585_v54 = vadd.f32 %v6290_v12, %v5878_v47  ;;  %v5882_v7 = vadd.f32 %v22885_v30, %v22835_v16 }
 0x337   :  { %v18830_v56 = vpop.f32.mrf.mxu0  ;;  %v7027_v28 = vld [vmem:[#allocation3 + $0x19] sm:$0xff]  ;;  %v5885_v16 = vadd.f32 %v22894_v62, %v22839_v57  ;;  %v23169_v57 = vpop.f32.mrf.mxu1 }
 0x338   :  { %v6955_v31 = vld [vmem:[#allocation3 + $0x18] sm:$0xff]  ;;  %v6956_v9 = vld [vmem:[#allocation3 + $0x20] sm:$0xff]  ;;  %6893 = vst.msk [vmem:[#allocation3 + $0x49] sm:$0xff] %vm6778_vm2, %v6718_v18  ;;  %v6721_v29 = vmax.f32 %v6657_v63, 0.0  ;;  %v6656_v36 = vadd.f32 %v23073_v8, %v6585_v54  ;;  %v6588_v61 = vadd.f32 %v18830_v56, %v5881_v40  ;;  %18931 = vmatprep.mubr.msk.f32.mxu1 %vm6778_vm2, %v7027_v28 }
 0x339   :  { %19043 = vmatprep.mubr.msk.f32.mxu0 %vm6778_vm2, %v6955_v31  ;;  %v6300_v22 = vpop.f32.mrf.mxu0  ;;  %18932 = vmatmul.mubr.msk.f32.gmra.mxu1 %vm6778_vm2, %v7028_v6  ;;  %v7030_v33 = vld [vmem:[#allocation3 + $0x39] sm:$0xff] }
 0x33a   :  { %19044 = vmatmul.mubr.msk.f32.gmra.mxu0 %vm6778_vm2, %v6956_v9  ;;  %6896 = vst.msk [vmem:[#allocation3 + $0x69] sm:$0xff] %vm6778_vm2, %v6721_v29  ;;  %v6720_v15 = vmax.f32 %v6656_v36, 0.0  ;;  %v6659_v24 = vadd.f32 %v23073_v8, %v6588_v61  ;;  %v6587_v5 = vadd.f32 %v6300_v22, %v5880_v39  ;;  %v5884_v39 = vadd.f32 %v22903_v27, %v22845_v26 }
 0x33b   :  { %v18833_v25 = vpop.f32.mrf.mxu0  ;;  %v7029_v53 = vld [vmem:[#allocation3 + $0x31] sm:$0xff]  ;;  %v5887_v26 = vadd.f32 %v22915_v59, %v22849_v11  ;;  %v26567_v59 = vld [vmem:[#allocation55_spill] sm:$0xff] }
 0x33c   :  { %v6957_v47 = vld [vmem:[#allocation3 + $0x30] sm:$0xff]  ;;  %v6958_v4 = vld [vmem:[#allocation3 + $0x38] sm:$0xff]  ;;  %6895 = vst.msk [vmem:[#allocation3 + $0x61] sm:$0xff] %vm6778_vm2, %v6720_v15  ;;  %v6723_v23 = vmax.f32 %v6659_v24, 0.0  ;;  %v6658_v12 = vadd.f32 %v23073_v8, %v6587_v5  ;;  %v6590_v40 = vadd.f32 %v18833_v25, %v5883_v32  ;;  %18934 = vmatprep.mubr.msk.f32.mxu1 %vm6778_vm2, %v7029_v53  ;;  %v5886_v53 = vadd.f32 %v22924_v21, %v22855_v44 }
 0x33d   :  { %19046 = vmatprep.mubr.msk.f32.mxu0 %vm6778_vm2, %v6957_v47  ;;  %v6310_v18 = vpop.f32.mrf.mxu0  ;;  %18935 = vmatmul.mubr.msk.f32.gmra.mxu1 %vm6778_vm2, %v7030_v33  ;;  %v7032_v62 = vld [vmem:[#allocation3 + $0x51] sm:$0xff]  ;;  %v5889_v44 = vadd.f32 %v22933_v58, %v22861_v34 }
 0x33e   :  { %19047 = vmatmul.mubr.msk.f32.gmra.mxu0 %vm6778_vm2, %v6958_v4  ;;  %6898 = vst.msk [vmem:[#allocation3 + $0x81] sm:$0xff] %vm6778_vm2, %v6723_v23  ;;  %v6722_v30 = vmax.f32 %v6658_v12, 0.0  ;;  %v6661_v63 = vadd.f32 %v23073_v8, %v6590_v40  ;;  %v6589_v54 = vadd.f32 %v6310_v18, %v5882_v7  ;;  %v26568_v23 = vld [vmem:[#allocation54_spill] sm:$0xff]  ;;  %v23185_v40 = vpop.f32.mrf.mxu1 }
 0x33f   :  { %v18836_v56 = vpop.f32.mrf.mxu0  ;;  %v7031_v28 = vld [vmem:[#allocation3 + $0x49] sm:$0xff]  ;;  %v4475_v12 = vadd.f32 %v26568_v23, %v26567_v59  ;;  %v26574_v59 = vld [vmem:[#allocation58_spill] sm:$0xff] }
 0x340   :  { %v6959_v31 = vld [vmem:[#allocation3 + $0x48] sm:$0xff]  ;;  %v6960_v9 = vld [vmem:[#allocation3 + $0x50] sm:$0xff]  ;;  %6897 = vst.msk [vmem:[#allocation3 + $0x79] sm:$0xff] %vm6778_vm2, %v6722_v30  ;;  %v6725_v29 = vmax.f32 %v6661_v63, 0.0  ;;  %v6660_v36 = vadd.f32 %v23073_v8, %v6589_v54  ;;  %v6592_v61 = vadd.f32 %v18836_v56, %v5885_v16  ;;  %18937 = vmatprep.mubr.msk.f32.mxu1 %vm6778_vm2, %v7031_v28  ;;  %v5888_v30 = vadd.f32 %v22941_v35, %v22866_v45  ;;  %v23202_v35 = vpop.f32.mrf.mxu1 }
 0x341   :  { %19049 = vmatprep.mubr.msk.f32.mxu0 %vm6778_vm2, %v6959_v31  ;;  %v6320_v6 = vpop.f32.mrf.mxu0  ;;  %18938 = vmatmul.mubr.msk.f32.gmra.mxu1 %vm6778_vm2, %v7032_v62  ;;  %v7034_v11 = vld [vmem:[#allocation3 + $0x69] sm:$0xff]  ;;  %v5183_v31 = vadd.f32 %v22878_v20, %v4475_v12 }
 0x342   :  { %19050 = vmatmul.mubr.msk.f32.gmra.mxu0 %vm6778_vm2, %v6960_v9  ;;  %6900 = vst.msk [vmem:[#allocation3 + $0x99] sm:$0xff] %vm6778_vm2, %v6725_v29  ;;  %v6724_v27 = vmax.f32 %v6660_v36, 0.0  ;;  %v6663_v22 = vadd.f32 %v23073_v8, %v6592_v61  ;;  %v6591_v32 = vadd.f32 %v6320_v6, %v5884_v39  ;;  %v26569_v29 = vld [vmem:[#allocation57_spill] sm:$0xff]  ;;  %v26570_v36 = vld [vmem:[#allocation56_spill] sm:$0xff]  ;;  %v23218_v12 = vpop.f32.mrf.mxu1 }
 0x343   :  { %v18839_v15 = vpop.f32.mrf.mxu0  ;;  %v7033_v24 = vld [vmem:[#allocation3 + $0x61] sm:$0xff]  ;;  %v4477_v45 = vadd.f32 %v26570_v36, %v26569_v29  ;;  %v26571_v20 = vld [vmem:[#allocation29_spill] sm:$0xff] }
 0x344   :  { %v6961_v5 = vld [vmem:[#allocation3 + $0x60] sm:$0xff]  ;;  %v6962_v25 = vld [vmem:[#allocation3 + $0x68] sm:$0xff]  ;;  %6899 = vst.msk [vmem:[#allocation3 + $0x91] sm:$0xff] %vm6778_vm2, %v6724_v27  ;;  %v6727_v47 = vmax.f32 %v6663_v22, 0.0  ;;  %v6662_v4 = vadd.f32 %v23073_v8, %v6591_v32  ;;  %v6594_v7 = vadd.f32 %v18839_v15, %v5887_v26  ;;  %18940 = vmatprep.mubr.msk.f32.mxu1 %vm6778_vm2, %v7033_v24  ;;  %v5891_v62 = vadd.f32 %v22951_v52, %v26571_v20  ;;  %v26577_v29 = vld [vmem:[#allocation61_spill] sm:$0xff] }
 0x345   :  { %19052 = vmatprep.mubr.msk.f32.mxu0 %vm6778_vm2, %v6961_v5  ;;  %v6330_v33 = vpop.f32.mrf.mxu0  ;;  %18941 = vmatmul.mubr.msk.f32.gmra.mxu1 %vm6778_vm2, %v7034_v11  ;;  %v7036_v39 = vld [vmem:[#allocation3 + $0x81] sm:$0xff]  ;;  %v26579_v20 = vld [vmem:[#allocation30_spill] sm:$0xff] }
 0x346   :  { %19053 = vmatmul.mubr.msk.f32.gmra.mxu0 %vm6778_vm2, %v6962_v25  ;;  %6902 = vst.msk [vmem:[#allocation3 + $0xb1] sm:$0xff] %vm6778_vm2, %v6727_v47  ;;  %v6726_v21 = vmax.f32 %v6662_v4, 0.0  ;;  %v6665_v18 = vadd.f32 %v23073_v8, %v6594_v7  ;;  %v6593_v16 = vadd.f32 %v6330_v33, %v5886_v53  ;;  %v26572_v22 = vld [vmem:[#allocation31_spill] sm:$0xff]  ;;  %v5890_v53 = vadd.f32 %v22958_v49, %v5183_v31  ;;  %v26576_v31 = vld [vmem:[#allocation32_spill] sm:$0xff] }
 0x347   :  { %v18842_v63 = vpop.f32.mrf.mxu0  ;;  %v7035_v54 = vld [vmem:[#allocation3 + $0x79] sm:$0xff]  ;;  %v5185_v32 = vadd.f32 %v26572_v22, %v4477_v45  ;;  %v26578_v36 = vld [vmem:[#allocation60_spill] sm:$0xff]  ;;  %v23234_v45 = vpop.f32.mrf.mxu1 }
 0x348   :  { %v6963_v56 = vld [vmem:[#allocation3 + $0x78] sm:$0xff]  ;;  %v6964_v28 = vld [vmem:[#allocation3 + $0x80] sm:$0xff]  ;;  %6901 = vst.msk [vmem:[#allocation3 + $0xa9] sm:$0xff] %vm6778_vm2, %v6726_v21  ;;  %v6729_v9 = vmax.f32 %v6665_v18, 0.0  ;;  %v6664_v34 = vadd.f32 %v23073_v8, %v6593_v16  ;;  %v6596_v58 = vadd.f32 %v18842_v63, %v5889_v44  ;;  %18943 = vmatprep.mubr.msk.f32.mxu1 %vm6778_vm2, %v7035_v54 }
 0x349   :  { %19055 = vmatprep.mubr.msk.f32.mxu0 %vm6778_vm2, %v6963_v56  ;;  %v6340_v61 = vpop.f32.mrf.mxu0  ;;  %18944 = vmatmul.mubr.msk.f32.gmra.mxu1 %vm6778_vm2, %v7036_v39  ;;  %v7038_v7 = vld [vmem:[#allocation3 + $0x99] sm:$0xff] }
 0x34a   :  { %19056 = vmatmul.mubr.msk.f32.gmra.mxu0 %vm6778_vm2, %v6964_v28  ;;  %6904 = vst.msk [vmem:[#allocation3 + $0xc9] sm:$0xff] %vm6778_vm2, %v6729_v9  ;;  %v6728_v6 = vmax.f32 %v6664_v34, 0.0  ;;  %v6667_v26 = vadd.f32 %v23073_v8, %v6596_v58  ;;  %v6595_v27 = vadd.f32 %v6340_v61, %v5888_v30  ;;  %v26573_v11 = vld [vmem:[#allocation59_spill] sm:$0xff]  ;;  %v5892_v30 = vadd.f32 %v22972_v60, %v5185_v32 }
 0x34b   :  { %v18845_v15 = vpop.f32.mrf.mxu0  ;;  %v7037_v24 = vld [vmem:[#allocation3 + $0x91] sm:$0xff]  ;;  %v4479_v23 = vadd.f32 %v26574_v59, %v26573_v11  ;;  %v26575_v49 = vld [vmem:[#allocation83_spill] sm:$0xff]  ;;  %v4481_v60 = vadd.f32 %v26578_v36, %v26577_v29 }
 0x34c   :  { %v6965_v5 = vld [vmem:[#allocation3 + $0x90] sm:$0xff]  ;;  %v6966_v25 = vld [vmem:[#allocation3 + $0x98] sm:$0xff]  ;;  %6903 = vst.msk [vmem:[#allocation3 + $0xc1] sm:$0xff] %vm6778_vm2, %v6728_v6  ;;  %v6731_v47 = vmax.f32 %v6667_v26, 0.0  ;;  %v6666_v4 = vadd.f32 %v23073_v8, %v6595_v27  ;;  %v6598_v52 = vadd.f32 %v18845_v15, %v5891_v62  ;;  %18946 = vmatprep.mubr.msk.f32.mxu1 %vm6778_vm2, %v7037_v24  ;;  %v5893_v44 = vadd.f32 %v22965_v37, %v26575_v49  ;;  %v26580_v22 = vld [vmem:[#allocation35_spill] sm:$0xff] }
 0x34d   :  { %19058 = vmatprep.mubr.msk.f32.mxu0 %vm6778_vm2, %v6965_v5  ;;  %v6350_v33 = vpop.f32.mrf.mxu0  ;;  %18947 = vmatmul.mubr.msk.f32.gmra.mxu1 %vm6778_vm2, %v7038_v7  ;;  %v5187_v9 = vadd.f32 %v26576_v31, %v4479_v23  ;;  %v7040_v39 = vld [vmem:[#allocation3 + $0xb1] sm:$0xff]  ;;  %v5895_v62 = vadd.f32 %v22982_v50, %v26579_v20  ;;  %v5189_v32 = vadd.f32 %v26580_v22, %v4481_v60  ;;  %v26581_v7 = vld [vmem:[#allocation63_spill] sm:$0xff]  ;;  %v23250_v23 = vpop.f32.mrf.mxu1 }
 0x34e   :  { %19059 = vmatmul.mubr.msk.f32.gmra.mxu0 %vm6778_vm2, %v6966_v25  ;;  %6906 = vst.msk [vmem:[#allocation3 + $0xe1] sm:$0xff] %vm6778_vm2, %v6731_v47  ;;  %v6730_v21 = vmax.f32 %v6666_v4, 0.0  ;;  %v6669_v18 = vadd.f32 %v23073_v8, %v6598_v52  ;;  %v6597_v16 = vadd.f32 %v6350_v33, %v5890_v53  ;;  %v26582_v11 = vld [vmem:[#allocation62_spill] sm:$0xff] }
 0x34f   :  { %v18848_v63 = vpop.f32.mrf.mxu0  ;;  %v7039_v54 = vld [vmem:[#allocation3 + $0xa9] sm:$0xff]  ;;  %v5894_v53 = vadd.f32 %v22989_v2, %v5187_v9  ;;  %v4483_v59 = vadd.f32 %v26582_v11, %v26581_v7  ;;  %v23266_v29 = vpop.f32.mrf.mxu1  ;;  %v26587_v60 = vld [vmem:[#allocation34_spill] sm:$0xff] }
 0x350   :  { %v6967_v56 = vld [vmem:[#allocation3 + $0xa8] sm:$0xff]  ;;  %v6968_v28 = vld [vmem:[#allocation3 + $0xb0] sm:$0xff]  ;;  %6905 = vst.msk [vmem:[#allocation3 + $0xd9] sm:$0xff] %vm6778_vm2, %v6730_v21  ;;  %v6733_v34 = vmax.f32 %v6669_v18, 0.0  ;;  %v6668_v58 = vadd.f32 %v23073_v8, %v6597_v16  ;;  %v6600_v37 = vadd.f32 %v18848_v63, %v5893_v44  ;;  %18949 = vmatprep.mubr.msk.f32.mxu1 %vm6778_vm2, %v7039_v54  ;;  %v5896_v16 = vadd.f32 %v23003_v48, %v5189_v32 }
 0x351   :  { %19061 = vmatprep.mubr.msk.f32.mxu0 %vm6778_vm2, %v6967_v56  ;;  %v6360_v61 = vpop.f32.mrf.mxu0  ;;  %18950 = vmatmul.mubr.msk.f32.gmra.mxu1 %vm6778_vm2, %v7040_v39  ;;  %v7042_v52 = vld [vmem:[#allocation3 + $0xc9] sm:$0xff]  ;;  %v23282_v7 = vpop.f32.mrf.mxu1 }
 0x352   :  { %19062 = vmatmul.mubr.msk.f32.gmra.mxu0 %vm6778_vm2, %v6968_v28  ;;  %6908 = vst.msk [vmem:[#allocation3 + $0xf9] sm:$0xff] %vm6778_vm2, %v6733_v34  ;;  %v6732_v6 = vmax.f32 %v6668_v58, 0.0  ;;  %v6671_v26 = vadd.f32 %v23073_v8, %v6600_v37  ;;  %v6599_v27 = vadd.f32 %v6360_v61, %v5892_v30  ;;  %v26583_v2 = vld [vmem:[#allocation33_spill] sm:$0xff]  ;;  %v26584_v28 = vld [vmem:[#allocation7_spill] sm:$0xff]  ;;  %v26586_v39 = vld [vmem:[#allocation64_spill] sm:$0xff]  ;;  %v5899_v61 = vadd.f32 %v23013_v41, %v26587_v60 }
 0x353   :  { %v18851_v15 = vpop.f32.mrf.mxu0  ;;  %v7041_v24 = vld [vmem:[#allocation3 + $0xc1] sm:$0xff]  ;;  %v5897_v49 = vadd.f32 %v22996_v1, %v26583_v2  ;;  %v5191_v31 = vadd.f32 %v26584_v28, %v4483_v59  ;;  %v26585_v37 = vld [vmem:[#allocation65_spill] sm:$0xff] }
 0x354   :  { %v6969_v5 = vld [vmem:[#allocation3 + $0xc0] sm:$0xff]  ;;  %v6970_v25 = vld [vmem:[#allocation3 + $0xc8] sm:$0xff]  ;;  %6907 = vst.msk [vmem:[#allocation3 + $0xf1] sm:$0xff] %vm6778_vm2, %v6732_v6  ;;  %v6735_v47 = vmax.f32 %v6671_v26, 0.0  ;;  %v6670_v4 = vadd.f32 %v23073_v8, %v6599_v27  ;;  %v6602_v50 = vadd.f32 %v18851_v15, %v5895_v62  ;;  %18952 = vmatprep.mubr.msk.f32.mxu1 %vm6778_vm2, %v7041_v24  ;;  %v4485_v48 = vadd.f32 %v26586_v39, %v26585_v37  ;;  %v26588_v26 = vld [vmem:[#allocation37_spill] sm:$0xff] }
 0x355   :  { %19064 = vmatprep.mubr.msk.f32.mxu0 %vm6778_vm2, %v6969_v5  ;;  %v6370_v33 = vpop.f32.mrf.mxu0  ;;  %18953 = vmatmul.mubr.msk.f32.gmra.mxu1 %vm6778_vm2, %v7042_v52  ;;  %v7044_v58 = vld [vmem:[#allocation3 + $0xe1] sm:$0xff]  ;;  %v5898_v5 = vadd.f32 %v23020_v51, %v5191_v31 }
 0x356   :  { %19065 = vmatmul.mubr.msk.f32.gmra.mxu0 %vm6778_vm2, %v6970_v25  ;;  %6910 = vst.msk [vmem:[#allocation3 + $0x111] sm:$0xff] %vm6778_vm2, %v6735_v47  ;;  %v6734_v44 = vmax.f32 %v6670_v4, 0.0  ;;  %v6673_v21 = vadd.f32 %v23073_v8, %v6602_v50  ;;  %v6601_v18 = vadd.f32 %v6370_v33, %v5894_v53  ;;  %v5193_v27 = vadd.f32 %v26588_v26, %v4485_v48  ;;  %v26589_v4 = vld [vmem:[#allocation67_spill] sm:$0xff]  ;;  %v26590_v50 = vld [vmem:[#allocation66_spill] sm:$0xff]  ;;  %v26591_v51 = vld [vmem:[#allocation36_spill] sm:$0xff] }
 0x357   :  { %v18854_v30 = vpop.f32.mrf.mxu0  ;;  %v7043_v63 = vld [vmem:[#allocation3 + $0xd9] sm:$0xff]  ;;  %v4487_v52 = vadd.f32 %v26590_v50, %v26589_v4  ;;  %v5901_v59 = vadd.f32 %v23027_v46, %v26591_v51  ;;  %v26595_v37 = vld [vmem:[#allocation8_spill] sm:$0xff] }
 0x358   :  { %v6971_v54 = vld [vmem:[#allocation3 + $0xd8] sm:$0xff]  ;;  %v6972_v56 = vld [vmem:[#allocation3 + $0xe0] sm:$0xff]  ;;  %6909 = vst.msk [vmem:[#allocation3 + $0x109] sm:$0xff] %vm6778_vm2, %v6734_v44  ;;  %v6737_v9 = vmax.f32 %v6673_v21, 0.0  ;;  %v6672_v34 = vadd.f32 %v23073_v8, %v6601_v18  ;;  %v6604_v1 = vadd.f32 %v18854_v30, %v5897_v49  ;;  %18955 = vmatprep.mubr.msk.f32.mxu1 %vm6778_vm2, %v7043_v63  ;;  %v5900_v44 = vadd.f32 %v23034_v43, %v5193_v27  ;;  %v26592_v63 = vld [vmem:[#allocation9_spill] sm:$0xff] }
 0x359   :  { %19067 = vmatprep.mubr.msk.f32.mxu0 %vm6778_vm2, %v6971_v54  ;;  %v6380_v36 = vpop.f32.mrf.mxu0  ;;  %18956 = vmatmul.mubr.msk.f32.gmra.mxu1 %vm6778_vm2, %v7044_v58  ;;  %v7046_v47 = vld [vmem:[#allocation3 + $0xf9] sm:$0xff]  ;;  %v5195_v54 = vadd.f32 %v26592_v63, %v4487_v52  ;;  %v5903_v39 = vadd.f32 %v23044_v55, %v26595_v37  ;;  %v26601_v63 = vld [vmem:[#allocation73_spill] sm:$0xff] }
 0x35a   :  { %19068 = vmatmul.mubr.msk.f32.gmra.mxu0 %vm6778_vm2, %v6972_v56  ;;  %6912 = vst.msk [vmem:[#allocation3 + $0x129] sm:$0xff] %vm6778_vm2, %v6737_v9  ;;  %v6736_v20 = vmax.f32 %v6672_v34, 0.0  ;;  %v6675_v62 = vadd.f32 %v23073_v8, %v6604_v1  ;;  %v6603_v6 = vadd.f32 %v6380_v36, %v5896_v16  ;;  %v26593_v9 = vld [vmem:[#allocation69_spill] sm:$0xff]  ;;  %v26594_v34 = vld [vmem:[#allocation68_spill] sm:$0xff]  ;;  %v23298_v1 = vpop.f32.mrf.mxu1 }
 0x35b   :  { %v18857_v22 = vpop.f32.mrf.mxu0  ;;  %v7045_v32 = vld [vmem:[#allocation3 + $0xf1] sm:$0xff]  ;;  %v4489_v43 = vadd.f32 %v26594_v34, %v26593_v9 }
 0x35c   :  { %v6973_v15 = vld [vmem:[#allocation3 + $0xf0] sm:$0xff]  ;;  %v6974_v24 = vld [vmem:[#allocation3 + $0xf8] sm:$0xff]  ;;  %6911 = vst.msk [vmem:[#allocation3 + $0x121] sm:$0xff] %vm6778_vm2, %v6736_v20  ;;  %v6739_v25 = vmax.f32 %v6675_v62, 0.0  ;;  %v6674_v53 = vadd.f32 %v23073_v8, %v6603_v6  ;;  %v6606_v41 = vadd.f32 %v18857_v22, %v5899_v61  ;;  %18958 = vmatprep.mubr.msk.f32.mxu1 %vm6778_vm2, %v7045_v32  ;;  %v26596_v61 = vld [vmem:[#allocation11_spill] sm:$0xff]  ;;  %v5902_v22 = vadd.f32 %v23051_v17, %v5195_v54 }
 0x35d   :  { %19070 = vmatprep.mubr.msk.f32.mxu0 %vm6778_vm2, %v6973_v15  ;;  %v6390_v11 = vpop.f32.mrf.mxu0  ;;  %18959 = vmatmul.mubr.msk.f32.gmra.mxu1 %vm6778_vm2, %v7046_v47  ;;  %v7048_v31 = vld [vmem:[#allocation3 + $0x111] sm:$0xff]  ;;  %v5197_v20 = vadd.f32 %v26596_v61, %v4489_v43  ;;  %v26602_v54 = vld [vmem:[#allocation72_spill] sm:$0xff] }
 0x35e   :  { %19071 = vmatmul.mubr.msk.f32.gmra.mxu0 %vm6778_vm2, %v6974_v24  ;;  %6914 = vst.msk [vmem:[#allocation3 + $0x141] sm:$0xff] %vm6778_vm2, %v6739_v25  ;;  %v6738_v33 = vmax.f32 %v6674_v53, 0.0  ;;  %v6677_v2 = vadd.f32 %v23073_v8, %v6606_v41  ;;  %v6605_v49 = vadd.f32 %v6390_v11, %v5898_v5  ;;  %v26597_v5 = vld [vmem:[#allocation70_spill] sm:$0xff]  ;;  %v26598_v25 = vld [vmem:[#allocation71_spill] sm:$0xff]  ;;  %v23314_v41 = vpop.f32.mrf.mxu1 }
 0x35f   :  { %v18860_v21 = vpop.f32.mrf.mxu0  ;;  %v7047_v18 = vld [vmem:[#allocation3 + $0x109] sm:$0xff]  ;;  %v4491_v53 = vadd.f32 %v26598_v25, %v26597_v5  ;;  %v26599_v17 = vld [vmem:[#allocation10_spill] sm:$0xff]  ;;  %v5904_v51 = vadd.f32 %v23080_v3, %v5197_v20  ;;  %v4493_v3 = vadd.f32 %v26602_v54, %v26601_v63 }
 0x360   :  { %v6975_v16 = vld [vmem:[#allocation3 + $0x108] sm:$0xff]  ;;  %v6976_v30 = vld [vmem:[#allocation3 + $0x110] sm:$0xff]  ;;  %6913 = vst.msk [vmem:[#allocation3 + $0x139] sm:$0xff] %vm6778_vm2, %v6738_v33  ;;  %v6741_v56 = vmax.f32 %v6677_v2, 0.0  ;;  %v6676_v28 = vadd.f32 %v23073_v8, %v6605_v49  ;;  %v6608_v46 = vadd.f32 %v18860_v21, %v5901_v59  ;;  %18961 = vmatprep.mubr.msk.f32.mxu1 %vm6778_vm2, %v7047_v18  ;;  %v5905_v4 = vadd.f32 %v23061_v13, %v26599_v17 }
 0x361   :  { %19073 = vmatprep.mubr.msk.f32.mxu0 %vm6778_vm2, %v6975_v16  ;;  %v6400_v58 = vpop.f32.mrf.mxu0  ;;  %18962 = vmatmul.mubr.msk.f32.gmra.mxu1 %vm6778_vm2, %v7048_v31  ;;  %v7050_v24 = vld [vmem:[#allocation3 + $0x129] sm:$0xff] }
 0x362   :  { %19074 = vmatmul.mubr.msk.f32.gmra.mxu0 %vm6778_vm2, %v6976_v30  ;;  %6916 = vst.msk [vmem:[#allocation3 + $0x159] sm:$0xff] %vm6778_vm2, %v6741_v56  ;;  %v6740_v48 = vmax.f32 %v6676_v28, 0.0  ;;  %v6679_v36 = vadd.f32 %v23073_v8, %v6608_v46  ;;  %v6607_v60 = vadd.f32 %v6400_v58, %v5900_v44  ;;  %v26600_v44 = vld [vmem:[#allocation38_spill] sm:$0xff]  ;;  %v23330_v56 = vpop.f32.mrf.mxu1  ;;  %v26603_v46 = vld [vmem:[#allocation39_spill] sm:$0xff] }
 0x363   :  { %v18863_v62 = vpop.f32.mrf.mxu0  ;;  %v7049_v6 = vld [vmem:[#allocation3 + $0x121] sm:$0xff]  ;;  %v5199_v21 = vadd.f32 %v26600_v44, %v4491_v53  ;;  %v5907_v31 = vadd.f32 %v23097_v38, %v26603_v46  ;;  %v26604_v58 = vld [vmem:[#allocation42_spill] sm:$0xff] }
 0x364   :  { %v6977_v26 = vld [vmem:[#allocation3 + $0x120] sm:$0xff]  ;;  %v6978_v27 = vld [vmem:[#allocation3 + $0x128] sm:$0xff]  ;;  %6915 = vst.msk [vmem:[#allocation3 + $0x151] sm:$0xff] %vm6778_vm2, %v6740_v48  ;;  %v6743_v32 = vmax.f32 %v6679_v36, 0.0  ;;  %v6678_v15 = vadd.f32 %v23073_v8, %v6607_v60  ;;  %v6610_v55 = vadd.f32 %v18863_v62, %v5903_v39  ;;  %18964 = vmatprep.mubr.msk.f32.mxu1 %vm6778_vm2, %v7049_v6  ;;  %v5201_v37 = vadd.f32 %v26604_v58, %v4493_v3  ;;  %v7057_v53 = vld [vmem:[#allocation3 + $0x1b1] sm:$0xff] }
 0x365   :  { %19076 = vmatprep.mubr.msk.f32.mxu0 %vm6778_vm2, %v6977_v26  ;;  %v6410_v47 = vpop.f32.mrf.mxu0  ;;  %18965 = vmatmul.mubr.msk.f32.gmra.mxu1 %vm6778_vm2, %v7050_v24  ;;  %v7052_v30 = vld [vmem:[#allocation3 + $0x141] sm:$0xff]  ;;  %v5906_v61 = vadd.f32 %v23113_v42, %v5199_v21  ;;  %v26605_v26 = vld [vmem:[#allocation74_spill] sm:$0xff] }
 0x366   :  { %19077 = vmatmul.mubr.msk.f32.gmra.mxu0 %vm6778_vm2, %v6978_v27  ;;  %6918 = vst.msk [vmem:[#allocation3 + $0x171] sm:$0xff] %vm6778_vm2, %v6743_v32  ;;  %v6742_v50 = vmax.f32 %v6678_v15, 0.0  ;;  %v6681_v52 = vadd.f32 %v23073_v8, %v6610_v55  ;;  %v6609_v11 = vadd.f32 %v6410_v47, %v5902_v22  ;;  %v26606_v27 = vld [vmem:[#allocation75_spill] sm:$0xff]  ;;  %v23349_v32 = vpop.f32.mrf.mxu1  ;;  %v26607_v42 = vld [vmem:[#allocation40_spill] sm:$0xff]  ;;  %v6985_v47 = vld [vmem:[#allocation3 + $0x1b0] sm:$0xff]  ;;  %v5908_v17 = vadd.f32 %v23141_v19, %v5201_v37 }
 0x367   :  { %v18866_v59 = vpop.f32.mrf.mxu0  ;;  %v7051_v33 = vld [vmem:[#allocation3 + $0x139] sm:$0xff]  ;;  %v4495_v22 = vadd.f32 %v26606_v27, %v26605_v26  ;;  %v5909_v55 = vadd.f32 %v23129_v10, %v26607_v42  ;;  %v26610_v44 = vld [vmem:[#allocation76_spill] sm:$0xff] }
 0x368   :  { %v6979_v2 = vld [vmem:[#allocation3 + $0x138] sm:$0xff]  ;;  %v6980_v49 = vld [vmem:[#allocation3 + $0x140] sm:$0xff]  ;;  %6917 = vst.msk [vmem:[#allocation3 + $0x169] sm:$0xff] %vm6778_vm2, %v6742_v50  ;;  %v6745_v18 = vmax.f32 %v6681_v52, 0.0  ;;  %v6680_v16 = vadd.f32 %v23073_v8, %v6609_v11  ;;  %v6612_v13 = vadd.f32 %v18866_v59, %v5905_v4  ;;  %18967 = vmatprep.mubr.msk.f32.mxu1 %vm6778_vm2, %v7051_v33 }
 0x369   :  { %19079 = vmatprep.mubr.msk.f32.mxu0 %vm6778_vm2, %v6979_v2  ;;  %v6420_v28 = vpop.f32.mrf.mxu0  ;;  %18968 = vmatmul.mubr.msk.f32.gmra.mxu1 %vm6778_vm2, %v7052_v30  ;;  %v7054_v6 = vld [vmem:[#allocation3 + $0x159] sm:$0xff] }
 0x36a   :  { %19080 = vmatmul.mubr.msk.f32.gmra.mxu0 %vm6778_vm2, %v6980_v49  ;;  %6920 = vst.msk [vmem:[#allocation3 + $0x189] sm:$0xff] %vm6778_vm2, %v6745_v18  ;;  %v6744_v9 = vmax.f32 %v6680_v16, 0.0  ;;  %v6683_v34 = vadd.f32 %v23073_v8, %v6612_v13  ;;  %v6611_v43 = vadd.f32 %v6420_v28, %v5904_v51  ;;  %v26608_v51 = vld [vmem:[#allocation43_spill] sm:$0xff]  ;;  %v26609_v49 = vld [vmem:[#allocation77_spill] sm:$0xff]  ;;  %v23370_v18 = vpop.f32.mrf.mxu1  ;;  %v6986_v46 = vld [vmem:[#allocation3 + $0x1b8] sm:$0xff] }
 0x36b   :  { %v18869_v39 = vpop.f32.mrf.mxu0  ;;  %v7053_v48 = vld [vmem:[#allocation3 + $0x151] sm:$0xff]  ;;  %v5203_v59 = vadd.f32 %v26608_v51, %v4495_v22  ;;  %v4497_v21 = vadd.f32 %v26610_v44, %v26609_v49  ;;  %v7058_v28 = vld [vmem:[#allocation3 + $0x1b9] sm:$0xff] }
 0x36c   :  { %v23339_v36 = vld [vmem:[#allocation3 + $0x150] sm:$0xff]  ;;  %v6982_v60 = vld [vmem:[#allocation3 + $0x158] sm:$0xff]  ;;  %6919 = vst.msk [vmem:[#allocation3 + $0x181] sm:$0xff] %vm6778_vm2, %v6744_v9  ;;  %v6747_v20 = vmax.f32 %v6683_v34, 0.0  ;;  %v6682_v38 = vadd.f32 %v23073_v8, %v6611_v43  ;;  %v6614_v62 = vadd.f32 %v18869_v39, %v5907_v31  ;;  %18970 = vmatprep.mubr.msk.f32.mxu1 %vm6778_vm2, %v7053_v48  ;;  %v26614_v48 = vld [vmem:[#allocation12_spill] sm:$0xff] }
 0x36d   :  { %19082 = vmatprep.mubr.msk.f32.mxu0 %vm6778_vm2, %v23339_v36  ;;  %v6430_v15 = vpop.f32.mrf.mxu0  ;;  %18971 = vmatmul.mubr.msk.f32.gmra.mxu1 %vm6778_vm2, %v7054_v6  ;;  %v7056_v19 = vld [vmem:[#allocation3 + $0x171] sm:$0xff]  ;;  %v5910_v43 = vadd.f32 %v23169_v57, %v5203_v59 }
 0x36e   :  { %19083 = vmatmul.mubr.msk.f32.gmra.mxu0 %vm6778_vm2, %v6982_v60  ;;  %6922 = vst.msk [vmem:[#allocation3 + $0x1d1] sm:$0xff] %vm6778_vm2, %v6747_v20  ;;  %v6746_v24 = vmax.f32 %v6682_v38, 0.0  ;;  %v6685_v5 = vadd.f32 %v23073_v8, %v6614_v62  ;;  %v6613_v25 = vadd.f32 %v6430_v15, %v5906_v61  ;;  %v26611_v13 = vld [vmem:[#allocation41_spill] sm:$0xff]  ;;  %v26612_v31 = vld [vmem:[#allocation46_spill] sm:$0xff]  ;;  %v23387_v61 = vpop.f32.mrf.mxu1  ;;  %v26615_v38 = vld [vmem:[#allocation44_spill] sm:$0xff] }
 0x36f   :  { %v18872_v4 = vpop.f32.mrf.mxu0  ;;  %v7055_v50 = vld [vmem:[#allocation3 + $0x169] sm:$0xff]  ;;  %v5911_v30 = vadd.f32 %v23155_v0, %v26611_v13  ;;  %v5205_v9 = vadd.f32 %v26612_v31, %v4497_v21  ;;  %v26613_v39 = vld [vmem:[#allocation78_spill] sm:$0xff]  ;;  %v5913_v62 = vadd.f32 %v23185_v40, %v26615_v38 }
 0x370   :  { %v23358_v52 = vld [vmem:[#allocation3 + $0x168] sm:$0xff]  ;;  %v23360_v11 = vld [vmem:[#allocation3 + $0x170] sm:$0xff]  ;;  %6921 = vst.msk [vmem:[#allocation3 + $0x1c9] sm:$0xff] %vm6778_vm2, %v6746_v24  ;;  %v6749_v10 = vmax.f32 %v6685_v5, 0.0  ;;  %v6684_v33 = vadd.f32 %v23073_v8, %v6613_v25  ;;  %v6616_v2 = vadd.f32 %v18872_v4, %v5909_v55  ;;  %18973 = vmatprep.mubr.msk.f32.mxu1 %vm6778_vm2, %v7055_v50  ;;  %v4499_v60 = vadd.f32 %v26614_v48, %v26613_v39  ;;  %v26616_v24 = vld [vmem:[#allocation47_spill] sm:$0xff]  ;;  %v23408_v50 = vpop.f32.mrf.mxu1 }
 0x371   :  { %19085 = vmatprep.mubr.msk.f32.mxu0 %vm6778_vm2, %v23358_v52  ;;  %v6440_v16 = vpop.f32.mrf.mxu0  ;;  %18974 = vmatmul.mubr.msk.f32.gmra.mxu1 %vm6778_vm2, %v7056_v19  ;;  %v5912_v27 = vadd.f32 %v23202_v35, %v5205_v9  ;;  %v26619_v59 = vld [vmem:[#allocation45_spill] sm:$0xff] }
 0x372   :  { %19086 = vmatmul.mubr.msk.f32.gmra.mxu0 %vm6778_vm2, %v23360_v11  ;;  %6924 = vst.msk [vmem:[#allocation3 + $0x1e9] sm:$0xff] %vm6778_vm2, %v6749_v10  ;;  %v6748_v63 = vmax.f32 %v6684_v33, 0.0  ;;  %v6687_v54 = vadd.f32 %v23073_v8, %v6616_v2  ;;  %v6615_v3 = vadd.f32 %v6440_v16, %v5908_v17  ;;  %18976 = vmatprep.mubr.msk.f32.mxu1 %vm6778_vm2, %v7057_v53  ;;  %v26618_v17 = vld [vmem:[#allocation79_spill] sm:$0xff]  ;;  %v26620_v49 = vld [vmem:[#allocation49_spill] sm:$0xff] }
 0x373   :  { %19088 = vmatprep.mubr.msk.f32.mxu0 %vm6778_vm2, %v6985_v47  ;;  %v18875_v34 = vpop.f32.mrf.mxu0  ;;  %v5207_v5 = vadd.f32 %v26616_v24, %v4499_v60  ;;  %v26617_v47 = vld [vmem:[#allocation80_spill] sm:$0xff]  ;;  %v5915_v10 = vadd.f32 %v23218_v12, %v26619_v59  ;;  %v26622_v31 = vld [vmem:[#allocation81_spill] sm:$0xff] }
 0x374   :  { %6923 = vst.msk [vmem:[#allocation3 + $0x1e1] sm:$0xff] %vm6778_vm2, %v6748_v63  ;;  %v6751_v0 = vmax.f32 %v6687_v54, 0.0  ;;  %v6686_v58 = vadd.f32 %v23073_v8, %v6615_v3  ;;  %v6618_v37 = vadd.f32 %v18875_v34, %v5911_v30  ;;  %v4501_v4 = vadd.f32 %v26618_v17, %v26617_v47  ;;  %v23430_v34 = vpop.f32.mrf.mxu1 }
 0x375   :  { %v6450_v20 = vpop.f32.mrf.mxu0  ;;  %18977 = vmatmul.mubr.msk.f32.gmra.mxu1 %vm6778_vm2, %v7058_v28  ;;  %v7060_v35 = vld [vmem:[#allocation3 + $0x1d1] sm:$0xff]  ;;  %v5914_v63 = vadd.f32 %v23234_v45, %v5207_v5  ;;  %v26623_v45 = vld [vmem:[#allocation48_spill] sm:$0xff] }
 0x376   :  { %19089 = vmatmul.mubr.msk.f32.gmra.mxu0 %vm6778_vm2, %v6986_v46  ;;  %6926 = vst.msk [vmem:[#allocation3 + $0x201] sm:$0xff] %vm6778_vm2, %v6751_v0  ;;  %v6750_v57 = vmax.f32 %v6686_v58, 0.0  ;;  %v6689_v6 = vadd.f32 %v23073_v8, %v6618_v37  ;;  %v6617_v26 = vadd.f32 %v6450_v20, %v5910_v43  ;;  %v5209_v44 = vadd.f32 %v26620_v49, %v4501_v4  ;;  %v26621_v46 = vld [vmem:[#allocation14_spill] sm:$0xff]  ;;  %v23452_v5 = vpop.f32.mrf.mxu1  ;;  %v26628_v4 = vld [vmem:[#allocation53_spill] sm:$0xff] }
 0x377   :  { %v18878_v22 = vpop.f32.mrf.mxu0  ;;  %v7059_v15 = vld [vmem:[#allocation3 + $0x1c9] sm:$0xff]  ;;  %v4503_v9 = vadd.f32 %v26622_v31, %v26621_v46  ;;  %v5917_v0 = vadd.f32 %v23250_v23, %v26623_v45  ;;  %v23485_v46 = vld [vmem:[%s26165_s4] ss:$0 sm:$0xff] }
 0x378   :  { %v23396_v42 = vld [vmem:[#allocation3 + $0x1c8] sm:$0xff]  ;;  %v23398_v55 = vld [vmem:[#allocation3 + $0x1d0] sm:$0xff]  ;;  %6925 = vst.msk [vmem:[#allocation3 + $0x1f9] sm:$0xff] %vm6778_vm2, %v6750_v57  ;;  %v6753_v25 = vmax.f32 %v6689_v6, 0.0  ;;  %v6688_v40 = vadd.f32 %v23073_v8, %v6617_v26  ;;  %v6620_v53 = vadd.f32 %v18878_v22, %v5913_v62  ;;  %18979 = vmatprep.mubr.msk.f32.mxu1 %vm6778_vm2, %v7059_v15  ;;  %v5916_v48 = vadd.f32 %v23266_v29, %v5209_v44  ;;  %v26624_v57 = vld [vmem:[#allocation51_spill] sm:$0xff] }
 0x379   :  { %19091 = vmatprep.mubr.msk.f32.mxu0 %vm6778_vm2, %v23396_v42  ;;  %v6460_v51 = vpop.f32.mrf.mxu0  ;;  %18980 = vmatmul.mubr.msk.f32.gmra.mxu1 %vm6778_vm2, %v7060_v35  ;;  %v7062_v28 = vld [vmem:[#allocation3 + $0x1e9] sm:$0xff]  ;;  %v5211_v6 = vadd.f32 %v26624_v57, %v4503_v9  ;;  %v26625_v22 = vld [vmem:[#allocation15_spill] sm:$0xff]  ;;  %v26633_v57 = vld [vmem:[#allocation18_spill] sm:$0xff] }
 0x37a   :  { %19092 = vmatmul.mubr.msk.f32.gmra.mxu0 %vm6778_vm2, %v23398_v55  ;;  %6928 = vst.msk [vmem:[#allocation3 + $0x219] sm:$0xff] %vm6778_vm2, %v6753_v25  ;;  %v6752_v33 = vmax.f32 %v6688_v40, 0.0  ;;  %v6691_v2 = vadd.f32 %v23073_v8, %v6620_v53  ;;  %v6619_v19 = vadd.f32 %v6460_v51, %v5912_v27  ;;  %v26626_v15 = vld [vmem:[#allocation13_spill] sm:$0xff]  ;;  %v26627_v40 = vld [vmem:[#allocation50_spill] sm:$0xff] }
 0x37b   :  { %v18881_v21 = vpop.f32.mrf.mxu0  ;;  %v7061_v16 = vld [vmem:[#allocation3 + $0x1e1] sm:$0xff]  ;;  %v4505_v24 = vadd.f32 %v26626_v15, %v26625_v22  ;;  %v5919_v53 = vadd.f32 %v23282_v7, %v26627_v40 }
 0x37c   :  { %v23418_v13 = vld [vmem:[#allocation3 + $0x1e0] sm:$0xff]  ;;  %v23420_v30 = vld [vmem:[#allocation3 + $0x1e8] sm:$0xff]  ;;  %6927 = vst.msk [vmem:[#allocation3 + $0x211] sm:$0xff] %vm6778_vm2, %v6752_v33  ;;  %v6755_v54 = vmax.f32 %v6691_v2, 0.0  ;;  %v6690_v12 = vadd.f32 %v23073_v8, %v6619_v19  ;;  %v6622_v3 = vadd.f32 %v18881_v21, %v5915_v10  ;;  %18982 = vmatprep.mubr.msk.f32.mxu1 %vm6778_vm2, %v7061_v16  ;;  %v5918_v19 = vadd.f32 %v23298_v1, %v5211_v6  ;;  %v26629_v16 = vld [vmem:[#allocation17_spill] sm:$0xff] }
 0x37d   :  { %19094 = vmatprep.mubr.msk.f32.mxu0 %vm6778_vm2, %v23418_v13  ;;  %v6470_v43 = vpop.f32.mrf.mxu0  ;;  %18983 = vmatmul.mubr.msk.f32.gmra.mxu1 %vm6778_vm2, %v7062_v28  ;;  %v7064_v29 = vld [vmem:[#allocation3 + $0x201] sm:$0xff]  ;;  %v5213_v51 = vadd.f32 %v26628_v4, %v4505_v24  ;;  %v26635_v24 = vld [vmem:[#allocation86_spill] sm:$0xff] }
 0x37e   :  { %19095 = vmatmul.mubr.msk.f32.gmra.mxu0 %vm6778_vm2, %v23420_v30  ;;  %6930 = vst.msk [vmem:[#allocation3 + $0x231] sm:$0xff] %vm6778_vm2, %v6755_v54  ;;  %v6754_v58 = vmax.f32 %v6690_v12, 0.0  ;;  %v6693_v37 = vadd.f32 %v23073_v8, %v6622_v3  ;;  %v6621_v39 = vadd.f32 %v6470_v43, %v5914_v63  ;;  %v26630_v63 = vld [vmem:[#allocation16_spill] sm:$0xff]  ;;  %v23474_v12 = vpop.f32.mrf.mxu1 }
 0x37f   :  { %v18884_v60 = vpop.f32.mrf.mxu0  ;;  %v7063_v20 = vld [vmem:[#allocation3 + $0x1f9] sm:$0xff]  ;;  %v4507_v54 = vadd.f32 %v26630_v63, %v26629_v16  ;;  %v26631_v1 = vld [vmem:[#allocation52_spill] sm:$0xff]  ;;  %v5920_v43 = vadd.f32 %v23330_v56, %v5213_v51 }
 0x380   :  { %v23440_v38 = vld [vmem:[#allocation3 + $0x1f8] sm:$0xff]  ;;  %v23442_v62 = vld [vmem:[#allocation3 + $0x200] sm:$0xff]  ;;  %6929 = vst.msk [vmem:[#allocation3 + $0x229] sm:$0xff] %vm6778_vm2, %v6754_v58  ;;  %v6757_v26 = vmax.f32 %v6693_v37, 0.0  ;;  %v6692_v23 = vadd.f32 %v23073_v8, %v6621_v39  ;;  %v6624_v27 = vadd.f32 %v18884_v60, %v5917_v0  ;;  %18985 = vmatprep.mubr.msk.f32.mxu1 %vm6778_vm2, %v7063_v20 }
 0x381   :  { %19097 = vmatprep.mubr.msk.f32.mxu0 %vm6778_vm2, %v23440_v38  ;;  %v6480_v25 = vpop.f32.mrf.mxu0  ;;  %18986 = vmatmul.mubr.msk.f32.gmra.mxu1 %vm6778_vm2, %v7064_v29  ;;  %v7066_v21 = vld [vmem:[#allocation3 + $0x219] sm:$0xff] }
 0x382   :  { %19098 = vmatmul.mubr.msk.f32.gmra.mxu0 %vm6778_vm2, %v23442_v62  ;;  %6932 = vst.msk [vmem:[#allocation3 + $0x249] sm:$0xff] %vm6778_vm2, %v6757_v26  ;;  %v6756_v35 = vmax.f32 %v6692_v23, 0.0  ;;  %v6695_v47 = vadd.f32 %v23073_v8, %v6624_v27  ;;  %v6623_v17 = vadd.f32 %v6480_v25, %v5916_v48  ;;  %v26632_v20 = vld [vmem:[#allocation19_spill] sm:$0xff]  ;;  %v23501_v26 = vpop.f32.mrf.mxu1 }
 0x383   :  { %v18887_v59 = vpop.f32.mrf.mxu0  ;;  %v7065_v10 = vld [vmem:[#allocation3 + $0x211] sm:$0xff]  ;;  %v4509_v6 = vadd.f32 %v26633_v57, %v26632_v20  ;;  %v26642_v20 = vld [vmem:[#allocation87_spill] sm:$0xff] }
 0x384   :  { %v23462_v33 = vld [vmem:[#allocation3 + $0x210] sm:$0xff]  ;;  %v23464_v2 = vld [vmem:[#allocation3 + $0x218] sm:$0xff]  ;;  %6931 = vst.msk [vmem:[#allocation3 + $0x241] sm:$0xff] %vm6778_vm2, %v6756_v35  ;;  %v6759_v49 = vmax.f32 %v6695_v47, 0.0  ;;  %v6694_v7 = vadd.f32 %v23073_v8, %v6623_v17  ;;  %v6626_v44 = vadd.f32 %v18887_v59, %v5919_v53  ;;  %18988 = vmatprep.mubr.msk.f32.mxu1 %vm6778_vm2, %v7065_v10  ;;  %v5921_v8 = vadd.f32 %v23314_v41, %v26631_v1 }
 0x385   :  { %19100 = vmatprep.mubr.msk.f32.mxu0 %vm6778_vm2, %v23462_v33  ;;  %v6490_v3 = vpop.f32.mrf.mxu0  ;;  %18989 = vmatmul.mubr.msk.f32.gmra.mxu1 %vm6778_vm2, %v7066_v21  ;;  %v5215_v41 = vadd.f32 %v23015_v14, %v4507_v54  ;;  %v7068_v56 = vld [vmem:[#allocation3 + $0x231] sm:$0xff]  ;;  %v26634_v14 = vld [vmem:[#allocation84_spill] sm:$0xff]  ;;  %v5217_v25 = vadd.f32 %v26635_v24, %v4509_v6  ;;  %v5927_v57 = vadd.f32 %v23430_v34, %v26642_v20 }
 0x386   :  { %19101 = vmatmul.mubr.msk.f32.gmra.mxu0 %vm6778_vm2, %v23464_v2  ;;  %6934 = vst.msk [vmem:[#allocation3 + $0x261] sm:$0xff] %vm6778_vm2, %v6759_v49  ;;  %v6758_v28 = vmax.f32 %v6694_v7, 0.0  ;;  %v6697_v31 = vadd.f32 %v23485_v46, %v6626_v44  ;;  %v6625_v9 = vadd.f32 %v6490_v3, %v5918_v19  ;;  %v5923_v27 = vadd.f32 %v23349_v32, %v26634_v14  ;;  %v26636_v10 = vld [vmem:[#allocation21_spill] sm:$0xff]  ;;  %v26637_v19 = vld [vmem:[#allocation20_spill] sm:$0xff]  ;;  %v23523_v7 = vpop.f32.mrf.mxu1 }
 0x387   :  { %v18890_v45 = vpop.f32.mrf.mxu0  ;;  %v7067_v0 = vld [vmem:[#allocation3 + $0x229] sm:$0xff]  ;;  %v5922_v17 = vadd.f32 %v23370_v18, %v5215_v41  ;;  %v4511_v49 = vadd.f32 %v26637_v19, %v26636_v10  ;;  %v5924_v3 = vadd.f32 %v23408_v50, %v5217_v25  ;;  %v26640_v41 = vld [vmem:[#allocation23_spill] sm:$0xff] }
 0x388   :  { %v23489_v58 = vld [vmem:[#allocation3 + $0x228] sm:$0xff]  ;;  %v23491_v37 = vld [vmem:[#allocation3 + $0x230] sm:$0xff]  ;;  %6933 = vst.msk [vmem:[#allocation3 + $0x259] sm:$0xff] %vm6778_vm2, %v6758_v28  ;;  %v6761_v39 = vmax.f32 %v6697_v31, 0.0  ;;  %v6696_v48 = vadd.f32 %v23485_v46, %v6625_v9  ;;  %v6628_v60 = vadd.f32 %v18890_v45, %v5921_v8  ;;  %18991 = vmatprep.mubr.msk.f32.mxu1 %vm6778_vm2, %v7067_v0 }
 0x389   :  { %19103 = vmatprep.mubr.msk.f32.mxu0 %vm6778_vm2, %v23489_v58  ;;  %v6500_v23 = vpop.f32.mrf.mxu0  ;;  %18992 = vmatmul.mubr.msk.f32.gmra.mxu1 %vm6778_vm2, %v7068_v56  ;;  %v7070_v59 = vld [vmem:[#allocation3 + $0x249] sm:$0xff] }
 0x38a   :  { %19104 = vmatmul.mubr.msk.f32.gmra.mxu0 %vm6778_vm2, %v23491_v37  ;;  %6936 = vst.msk [vmem:[#allocation3 + $0x279] sm:$0xff] %vm6778_vm2, %v6761_v39  ;;  %v6760_v29 = vmax.f32 %v6696_v48, 0.0  ;;  %v6699_v22 = vadd.f32 %v23485_v46, %v6628_v60  ;;  %v6627_v15 = vadd.f32 %v6500_v23, %v5920_v43  ;;  %v26638_v18 = vld [vmem:[#allocation85_spill] sm:$0xff]  ;;  %v26639_v9 = vld [vmem:[#allocation88_spill] sm:$0xff]  ;;  %v26641_v39 = vld [vmem:[#allocation22_spill] sm:$0xff]  ;;  %v5843_v60 = vpop.f32.mrf.mxu1 }
 0x38b   :  { %v18893_v40 = vpop.f32.mrf.mxu0  ;;  %v7069_v53 = vld [vmem:[#allocation3 + $0x241] sm:$0xff]  ;;  %v5925_v21 = vadd.f32 %v23387_v61, %v26638_v18  ;;  %v5219_v43 = vadd.f32 %v26639_v9, %v4511_v49  ;;  %v4513_v48 = vadd.f32 %v26641_v39, %v26640_v41 }
 0x38c   :  { %v23511_v35 = vld [vmem:[#allocation3 + $0x240] sm:$0xff]  ;;  %v23513_v47 = vld [vmem:[#allocation3 + $0x248] sm:$0xff]  ;;  %6935 = vst.msk [vmem:[#allocation3 + $0x271] sm:$0xff] %vm6778_vm2, %v6760_v29  ;;  %v6763_v4 = vmax.f32 %v6699_v22, 0.0  ;;  %v6698_v32 = vadd.f32 %v23485_v46, %v6627_v15  ;;  %v6630_v51 = vadd.f32 %v18893_v40, %v5923_v27  ;;  %18994 = vmatprep.mubr.msk.f32.mxu1 %vm6778_vm2, %v7069_v53  ;;  %v26643_v27 = vld [vmem:[#allocation90_spill] sm:$0xff]  ;;  %v18810_v10 = vpop.f32.mrf.mxu1 }
 0x38d   :  { %19106 = vmatprep.mubr.msk.f32.mxu0 %vm6778_vm2, %v23511_v35  ;;  %v6510_v44 = vpop.f32.mrf.mxu0  ;;  %18995 = vmatmul.mubr.msk.f32.gmra.mxu1 %vm6778_vm2, %v7070_v59  ;;  %v7072_v50 = vld [vmem:[#allocation3 + $0x261] sm:$0xff]  ;;  %v5221_v29 = vadd.f32 %v26643_v27, %v4513_v48  ;;  %v5926_v40 = vadd.f32 %v23452_v5, %v5219_v43  ;;  %v26646_v5 = vld [vmem:[#allocation89_spill] sm:$0xff] }
 0x38e   :  { %19107 = vmatmul.mubr.msk.f32.gmra.mxu0 %vm6778_vm2, %v23513_v47  ;;  %6938 = vst.msk [vmem:[#allocation3 + $0x291] sm:$0xff] %vm6778_vm2, %v6763_v4  ;;  %v6762_v16 = vmax.f32 %v6698_v32, 0.0  ;;  %v6701_v63 = vadd.f32 %v23485_v46, %v6630_v51  ;;  %v6629_v54 = vadd.f32 %v6510_v44, %v5922_v17  ;;  %v26644_v32 = vld [vmem:[#allocation25_spill] sm:$0xff]  ;;  %v26645_v51 = vld [vmem:[#allocation24_spill] sm:$0xff]  ;;  %v5929_v49 = vadd.f32 %v23474_v12, %v26646_v5  ;;  %v5853_v41 = vpop.f32.mrf.mxu1  ;;  %v26650_v48 = vld [vmem:[#allocation91_spill] sm:$0xff] }
 0x38f   :  { %v18896_v1 = vpop.f32.mrf.mxu0  ;;  %v7071_v8 = vld [vmem:[#allocation3 + $0x259] sm:$0xff]  ;;  %v4515_v59 = vadd.f32 %v26645_v51, %v26644_v32  ;;  %v26653_v32 = vld [vmem:[#allocation28_spill] sm:$0xff] }
 0x390   :  { %v23533_v28 = vld [vmem:[#allocation3 + $0x258] sm:$0xff]  ;;  %v23535_v31 = vld [vmem:[#allocation3 + $0x260] sm:$0xff]  ;;  %6937 = vst.msk [vmem:[#allocation3 + $0x289] sm:$0xff] %vm6778_vm2, %v6762_v16  ;;  %v6765_v45 = vmax.f32 %v6701_v63, 0.0  ;;  %v6700_v61 = vadd.f32 %v23485_v46, %v6629_v54  ;;  %v6632_v0 = vadd.f32 %v18896_v1, %v5925_v21  ;;  %18997 = vmatprep.mubr.msk.f32.mxu1 %vm6778_vm2, %v7071_v8  ;;  %v5928_v16 = vadd.f32 %v23501_v26, %v5221_v29  ;;  %v26647_v8 = vld [vmem:[#allocation92_spill] sm:$0xff] }
 0x391   :  { %19109 = vmatprep.mubr.msk.f32.mxu0 %vm6778_vm2, %v23533_v28  ;;  %v6520_v56 = vpop.f32.mrf.mxu0  ;;  %18998 = vmatmul.mubr.msk.f32.gmra.mxu1 %vm6778_vm2, %v7072_v50  ;;  %v7074_v4 = vld [vmem:[#allocation3 + $0x279] sm:$0xff]  ;;  %v5223_v9 = vadd.f32 %v26647_v8, %v4515_v59  ;;  %v18813_v59 = vpop.f32.mrf.mxu1 }
 0x392   :  { %19110 = vmatmul.mubr.msk.f32.gmra.mxu0 %vm6778_vm2, %v23535_v31  ;;  %6940 = vst.msk [vmem:[#allocation3 + $0x2a9] sm:$0xff] %vm6778_vm2, %v6765_v45  ;;  %v6764_v6 = vmax.f32 %v6700_v61, 0.0  ;;  %v6703_v23 = vadd.f32 %v23485_v46, %v6632_v0  ;;  %v6631_v14 = vadd.f32 %v6520_v56, %v5924_v3  ;;  %v26648_v61 = vld [vmem:[#allocation26_spill] sm:$0xff]  ;;  %v26649_v0 = vld [vmem:[#allocation27_spill] sm:$0xff]  ;;  %v5931_v56 = vadd.f32 %v23523_v7, %v26650_v48 }
 0x393   :  { %v18899_v22 = vpop.f32.mrf.mxu0  ;;  %v7073_v15 = vld [vmem:[#allocation3 + $0x271] sm:$0xff]  ;;  %v4517_v50 = vadd.f32 %v26649_v0, %v26648_v61  ;;  %v5863_v61 = vpop.f32.mrf.mxu1 }
 0x394   :  { %v23553_v24 = vld [vmem:[#allocation3 + $0x270] sm:$0xff]  ;;  %v23555_v25 = vld [vmem:[#allocation3 + $0x278] sm:$0xff]  ;;  %6939 = vst.msk [vmem:[#allocation3 + $0x2a1] sm:$0xff] %vm6778_vm2, %v6764_v6  ;;  %v6767_v53 = vmax.f32 %v6703_v23, 0.0  ;;  %v6702_v34 = vadd.f32 %v23485_v46, %v6631_v14  ;;  %v6634_v17 = vadd.f32 %v18899_v22, %v5927_v57  ;;  %19000 = vmatprep.mubr.msk.f32.mxu1 %vm6778_vm2, %v7073_v15 }
 0x395   :  { %19112 = vmatprep.mubr.msk.f32.mxu0 %vm6778_vm2, %v23553_v24  ;;  %v6530_v19 = vpop.f32.mrf.mxu0  ;;  %19001 = vmatmul.mubr.msk.f32.gmra.mxu1 %vm6778_vm2, %v7074_v4  ;;  %v7076_v26 = vld [vmem:[#allocation3 + $0x291] sm:$0xff] }
 0x396   :  { %19113 = vmatmul.mubr.msk.f32.gmra.mxu0 %vm6778_vm2, %v23555_v25  ;;  %6942 = vst.msk [vmem:[#allocation3 + $0x2c1] sm:$0xff] %vm6778_vm2, %v6767_v53  ;;  %v6766_v44 = vmax.f32 %v6702_v34, 0.0  ;;  %v6705_v18 = vadd.f32 %v23485_v46, %v6634_v17  ;;  %v6633_v21 = vadd.f32 %v6530_v19, %v5926_v40  ;;  %v26651_v23 = vld [vmem:[#allocation94_spill] sm:$0xff]  ;;  %v5930_v40 = vadd.f32 %v5843_v60, %v5223_v9  ;;  %v26654_v60 = vld [vmem:[#allocation93_spill] sm:$0xff]  ;;  %v26655_v9 = vld [vmem:[#allocation96_spill] sm:$0xff] }
 0x397   :  { %v18902_v63 = vpop.f32.mrf.mxu0  ;;  %v7075_v54 = vld [vmem:[#allocation3 + $0x289] sm:$0xff]  ;;  %v5225_v14 = vadd.f32 %v26651_v23, %v4517_v50  ;;  %v26652_v4 = vld [vmem:[#allocation82_spill] sm:$0xff]  ;;  %v5933_v5 = vadd.f32 %v18810_v10, %v26654_v60  ;;  %v26656_v50 = vld [vmem:[#allocation95_spill] sm:$0xff]  ;;  %v18930_v60 = vpop.f32.mrf.mxu1 }
 0x398   :  { %v23573_v3 = vld [vmem:[#allocation3 + $0x288] sm:$0xff]  ;;  %v23575_v1 = vld [vmem:[#allocation3 + $0x290] sm:$0xff]  ;;  %6941 = vst.msk [vmem:[#allocation3 + $0x2b9] sm:$0xff] %vm6778_vm2, %v6766_v44  ;;  %v6769_v43 = vmax.f32 %v6705_v18, 0.0  ;;  %v6704_v12 = vadd.f32 %v23485_v46, %v6633_v21  ;;  %v6636_v45 = vadd.f32 %v18902_v63, %v5929_v49  ;;  %19003 = vmatprep.mubr.msk.f32.mxu1 %vm6778_vm2, %v7075_v54  ;;  %v4519_v51 = vadd.f32 %v26653_v32, %v26652_v4 }
 0x399   :  { %19115 = vmatprep.mubr.msk.f32.mxu0 %vm6778_vm2, %v23573_v3  ;;  %v6540_v39 = vpop.f32.mrf.mxu0  ;;  %19004 = vmatmul.mubr.msk.f32.gmra.mxu1 %vm6778_vm2, %v7076_v26  ;;  %v7078_v17 = vld [vmem:[#allocation3 + $0x2a9] sm:$0xff]  ;;  %v5932_v21 = vadd.f32 %v5853_v41, %v5225_v14  ;;  %v5935_v41 = vadd.f32 %v18813_v59, %v26656_v50 }
 0x39a   :  { %19116 = vmatmul.mubr.msk.f32.gmra.mxu0 %vm6778_vm2, %v23575_v1  ;;  %6944 = vst.msk [vmem:[#allocation3 + $0x2d9] sm:$0xff] %vm6778_vm2, %v6769_v43  ;;  %v6768_v20 = vmax.f32 %v6704_v12, 0.0  ;;  %v6707_v57 = vadd.f32 %v23485_v46, %v6636_v45  ;;  %v6635_v6 = vadd.f32 %v6540_v39, %v5928_v16  ;;  %v5227_v43 = vadd.f32 %v26655_v9, %v4519_v51  ;;  %v8253_v50 = vld [vmem:[#allocation3 + $0xa] sm:$0xff] }
 0x39b   :  { %v18905_v27 = vpop.f32.mrf.mxu0  ;;  %v7077_v29 = vld [vmem:[#allocation3 + $0x2a1] sm:$0xff] }
 0x39c   :  { %v23593_v22 = vld [vmem:[#allocation3 + $0x2a0] sm:$0xff]  ;;  %v23595_v15 = vld [vmem:[#allocation3 + $0x2a8] sm:$0xff]  ;;  %6943 = vst.msk [vmem:[#allocation3 + $0x2d1] sm:$0xff] %vm6778_vm2, %v6768_v20  ;;  %v6771_v53 = vmax.f32 %v6707_v57, 0.0  ;;  %v6706_v7 = vadd.f32 %v23485_v46, %v6635_v6  ;;  %v6638_v34 = vadd.f32 %v18905_v27, %v5931_v56  ;;  %19006 = vmatprep.mubr.msk.f32.mxu1 %vm6778_vm2, %v7077_v29  ;;  %v5934_v14 = vadd.f32 %v5863_v61, %v5227_v43 }
 0x39d   :  { %19118 = vmatprep.mubr.msk.f32.mxu0 %vm6778_vm2, %v23593_v22  ;;  %v6550_v19 = vpop.f32.mrf.mxu0  ;;  %19007 = vmatmul.mubr.msk.f32.gmra.mxu1 %vm6778_vm2, %v7078_v17  ;;  %v7080_v26 = vld [vmem:[#allocation3 + $0x2c1] sm:$0xff] }
 0x39e   :  { %19119 = vmatmul.mubr.msk.f32.gmra.mxu0 %vm6778_vm2, %v23595_v15  ;;  %6946 = vst.msk [vmem:[#allocation3 + $0x2f1] sm:$0xff] %vm6778_vm2, %v6771_v53  ;;  %v6770_v49 = vmax.f32 %v6706_v7, 0.0  ;;  %v6709_v44 = vadd.f32 %v23485_v46, %v6638_v34  ;;  %v6637_v18 = vadd.f32 %v6550_v19, %v5930_v40  ;;  %v16387_v34 = vld [vmem:[%s26166_s5 + $0x178] sm:$0xff] }
 0x39f   :  { %v18908_v16 = vpop.f32.mrf.mxu0  ;;  %v7079_v63 = vld [vmem:[#allocation3 + $0x2b9] sm:$0xff]  ;;  %19472 = vmatprep.subr.mxu0 %v16387_v34 }
 0x3a0   :  { %v23610_v54 = vld [vmem:[#allocation3 + $0x2b8] sm:$0xff]  ;;  %v23612_v8 = vld [vmem:[#allocation3 + $0x2c0] sm:$0xff]  ;;  %6945 = vst.msk [vmem:[#allocation3 + $0x2e9] sm:$0xff] %vm6778_vm2, %v6770_v49  ;;  %v6773_v12 = vmax.f32 %v6709_v44, 0.0  ;;  %v6708_v10 = vadd.f32 %v23485_v46, %v6637_v18  ;;  %v6640_v45 = vadd.f32 %v18908_v16, %v5933_v5  ;;  %19009 = vmatprep.mubr.msk.f32.mxu1 %vm6778_vm2, %v7079_v63 }
 0x3a1   :  { %19121 = vmatprep.mubr.msk.f32.mxu0 %vm6778_vm2, %v23610_v54  ;;  %v6560_v0 = vpop.f32.mrf.mxu0  ;;  %19010 = vmatmul.mubr.msk.f32.gmra.mxu1 %vm6778_vm2, %v7080_v26  ;;  %v7082_v53 = vld [vmem:[#allocation3 + $0x2d9] sm:$0xff] }
 0x3a2   :  { %19122 = vmatmul.mubr.msk.f32.gmra.mxu0 %vm6778_vm2, %v23612_v8  ;;  %6948 = vst.msk [vmem:[#allocation3 + $0x309] sm:$0xff] %vm6778_vm2, %v6773_v12  ;;  %v6772_v39 = vmax.f32 %v6708_v10, 0.0  ;;  %v6711_v48 = vadd.f32 %v23485_v46, %v6640_v45  ;;  %v6639_v56 = vadd.f32 %v6560_v0, %v5932_v21  ;;  %v8252_v12 = vld [vmem:[#allocation3 + $0x2] sm:$0xff]  ;;  %v8966_v0 = vld [vmem:[#allocation3 + $0x18] sm:$0xff] }
 0x3a3   :  { %v18911_v20 = vpop.f32.mrf.mxu0  ;;  %v7081_v57 = vld [vmem:[#allocation3 + $0x2d1] sm:$0xff] }
 0x3a4   :  { %v23626_v6 = vld [vmem:[#allocation3 + $0x2d0] sm:$0xff]  ;;  %v23628_v23 = vld [vmem:[#allocation3 + $0x2d8] sm:$0xff]  ;;  %6947 = vst.msk [vmem:[#allocation3 + $0x301] sm:$0xff] %vm6778_vm2, %v6772_v39  ;;  %v6775_v27 = vmax.f32 %v6711_v48, 0.0  ;;  %v6710_v29 = vadd.f32 %v23485_v46, %v6639_v56  ;;  %v6642_v40 = vadd.f32 %v18911_v20, %v5935_v41  ;;  %19012 = vmatprep.mubr.msk.f32.mxu1 %vm6778_vm2, %v7081_v57  ;;  %v8967_v41 = vld [vmem:[#allocation3 + $0x20] sm:$0xff] }
 0x3a5   :  { %19124 = vmatprep.mubr.msk.f32.mxu0 %vm6778_vm2, %v23626_v6  ;;  %v6570_v7 = vpop.f32.mrf.mxu0  ;;  %19013 = vmatmul.mubr.msk.f32.gmra.mxu1 %vm6778_vm2, %v7082_v53  ;;  %v7084_v18 = vld [vmem:[#allocation3 + $0x2f1] sm:$0xff]  ;;  %v23686_v48 = vld [vmem:[#allocation3 + $0x1a] sm:$0xff]  ;;  %v23694_v57 = vld [vmem:[#allocation3 + $0x22] sm:$0xff] }
 0x3a6   :  { %19125 = vmatmul.mubr.msk.f32.gmra.mxu0 %vm6778_vm2, %v23628_v23  ;;  %6950 = vst.msk [vmem:[#allocation3 + $0x321] sm:$0xff] %vm6778_vm2, %v6775_v27  ;;  %v6774_v17 = vmax.f32 %v6710_v29, 0.0  ;;  %v6713_v4 = vadd.f32 %v23485_v46, %v6642_v40  ;;  %v6641_v32 = vadd.f32 %v6570_v7, %v5934_v14  ;;  %v16314_v39 = vld [vmem:[%s26166_s5 + $0x130] sm:$0xff]  ;;  %v19926_v56 = vld [vmem:[%s26166_s5 + $0x138] sm:$0xff]  ;;  %v16313_v27 = vld [vmem:[%s26166_s5 + $0x128] sm:$0xff] }
 0x3a7   :  { %v7083_v51 = vld [vmem:[#allocation3 + $0x2e9] sm:$0xff]  ;;  %v19042_v5 = vpop.f32.mrf.mxu0  ;;  %v8969_v14 = vld [vmem:[#allocation3 + $0x38] sm:$0xff] }
 0x3a8   :  { %v23643_v59 = vld [vmem:[#allocation3 + $0x2e8] sm:$0xff]  ;;  %v23645_v19 = vld [vmem:[#allocation3 + $0x2f0] sm:$0xff]  ;;  %6949 = vst.msk [vmem:[#allocation3 + $0x319] sm:$0xff] %vm6778_vm2, %v6774_v17  ;;  %v6777_v49 = vmax.f32 %v6713_v4, 0.0  ;;  %v6712_v44 = vadd.f32 %v23485_v46, %v6641_v32  ;;  %19015 = vmatprep.mubr.msk.f32.mxu1 %vm6778_vm2, %v7083_v51  ;;  %v23652_v21 = vadd.f32 %v19042_v5, %v18930_v60  ;;  %v23710_v7 = vld [vmem:[#allocation3 + $0x3a] sm:$0xff] }
 0x3a9   :  { %19127 = vmatprep.mubr.msk.f32.mxu0 %vm6778_vm2, %v23643_v59  ;;  %19016 = vmatmul.mubr.msk.f32.gmra.mxu1 %vm6778_vm2, %v7084_v18  ;;  %v7086_v43 = vld [vmem:[#allocation3 + $0x309] sm:$0xff]  ;;  %v23705_v40 = vld [vmem:[#allocation3 + $0x32] sm:$0xff]  ;;  %v16312_v17 = vld [vmem:[%s26166_s5 + $0x120] sm:$0xff] }
 0x3aa   :  { %26657 = vst [vmem:[#allocation55_spill] sm:$0xff] %v23652_v21  ;;  %19128 = vmatmul.mubr.msk.f32.gmra.mxu0 %vm6778_vm2, %v23645_v19  ;;  %6952 = vst.msk [vmem:[#allocation3 + $0x339] sm:$0xff] %vm6778_vm2, %v6777_v49  ;;  %v6776_v16 = vmax.f32 %v6712_v44, 0.0  ;;  %v8968_v20 = vld [vmem:[#allocation3 + $0x30] sm:$0xff]  ;;  %v8970_v53 = vld [vmem:[#allocation3 + $0x48] sm:$0xff] }
 0x3ab   :  { %v7085_v63 = vld [vmem:[#allocation3 + $0x301] sm:$0xff]  ;;  %v16386_v29 = vld [vmem:[%s26166_s5 + $0x170] sm:$0xff]  ;;  %v16311_v49 = vld [vmem:[%s26166_s5 + $0x118] sm:$0xff] }
 0x3ac   :  { %v23658_v9 = vld [vmem:[#allocation3 + $0x300] sm:$0xff]  ;;  %v23660_v46 = vld [vmem:[#allocation3 + $0x308] sm:$0xff]  ;;  %6951 = vst.msk [vmem:[#allocation3 + $0x331] sm:$0xff] %vm6778_vm2, %v6776_v16  ;;  %19018 = vmatprep.mubr.msk.f32.mxu1 %vm6778_vm2, %v7085_v63  ;;  %v23726_v60 = vld [vmem:[#allocation3 + $0x52] sm:$0xff] }
 0x3ad   :  { %19130 = vmatprep.mubr.msk.f32.mxu0 %vm6778_vm2, %v23658_v9  ;;  %19019 = vmatmul.mubr.msk.f32.gmra.mxu1 %vm6778_vm2, %v7086_v43  ;;  %v7088_v61 = vld [vmem:[#allocation3 + $0x321] sm:$0xff]  ;;  %v23721_v32 = vld [vmem:[#allocation3 + $0x4a] sm:$0xff]  ;;  %v8974_v16 = vld [vmem:[#allocation3 + $0x78] sm:$0xff] }
 0x3ae   :  { %19131 = vmatmul.mubr.msk.f32.gmra.mxu0 %vm6778_vm2, %v23660_v46  ;;  %v16385_v4 = vld [vmem:[%s26166_s5 + $0x168] sm:$0xff]  ;;  %v8972_v51 = vld [vmem:[#allocation3 + $0x60] sm:$0xff] }
 0x3af   :  { %v7087_v10 = vld [vmem:[#allocation3 + $0x319] sm:$0xff]  ;;  %v8973_v5 = vld [vmem:[#allocation3 + $0x68] sm:$0xff] }
 0x3b0   :  { %v23669_v45 = vld [vmem:[#allocation3 + $0x318] sm:$0xff]  ;;  %v23671_v26 = vld [vmem:[#allocation3 + $0x320] sm:$0xff]  ;;  %19021 = vmatprep.mubr.msk.f32.mxu1 %vm6778_vm2, %v7087_v10  ;;  %v23742_v63 = vld [vmem:[#allocation3 + $0x6a] sm:$0xff] }
 0x3b1   :  { %19133 = vmatprep.mubr.msk.f32.mxu0 %vm6778_vm2, %v23669_v45  ;;  %19022 = vmatmul.mubr.msk.f32.gmra.mxu1 %vm6778_vm2, %v7088_v61  ;;  %v16384_v44 = vld [vmem:[%s26166_s5 + $0x160] sm:$0xff]  ;;  %v16383_v10 = vld [vmem:[%s26166_s5 + $0x158] sm:$0xff] }
 0x3b2   :  { %19134 = vmatmul.mubr.msk.f32.gmra.mxu0 %vm6778_vm2, %v23671_v26  ;;  %19152 = vmatprep.mubr.msk.f32.mxu1 %vm6778_vm2, %v8252_v12  ;;  %v23737_v18 = vld [vmem:[#allocation3 + $0x62] sm:$0xff]  ;;  %v16310_v12 = vld [vmem:[%s26166_s5 + $0x110] sm:$0xff]  ;;  %v23753_v61 = vld [vmem:[#allocation3 + $0x7a] sm:$0xff] }
 0x3b3   :  { %19264 = vmatprep.mubr.msk.f32.mxu0 %vm6778_vm2, %v8966_v0  ;;  %v8975_v43 = vld [vmem:[#allocation3 + $0x80] sm:$0xff]  ;;  %v8976_v0 = vld [vmem:[#allocation3 + $0x90] sm:$0xff] }
 0x3b4   :  { %v8996_v21 = vld [vmem:[#allocation3 + $0x180] sm:$0xff] }
 0x3b5   :  { %19153 = vmatmul.mubr.msk.f32.vlgmr.msra.gmra.mxu1 %vm6778_vm2, %v8253_v50  ;;  %v23758_v50 = vld [vmem:[#allocation3 + $0x82] sm:$0xff] }
 0x3b6   :  { %19265 = vmatmul.mubr.msk.f32.vlgmr.msra.gmra.mxu0 %vm6778_vm2, %v8967_v41  ;;  %19361 = vmatpush3.msra.mxu1 %v19926_v56  ;;  %v8977_v41 = vld [vmem:[#allocation3 + $0x98] sm:$0xff]  ;;  %v16382_v56 = vld [vmem:[%s26166_s5 + $0x150] sm:$0xff] }
 0x3b7   :  { %19155 = vmatprep.mubr.msk.f32.mxu1 %vm6778_vm2, %v23686_v48  ;;  %19267 = vmatprep.mubr.msk.f32.mxu0 %vm6778_vm2, %v8968_v20  ;;  %v23769_v20 = vld [vmem:[#allocation3 + $0x92] sm:$0xff] }
 0x3b8   :  { %19362 = vmatprep.subr.mxu1 %v16314_v39  ;;  %19473 = vmatpush3.msra.mxu0 %v16387_v34  ;;  %v8971_v34 = vld [vmem:[#allocation3 + $0x50] sm:$0xff] }
 0x3b9   :  { %19363 = vmatpush3.msra.mxu1 %v16314_v39  ;;  %19474 = vmatprep.subr.mxu0 %v16386_v29  ;;  %v16309_v39 = vld [vmem:[%s26166_s5 + $0x108] sm:$0xff] }
 0x3ba   :  { %19156 = vmatmul.mubr.msk.f32.gmra.mxu1 %vm6778_vm2, %v23694_v57  ;;  %19268 = vmatmul.mubr.msk.f32.gmra.mxu0 %vm6778_vm2, %v8969_v14  ;;  %v19927_v14 = vld [vmem:[#allocation3 + $0xa8] sm:$0xff] }
 0x3bb   :  { %19158 = vmatprep.mubr.msk.f32.mxu1 %vm6778_vm2, %v23705_v40  ;;  %19270 = vmatprep.mubr.msk.f32.mxu0 %vm6778_vm2, %v8970_v53  ;;  %v16381_v53 = vld [vmem:[%s26166_s5 + $0x148] sm:$0xff] }
 0x3bc   :  { %19364 = vmatprep.subr.mxu1 %v16313_v27  ;;  %19475 = vmatpush3.msra.mxu0 %v16386_v29  ;;  %v16308_v29 = vld [vmem:[%s26166_s5 + $0x100] sm:$0xff] }
 0x3bd   :  { %19365 = vmatpush3.msra.mxu1 %v16313_v27  ;;  %19476 = vmatprep.subr.mxu0 %v16385_v4  ;;  %v23774_v27 = vld [vmem:[#allocation3 + $0x9a] sm:$0xff] }
 0x3be   :  { %19159 = vmatmul.mubr.msk.f32.gmra.mxu1 %vm6778_vm2, %v23710_v7  ;;  %19271 = vmatmul.mubr.msk.f32.gmra.mxu0 %vm6778_vm2, %v8971_v34  ;;  %v19928_v34 = vld [vmem:[#allocation3 + $0xb0] sm:$0xff] }
 0x3bf   :  { %19161 = vmatprep.mubr.msk.f32.mxu1 %vm6778_vm2, %v23721_v32  ;;  %19273 = vmatprep.mubr.msk.f32.mxu0 %vm6778_vm2, %v8972_v51  ;;  %v23790_v51 = vld [vmem:[#allocation3 + $0xb2] sm:$0xff] }
 0x3c0   :  { %19366 = vmatprep.subr.mxu1 %v16312_v17  ;;  %19477 = vmatpush3.msra.mxu0 %v16385_v4  ;;  %v19929_v4 = vld [vmem:[#allocation3 + $0xc0] sm:$0xff] }
 0x3c1   :  { %19367 = vmatpush3.msra.mxu1 %v16312_v17  ;;  %19478 = vmatprep.subr.mxu0 %v16384_v44  ;;  %v23785_v17 = vld [vmem:[#allocation3 + $0xaa] sm:$0xff] }
 0x3c2   :  { %19162 = vmatmul.mubr.msk.f32.gmra.mxu1 %vm6778_vm2, %v23726_v60  ;;  %19274 = vmatmul.mubr.msk.f32.gmra.mxu0 %vm6778_vm2, %v8973_v5  ;;  %v16380_v5 = vld [vmem:[%s26166_s5 + $0x140] sm:$0xff] }
 0x3c3   :  { %19164 = vmatprep.mubr.msk.f32.mxu1 %vm6778_vm2, %v23737_v18  ;;  %19276 = vmatprep.mubr.msk.f32.mxu0 %vm6778_vm2, %v8974_v16  ;;  %v23803_v16 = vld [vmem:[#allocation3 + $0xc2] sm:$0xff] }
 0x3c4   :  { %19368 = vmatprep.subr.mxu1 %v16311_v49  ;;  %19479 = vmatpush3.msra.mxu0 %v16384_v44  ;;  %v19930_v44 = vld [vmem:[#allocation3 + $0xc8] sm:$0xff] }
 0x3c5   :  { %19369 = vmatpush3.msra.mxu1 %v16311_v49  ;;  %19480 = vmatprep.subr.mxu0 %v16383_v10  ;;  %v23798_v49 = vld [vmem:[%s26166_s5 + $0x1b8] sm:$0xff] }
 0x3c6   :  { %19165 = vmatmul.mubr.msk.f32.gmra.mxu1 %vm6778_vm2, %v23742_v63  ;;  %19277 = vmatmul.mubr.msk.f32.gmra.mxu0 %vm6778_vm2, %v8975_v43  ;;  %v19931_v43 = vld [vmem:[#allocation3 + $0xd8] sm:$0xff] }
 0x3c7   :  { %19167 = vmatprep.mubr.msk.f32.mxu1 %vm6778_vm2, %v23753_v61  ;;  %19279 = vmatprep.mubr.msk.f32.mxu0 %vm6778_vm2, %v8976_v0  ;;  %v23814_v0 = vld [vmem:[#allocation3 + $0xda] sm:$0xff] }
 0x3c8   :  { %19370 = vmatprep.subr.mxu1 %v16310_v12  ;;  %19481 = vmatpush3.msra.mxu0 %v16383_v10  ;;  %v19932_v10 = vld [vmem:[#allocation3 + $0xe0] sm:$0xff] }
 0x3c9   :  { %19371 = vmatpush3.msra.mxu1 %v16310_v12  ;;  %19482 = vmatprep.subr.mxu0 %v16382_v56  ;;  %v23809_v12 = vld [vmem:[#allocation3 + $0xca] sm:$0xff] }
 0x3ca   :  { %19168 = vmatmul.mubr.msk.f32.gmra.mxu1 %vm6778_vm2, %v23758_v50  ;;  %19280 = vmatmul.mubr.msk.f32.gmra.mxu0 %vm6778_vm2, %v8977_v41  ;;  %v19933_v41 = vld [vmem:[#allocation3 + $0xf0] sm:$0xff] }
 0x3cb   :  { %19170 = vmatprep.mubr.msk.f32.mxu1 %vm6778_vm2, %v23769_v20  ;;  %19282 = vmatprep.mubr.msk.f32.mxu0 %vm6778_vm2, %v19927_v14  ;;  %v23824_v14 = vld [vmem:[#allocation3 + $0xf2] sm:$0xff] }
 0x3cc   :  { %19372 = vmatprep.subr.mxu1 %v16309_v39  ;;  %19483 = vmatpush3.msra.mxu0 %v16382_v56  ;;  %v19934_v56 = vld [vmem:[#allocation3 + $0xf8] sm:$0xff] }
 0x3cd   :  { %19373 = vmatpush3.msra.mxu1 %v16309_v39  ;;  %19484 = vmatprep.subr.mxu0 %v16381_v53  ;;  %v23819_v39 = vld [vmem:[#allocation3 + $0xe2] sm:$0xff] }
 0x3ce   :  { %19171 = vmatmul.mubr.msk.f32.gmra.mxu1 %vm6778_vm2, %v23774_v27  ;;  %19283 = vmatmul.mubr.msk.f32.gmra.mxu0 %vm6778_vm2, %v19928_v34  ;;  %v19936_v34 = vld [vmem:[#allocation3 + $0x110] sm:$0xff] }
 0x3cf   :  { %19173 = vmatprep.mubr.msk.f32.mxu1 %vm6778_vm2, %v23785_v17  ;;  %19285 = vmatprep.mubr.msk.f32.mxu0 %vm6778_vm2, %v19929_v4  ;;  %v23834_v4 = vld [vmem:[#allocation3 + $0x10a] sm:$0xff] }
 0x3d0   :  { %19374 = vmatprep.subr.mxu1 %v16308_v29  ;;  %19485 = vmatpush3.msra.mxu0 %v16381_v53  ;;  %v23829_v53 = vld [vmem:[#allocation3 + $0xfa] sm:$0xff] }
 0x3d1   :  { %19375 = vmatpush3.msra.mxu1 %v16308_v29  ;;  %19486 = vmatprep.subr.mxu0 %v16380_v5  ;;  %v19935_v29 = vld [vmem:[#allocation3 + $0x108] sm:$0xff] }
 0x3d2   :  { %19174 = vmatmul.mubr.msk.f32.gmra.mxu1 %vm6778_vm2, %v23790_v51  ;;  %19286 = vmatmul.mubr.msk.f32.gmra.mxu0 %vm6778_vm2, %v19930_v44  ;;  %v23839_v44 = vld [vmem:[#allocation3 + $0x112] sm:$0xff] }
 0x3d3   :  { %19176 = vmatprep.mubr.msk.f32.mxu1 %vm6778_vm2, %v23803_v16  ;;  %19288 = vmatprep.mubr.msk.f32.mxu0 %vm6778_vm2, %v19931_v43  ;;  %v19938_v43 = vld [vmem:[#allocation3 + $0x128] sm:$0xff] }
 0x3d4   :  { %19584 = vmatprep.subr.mxu1 %v23798_v49  ;;  %19487 = vmatpush3.msra.mxu0 %v16380_v5  ;;  %v19937_v5 = vld [vmem:[#allocation3 + $0x120] sm:$0xff] }
 0x3d6   :  { %19177 = vmatmul.mubr.msk.f32.gmra.mxu1 %vm6778_vm2, %v23809_v12  ;;  %19289 = vmatmul.mubr.msk.f32.gmra.mxu0 %vm6778_vm2, %v19932_v10  ;;  %v23844_v10 = vld [vmem:[#allocation3 + $0x122] sm:$0xff] }
 0x3d7   :  { %19179 = vmatprep.mubr.msk.f32.mxu1 %vm6778_vm2, %v23814_v0  ;;  %19291 = vmatprep.mubr.msk.f32.mxu0 %vm6778_vm2, %v19933_v41  ;;  %v19939_v41 = vld [vmem:[#allocation3 + $0x138] sm:$0xff] }
 0x3da   :  { %19180 = vmatmul.mubr.msk.f32.gmra.mxu1 %vm6778_vm2, %v23819_v39  ;;  %19292 = vmatmul.mubr.msk.f32.gmra.mxu0 %vm6778_vm2, %v19934_v56  ;;  %v23849_v56 = vld [vmem:[#allocation3 + $0x12a] sm:$0xff] }
 0x3db   :  { %19182 = vmatprep.mubr.msk.f32.mxu1 %vm6778_vm2, %v23824_v14  ;;  %19294 = vmatprep.mubr.msk.f32.mxu0 %vm6778_vm2, %v19935_v29  ;;  %v19940_v29 = vld [vmem:[#allocation3 + $0x140] sm:$0xff] }
 0x3de   :  { %19183 = vmatmul.mubr.msk.f32.gmra.mxu1 %vm6778_vm2, %v23829_v53  ;;  %19295 = vmatmul.mubr.msk.f32.gmra.mxu0 %vm6778_vm2, %v19936_v34  ;;  %v23854_v34 = vld [vmem:[#allocation3 + $0x13a] sm:$0xff] }
 0x3df   :  { %19185 = vmatprep.mubr.msk.f32.mxu1 %vm6778_vm2, %v23834_v4  ;;  %19297 = vmatprep.mubr.msk.f32.mxu0 %vm6778_vm2, %v19937_v5  ;;  %v23860_v5 = vld [vmem:[#allocation3 + $0x142] sm:$0xff] }
 0x3e2   :  { %19186 = vmatmul.mubr.msk.f32.gmra.mxu1 %vm6778_vm2, %v23839_v44  ;;  %19298 = vmatmul.mubr.msk.f32.gmra.mxu0 %vm6778_vm2, %v19938_v43  ;;  %v19941_v43 = vld [vmem:[#allocation3 + $0x158] sm:$0xff] }
 0x3e3   :  { %19188 = vmatprep.mubr.msk.f32.mxu1 %vm6778_vm2, %v23844_v10  ;;  %19300 = vmatprep.mubr.msk.f32.mxu0 %vm6778_vm2, %v19939_v41  ;;  %v23865_v41 = vld [vmem:[#allocation3 + $0x152] sm:$0xff] }
 0x3e4   :  { %26658 = vst [vmem:[#allocation54_spill] sm:$0xff] %v23865_v41 }
 0x3e6   :  { %19189 = vmatmul.mubr.msk.f32.gmra.mxu1 %vm6778_vm2, %v23849_v56  ;;  %19301 = vmatmul.mubr.msk.f32.gmra.mxu0 %vm6778_vm2, %v19940_v29  ;;  %v23871_v29 = vld [vmem:[#allocation3 + $0x15a] sm:$0xff] }
 0x3e7   :  { %19191 = vmatprep.mubr.msk.f32.mxu1 %vm6778_vm2, %v23854_v34  ;;  %19303 = vmatprep.mubr.msk.f32.mxu0 %vm6778_vm2, %v23339_v36  ;;  %26659 = vst [vmem:[#allocation57_spill] sm:$0xff] %v23871_v29  ;;  %v23877_v36 = vld [vmem:[#allocation3 + $0x16a] sm:$0xff] }
 0x3e8   :  { %26660 = vst [vmem:[#allocation56_spill] sm:$0xff] %v23877_v36 }
 0x3ea   :  { %19192 = vmatmul.mubr.msk.f32.gmra.mxu1 %vm6778_vm2, %v23860_v5  ;;  %19304 = vmatmul.mubr.msk.f32.gmra.mxu0 %vm6778_vm2, %v19941_v43  ;;  %v8284_v43 = vld [vmem:[#allocation3 + $0x1b2] sm:$0xff] }
 0x3eb   :  { %19194 = vmatprep.mubr.msk.f32.mxu1 %vm6778_vm2, %v23865_v41  ;;  %19306 = vmatprep.mubr.msk.f32.mxu0 %vm6778_vm2, %v23358_v52  ;;  %v23882_v41 = vld [vmem:[#allocation3 + $0x172] sm:$0xff]  ;;  %v8997_v52 = vld [vmem:[#allocation3 + $0x188] sm:$0xff] }
 0x3ec   :  { %26661 = vst [vmem:[#allocation29_spill] sm:$0xff] %v23882_v41 }
 0x3ee   :  { %19195 = vmatmul.mubr.msk.f32.gmra.mxu1 %vm6778_vm2, %v23871_v29  ;;  %19307 = vmatmul.mubr.msk.f32.gmra.mxu0 %vm6778_vm2, %v23360_v11  ;;  %v8285_v11 = vld [vmem:[#allocation3 + $0x1ba] sm:$0xff] }
 0x3ef   :  { %19197 = vmatprep.mubr.msk.f32.mxu1 %vm6778_vm2, %v23877_v36  ;;  %19309 = vmatprep.mubr.msk.f32.mxu0 %vm6778_vm2, %v8996_v21  ;;  %v23893_v21 = vld [vmem:[#allocation3 + $0x1ca] sm:$0xff] }
 0x3f0   :  { %26662 = vst [vmem:[#allocation31_spill] sm:$0xff] %v23893_v21 }
 0x3f2   :  { %19198 = vmatmul.mubr.msk.f32.gmra.mxu1 %vm6778_vm2, %v23882_v41  ;;  %19310 = vmatmul.mubr.msk.f32.gmra.mxu0 %vm6778_vm2, %v8997_v52  ;;  %v23899_v52 = vpop.f32.mrf.mxu1  ;;  %v23901_v41 = vpop.f32.mrf.mxu0 }
 0x3f3   :  { %19312 = vmatprep.mubr.msk.f32.mxu0 %vm6778_vm2, %v23396_v42  ;;  %19200 = vmatprep.mubr.msk.f32.mxu1 %vm6778_vm2, %v8284_v43  ;;  %26663 = vst [vmem:[#allocation59_spill] sm:$0xff] %v23899_v52  ;;  %26664 = vst [vmem:[#allocation58_spill] sm:$0xff] %v23901_v41  ;;  %v23903_v42 = vld [vmem:[#allocation3 + $0x1d2] sm:$0xff] }
 0x3f4   :  { %26665 = vst [vmem:[#allocation83_spill] sm:$0xff] %v23903_v42 }
 0x3f6   :  { %19201 = vmatmul.mubr.msk.f32.gmra.mxu1 %vm6778_vm2, %v8285_v11  ;;  %19313 = vmatmul.mubr.msk.f32.gmra.mxu0 %vm6778_vm2, %v23398_v55  ;;  %v23909_v55 = vld [vmem:[#allocation3 + $0x1e2] sm:$0xff] }
 0x3f7   :  { %19203 = vmatprep.mubr.msk.f32.mxu1 %vm6778_vm2, %v23893_v21  ;;  %19315 = vmatprep.mubr.msk.f32.mxu0 %vm6778_vm2, %v23418_v13  ;;  %v23919_v21 = vld [vmem:[#allocation3 + $0x1ea] sm:$0xff] }
 0x3f9   :  { %v18933_v43 = vpop.f32.mrf.mxu1 }
 0x3fa   :  { %v19045_v36 = vpop.f32.mrf.mxu0  ;;  %19204 = vmatmul.mubr.msk.f32.gmra.mxu1 %vm6778_vm2, %v23903_v42  ;;  %19316 = vmatmul.mubr.msk.f32.gmra.mxu0 %vm6778_vm2, %v23420_v30  ;;  %v23925_v30 = vld [vmem:[#allocation3 + $0x1fa] sm:$0xff] }
 0x3fb   :  { %v23911_v11 = vadd.f32 %v19045_v36, %v18933_v43  ;;  %19206 = vmatprep.mubr.msk.f32.mxu1 %vm6778_vm2, %v23909_v55  ;;  %19318 = vmatprep.mubr.msk.f32.mxu0 %vm6778_vm2, %v23440_v38  ;;  %v7366_v13 = vpop.f32.mrf.mxu1 }
 0x3fc   :  { %v7943_v41 = vpop.f32.mrf.mxu0 }
 0x3fd   :  { %26666 = vst [vmem:[#allocation32_spill] sm:$0xff] %v23911_v11  ;;  %v23917_v52 = vadd.f32 %v7943_v41, %v7366_v13  ;;  %v18936_v42 = vpop.f32.mrf.mxu1  ;;  %v23935_v13 = vld [vmem:[#allocation3 + $0x202] sm:$0xff] }
 0x3fe   :  { %v19048_v29 = vpop.f32.mrf.mxu0  ;;  %19207 = vmatmul.mubr.msk.f32.gmra.mxu1 %vm6778_vm2, %v23919_v21  ;;  %19319 = vmatmul.mubr.msk.f32.gmra.mxu0 %vm6778_vm2, %v23442_v62  ;;  %v23941_v62 = vld [vmem:[#allocation3 + $0x212] sm:$0xff] }
 0x3ff   :  { %26667 = vst [vmem:[#allocation61_spill] sm:$0xff] %v23917_v52  ;;  %v23927_v36 = vadd.f32 %v19048_v29, %v18936_v42  ;;  %19209 = vmatprep.mubr.msk.f32.mxu1 %vm6778_vm2, %v23925_v30  ;;  %19321 = vmatprep.mubr.msk.f32.mxu0 %vm6778_vm2, %v23462_v33  ;;  %v7376_v38 = vpop.f32.mrf.mxu1 }
 0x400   :  { %v7953_v41 = vpop.f32.mrf.mxu0 }
 0x401   :  { %26668 = vst [vmem:[#allocation60_spill] sm:$0xff] %v23927_v36  ;;  %v23933_v43 = vadd.f32 %v7953_v41, %v7376_v38  ;;  %v18939_v52 = vpop.f32.mrf.mxu1  ;;  %v23951_v41 = vld [vmem:[#allocation3 + $0x21a] sm:$0xff] }
 0x402   :  { %v19051_v11 = vpop.f32.mrf.mxu0  ;;  %19210 = vmatmul.mubr.msk.f32.gmra.mxu1 %vm6778_vm2, %v23935_v13  ;;  %19322 = vmatmul.mubr.msk.f32.gmra.mxu0 %vm6778_vm2, %v23464_v2  ;;  %v23957_v2 = vld [vmem:[#allocation3 + $0x22a] sm:$0xff] }
 0x403   :  { %26669 = vst [vmem:[#allocation30_spill] sm:$0xff] %v23933_v43  ;;  %v23943_v29 = vadd.f32 %v19051_v11, %v18939_v52  ;;  %19212 = vmatprep.mubr.msk.f32.mxu1 %vm6778_vm2, %v23941_v62  ;;  %19324 = vmatprep.mubr.msk.f32.mxu0 %vm6778_vm2, %v23489_v58  ;;  %v7386_v33 = vpop.f32.mrf.mxu1 }
 0x404   :  { %v7963_v42 = vpop.f32.mrf.mxu0 }
 0x405   :  { %26670 = vst [vmem:[#allocation35_spill] sm:$0xff] %v23943_v29  ;;  %v23949_v38 = vadd.f32 %v7963_v42, %v7386_v33  ;;  %v18942_v43 = vpop.f32.mrf.mxu1  ;;  %v23967_v42 = vld [vmem:[#allocation3 + $0x232] sm:$0xff] }
 0x406   :  { %v19054_v36 = vpop.f32.mrf.mxu0  ;;  %19213 = vmatmul.mubr.msk.f32.gmra.mxu1 %vm6778_vm2, %v23951_v41  ;;  %19325 = vmatmul.mubr.msk.f32.gmra.mxu0 %vm6778_vm2, %v23491_v37  ;;  %v23973_v37 = vld [vmem:[#allocation3 + $0x242] sm:$0xff] }
 0x407   :  { %26671 = vst [vmem:[#allocation63_spill] sm:$0xff] %v23949_v38  ;;  %v23959_v52 = vadd.f32 %v19054_v36, %v18942_v43  ;;  %19215 = vmatprep.mubr.msk.f32.mxu1 %vm6778_vm2, %v23957_v2  ;;  %19327 = vmatprep.mubr.msk.f32.mxu0 %vm6778_vm2, %v23511_v35  ;;  %v7396_v58 = vpop.f32.mrf.mxu1 }
 0x408   :  { %v7973_v11 = vpop.f32.mrf.mxu0 }
 0x409   :  { %26672 = vst [vmem:[#allocation62_spill] sm:$0xff] %v23959_v52  ;;  %v23965_v33 = vadd.f32 %v7973_v11, %v7396_v58  ;;  %v18945_v38 = vpop.f32.mrf.mxu1  ;;  %v23983_v11 = vld [vmem:[#allocation3 + $0x24a] sm:$0xff] }
 0x40a   :  { %v19057_v29 = vpop.f32.mrf.mxu0  ;;  %19216 = vmatmul.mubr.msk.f32.gmra.mxu1 %vm6778_vm2, %v23967_v42  ;;  %19328 = vmatmul.mubr.msk.f32.gmra.mxu0 %vm6778_vm2, %v23513_v47  ;;  %v23989_v47 = vld [vmem:[#allocation3 + $0x25a] sm:$0xff] }
 0x40b   :  { %26673 = vst [vmem:[#allocation33_spill] sm:$0xff] %v23965_v33  ;;  %v23975_v36 = vadd.f32 %v19057_v29, %v18945_v38  ;;  %19218 = vmatprep.mubr.msk.f32.mxu1 %vm6778_vm2, %v23973_v37  ;;  %19330 = vmatprep.mubr.msk.f32.mxu0 %vm6778_vm2, %v23533_v28  ;;  %v7406_v35 = vpop.f32.mrf.mxu1 }
 0x40c   :  { %v7983_v43 = vpop.f32.mrf.mxu0 }
 0x40d   :  { %26674 = vst [vmem:[#allocation7_spill] sm:$0xff] %v23975_v36  ;;  %v23981_v58 = vadd.f32 %v7983_v43, %v7406_v35  ;;  %v18948_v33 = vpop.f32.mrf.mxu1  ;;  %v23999_v43 = vld [vmem:[#allocation3 + $0x262] sm:$0xff] }
 0x40e   :  { %v19060_v52 = vpop.f32.mrf.mxu0  ;;  %19219 = vmatmul.mubr.msk.f32.gmra.mxu1 %vm6778_vm2, %v23983_v11  ;;  %19331 = vmatmul.mubr.msk.f32.gmra.mxu0 %vm6778_vm2, %v23535_v31  ;;  %v24005_v31 = vld [vmem:[#allocation3 + $0x272] sm:$0xff] }
 0x40f   :  { %26675 = vst [vmem:[#allocation65_spill] sm:$0xff] %v23981_v58  ;;  %v23991_v29 = vadd.f32 %v19060_v52, %v18948_v33  ;;  %19221 = vmatprep.mubr.msk.f32.mxu1 %vm6778_vm2, %v23989_v47  ;;  %19333 = vmatprep.mubr.msk.f32.mxu0 %vm6778_vm2, %v23553_v24  ;;  %v7416_v28 = vpop.f32.mrf.mxu1 }
 0x410   :  { %v7993_v38 = vpop.f32.mrf.mxu0 }
 0x411   :  { %26676 = vst [vmem:[#allocation64_spill] sm:$0xff] %v23991_v29  ;;  %v23997_v35 = vadd.f32 %v7993_v38, %v7416_v28  ;;  %v18951_v58 = vpop.f32.mrf.mxu1  ;;  %v24015_v38 = vld [vmem:[#allocation3 + $0x27a] sm:$0xff] }
 0x412   :  { %v19063_v36 = vpop.f32.mrf.mxu0  ;;  %19222 = vmatmul.mubr.msk.f32.gmra.mxu1 %vm6778_vm2, %v23999_v43  ;;  %19334 = vmatmul.mubr.msk.f32.gmra.mxu0 %vm6778_vm2, %v23555_v25  ;;  %v24021_v25 = vld [vmem:[#allocation3 + $0x28a] sm:$0xff] }
 0x413   :  { %26677 = vst [vmem:[#allocation34_spill] sm:$0xff] %v23997_v35  ;;  %v24007_v52 = vadd.f32 %v19063_v36, %v18951_v58  ;;  %19224 = vmatprep.mubr.msk.f32.mxu1 %vm6778_vm2, %v24005_v31  ;;  %19336 = vmatprep.mubr.msk.f32.mxu0 %vm6778_vm2, %v23573_v3  ;;  %v7426_v24 = vpop.f32.mrf.mxu1 }
 0x414   :  { %v8003_v33 = vpop.f32.mrf.mxu0 }
 0x415   :  { %26678 = vst [vmem:[#allocation37_spill] sm:$0xff] %v24007_v52  ;;  %v24013_v28 = vadd.f32 %v8003_v33, %v7426_v24  ;;  %v18954_v35 = vpop.f32.mrf.mxu1  ;;  %v24031_v33 = vld [vmem:[#allocation3 + $0x292] sm:$0xff] }
 0x416   :  { %v19066_v29 = vpop.f32.mrf.mxu0  ;;  %19225 = vmatmul.mubr.msk.f32.gmra.mxu1 %vm6778_vm2, %v24015_v38  ;;  %19337 = vmatmul.mubr.msk.f32.gmra.mxu0 %vm6778_vm2, %v23575_v1  ;;  %v24037_v1 = vld [vmem:[#allocation3 + $0x2a2] sm:$0xff] }
 0x417   :  { %26679 = vst [vmem:[#allocation67_spill] sm:$0xff] %v24013_v28  ;;  %v24023_v36 = vadd.f32 %v19066_v29, %v18954_v35  ;;  %19227 = vmatprep.mubr.msk.f32.mxu1 %vm6778_vm2, %v24021_v25  ;;  %19339 = vmatprep.mubr.msk.f32.mxu0 %vm6778_vm2, %v23593_v22  ;;  %v7436_v3 = vpop.f32.mrf.mxu1 }
 0x418   :  { %v8013_v58 = vpop.f32.mrf.mxu0 }
 0x419   :  { %26680 = vst [vmem:[#allocation66_spill] sm:$0xff] %v24023_v36  ;;  %v24029_v24 = vadd.f32 %v8013_v58, %v7436_v3  ;;  %v18957_v28 = vpop.f32.mrf.mxu1  ;;  %v24047_v58 = vld [vmem:[#allocation3 + $0x2aa] sm:$0xff] }
 0x41a   :  { %v19069_v52 = vpop.f32.mrf.mxu0  ;;  %19228 = vmatmul.mubr.msk.f32.gmra.mxu1 %vm6778_vm2, %v24031_v33  ;;  %19340 = vmatmul.mubr.msk.f32.gmra.mxu0 %vm6778_vm2, %v23595_v15  ;;  %v24053_v15 = vld [vmem:[#allocation3 + $0x2ba] sm:$0xff] }
 0x41b   :  { %26681 = vst [vmem:[#allocation36_spill] sm:$0xff] %v24029_v24  ;;  %v24039_v29 = vadd.f32 %v19069_v52, %v18957_v28  ;;  %19230 = vmatprep.mubr.msk.f32.mxu1 %vm6778_vm2, %v24037_v1  ;;  %19342 = vmatprep.mubr.msk.f32.mxu0 %vm6778_vm2, %v23610_v54  ;;  %v7446_v22 = vpop.f32.mrf.mxu1 }
 0x41c   :  { %v8023_v35 = vpop.f32.mrf.mxu0 }
 0x41d   :  { %26682 = vst [vmem:[#allocation9_spill] sm:$0xff] %v24039_v29  ;;  %v24045_v3 = vadd.f32 %v8023_v35, %v7446_v22  ;;  %v18960_v24 = vpop.f32.mrf.mxu1  ;;  %v24063_v35 = vld [vmem:[#allocation3 + $0x2c2] sm:$0xff] }
 0x41e   :  { %v19072_v36 = vpop.f32.mrf.mxu0  ;;  %19231 = vmatmul.mubr.msk.f32.gmra.mxu1 %vm6778_vm2, %v24047_v58  ;;  %19343 = vmatmul.mubr.msk.f32.gmra.mxu0 %vm6778_vm2, %v23612_v8  ;;  %v24069_v8 = vld [vmem:[#allocation3 + $0x2d2] sm:$0xff] }
 0x41f   :  { %26683 = vst [vmem:[#allocation69_spill] sm:$0xff] %v24045_v3  ;;  %v24055_v52 = vadd.f32 %v19072_v36, %v18960_v24  ;;  %19233 = vmatprep.mubr.msk.f32.mxu1 %vm6778_vm2, %v24053_v15  ;;  %19345 = vmatprep.mubr.msk.f32.mxu0 %vm6778_vm2, %v23626_v6  ;;  %v7456_v54 = vpop.f32.mrf.mxu1 }
 0x420   :  { %v8033_v28 = vpop.f32.mrf.mxu0 }
 0x421   :  { %26684 = vst [vmem:[#allocation68_spill] sm:$0xff] %v24055_v52  ;;  %v24061_v22 = vadd.f32 %v8033_v28, %v7456_v54  ;;  %v18963_v3 = vpop.f32.mrf.mxu1  ;;  %v24079_v28 = vld [vmem:[#allocation3 + $0x2da] sm:$0xff] }
 0x422   :  { %v19075_v29 = vpop.f32.mrf.mxu0  ;;  %19234 = vmatmul.mubr.msk.f32.gmra.mxu1 %vm6778_vm2, %v24063_v35  ;;  %19346 = vmatmul.mubr.msk.f32.gmra.mxu0 %vm6778_vm2, %v23628_v23  ;;  %v24085_v23 = vld [vmem:[#allocation3 + $0x2ea] sm:$0xff] }
 0x423   :  { %26685 = vst [vmem:[#allocation8_spill] sm:$0xff] %v24061_v22  ;;  %v24071_v36 = vadd.f32 %v19075_v29, %v18963_v3  ;;  %19236 = vmatprep.mubr.msk.f32.mxu1 %vm6778_vm2, %v24069_v8  ;;  %19348 = vmatprep.mubr.msk.f32.mxu0 %vm6778_vm2, %v23643_v59  ;;  %v7466_v6 = vpop.f32.mrf.mxu1  ;;  %26687 = vst [vmem:[#allocation70_spill] sm:$0xff] %v24085_v23  ;;  %v16531_v59 = vld [vmem:[%s26166_s5 + $0x1f8] sm:$0xff] }
 0x424   :  { %v8043_v24 = vpop.f32.mrf.mxu0  ;;  %19696 = vmatprep.subr.mxu0 %v16531_v59 }
 0x425   :  { %v24077_v54 = vadd.f32 %v8043_v24, %v7466_v6  ;;  %v18966_v22 = vpop.f32.mrf.mxu1 }
 0x426   :  { %v19078_v52 = vpop.f32.mrf.mxu0  ;;  %19237 = vmatmul.mubr.msk.f32.gmra.mxu1 %vm6778_vm2, %v24079_v28  ;;  %19349 = vmatmul.mubr.msk.f32.gmra.mxu0 %vm6778_vm2, %v23645_v19  ;;  %v24098_v19 = vld [vmem:[#allocation3 + $0x2f2] sm:$0xff] }
 0x427   :  { %26686 = vst [vmem:[#allocation11_spill] sm:$0xff] %v24077_v54  ;;  %v24087_v29 = vadd.f32 %v19078_v52, %v18966_v22  ;;  %19239 = vmatprep.mubr.msk.f32.mxu1 %vm6778_vm2, %v24085_v23  ;;  %19351 = vmatprep.mubr.msk.f32.mxu0 %vm6778_vm2, %v23658_v9  ;;  %v7476_v3 = vpop.f32.mrf.mxu1  ;;  %26690 = vst [vmem:[#allocation38_spill] sm:$0xff] %v24098_v19  ;;  %v24104_v9 = vld [vmem:[#allocation3 + $0x302] sm:$0xff] }
 0x428   :  { %v8053_v6 = vpop.f32.mrf.mxu0  ;;  %26691 = vst [vmem:[#allocation73_spill] sm:$0xff] %v24104_v9 }
 0x429   :  { %26688 = vst [vmem:[#allocation71_spill] sm:$0xff] %v24087_v29  ;;  %v24096_v24 = vadd.f32 %v8053_v6, %v7476_v3  ;;  %v18969_v54 = vpop.f32.mrf.mxu1  ;;  %v24114_v29 = vld [vmem:[#allocation3 + $0x30a] sm:$0xff] }
 0x42a   :  { %v19081_v52 = vpop.f32.mrf.mxu0  ;;  %19240 = vmatmul.mubr.msk.f32.gmra.mxu1 %vm6778_vm2, %v24098_v19  ;;  %19352 = vmatmul.mubr.msk.f32.gmra.mxu0 %vm6778_vm2, %v23660_v46  ;;  %26694 = vst [vmem:[#allocation42_spill] sm:$0xff] %v24114_v29  ;;  %v24120_v46 = vld [vmem:[#allocation3 + $0x31a] sm:$0xff] }
 0x42b   :  { %26689 = vst [vmem:[#allocation10_spill] sm:$0xff] %v24096_v24  ;;  %v24106_v22 = vadd.f32 %v19081_v52, %v18969_v54  ;;  %19242 = vmatprep.mubr.msk.f32.mxu1 %vm6778_vm2, %v24104_v9  ;;  %19354 = vmatprep.mubr.msk.f32.mxu0 %vm6778_vm2, %v23669_v45  ;;  %v7486_v3 = vpop.f32.mrf.mxu1  ;;  %v9028_v54 = vld [vmem:[#allocation3 + $0x330] sm:$0xff] }
 0x42c   :  { %v8063_v6 = vpop.f32.mrf.mxu0 }
 0x42d   :  { %26692 = vst [vmem:[#allocation72_spill] sm:$0xff] %v24106_v22  ;;  %v24112_v24 = vadd.f32 %v8063_v6, %v7486_v3  ;;  %v18972_v19 = vpop.f32.mrf.mxu1  ;;  %v9029_v22 = vld [vmem:[#allocation3 + $0x338] sm:$0xff] }
 0x42e   :  { %v19084_v23 = vpop.f32.mrf.mxu0  ;;  %19243 = vmatmul.mubr.msk.f32.gmra.mxu1 %vm6778_vm2, %v24114_v29  ;;  %19355 = vmatmul.mubr.msk.f32.gmra.mxu0 %vm6778_vm2, %v23671_v26  ;;  %v9680_v26 = vld [vmem:[#allocation3 + $0x19] sm:$0xff] }
 0x42f   :  { %26693 = vst [vmem:[#allocation39_spill] sm:$0xff] %v24112_v24  ;;  %v24122_v52 = vadd.f32 %v19084_v23, %v18972_v19  ;;  %19245 = vmatprep.mubr.msk.f32.mxu1 %vm6778_vm2, %v24120_v46  ;;  %19357 = vmatprep.mubr.msk.f32.mxu0 %vm6778_vm2, %v9028_v54  ;;  %v7496_v45 = vpop.f32.mrf.mxu1  ;;  %v24129_v24 = vld [vmem:[#allocation3 + $0x322] sm:$0xff] }
 0x430   :  { %v8073_v3 = vpop.f32.mrf.mxu0  ;;  %26697 = vst [vmem:[#allocation40_spill] sm:$0xff] %v24129_v24 }
 0x431   :  { %26695 = vst [vmem:[#allocation74_spill] sm:$0xff] %v24122_v52  ;;  %v24127_v6 = vadd.f32 %v8073_v3, %v7496_v45  ;;  %v18975_v29 = vpop.f32.mrf.mxu1  ;;  %v9681_v3 = vld [vmem:[#allocation3 + $0x21] sm:$0xff] }
 0x432   :  { %v19087_v9 = vpop.f32.mrf.mxu0  ;;  %19246 = vmatmul.mubr.msk.f32.gmra.mxu1 %vm6778_vm2, %v24129_v24  ;;  %19358 = vmatmul.mubr.msk.f32.gmra.mxu0 %vm6778_vm2, %v9029_v22 }
 0x433   :  { %26696 = vst [vmem:[#allocation75_spill] sm:$0xff] %v24127_v6  ;;  %v24134_v23 = vadd.f32 %v19087_v9, %v18975_v29  ;;  %19376 = vmatprep.mubr.msk.f32.mxu1 %vm6778_vm2, %v9680_v26  ;;  %19488 = vmatprep.mubr.msk.f32.mxu0 %vm6778_vm2, %v23686_v48  ;;  %v7506_v19 = vpop.f32.mrf.mxu1  ;;  %v16458_v6 = vld [vmem:[%s26166_s5 + $0x1b0] sm:$0xff] }
 0x434   :  { %v8083_v54 = vpop.f32.mrf.mxu0  ;;  %v24147_v29 = vld [vmem:[#allocation3 + $0x31] sm:$0xff] }
 0x435   :  { %v24139_v45 = vadd.f32 %v8083_v54, %v7506_v19  ;;  %v18978_v52 = vpop.f32.mrf.mxu1  ;;  %v9683_v19 = vld [vmem:[#allocation3 + $0x39] sm:$0xff] }
 0x436   :  { %v19090_v24 = vpop.f32.mrf.mxu0  ;;  %19377 = vmatmul.mubr.msk.f32.vlgmr.msra.gmra.mxu1 %vm6778_vm2, %v9681_v3  ;;  %19489 = vmatmul.mubr.msk.f32.vlgmr.msra.gmra.mxu0 %vm6778_vm2, %v23694_v57  ;;  %v16457_v57 = vld [vmem:[%s26166_s5 + $0x1a8] sm:$0xff] }
 0x437   :  { %v24149_v9 = vadd.f32 %v19090_v24, %v18978_v52  ;;  %19585 = vmatpush3.msra.mxu1 %v23798_v49  ;;  %19379 = vmatprep.mubr.msk.f32.mxu1 %vm6778_vm2, %v24147_v29  ;;  %v7516_v48 = vpop.f32.mrf.mxu1  ;;  %v16530_v49 = vld [vmem:[%s26166_s5 + $0x1f0] sm:$0xff] }
 0x438   :  { %19491 = vmatprep.mubr.msk.f32.mxu0 %vm6778_vm2, %v23705_v40  ;;  %v8093_v22 = vpop.f32.mrf.mxu0  ;;  %19586 = vmatprep.subr.mxu1 %v16458_v6  ;;  %v9684_v40 = vld [vmem:[#allocation3 + $0x49] sm:$0xff] }
 0x439   :  { %v24156_v26 = vadd.f32 %v8093_v22, %v7516_v48  ;;  %19587 = vmatpush3.msra.mxu1 %v16458_v6  ;;  %19697 = vmatpush3.msra.mxu0 %v16531_v59  ;;  %v18981_v24 = vpop.f32.mrf.mxu1  ;;  %v9685_v48 = vld [vmem:[#allocation3 + $0x51] sm:$0xff]  ;;  %v16529_v22 = vld [vmem:[%s26166_s5 + $0x1e8] sm:$0xff] }
 0x43a   :  { %v19093_v52 = vpop.f32.mrf.mxu0  ;;  %19380 = vmatmul.mubr.msk.f32.gmra.mxu1 %vm6778_vm2, %v9683_v19  ;;  %19492 = vmatmul.mubr.msk.f32.gmra.mxu0 %vm6778_vm2, %v23710_v7  ;;  %v16456_v7 = vld [vmem:[%s26166_s5 + $0x1a0] sm:$0xff] }
 0x43b   :  { %v24167_v54 = vadd.f32 %v19093_v52, %v18981_v24  ;;  %19382 = vmatprep.mubr.msk.f32.mxu1 %vm6778_vm2, %v9684_v40  ;;  %19494 = vmatprep.mubr.msk.f32.mxu0 %vm6778_vm2, %v23721_v32  ;;  %v7526_v59 = vpop.f32.mrf.mxu1  ;;  %v9686_v32 = vld [vmem:[#allocation3 + $0x61] sm:$0xff] }
 0x43c   :  { %v8103_v6 = vpop.f32.mrf.mxu0  ;;  %19588 = vmatprep.subr.mxu1 %v16457_v57  ;;  %19698 = vmatprep.subr.mxu0 %v16530_v49 }
 0x43d   :  { %v24172_v3 = vadd.f32 %v8103_v6, %v7526_v59  ;;  %19589 = vmatpush3.msra.mxu1 %v16457_v57  ;;  %19699 = vmatpush3.msra.mxu0 %v16530_v49  ;;  %v18984_v19 = vpop.f32.mrf.mxu1  ;;  %v9687_v59 = vld [vmem:[#allocation3 + $0x69] sm:$0xff]  ;;  %v16528_v6 = vld [vmem:[%s26166_s5 + $0x1e0] sm:$0xff] }
 0x43e   :  { %v19096_v24 = vpop.f32.mrf.mxu0  ;;  %19383 = vmatmul.mubr.msk.f32.gmra.mxu1 %vm6778_vm2, %v9685_v48  ;;  %19495 = vmatmul.mubr.msk.f32.gmra.mxu0 %vm6778_vm2, %v23726_v60  ;;  %v16455_v60 = vld [vmem:[%s26166_s5 + $0x198] sm:$0xff] }
 0x43f   :  { %v24183_v52 = vadd.f32 %v19096_v24, %v18984_v19  ;;  %19385 = vmatprep.mubr.msk.f32.mxu1 %vm6778_vm2, %v9686_v32  ;;  %19497 = vmatprep.mubr.msk.f32.mxu0 %vm6778_vm2, %v23737_v18  ;;  %v7536_v57 = vpop.f32.mrf.mxu1  ;;  %v9688_v18 = vld [vmem:[#allocation3 + $0x79] sm:$0xff] }
 0x440   :  { %v8113_v49 = vpop.f32.mrf.mxu0  ;;  %19590 = vmatprep.subr.mxu1 %v16456_v7  ;;  %19700 = vmatprep.subr.mxu0 %v16529_v22 }
 0x441   :  { %v24188_v40 = vadd.f32 %v8113_v49, %v7536_v57  ;;  %19591 = vmatpush3.msra.mxu1 %v16456_v7  ;;  %19701 = vmatpush3.msra.mxu0 %v16529_v22  ;;  %v18987_v48 = vpop.f32.mrf.mxu1  ;;  %v9689_v57 = vld [vmem:[#allocation3 + $0x81] sm:$0xff]  ;;  %v16527_v49 = vld [vmem:[%s26166_s5 + $0x1d8] sm:$0xff] }
 0x442   :  { %v19099_v19 = vpop.f32.mrf.mxu0  ;;  %19386 = vmatmul.mubr.msk.f32.gmra.mxu1 %vm6778_vm2, %v9687_v59  ;;  %19498 = vmatmul.mubr.msk.f32.gmra.mxu0 %vm6778_vm2, %v23742_v63  ;;  %v16454_v63 = vld [vmem:[%s26166_s5 + $0x190] sm:$0xff] }
 0x443   :  { %v24199_v24 = vadd.f32 %v19099_v19, %v18987_v48  ;;  %19388 = vmatprep.mubr.msk.f32.mxu1 %vm6778_vm2, %v9688_v18  ;;  %19500 = vmatprep.mubr.msk.f32.mxu0 %vm6778_vm2, %v23753_v61  ;;  %v7546_v7 = vpop.f32.mrf.mxu1  ;;  %v9690_v61 = vld [vmem:[#allocation3 + $0x91] sm:$0xff] }
 0x444   :  { %v8123_v22 = vpop.f32.mrf.mxu0  ;;  %19592 = vmatprep.subr.mxu1 %v16455_v60  ;;  %19702 = vmatprep.subr.mxu0 %v16528_v6 }
 0x445   :  { %v24204_v32 = vadd.f32 %v8123_v22, %v7546_v7  ;;  %19593 = vmatpush3.msra.mxu1 %v16455_v60  ;;  %19703 = vmatpush3.msra.mxu0 %v16528_v6  ;;  %v18990_v59 = vpop.f32.mrf.mxu1  ;;  %v9691_v7 = vld [vmem:[#allocation3 + $0x99] sm:$0xff]  ;;  %v16526_v22 = vld [vmem:[%s26166_s5 + $0x1d0] sm:$0xff] }
 0x446   :  { %v19102_v48 = vpop.f32.mrf.mxu0  ;;  %19389 = vmatmul.mubr.msk.f32.gmra.mxu1 %vm6778_vm2, %v9689_v57  ;;  %19501 = vmatmul.mubr.msk.f32.gmra.mxu0 %vm6778_vm2, %v23758_v50  ;;  %v16453_v50 = vld [vmem:[%s26166_s5 + $0x188] sm:$0xff] }
 0x447   :  { %v24215_v19 = vadd.f32 %v19102_v48, %v18990_v59  ;;  %19391 = vmatprep.mubr.msk.f32.mxu1 %vm6778_vm2, %v9690_v61  ;;  %19503 = vmatprep.mubr.msk.f32.mxu0 %vm6778_vm2, %v23769_v20  ;;  %v7556_v60 = vpop.f32.mrf.mxu1  ;;  %v9692_v20 = vld [vmem:[#allocation3 + $0xa9] sm:$0xff] }
 0x448   :  { %v8133_v6 = vpop.f32.mrf.mxu0  ;;  %19594 = vmatprep.subr.mxu1 %v16454_v63  ;;  %19704 = vmatprep.subr.mxu0 %v16527_v49 }
 0x449   :  { %v24220_v18 = vadd.f32 %v8133_v6, %v7556_v60  ;;  %19595 = vmatpush3.msra.mxu1 %v16454_v63  ;;  %19705 = vmatpush3.msra.mxu0 %v16527_v49  ;;  %v18993_v57 = vpop.f32.mrf.mxu1  ;;  %v9693_v60 = vld [vmem:[#allocation3 + $0xb1] sm:$0xff]  ;;  %v16525_v6 = vld [vmem:[%s26166_s5 + $0x1c8] sm:$0xff] }
 0x44a   :  { %v19105_v59 = vpop.f32.mrf.mxu0  ;;  %19392 = vmatmul.mubr.msk.f32.gmra.mxu1 %vm6778_vm2, %v9691_v7  ;;  %19504 = vmatmul.mubr.msk.f32.gmra.mxu0 %vm6778_vm2, %v23774_v27  ;;  %v16452_v27 = vld [vmem:[%s26166_s5 + $0x180] sm:$0xff] }
 0x44b   :  { %v24231_v48 = vadd.f32 %v19105_v59, %v18993_v57  ;;  %19394 = vmatprep.mubr.msk.f32.mxu1 %vm6778_vm2, %v9692_v20  ;;  %19506 = vmatprep.mubr.msk.f32.mxu0 %vm6778_vm2, %v23785_v17  ;;  %v7566_v63 = vpop.f32.mrf.mxu1  ;;  %v9694_v17 = vld [vmem:[#allocation3 + $0xc1] sm:$0xff] }
 0x44c   :  { %v8143_v49 = vpop.f32.mrf.mxu0  ;;  %19596 = vmatprep.subr.mxu1 %v16453_v50  ;;  %19706 = vmatprep.subr.mxu0 %v16526_v22 }
 0x44d   :  { %v24236_v61 = vadd.f32 %v8143_v49, %v7566_v63  ;;  %19597 = vmatpush3.msra.mxu1 %v16453_v50  ;;  %19707 = vmatpush3.msra.mxu0 %v16526_v22  ;;  %v18996_v7 = vpop.f32.mrf.mxu1  ;;  %v9695_v63 = vld [vmem:[#allocation3 + $0xc9] sm:$0xff]  ;;  %v24260_v49 = vld [vmem:[%s26166_s5 + $0x238] sm:$0xff] }
 0x44e   :  { %v19108_v57 = vpop.f32.mrf.mxu0  ;;  %19395 = vmatmul.mubr.msk.f32.gmra.mxu1 %vm6778_vm2, %v9693_v60  ;;  %19507 = vmatmul.mubr.msk.f32.gmra.mxu0 %vm6778_vm2, %v23790_v51  ;;  %v16524_v51 = vld [vmem:[%s26166_s5 + $0x1c0] sm:$0xff] }
 0x44f   :  { %v24247_v59 = vadd.f32 %v19108_v57, %v18996_v7  ;;  %19397 = vmatprep.mubr.msk.f32.mxu1 %vm6778_vm2, %v9694_v17  ;;  %19509 = vmatprep.mubr.msk.f32.mxu0 %vm6778_vm2, %v23803_v16  ;;  %v7576_v50 = vpop.f32.mrf.mxu1  ;;  %v9696_v7 = vld [vmem:[#allocation3 + $0xd9] sm:$0xff] }
 0x450   :  { %v8153_v22 = vpop.f32.mrf.mxu0  ;;  %19598 = vmatprep.subr.mxu1 %v16452_v27  ;;  %19708 = vmatprep.subr.mxu0 %v16525_v6 }
 0x451   :  { %v24252_v20 = vadd.f32 %v8153_v22, %v7576_v50  ;;  %19599 = vmatpush3.msra.mxu1 %v16452_v27  ;;  %19709 = vmatpush3.msra.mxu0 %v16525_v6  ;;  %v18999_v60 = vpop.f32.mrf.mxu1  ;;  %v9697_v50 = vld [vmem:[#allocation3 + $0xe1] sm:$0xff] }
 0x452   :  { %v19111_v16 = vpop.f32.mrf.mxu0  ;;  %19398 = vmatmul.mubr.msk.f32.gmra.mxu1 %vm6778_vm2, %v9695_v63  ;;  %19510 = vmatmul.mubr.msk.f32.gmra.mxu0 %vm6778_vm2, %v23809_v12  ;;  %v9698_v12 = vld [vmem:[#allocation3 + $0xf1] sm:$0xff] }
 0x453   :  { %v24265_v57 = vadd.f32 %v19111_v16, %v18999_v60  ;;  %19400 = vmatprep.mubr.msk.f32.mxu1 %vm6778_vm2, %v9696_v7  ;;  %19512 = vmatprep.mubr.msk.f32.mxu0 %vm6778_vm2, %v23814_v0  ;;  %v7586_v27 = vpop.f32.mrf.mxu1 }
 0x454   :  { %v8163_v6 = vpop.f32.mrf.mxu0  ;;  %19710 = vmatprep.subr.mxu0 %v16524_v51  ;;  %19808 = vmatprep.subr.mxu1 %v24260_v49 }
 0x455   :  { %v24271_v17 = vadd.f32 %v8163_v6, %v7586_v27  ;;  %19711 = vmatpush3.msra.mxu0 %v16524_v51  ;;  %v19002_v22 = vpop.f32.mrf.mxu1  ;;  %v9699_v51 = vld [vmem:[#allocation3 + $0xf9] sm:$0xff] }
 0x456   :  { %v19114_v63 = vpop.f32.mrf.mxu0  ;;  %19401 = vmatmul.mubr.msk.f32.gmra.mxu1 %vm6778_vm2, %v9697_v50  ;;  %19513 = vmatmul.mubr.msk.f32.gmra.mxu0 %vm6778_vm2, %v23819_v39  ;;  %v9700_v39 = vld [vmem:[#allocation3 + $0x109] sm:$0xff] }
 0x457   :  { %v24276_v60 = vadd.f32 %v19114_v63, %v19002_v22  ;;  %19403 = vmatprep.mubr.msk.f32.mxu1 %vm6778_vm2, %v9698_v12  ;;  %19515 = vmatprep.mubr.msk.f32.mxu0 %vm6778_vm2, %v23824_v14  ;;  %v7596_v0 = vpop.f32.mrf.mxu1  ;;  %v9701_v12 = vld [vmem:[#allocation3 + $0x111] sm:$0xff] }
 0x458   :  { %v8173_v16 = vpop.f32.mrf.mxu0 }
 0x459   :  { %v24281_v7 = vadd.f32 %v8173_v16, %v7596_v0  ;;  %v19005_v27 = vpop.f32.mrf.mxu1 }
 0x45a   :  { %v19117_v6 = vpop.f32.mrf.mxu0  ;;  %19404 = vmatmul.mubr.msk.f32.gmra.mxu1 %vm6778_vm2, %v9699_v51  ;;  %19516 = vmatmul.mubr.msk.f32.gmra.mxu0 %vm6778_vm2, %v23829_v53  ;;  %v9702_v53 = vld [vmem:[#allocation3 + $0x121] sm:$0xff] }
 0x45b   :  { %v24286_v50 = vadd.f32 %v19117_v6, %v19005_v27  ;;  %19406 = vmatprep.mubr.msk.f32.mxu1 %vm6778_vm2, %v9700_v39  ;;  %19518 = vmatprep.mubr.msk.f32.mxu0 %vm6778_vm2, %v23834_v4  ;;  %v7606_v14 = vpop.f32.mrf.mxu1  ;;  %v9703_v39 = vld [vmem:[#allocation3 + $0x129] sm:$0xff] }
 0x45c   :  { %v8183_v22 = vpop.f32.mrf.mxu0 }
 0x45d   :  { %v24291_v63 = vadd.f32 %v8183_v22, %v7606_v14  ;;  %v19008_v0 = vpop.f32.mrf.mxu1 }
 0x45e   :  { %v19120_v16 = vpop.f32.mrf.mxu0  ;;  %19407 = vmatmul.mubr.msk.f32.gmra.mxu1 %vm6778_vm2, %v9701_v12  ;;  %19519 = vmatmul.mubr.msk.f32.gmra.mxu0 %vm6778_vm2, %v23839_v44  ;;  %v9704_v44 = vld [vmem:[#allocation3 + $0x139] sm:$0xff] }
 0x45f   :  { %v24296_v51 = vadd.f32 %v19120_v16, %v19008_v0  ;;  %19409 = vmatprep.mubr.msk.f32.mxu1 %vm6778_vm2, %v9702_v53  ;;  %19521 = vmatprep.mubr.msk.f32.mxu0 %vm6778_vm2, %v23844_v10  ;;  %v7616_v4 = vpop.f32.mrf.mxu1  ;;  %v9705_v53 = vld [vmem:[#allocation3 + $0x141] sm:$0xff] }
 0x460   :  { %v8193_v27 = vpop.f32.mrf.mxu0 }
 0x461   :  { %26698 = vst [vmem:[#allocation43_spill] sm:$0xff] %v24296_v51  ;;  %v24301_v6 = vadd.f32 %v8193_v27, %v7616_v4  ;;  %v19011_v14 = vpop.f32.mrf.mxu1 }
 0x462   :  { %v19123_v22 = vpop.f32.mrf.mxu0  ;;  %19410 = vmatmul.mubr.msk.f32.gmra.mxu1 %vm6778_vm2, %v9703_v39  ;;  %19522 = vmatmul.mubr.msk.f32.gmra.mxu0 %vm6778_vm2, %v23849_v56  ;;  %v9706_v56 = vld [vmem:[#allocation3 + $0x151] sm:$0xff] }
 0x463   :  { %26699 = vst [vmem:[#allocation77_spill] sm:$0xff] %v24301_v6  ;;  %v24306_v12 = vadd.f32 %v19123_v22, %v19011_v14  ;;  %19412 = vmatprep.mubr.msk.f32.mxu1 %vm6778_vm2, %v9704_v44  ;;  %19524 = vmatprep.mubr.msk.f32.mxu0 %vm6778_vm2, %v23854_v34  ;;  %v7626_v10 = vpop.f32.mrf.mxu1  ;;  %v26703_v14 = vld [vmem:[#allocation54_spill] sm:$0xff] }
 0x464   :  { %v8203_v0 = vpop.f32.mrf.mxu0 }
 0x465   :  { %26700 = vst [vmem:[#allocation76_spill] sm:$0xff] %v24306_v12  ;;  %v24311_v16 = vadd.f32 %v8203_v0, %v7626_v10  ;;  %v19014_v4 = vpop.f32.mrf.mxu1  ;;  %v9707_v10 = vld [vmem:[#allocation3 + $0x159] sm:$0xff] }
 0x466   :  { %v19126_v27 = vpop.f32.mrf.mxu0  ;;  %19413 = vmatmul.mubr.msk.f32.gmra.mxu1 %vm6778_vm2, %v9705_v53  ;;  %19525 = vmatmul.mubr.msk.f32.gmra.mxu0 %vm6778_vm2, %v23860_v5  ;;  %v26705_v53 = vld [vmem:[#allocation57_spill] sm:$0xff] }
 0x467   :  { %26701 = vst [vmem:[#allocation41_spill] sm:$0xff] %v24311_v16  ;;  %v24316_v39 = vadd.f32 %v19126_v27, %v19014_v4  ;;  %19415 = vmatprep.mubr.msk.f32.mxu1 %vm6778_vm2, %v9706_v56  ;;  %19527 = vmatprep.mubr.msk.f32.mxu0 %vm6778_vm2, %v26703_v14  ;;  %v7636_v34 = vpop.f32.mrf.mxu1  ;;  %v9708_v5 = vld [vmem:[#allocation3 + $0x169] sm:$0xff] }
 0x468   :  { %v8213_v22 = vpop.f32.mrf.mxu0  ;;  %v26707_v27 = vld [vmem:[#allocation56_spill] sm:$0xff] }
 0x469   :  { %26702 = vst [vmem:[#allocation46_spill] sm:$0xff] %v24316_v39  ;;  %v24321_v44 = vadd.f32 %v8213_v22, %v7636_v34  ;;  %v19017_v0 = vpop.f32.mrf.mxu1  ;;  %v9709_v22 = vld [vmem:[#allocation3 + $0x171] sm:$0xff] }
 0x46a   :  { %v19129_v16 = vpop.f32.mrf.mxu0  ;;  %19416 = vmatmul.mubr.msk.f32.gmra.mxu1 %vm6778_vm2, %v9707_v10  ;;  %19528 = vmatmul.mubr.msk.f32.gmra.mxu0 %vm6778_vm2, %v26705_v53  ;;  %v26709_v10 = vld [vmem:[#allocation29_spill] sm:$0xff]  ;;  %v9710_v53 = vld [vmem:[#allocation3 + $0x181] sm:$0xff] }
 0x46b   :  { %26704 = vst [vmem:[#allocation78_spill] sm:$0xff] %v24321_v44  ;;  %v24326_v4 = vadd.f32 %v19129_v16, %v19017_v0  ;;  %19418 = vmatprep.mubr.msk.f32.mxu1 %vm6778_vm2, %v9708_v5  ;;  %19530 = vmatprep.mubr.msk.f32.mxu0 %vm6778_vm2, %v26707_v27  ;;  %v7646_v56 = vpop.f32.mrf.mxu1  ;;  %v10424_v16 = vld [vmem:[#allocation3 + $0x182] sm:$0xff] }
 0x46c   :  { %v8223_v14 = vpop.f32.mrf.mxu0 }
 0x46d   :  { %26706 = vst [vmem:[#allocation12_spill] sm:$0xff] %v24326_v4  ;;  %v24331_v34 = vadd.f32 %v8223_v14, %v7646_v56  ;;  %v19020_v44 = vpop.f32.mrf.mxu1  ;;  %v9711_v14 = vld [vmem:[#allocation3 + $0x189] sm:$0xff] }
 0x46e   :  { %v19132_v39 = vpop.f32.mrf.mxu0  ;;  %19419 = vmatmul.mubr.msk.f32.gmra.mxu1 %vm6778_vm2, %v9709_v22  ;;  %19531 = vmatmul.mubr.msk.f32.gmra.mxu0 %vm6778_vm2, %v26709_v10  ;;  %v9712_v22 = vld [vmem:[#allocation3 + $0x1c9] sm:$0xff] }
 0x46f   :  { %26708 = vst [vmem:[#allocation44_spill] sm:$0xff] %v24331_v34  ;;  %v24336_v0 = vadd.f32 %v19132_v39, %v19020_v44  ;;  %19421 = vmatprep.mubr.msk.f32.mxu1 %vm6778_vm2, %v9710_v53  ;;  %19533 = vmatprep.mubr.msk.f32.mxu0 %vm6778_vm2, %v10424_v16  ;;  %v7656_v5 = vpop.f32.mrf.mxu1  ;;  %v10425_v34 = vld [vmem:[#allocation3 + $0x18a] sm:$0xff]  ;;  %v26713_v39 = vld [vmem:[#allocation31_spill] sm:$0xff] }
 0x470   :  { %v8233_v27 = vpop.f32.mrf.mxu0 }
 0x471   :  { %26710 = vst [vmem:[#allocation47_spill] sm:$0xff] %v24336_v0  ;;  %v24340_v56 = vadd.f32 %v8233_v27, %v7656_v5  ;;  %v19023_v4 = vpop.f32.mrf.mxu1  ;;  %v9713_v5 = vld [vmem:[#allocation3 + $0x1d1] sm:$0xff] }
 0x472   :  { %v19135_v12 = vpop.f32.mrf.mxu0  ;;  %19422 = vmatmul.mubr.msk.f32.gmra.mxu1 %vm6778_vm2, %v9711_v14  ;;  %19534 = vmatmul.mubr.msk.f32.gmra.mxu0 %vm6778_vm2, %v10425_v34  ;;  %v26715_v14 = vld [vmem:[#allocation83_spill] sm:$0xff] }
 0x473   :  { %26711 = vst [vmem:[#allocation80_spill] sm:$0xff] %v24340_v56  ;;  %v24344_v10 = vadd.f32 %v19135_v12, %v19023_v4  ;;  %19424 = vmatprep.mubr.msk.f32.mxu1 %vm6778_vm2, %v9712_v22  ;;  %19536 = vmatprep.mubr.msk.f32.mxu0 %vm6778_vm2, %v26713_v39  ;;  %v7666_v44 = vpop.f32.mrf.mxu1  ;;  %v9714_v34 = vld [vmem:[#allocation3 + $0x1e1] sm:$0xff]  ;;  %v26717_v4 = vld [vmem:[#allocation58_spill] sm:$0xff] }
 0x474   :  { %v8243_v53 = vpop.f32.mrf.mxu0  ;;  %v26716_v12 = vld [vmem:[#allocation59_spill] sm:$0xff] }
 0x475   :  { %26712 = vst [vmem:[#allocation79_spill] sm:$0xff] %v24344_v10  ;;  %v24349_v16 = vadd.f32 %v8243_v53, %v7666_v44  ;;  %v19154_v27 = vpop.f32.mrf.mxu1  ;;  %v7934_v10 = vadd.f32 %v26717_v4, %v26716_v12  ;;  %v26718_v22 = vld [vmem:[#allocation55_spill] sm:$0xff] }
 0x476   :  { %v19266_v56 = vpop.f32.mrf.mxu0  ;;  %19425 = vmatmul.mubr.msk.f32.gmra.mxu1 %vm6778_vm2, %v9713_v5  ;;  %19537 = vmatmul.mubr.msk.f32.gmra.mxu0 %vm6778_vm2, %v26715_v14  ;;  %v8903_v0 = vadd.f32 %v19154_v27, %v26718_v22  ;;  %v9715_v5 = vld [vmem:[#allocation3 + $0x1e9] sm:$0xff]  ;;  %v9716_v14 = vld [vmem:[#allocation3 + $0x1f9] sm:$0xff]  ;;  %v9717_v22 = vld [vmem:[#allocation3 + $0x201] sm:$0xff] }
 0x477   :  { %26714 = vst [vmem:[#allocation45_spill] sm:$0xff] %v24349_v16  ;;  %19427 = vmatprep.mubr.msk.f32.mxu1 %vm6778_vm2, %v9714_v34  ;;  %19539 = vmatprep.mubr.msk.f32.mxu0 %vm6778_vm2, %v23909_v55  ;;  %v8583_v39 = vpop.f32.mrf.mxu1  ;;  %v26719_v34 = vld [vmem:[#allocation32_spill] sm:$0xff] }
 0x478   :  { %v9297_v44 = vpop.f32.mrf.mxu0  ;;  %v24360_v53 = vadd.f32 %v19266_v56, %v8903_v0  ;;  %v8902_v16 = vadd.f32 %v8583_v39, %v7934_v10  ;;  %v26720_v10 = vld [vmem:[#allocation61_spill] sm:$0xff] }
 0x47a   :  { %v19157_v6 = vpop.f32.mrf.mxu1  ;;  %v19269_v51 = vpop.f32.mrf.mxu0  ;;  %19428 = vmatmul.mubr.msk.f32.gmra.mxu1 %vm6778_vm2, %v9715_v5  ;;  %19540 = vmatmul.mubr.msk.f32.gmra.mxu0 %vm6778_vm2, %v23919_v21  ;;  %v24365_v27 = vadd.f32 %v9297_v44, %v8902_v16  ;;  %v9718_v21 = vld [vmem:[#allocation3 + $0x211] sm:$0xff]  ;;  %v26721_v16 = vld [vmem:[#allocation60_spill] sm:$0xff] }
 0x47b   :  { %v8905_v12 = vadd.f32 %v19157_v6, %v26719_v34  ;;  %19430 = vmatprep.mubr.msk.f32.mxu1 %vm6778_vm2, %v9716_v14  ;;  %19542 = vmatprep.mubr.msk.f32.mxu0 %vm6778_vm2, %v23925_v30  ;;  %v26722_v34 = vld [vmem:[#allocation30_spill] sm:$0xff] }
 0x47c   :  { %v8593_v55 = vpop.f32.mrf.mxu1  ;;  %v9307_v0 = vpop.f32.mrf.mxu0 }
 0x47d   :  { %v24371_v56 = vadd.f32 %v19269_v51, %v8905_v12  ;;  %v8904_v4 = vadd.f32 %v8593_v55, %v26720_v10  ;;  %v9719_v55 = vld [vmem:[#allocation3 + $0x219] sm:$0xff] }
 0x47e   :  { %v19160_v39 = vpop.f32.mrf.mxu1  ;;  %v19272_v5 = vpop.f32.mrf.mxu0  ;;  %19431 = vmatmul.mubr.msk.f32.gmra.mxu1 %vm6778_vm2, %v9717_v22  ;;  %19543 = vmatmul.mubr.msk.f32.gmra.mxu0 %vm6778_vm2, %v23935_v13  ;;  %v9720_v13 = vld [vmem:[#allocation3 + $0x229] sm:$0xff] }
 0x47f   :  { %v24377_v6 = vadd.f32 %v9307_v0, %v8904_v4  ;;  %v8907_v44 = vadd.f32 %v19160_v39, %v26721_v16  ;;  %19433 = vmatprep.mubr.msk.f32.mxu1 %vm6778_vm2, %v9718_v21  ;;  %19545 = vmatprep.mubr.msk.f32.mxu0 %vm6778_vm2, %v23941_v62  ;;  %v26723_v4 = vld [vmem:[#allocation35_spill] sm:$0xff] }
 0x480   :  { %v8603_v30 = vpop.f32.mrf.mxu1  ;;  %v9317_v51 = vpop.f32.mrf.mxu0  ;;  %v26724_v16 = vld [vmem:[#allocation63_spill] sm:$0xff] }
 0x481   :  { %v24383_v14 = vadd.f32 %v19272_v5, %v8907_v44  ;;  %v8906_v12 = vadd.f32 %v8603_v30, %v26722_v34  ;;  %v9721_v30 = vld [vmem:[#allocation3 + $0x231] sm:$0xff] }
 0x482   :  { %v19163_v10 = vpop.f32.mrf.mxu1  ;;  %v19275_v22 = vpop.f32.mrf.mxu0  ;;  %19434 = vmatmul.mubr.msk.f32.gmra.mxu1 %vm6778_vm2, %v9719_v55  ;;  %19546 = vmatmul.mubr.msk.f32.gmra.mxu0 %vm6778_vm2, %v23951_v41  ;;  %v9722_v41 = vld [vmem:[#allocation3 + $0x241] sm:$0xff] }
 0x483   :  { %v24389_v0 = vadd.f32 %v9317_v51, %v8906_v12  ;;  %v8909_v39 = vadd.f32 %v19163_v10, %v26723_v4  ;;  %19436 = vmatprep.mubr.msk.f32.mxu1 %vm6778_vm2, %v9720_v13  ;;  %19548 = vmatprep.mubr.msk.f32.mxu0 %vm6778_vm2, %v23957_v2  ;;  %v26725_v12 = vld [vmem:[#allocation62_spill] sm:$0xff]  ;;  %v26726_v4 = vld [vmem:[#allocation33_spill] sm:$0xff] }
 0x484   :  { %v8613_v62 = vpop.f32.mrf.mxu1  ;;  %v9327_v5 = vpop.f32.mrf.mxu0 }
 0x485   :  { %v24395_v21 = vadd.f32 %v19275_v22, %v8909_v39  ;;  %v8908_v44 = vadd.f32 %v8613_v62, %v26724_v16  ;;  %v9723_v62 = vld [vmem:[#allocation3 + $0x249] sm:$0xff] }
 0x486   :  { %v19166_v34 = vpop.f32.mrf.mxu1  ;;  %v19278_v55 = vpop.f32.mrf.mxu0  ;;  %19437 = vmatmul.mubr.msk.f32.gmra.mxu1 %vm6778_vm2, %v9721_v30  ;;  %19549 = vmatmul.mubr.msk.f32.gmra.mxu0 %vm6778_vm2, %v23967_v42  ;;  %v9724_v42 = vld [vmem:[#allocation3 + $0x259] sm:$0xff] }
 0x487   :  { %v24401_v51 = vadd.f32 %v9327_v5, %v8908_v44  ;;  %v8911_v10 = vadd.f32 %v19166_v34, %v26725_v12  ;;  %19439 = vmatprep.mubr.msk.f32.mxu1 %vm6778_vm2, %v9722_v41  ;;  %19551 = vmatprep.mubr.msk.f32.mxu0 %vm6778_vm2, %v23973_v37  ;;  %v26727_v44 = vld [vmem:[#allocation7_spill] sm:$0xff]  ;;  %v26728_v12 = vld [vmem:[#allocation65_spill] sm:$0xff] }
 0x488   :  { %v8623_v2 = vpop.f32.mrf.mxu1  ;;  %v9337_v22 = vpop.f32.mrf.mxu0 }
 0x489   :  { %v24407_v13 = vadd.f32 %v19278_v55, %v8911_v10  ;;  %v8910_v39 = vadd.f32 %v8623_v2, %v26726_v4  ;;  %v9725_v2 = vld [vmem:[#allocation3 + $0x261] sm:$0xff] }
 0x48a   :  { %v19169_v16 = vpop.f32.mrf.mxu1  ;;  %v19281_v30 = vpop.f32.mrf.mxu0  ;;  %19440 = vmatmul.mubr.msk.f32.gmra.mxu1 %vm6778_vm2, %v9723_v62  ;;  %19552 = vmatmul.mubr.msk.f32.gmra.mxu0 %vm6778_vm2, %v23983_v11  ;;  %v9726_v11 = vld [vmem:[#allocation3 + $0x271] sm:$0xff] }
 0x48b   :  { %v24413_v5 = vadd.f32 %v9337_v22, %v8910_v39  ;;  %v8913_v34 = vadd.f32 %v19169_v16, %v26727_v44  ;;  %19442 = vmatprep.mubr.msk.f32.mxu1 %vm6778_vm2, %v9724_v42  ;;  %19554 = vmatprep.mubr.msk.f32.mxu0 %vm6778_vm2, %v23989_v47  ;;  %v26729_v39 = vld [vmem:[#allocation64_spill] sm:$0xff]  ;;  %v26730_v44 = vld [vmem:[#allocation34_spill] sm:$0xff] }
 0x48c   :  { %v8633_v37 = vpop.f32.mrf.mxu1  ;;  %v9347_v55 = vpop.f32.mrf.mxu0 }
 0x48d   :  { %v24419_v41 = vadd.f32 %v19281_v30, %v8913_v34  ;;  %v8912_v10 = vadd.f32 %v8633_v37, %v26728_v12  ;;  %v9727_v37 = vld [vmem:[#allocation3 + $0x279] sm:$0xff] }
 0x48e   :  { %v19172_v4 = vpop.f32.mrf.mxu1  ;;  %v19284_v62 = vpop.f32.mrf.mxu0  ;;  %19443 = vmatmul.mubr.msk.f32.gmra.mxu1 %vm6778_vm2, %v9725_v2  ;;  %19555 = vmatmul.mubr.msk.f32.gmra.mxu0 %vm6778_vm2, %v23999_v43  ;;  %v9728_v43 = vld [vmem:[#allocation3 + $0x289] sm:$0xff] }
 0x48f   :  { %v24425_v22 = vadd.f32 %v9347_v55, %v8912_v10  ;;  %v8915_v16 = vadd.f32 %v19172_v4, %v26729_v39  ;;  %19445 = vmatprep.mubr.msk.f32.mxu1 %vm6778_vm2, %v9726_v11  ;;  %19557 = vmatprep.mubr.msk.f32.mxu0 %vm6778_vm2, %v24005_v31  ;;  %v26731_v10 = vld [vmem:[#allocation37_spill] sm:$0xff]  ;;  %v26732_v39 = vld [vmem:[#allocation67_spill] sm:$0xff] }
 0x490   :  { %v8643_v47 = vpop.f32.mrf.mxu1  ;;  %v9357_v30 = vpop.f32.mrf.mxu0 }
 0x491   :  { %v24431_v42 = vadd.f32 %v19284_v62, %v8915_v16  ;;  %v8914_v34 = vadd.f32 %v8643_v47, %v26730_v44  ;;  %v9729_v47 = vld [vmem:[#allocation3 + $0x291] sm:$0xff] }
 0x492   :  { %v19175_v12 = vpop.f32.mrf.mxu1  ;;  %v19287_v2 = vpop.f32.mrf.mxu0  ;;  %19446 = vmatmul.mubr.msk.f32.gmra.mxu1 %vm6778_vm2, %v9727_v37  ;;  %19558 = vmatmul.mubr.msk.f32.gmra.mxu0 %vm6778_vm2, %v24015_v38  ;;  %v9730_v38 = vld [vmem:[#allocation3 + $0x2a1] sm:$0xff] }
 0x493   :  { %v24437_v55 = vadd.f32 %v9357_v30, %v8914_v34  ;;  %v8917_v4 = vadd.f32 %v19175_v12, %v26731_v10  ;;  %19448 = vmatprep.mubr.msk.f32.mxu1 %vm6778_vm2, %v9728_v43  ;;  %19560 = vmatprep.mubr.msk.f32.mxu0 %vm6778_vm2, %v24021_v25  ;;  %v26733_v34 = vld [vmem:[#allocation66_spill] sm:$0xff]  ;;  %v26734_v10 = vld [vmem:[#allocation36_spill] sm:$0xff] }
 0x494   :  { %v8653_v31 = vpop.f32.mrf.mxu1  ;;  %v9367_v62 = vpop.f32.mrf.mxu0 }
 0x495   :  { %v24443_v11 = vadd.f32 %v19287_v2, %v8917_v4  ;;  %v8916_v16 = vadd.f32 %v8653_v31, %v26732_v39  ;;  %v9731_v31 = vld [vmem:[#allocation3 + $0x2a9] sm:$0xff] }
 0x496   :  { %v19178_v44 = vpop.f32.mrf.mxu1  ;;  %v19290_v37 = vpop.f32.mrf.mxu0  ;;  %19449 = vmatmul.mubr.msk.f32.gmra.mxu1 %vm6778_vm2, %v9729_v47  ;;  %19561 = vmatmul.mubr.msk.f32.gmra.mxu0 %vm6778_vm2, %v24031_v33  ;;  %v9732_v33 = vld [vmem:[#allocation3 + $0x2b9] sm:$0xff] }
 0x497   :  { %v24449_v30 = vadd.f32 %v9367_v62, %v8916_v16  ;;  %v8919_v12 = vadd.f32 %v19178_v44, %v26733_v34  ;;  %19451 = vmatprep.mubr.msk.f32.mxu1 %vm6778_vm2, %v9730_v38  ;;  %19563 = vmatprep.mubr.msk.f32.mxu0 %vm6778_vm2, %v24037_v1  ;;  %v26735_v16 = vld [vmem:[#allocation9_spill] sm:$0xff] }
 0x498   :  { %v8663_v25 = vpop.f32.mrf.mxu1  ;;  %v9377_v2 = vpop.f32.mrf.mxu0  ;;  %v26736_v34 = vld [vmem:[#allocation69_spill] sm:$0xff] }
 0x499   :  { %v24455_v43 = vadd.f32 %v19290_v37, %v8919_v12  ;;  %v8918_v4 = vadd.f32 %v8663_v25, %v26734_v10  ;;  %v9733_v25 = vld [vmem:[#allocation3 + $0x2c1] sm:$0xff] }
 0x49a   :  { %v19181_v39 = vpop.f32.mrf.mxu1  ;;  %v19293_v47 = vpop.f32.mrf.mxu0  ;;  %19452 = vmatmul.mubr.msk.f32.gmra.mxu1 %vm6778_vm2, %v9731_v31  ;;  %19564 = vmatmul.mubr.msk.f32.gmra.mxu0 %vm6778_vm2, %v24047_v58  ;;  %v9734_v58 = vld [vmem:[#allocation3 + $0x2d1] sm:$0xff] }
 0x49b   :  { %v24461_v62 = vadd.f32 %v9377_v2, %v8918_v4  ;;  %v8921_v44 = vadd.f32 %v19181_v39, %v26735_v16  ;;  %19454 = vmatprep.mubr.msk.f32.mxu1 %vm6778_vm2, %v9732_v33  ;;  %19566 = vmatprep.mubr.msk.f32.mxu0 %vm6778_vm2, %v24053_v15  ;;  %v26737_v4 = vld [vmem:[#allocation68_spill] sm:$0xff] }
 0x49c   :  { %v8673_v1 = vpop.f32.mrf.mxu1  ;;  %v9387_v37 = vpop.f32.mrf.mxu0  ;;  %v26738_v16 = vld [vmem:[#allocation8_spill] sm:$0xff] }
 0x49d   :  { %v24467_v38 = vadd.f32 %v19293_v47, %v8921_v44  ;;  %v8920_v12 = vadd.f32 %v8673_v1, %v26736_v34  ;;  %v9735_v1 = vld [vmem:[#allocation3 + $0x2d9] sm:$0xff] }
 0x49e   :  { %v19184_v10 = vpop.f32.mrf.mxu1  ;;  %v19296_v31 = vpop.f32.mrf.mxu0  ;;  %19455 = vmatmul.mubr.msk.f32.gmra.mxu1 %vm6778_vm2, %v9733_v25  ;;  %19567 = vmatmul.mubr.msk.f32.gmra.mxu0 %vm6778_vm2, %v24063_v35  ;;  %v9736_v35 = vld [vmem:[#allocation3 + $0x2e9] sm:$0xff] }
 0x49f   :  { %v24473_v2 = vadd.f32 %v9387_v37, %v8920_v12  ;;  %v8923_v39 = vadd.f32 %v19184_v10, %v26737_v4  ;;  %19457 = vmatprep.mubr.msk.f32.mxu1 %vm6778_vm2, %v9734_v58  ;;  %19569 = vmatprep.mubr.msk.f32.mxu0 %vm6778_vm2, %v24069_v8  ;;  %v26740_v8 = vld [vmem:[#allocation70_spill] sm:$0xff]  ;;  %v26742_v4 = vld [vmem:[#allocation11_spill] sm:$0xff] }
 0x4a0   :  { %v8683_v15 = vpop.f32.mrf.mxu1  ;;  %v9397_v47 = vpop.f32.mrf.mxu0 }
 0x4a1   :  { %v24479_v33 = vadd.f32 %v19296_v31, %v8923_v39  ;;  %v8922_v44 = vadd.f32 %v8683_v15, %v26738_v16  ;;  %v9737_v15 = vld [vmem:[#allocation3 + $0x2f1] sm:$0xff] }
 0x4a2   :  { %v19187_v34 = vpop.f32.mrf.mxu1  ;;  %v19299_v25 = vpop.f32.mrf.mxu0  ;;  %19458 = vmatmul.mubr.msk.f32.gmra.mxu1 %vm6778_vm2, %v9735_v1  ;;  %19570 = vmatmul.mubr.msk.f32.gmra.mxu0 %vm6778_vm2, %v24079_v28  ;;  %v26743_v28 = vld [vmem:[#allocation38_spill] sm:$0xff] }
 0x4a3   :  { %v24485_v37 = vadd.f32 %v9397_v47, %v8922_v44  ;;  %v8925_v12 = vadd.f32 %v19187_v34, %v24071_v36  ;;  %19460 = vmatprep.mubr.msk.f32.mxu1 %vm6778_vm2, %v9736_v35  ;;  %19572 = vmatprep.mubr.msk.f32.mxu0 %vm6778_vm2, %v26740_v8  ;;  %v9738_v36 = vld [vmem:[#allocation3 + $0x301] sm:$0xff]  ;;  %v26745_v35 = vld [vmem:[#allocation73_spill] sm:$0xff] }
 0x4a4   :  { %v8693_v10 = vpop.f32.mrf.mxu1  ;;  %v9407_v31 = vpop.f32.mrf.mxu0  ;;  %v26744_v44 = vld [vmem:[#allocation71_spill] sm:$0xff] }
 0x4a5   :  { %26739 = vst [vmem:[#allocation49_spill] sm:$0xff] %v24485_v37  ;;  %v24491_v58 = vadd.f32 %v19299_v25, %v8925_v12  ;;  %v8924_v39 = vadd.f32 %v8693_v10, %v26742_v4  ;;  %v26747_v10 = vld [vmem:[#allocation10_spill] sm:$0xff] }
 0x4a6   :  { %v19190_v16 = vpop.f32.mrf.mxu1  ;;  %v19302_v1 = vpop.f32.mrf.mxu0  ;;  %19461 = vmatmul.mubr.msk.f32.gmra.mxu1 %vm6778_vm2, %v9737_v15  ;;  %19573 = vmatmul.mubr.msk.f32.gmra.mxu0 %vm6778_vm2, %v26743_v28  ;;  %v9739_v15 = vld [vmem:[#allocation3 + $0x309] sm:$0xff] }
 0x4a7   :  { %26741 = vst [vmem:[#allocation14_spill] sm:$0xff] %v24491_v58  ;;  %v24497_v47 = vadd.f32 %v9407_v31, %v8924_v39  ;;  %v8927_v34 = vadd.f32 %v19190_v16, %v26744_v44  ;;  %19463 = vmatprep.mubr.msk.f32.mxu1 %vm6778_vm2, %v9738_v36  ;;  %19575 = vmatprep.mubr.msk.f32.mxu0 %vm6778_vm2, %v26745_v35  ;;  %v26748_v31 = vld [vmem:[#allocation42_spill] sm:$0xff]  ;;  %v26750_v28 = vld [vmem:[#allocation72_spill] sm:$0xff]  ;;  %v26752_v35 = vld [vmem:[#allocation39_spill] sm:$0xff] }
 0x4a8   :  { %v8703_v25 = vpop.f32.mrf.mxu1  ;;  %v9417_v12 = vpop.f32.mrf.mxu0  ;;  %v9740_v39 = vld [vmem:[#allocation3 + $0x319] sm:$0xff] }
 0x4a9   :  { %v24503_v8 = vadd.f32 %v19302_v1, %v8927_v34  ;;  %v8926_v4 = vadd.f32 %v8703_v25, %v26747_v10  ;;  %v9741_v10 = vld [vmem:[#allocation3 + $0x321] sm:$0xff] }
 0x4aa   :  { %v19193_v58 = vpop.f32.mrf.mxu1  ;;  %v19305_v37 = vpop.f32.mrf.mxu0  ;;  %19464 = vmatmul.mubr.msk.f32.gmra.mxu1 %vm6778_vm2, %v9739_v15  ;;  %19576 = vmatmul.mubr.msk.f32.gmra.mxu0 %vm6778_vm2, %v26748_v31 }
 0x4ab   :  { %26746 = vst [vmem:[#allocation81_spill] sm:$0xff] %v24503_v8  ;;  %v24509_v16 = vadd.f32 %v9417_v12, %v8926_v4  ;;  %v8929_v36 = vadd.f32 %v19193_v58, %v26750_v28  ;;  %19466 = vmatprep.mubr.msk.f32.mxu1 %vm6778_vm2, %v9740_v39  ;;  %19578 = vmatprep.mubr.msk.f32.mxu0 %vm6778_vm2, %v24120_v46  ;;  %v26753_v12 = vld [vmem:[#allocation40_spill] sm:$0xff]  ;;  %v9742_v58 = vld [vmem:[#allocation3 + $0x331] sm:$0xff] }
 0x4ac   :  { %v8713_v1 = vpop.f32.mrf.mxu1  ;;  %v9427_v44 = vpop.f32.mrf.mxu0  ;;  %v10456_v4 = vld [vmem:[#allocation3 + $0x332] sm:$0xff] }
 0x4ad   :  { %26749 = vst [vmem:[#allocation48_spill] sm:$0xff] %v24509_v16  ;;  %v24515_v34 = vadd.f32 %v19305_v37, %v8929_v36  ;;  %v8928_v25 = vadd.f32 %v8713_v1, %v26752_v35  ;;  %v26754_v39 = vld [vmem:[#allocation74_spill] sm:$0xff]  ;;  %v26755_v1 = vld [vmem:[#allocation75_spill] sm:$0xff] }
 0x4ae   :  { %v19196_v15 = vpop.f32.mrf.mxu1  ;;  %v19308_v8 = vpop.f32.mrf.mxu0  ;;  %19467 = vmatmul.mubr.msk.f32.gmra.mxu1 %vm6778_vm2, %v9741_v10  ;;  %19579 = vmatmul.mubr.msk.f32.gmra.mxu0 %vm6778_vm2, %v26753_v12  ;;  %v9743_v10 = vld [vmem:[#allocation3 + $0x339] sm:$0xff] }
 0x4af   :  { %26751 = vst [vmem:[#allocation51_spill] sm:$0xff] %v24515_v34  ;;  %v24521_v31 = vadd.f32 %v9427_v44, %v8928_v25  ;;  %v8931_v46 = vadd.f32 %v19196_v15, %v26754_v39  ;;  %19469 = vmatprep.mubr.msk.f32.mxu1 %vm6778_vm2, %v9742_v58  ;;  %19581 = vmatprep.mubr.msk.f32.mxu0 %vm6778_vm2, %v10456_v4  ;;  %v10457_v34 = vld [vmem:[#allocation3 + $0x33a] sm:$0xff]  ;;  %v11109_v44 = vld [vmem:[#allocation3 + $0x30] sm:$0xff] }
 0x4b0   :  { %v8723_v37 = vpop.f32.mrf.mxu1  ;;  %v9437_v28 = vpop.f32.mrf.mxu0 }
 0x4b1   :  { %v24526_v36 = vadd.f32 %v19308_v8, %v8931_v46  ;;  %v8930_v35 = vadd.f32 %v8723_v37, %v26755_v1  ;;  %v11110_v46 = vld [vmem:[#allocation3 + $0x38] sm:$0xff] }
 0x4b2   :  { %v19199_v16 = vpop.f32.mrf.mxu1  ;;  %v19311_v12 = vpop.f32.mrf.mxu0  ;;  %19470 = vmatmul.mubr.msk.f32.gmra.mxu1 %vm6778_vm2, %v9743_v10  ;;  %19582 = vmatmul.mubr.msk.f32.gmra.mxu0 %vm6778_vm2, %v10457_v34  ;;  %v11824_v37 = vld [vmem:[#allocation3 + $0x39] sm:$0xff]  ;;  %v16602_v34 = vld [vmem:[%s26166_s5 + $0x230] sm:$0xff] }
 0x4b3   :  { %v24531_v25 = vadd.f32 %v9437_v28, %v8930_v35  ;;  %v8933_v15 = vadd.f32 %v19199_v16, %v24134_v23  ;;  %19600 = vmatprep.mubr.msk.f32.mxu1 %vm6778_vm2, %v11109_v44  ;;  %19712 = vmatprep.mubr.msk.f32.mxu0 %vm6778_vm2, %v24147_v29  ;;  %v11111_v23 = vld [vmem:[#allocation3 + $0x48] sm:$0xff] }
 0x4b4   :  { %v8733_v8 = vpop.f32.mrf.mxu1  ;;  %v9447_v58 = vpop.f32.mrf.mxu0 }
 0x4b5   :  { %v24537_v4 = vadd.f32 %v19311_v12, %v8933_v15  ;;  %v8932_v39 = vadd.f32 %v8733_v8, %v24139_v45  ;;  %v11825_v45 = vld [vmem:[#allocation3 + $0x49] sm:$0xff]  ;;  %v11826_v8 = vld [vmem:[#allocation3 + $0x51] sm:$0xff] }
 0x4b6   :  { %v19202_v28 = vpop.f32.mrf.mxu1  ;;  %v19314_v1 = vpop.f32.mrf.mxu0  ;;  %19601 = vmatmul.mubr.msk.f32.vlgmr.msra.gmra.mxu1 %vm6778_vm2, %v11110_v46  ;;  %19713 = vmatmul.mubr.msk.f32.vlgmr.msra.gmra.mxu0 %vm6778_vm2, %v11824_v37  ;;  %v11112_v15 = vld [vmem:[#allocation3 + $0x50] sm:$0xff]  ;;  %v11827_v46 = vld [vmem:[#allocation3 + $0x61] sm:$0xff] }
 0x4b7   :  { %v24545_v29 = vadd.f32 %v9447_v58, %v8932_v39  ;;  %v8935_v16 = vadd.f32 %v19202_v28, %v24149_v9  ;;  %19809 = vmatpush3.msra.mxu1 %v24260_v49  ;;  %19603 = vmatprep.mubr.msk.f32.mxu1 %vm6778_vm2, %v11111_v23  ;;  %v16601_v9 = vld [vmem:[%s26166_s5 + $0x228] sm:$0xff]  ;;  %v11113_v39 = vld [vmem:[#allocation3 + $0x60] sm:$0xff] }
 0x4b8   :  { %19715 = vmatprep.mubr.msk.f32.mxu0 %vm6778_vm2, %v11825_v45  ;;  %v8743_v35 = vpop.f32.mrf.mxu1  ;;  %v9457_v10 = vpop.f32.mrf.mxu0  ;;  %19810 = vmatprep.subr.mxu1 %v16602_v34  ;;  %v11828_v45 = vld [vmem:[#allocation3 + $0x69] sm:$0xff] }
 0x4b9   :  { %v24551_v12 = vadd.f32 %v19314_v1, %v8935_v16  ;;  %v8934_v44 = vadd.f32 %v8743_v35, %v24156_v26  ;;  %19811 = vmatpush3.msra.mxu1 %v16602_v34  ;;  %v11114_v16 = vld [vmem:[#allocation3 + $0x68] sm:$0xff]  ;;  %v16600_v35 = vld [vmem:[%s26166_s5 + $0x220] sm:$0xff] }
 0x4ba   :  { %v19205_v49 = vpop.f32.mrf.mxu1  ;;  %v19317_v58 = vpop.f32.mrf.mxu0  ;;  %19604 = vmatmul.mubr.msk.f32.gmra.mxu1 %vm6778_vm2, %v11112_v15  ;;  %19716 = vmatmul.mubr.msk.f32.gmra.mxu0 %vm6778_vm2, %v11826_v8  ;;  %v11829_v15 = vld [vmem:[#allocation3 + $0x79] sm:$0xff] }
 0x4bb   :  { %v24559_v37 = vadd.f32 %v9457_v10, %v8934_v44  ;;  %v8937_v28 = vadd.f32 %v19205_v49, %v24167_v54  ;;  %19606 = vmatprep.mubr.msk.f32.mxu1 %vm6778_vm2, %v11113_v39  ;;  %19718 = vmatprep.mubr.msk.f32.mxu0 %vm6778_vm2, %v11827_v46  ;;  %v11115_v44 = vld [vmem:[#allocation3 + $0x78] sm:$0xff]  ;;  %v11116_v46 = vld [vmem:[#allocation3 + $0x80] sm:$0xff] }
 0x4bc   :  { %v8753_v26 = vpop.f32.mrf.mxu1  ;;  %v9467_v34 = vpop.f32.mrf.mxu0  ;;  %19812 = vmatprep.subr.mxu1 %v16601_v9 }
 0x4bd   :  { %v24564_v1 = vadd.f32 %v19317_v58, %v8937_v28  ;;  %v8936_v23 = vadd.f32 %v8753_v26, %v24172_v3  ;;  %19813 = vmatpush3.msra.mxu1 %v16601_v9  ;;  %v11830_v28 = vld [vmem:[#allocation3 + $0x81] sm:$0xff]  ;;  %v16599_v26 = vld [vmem:[%s26166_s5 + $0x218] sm:$0xff] }
 0x4be   :  { %v19208_v10 = vpop.f32.mrf.mxu1  ;;  %v19320_v54 = vpop.f32.mrf.mxu0  ;;  %19607 = vmatmul.mubr.msk.f32.gmra.mxu1 %vm6778_vm2, %v11114_v16  ;;  %19719 = vmatmul.mubr.msk.f32.gmra.mxu0 %vm6778_vm2, %v11828_v45  ;;  %v11831_v16 = vld [vmem:[#allocation3 + $0x91] sm:$0xff] }
 0x4bf   :  { %v24572_v8 = vadd.f32 %v9467_v34, %v8936_v23  ;;  %v8939_v49 = vadd.f32 %v19208_v10, %v24183_v52  ;;  %19609 = vmatprep.mubr.msk.f32.mxu1 %vm6778_vm2, %v11115_v44  ;;  %19721 = vmatprep.mubr.msk.f32.mxu0 %vm6778_vm2, %v11829_v15  ;;  %v11117_v23 = vld [vmem:[#allocation3 + $0x90] sm:$0xff]  ;;  %v11118_v15 = vld [vmem:[#allocation3 + $0x98] sm:$0xff] }
 0x4c0   :  { %v8763_v3 = vpop.f32.mrf.mxu1  ;;  %v9477_v9 = vpop.f32.mrf.mxu0  ;;  %19814 = vmatprep.subr.mxu1 %v16600_v35 }
 0x4c1   :  { %v24577_v58 = vadd.f32 %v19320_v54, %v8939_v49  ;;  %v8938_v39 = vadd.f32 %v8763_v3, %v24188_v40  ;;  %19815 = vmatpush3.msra.mxu1 %v16600_v35  ;;  %v11832_v49 = vld [vmem:[#allocation3 + $0x99] sm:$0xff]  ;;  %v16598_v3 = vld [vmem:[%s26166_s5 + $0x210] sm:$0xff] }
 0x4c2   :  { %v19211_v34 = vpop.f32.mrf.mxu1  ;;  %v19323_v52 = vpop.f32.mrf.mxu0  ;;  %19610 = vmatmul.mubr.msk.f32.gmra.mxu1 %vm6778_vm2, %v11116_v46  ;;  %19722 = vmatmul.mubr.msk.f32.gmra.mxu0 %vm6778_vm2, %v11830_v28  ;;  %v11833_v46 = vld [vmem:[#allocation3 + $0xa9] sm:$0xff] }
 0x4c3   :  { %v24585_v45 = vadd.f32 %v9477_v9, %v8938_v39  ;;  %v8941_v10 = vadd.f32 %v19211_v34, %v24199_v24  ;;  %19612 = vmatprep.mubr.msk.f32.mxu1 %vm6778_vm2, %v11117_v23  ;;  %19724 = vmatprep.mubr.msk.f32.mxu0 %vm6778_vm2, %v11831_v16  ;;  %v11119_v39 = vld [vmem:[#allocation3 + $0xa8] sm:$0xff]  ;;  %v11120_v16 = vld [vmem:[#allocation3 + $0xb0] sm:$0xff] }
 0x4c4   :  { %v8773_v40 = vpop.f32.mrf.mxu1  ;;  %v9487_v35 = vpop.f32.mrf.mxu0  ;;  %19816 = vmatprep.subr.mxu1 %v16599_v26 }
 0x4c5   :  { %v24590_v54 = vadd.f32 %v19323_v52, %v8941_v10  ;;  %v8940_v44 = vadd.f32 %v8773_v40, %v24204_v32  ;;  %19817 = vmatpush3.msra.mxu1 %v16599_v26  ;;  %v11834_v10 = vld [vmem:[#allocation3 + $0xb1] sm:$0xff]  ;;  %v16597_v40 = vld [vmem:[%s26166_s5 + $0x208] sm:$0xff] }
 0x4c6   :  { %v19214_v9 = vpop.f32.mrf.mxu1  ;;  %v19326_v24 = vpop.f32.mrf.mxu0  ;;  %19613 = vmatmul.mubr.msk.f32.gmra.mxu1 %vm6778_vm2, %v11118_v15  ;;  %19725 = vmatmul.mubr.msk.f32.gmra.mxu0 %vm6778_vm2, %v11832_v49  ;;  %v11835_v15 = vld [vmem:[#allocation3 + $0xc1] sm:$0xff] }
 0x4c7   :  { %v24598_v28 = vadd.f32 %v9487_v35, %v8940_v44  ;;  %v8943_v34 = vadd.f32 %v19214_v9, %v24215_v19  ;;  %19615 = vmatprep.mubr.msk.f32.mxu1 %vm6778_vm2, %v11119_v39  ;;  %19727 = vmatprep.mubr.msk.f32.mxu0 %vm6778_vm2, %v11833_v46  ;;  %v11121_v44 = vld [vmem:[#allocation3 + $0xc0] sm:$0xff]  ;;  %v11122_v46 = vld [vmem:[#allocation3 + $0xc8] sm:$0xff] }
 0x4c8   :  { %v8783_v32 = vpop.f32.mrf.mxu1  ;;  %v9497_v26 = vpop.f32.mrf.mxu0  ;;  %19818 = vmatprep.subr.mxu1 %v16598_v3 }
 0x4c9   :  { %v24603_v52 = vadd.f32 %v19326_v24, %v8943_v34  ;;  %v8942_v23 = vadd.f32 %v8783_v32, %v24220_v18  ;;  %19819 = vmatpush3.msra.mxu1 %v16598_v3  ;;  %v11836_v34 = vld [vmem:[#allocation3 + $0xc9] sm:$0xff]  ;;  %v16596_v32 = vld [vmem:[%s26166_s5 + $0x200] sm:$0xff] }
 0x4ca   :  { %v19217_v35 = vpop.f32.mrf.mxu1  ;;  %v19329_v19 = vpop.f32.mrf.mxu0  ;;  %19616 = vmatmul.mubr.msk.f32.gmra.mxu1 %vm6778_vm2, %v11120_v16  ;;  %19728 = vmatmul.mubr.msk.f32.gmra.mxu0 %vm6778_vm2, %v11834_v10  ;;  %v11837_v16 = vld [vmem:[#allocation3 + $0xd9] sm:$0xff] }
 0x4cb   :  { %v24611_v49 = vadd.f32 %v9497_v26, %v8942_v23  ;;  %v8945_v9 = vadd.f32 %v19217_v35, %v24231_v48  ;;  %19618 = vmatprep.mubr.msk.f32.mxu1 %vm6778_vm2, %v11121_v44  ;;  %19730 = vmatprep.mubr.msk.f32.mxu0 %vm6778_vm2, %v11835_v15  ;;  %v11123_v23 = vld [vmem:[#allocation3 + $0xd8] sm:$0xff]  ;;  %v11124_v15 = vld [vmem:[#allocation3 + $0xe0] sm:$0xff] }
 0x4cc   :  { %v8793_v18 = vpop.f32.mrf.mxu1  ;;  %v9507_v3 = vpop.f32.mrf.mxu0  ;;  %19820 = vmatprep.subr.mxu1 %v16597_v40 }
 0x4cd   :  { %v24616_v24 = vadd.f32 %v19329_v19, %v8945_v9  ;;  %v8944_v39 = vadd.f32 %v8793_v18, %v24236_v61  ;;  %19821 = vmatpush3.msra.mxu1 %v16597_v40  ;;  %v11838_v9 = vld [vmem:[#allocation3 + $0xe1] sm:$0xff] }
 0x4ce   :  { %v19220_v26 = vpop.f32.mrf.mxu1  ;;  %v19332_v48 = vpop.f32.mrf.mxu0  ;;  %19619 = vmatmul.mubr.msk.f32.gmra.mxu1 %vm6778_vm2, %v11122_v46  ;;  %19731 = vmatmul.mubr.msk.f32.gmra.mxu0 %vm6778_vm2, %v11836_v34 }
 0x4cf   :  { %v24624_v10 = vadd.f32 %v9507_v3, %v8944_v39  ;;  %v8947_v35 = vadd.f32 %v19220_v26, %v24247_v59  ;;  %19621 = vmatprep.mubr.msk.f32.mxu1 %vm6778_vm2, %v11123_v23  ;;  %19733 = vmatprep.mubr.msk.f32.mxu0 %vm6778_vm2, %v11837_v16  ;;  %v11125_v59 = vld [vmem:[#allocation3 + $0xf0] sm:$0xff]  ;;  %v11126_v23 = vld [vmem:[#allocation3 + $0xf8] sm:$0xff] }
 0x4d0   :  { %v8803_v61 = vpop.f32.mrf.mxu1  ;;  %v9517_v40 = vpop.f32.mrf.mxu0  ;;  %19822 = vmatprep.subr.mxu1 %v16596_v32  ;;  %v11839_v3 = vld [vmem:[#allocation3 + $0xf1] sm:$0xff]  ;;  %v11840_v16 = vld [vmem:[#allocation3 + $0xf9] sm:$0xff] }
 0x4d1   :  { %v24629_v19 = vadd.f32 %v19332_v48, %v8947_v35  ;;  %v8946_v44 = vadd.f32 %v8803_v61, %v24252_v20  ;;  %19823 = vmatpush3.msra.mxu1 %v16596_v32 }
 0x4d2   :  { %v19223_v18 = vpop.f32.mrf.mxu1  ;;  %v19335_v46 = vpop.f32.mrf.mxu0  ;;  %19622 = vmatmul.mubr.msk.f32.gmra.mxu1 %vm6778_vm2, %v11124_v15  ;;  %19734 = vmatmul.mubr.msk.f32.gmra.mxu0 %vm6778_vm2, %v11838_v9 }
 0x4d3   :  { %v24634_v39 = vadd.f32 %v9517_v40, %v8946_v44  ;;  %v8949_v34 = vadd.f32 %v19223_v18, %v24265_v57  ;;  %19624 = vmatprep.mubr.msk.f32.mxu1 %vm6778_vm2, %v11125_v59  ;;  %19736 = vmatprep.mubr.msk.f32.mxu0 %vm6778_vm2, %v11839_v3  ;;  %v11127_v40 = vld [vmem:[#allocation3 + $0x108] sm:$0xff]  ;;  %v11128_v59 = vld [vmem:[#allocation3 + $0x110] sm:$0xff] }
 0x4d4   :  { %v8813_v20 = vpop.f32.mrf.mxu1  ;;  %v9527_v26 = vpop.f32.mrf.mxu0  ;;  %v11841_v57 = vld [vmem:[#allocation3 + $0x109] sm:$0xff]  ;;  %v11842_v3 = vld [vmem:[#allocation3 + $0x111] sm:$0xff] }
 0x4d5   :  { %v24639_v48 = vadd.f32 %v19335_v46, %v8949_v34  ;;  %v8948_v32 = vadd.f32 %v8813_v20, %v24271_v17 }
 0x4d6   :  { %v19226_v35 = vpop.f32.mrf.mxu1  ;;  %v19338_v61 = vpop.f32.mrf.mxu0  ;;  %19625 = vmatmul.mubr.msk.f32.gmra.mxu1 %vm6778_vm2, %v11126_v23  ;;  %19737 = vmatmul.mubr.msk.f32.gmra.mxu0 %vm6778_vm2, %v11840_v16 }
 0x4d7   :  { %v24644_v44 = vadd.f32 %v9527_v26, %v8948_v32  ;;  %v8951_v15 = vadd.f32 %v19226_v35, %v24276_v60  ;;  %19627 = vmatprep.mubr.msk.f32.mxu1 %vm6778_vm2, %v11127_v40  ;;  %19739 = vmatprep.mubr.msk.f32.mxu0 %vm6778_vm2, %v11841_v57  ;;  %v11129_v26 = vld [vmem:[#allocation3 + $0x120] sm:$0xff]  ;;  %v11130_v40 = vld [vmem:[#allocation3 + $0x128] sm:$0xff] }
 0x4d8   :  { %v8823_v9 = vpop.f32.mrf.mxu1  ;;  %v9537_v17 = vpop.f32.mrf.mxu0  ;;  %v11843_v60 = vld [vmem:[#allocation3 + $0x121] sm:$0xff]  ;;  %v11844_v57 = vld [vmem:[#allocation3 + $0x129] sm:$0xff] }
 0x4d9   :  { %v24649_v18 = vadd.f32 %v19338_v61, %v8951_v15  ;;  %v8950_v46 = vadd.f32 %v8823_v9, %v24281_v7 }
 0x4da   :  { %v19229_v34 = vpop.f32.mrf.mxu1  ;;  %v19341_v20 = vpop.f32.mrf.mxu0  ;;  %19628 = vmatmul.mubr.msk.f32.gmra.mxu1 %vm6778_vm2, %v11128_v59  ;;  %19740 = vmatmul.mubr.msk.f32.gmra.mxu0 %vm6778_vm2, %v11842_v3  ;;  %v26759_v59 = vld [vmem:[#allocation43_spill] sm:$0xff] }
 0x4db   :  { %v24654_v32 = vadd.f32 %v9537_v17, %v8950_v46  ;;  %v8953_v23 = vadd.f32 %v19229_v34, %v24286_v50  ;;  %19630 = vmatprep.mubr.msk.f32.mxu1 %vm6778_vm2, %v11129_v26  ;;  %19742 = vmatprep.mubr.msk.f32.mxu0 %vm6778_vm2, %v11843_v60  ;;  %v11131_v17 = vld [vmem:[#allocation3 + $0x138] sm:$0xff]  ;;  %v26761_v26 = vld [vmem:[#allocation77_spill] sm:$0xff] }
 0x4dc   :  { %v8833_v16 = vpop.f32.mrf.mxu1  ;;  %v9547_v7 = vpop.f32.mrf.mxu0  ;;  %v11845_v50 = vld [vmem:[#allocation3 + $0x139] sm:$0xff] }
 0x4dd   :  { %26756 = vst [vmem:[#allocation15_spill] sm:$0xff] %v24654_v32  ;;  %v24659_v35 = vadd.f32 %v19341_v20, %v8953_v23  ;;  %v8952_v61 = vadd.f32 %v8833_v16, %v24291_v63  ;;  %v11132_v23 = vld [vmem:[#allocation3 + $0x140] sm:$0xff] }
 0x4de   :  { %v19232_v15 = vpop.f32.mrf.mxu1  ;;  %v19344_v9 = vpop.f32.mrf.mxu0  ;;  %19631 = vmatmul.mubr.msk.f32.gmra.mxu1 %vm6778_vm2, %v11130_v40  ;;  %19743 = vmatmul.mubr.msk.f32.gmra.mxu0 %vm6778_vm2, %v11844_v57  ;;  %v11846_v16 = vld [vmem:[#allocation3 + $0x141] sm:$0xff] }
 0x4df   :  { %26757 = vst [vmem:[#allocation13_spill] sm:$0xff] %v24659_v35  ;;  %v24664_v46 = vadd.f32 %v9547_v7, %v8952_v61  ;;  %v8955_v3 = vadd.f32 %v19232_v15, %v26759_v59  ;;  %19633 = vmatprep.mubr.msk.f32.mxu1 %vm6778_vm2, %v11131_v17  ;;  %19745 = vmatprep.mubr.msk.f32.mxu0 %vm6778_vm2, %v11845_v50  ;;  %v11133_v7 = vld [vmem:[#allocation3 + $0x150] sm:$0xff]  ;;  %v26763_v17 = vld [vmem:[#allocation76_spill] sm:$0xff] }
 0x4e0   :  { %v8843_v34 = vpop.f32.mrf.mxu1  ;;  %v9557_v63 = vpop.f32.mrf.mxu0  ;;  %v11847_v61 = vld [vmem:[#allocation3 + $0x151] sm:$0xff] }
 0x4e1   :  { %26758 = vst [vmem:[#allocation50_spill] sm:$0xff] %v24664_v46  ;;  %v24669_v20 = vadd.f32 %v19344_v9, %v8955_v3  ;;  %v8954_v60 = vadd.f32 %v8843_v34, %v26761_v26  ;;  %v26765_v34 = vld [vmem:[#allocation41_spill] sm:$0xff] }
 0x4e2   :  { %v19235_v40 = vpop.f32.mrf.mxu1  ;;  %v19347_v57 = vpop.f32.mrf.mxu0  ;;  %19634 = vmatmul.mubr.msk.f32.gmra.mxu1 %vm6778_vm2, %v11132_v23  ;;  %19746 = vmatmul.mubr.msk.f32.gmra.mxu0 %vm6778_vm2, %v11846_v16  ;;  %v11848_v23 = vld [vmem:[#allocation3 + $0x159] sm:$0xff] }
 0x4e3   :  { %26760 = vst [vmem:[#allocation53_spill] sm:$0xff] %v24669_v20  ;;  %v24674_v15 = vadd.f32 %v9557_v63, %v8954_v60  ;;  %v8957_v50 = vadd.f32 %v19235_v40, %v26763_v17  ;;  %19636 = vmatprep.mubr.msk.f32.mxu1 %vm6778_vm2, %v11133_v7  ;;  %19748 = vmatprep.mubr.msk.f32.mxu0 %vm6778_vm2, %v11847_v61  ;;  %v11134_v20 = vld [vmem:[#allocation3 + $0x158] sm:$0xff]  ;;  %v11135_v63 = vld [vmem:[#allocation3 + $0x168] sm:$0xff] }
 0x4e4   :  { %v8853_v9 = vpop.f32.mrf.mxu1  ;;  %v9567_v59 = vpop.f32.mrf.mxu0  ;;  %v11849_v60 = vld [vmem:[#allocation3 + $0x169] sm:$0xff]  ;;  %v26767_v7 = vld [vmem:[#allocation46_spill] sm:$0xff] }
 0x4e5   :  { %26762 = vst [vmem:[#allocation17_spill] sm:$0xff] %v24674_v15  ;;  %v24679_v3 = vadd.f32 %v19347_v57, %v8957_v50  ;;  %v8956_v26 = vadd.f32 %v8853_v9, %v26765_v34  ;;  %v26769_v9 = vld [vmem:[#allocation78_spill] sm:$0xff] }
 0x4e6   :  { %v19238_v46 = vpop.f32.mrf.mxu1  ;;  %v19350_v16 = vpop.f32.mrf.mxu0  ;;  %19637 = vmatmul.mubr.msk.f32.gmra.mxu1 %vm6778_vm2, %v11134_v20  ;;  %19749 = vmatmul.mubr.msk.f32.gmra.mxu0 %vm6778_vm2, %v11848_v23  ;;  %v11850_v20 = vld [vmem:[#allocation3 + $0x171] sm:$0xff] }
 0x4e7   :  { %26764 = vst [vmem:[#allocation16_spill] sm:$0xff] %v24679_v3  ;;  %v24684_v40 = vadd.f32 %v9567_v59, %v8956_v26  ;;  %v8959_v61 = vadd.f32 %v19238_v46, %v26767_v7  ;;  %19639 = vmatprep.mubr.msk.f32.mxu1 %vm6778_vm2, %v11135_v63  ;;  %19751 = vmatprep.mubr.msk.f32.mxu0 %vm6778_vm2, %v11849_v60  ;;  %v11136_v3 = vld [vmem:[#allocation3 + $0x170] sm:$0xff]  ;;  %v11137_v59 = vld [vmem:[#allocation3 + $0x180] sm:$0xff]  ;;  %v26770_v63 = vld [vmem:[#allocation12_spill] sm:$0xff] }
 0x4e8   :  { %v8863_v57 = vpop.f32.mrf.mxu1  ;;  %v9577_v17 = vpop.f32.mrf.mxu0  ;;  %v11851_v46 = vld [vmem:[#allocation3 + $0x181] sm:$0xff] }
 0x4e9   :  { %26766 = vst [vmem:[#allocation52_spill] sm:$0xff] %v24684_v40  ;;  %v24689_v50 = vadd.f32 %v19350_v16, %v8959_v61  ;;  %v8958_v34 = vadd.f32 %v8863_v57, %v26769_v9  ;;  %v11139_v61 = vld [vmem:[#allocation3 + $0x198] sm:$0xff]  ;;  %v11138_v40 = vld [vmem:[#allocation3 + $0x188] sm:$0xff] }
 0x4ea   :  { %v19241_v15 = vpop.f32.mrf.mxu1  ;;  %v19353_v23 = vpop.f32.mrf.mxu0  ;;  %19640 = vmatmul.mubr.msk.f32.gmra.mxu1 %vm6778_vm2, %v11136_v3  ;;  %19752 = vmatmul.mubr.msk.f32.gmra.mxu0 %vm6778_vm2, %v11850_v20  ;;  %v11853_v57 = vld [vmem:[#allocation3 + $0x199] sm:$0xff]  ;;  %v11852_v20 = vld [vmem:[#allocation3 + $0x189] sm:$0xff] }
 0x4eb   :  { %26768 = vst [vmem:[#allocation19_spill] sm:$0xff] %v24689_v50  ;;  %v24694_v26 = vadd.f32 %v9577_v17, %v8958_v34  ;;  %v8961_v60 = vadd.f32 %v19241_v15, %v26770_v63  ;;  %19642 = vmatprep.mubr.msk.f32.mxu1 %vm6778_vm2, %v11137_v59  ;;  %19754 = vmatprep.mubr.msk.f32.mxu0 %vm6778_vm2, %v11851_v46  ;;  %v26772_v50 = vld [vmem:[#allocation44_spill] sm:$0xff]  ;;  %v26773_v17 = vld [vmem:[#allocation47_spill] sm:$0xff] }
 0x4ec   :  { %v8873_v16 = vpop.f32.mrf.mxu1  ;;  %v9587_v7 = vpop.f32.mrf.mxu0  ;;  %v11854_v59 = vld [vmem:[#allocation3 + $0x1a1] sm:$0xff] }
 0x4ed   :  { %v24699_v9 = vadd.f32 %v19353_v23, %v8961_v60  ;;  %v8960_v3 = vadd.f32 %v8873_v16, %v26772_v50  ;;  %v11140_v23 = vld [vmem:[#allocation3 + $0x1a0] sm:$0xff]  ;;  %v26775_v60 = vld [vmem:[#allocation80_spill] sm:$0xff] }
 0x4ee   :  { %v19244_v35 = vpop.f32.mrf.mxu1  ;;  %v19356_v32 = vpop.f32.mrf.mxu0  ;;  %19643 = vmatmul.mubr.msk.f32.gmra.mxu1 %vm6778_vm2, %v11138_v40  ;;  %19755 = vmatmul.mubr.msk.f32.gmra.mxu0 %vm6778_vm2, %v11852_v20 }
 0x4ef   :  { %26771 = vst [vmem:[#allocation18_spill] sm:$0xff] %v24699_v9  ;;  %v24704_v15 = vadd.f32 %v9587_v7, %v8960_v3  ;;  %v8963_v34 = vadd.f32 %v19244_v35, %v26773_v17  ;;  %19645 = vmatprep.mubr.msk.f32.mxu1 %vm6778_vm2, %v11139_v61  ;;  %19757 = vmatprep.mubr.msk.f32.mxu0 %vm6778_vm2, %v11853_v57  ;;  %v11141_v7 = vld [vmem:[#allocation3 + $0x1e0] sm:$0xff] }
 0x4f0   :  { %v8883_v46 = vpop.f32.mrf.mxu1  ;;  %v9597_v50 = vpop.f32.mrf.mxu0  ;;  %v11855_v35 = vld [vmem:[#allocation3 + $0x1e1] sm:$0xff] }
 0x4f1   :  { %v24709_v63 = vadd.f32 %v19356_v32, %v8963_v34  ;;  %v8962_v16 = vadd.f32 %v8883_v46, %v26775_v60  ;;  %v26776_v61 = vld [vmem:[#allocation79_spill] sm:$0xff]  ;;  %v26777_v34 = vld [vmem:[#allocation45_spill] sm:$0xff]  ;;  %v11142_v60 = vld [vmem:[#allocation3 + $0x1e8] sm:$0xff] }
 0x4f2   :  { %v19247_v9 = vpop.f32.mrf.mxu1  ;;  %v19359_v40 = vpop.f32.mrf.mxu0  ;;  %19646 = vmatmul.mubr.msk.f32.gmra.mxu1 %vm6778_vm2, %v11140_v23  ;;  %19758 = vmatmul.mubr.msk.f32.gmra.mxu0 %vm6778_vm2, %v11854_v59  ;;  %v11856_v23 = vld [vmem:[#allocation3 + $0x1e9] sm:$0xff] }
 0x4f3   :  { %26774 = vst [vmem:[#allocation84_spill] sm:$0xff] %v24709_v63  ;;  %v24714_v3 = vadd.f32 %v9597_v50, %v8962_v16  ;;  %v8965_v57 = vadd.f32 %v19247_v9, %v26776_v61  ;;  %19648 = vmatprep.mubr.msk.f32.mxu1 %vm6778_vm2, %v11141_v7  ;;  %19760 = vmatprep.mubr.msk.f32.mxu0 %vm6778_vm2, %v11855_v35  ;;  %v11143_v50 = vld [vmem:[#allocation3 + $0x1f8] sm:$0xff] }
 0x4f4   :  { %v8893_v32 = vpop.f32.mrf.mxu1  ;;  %v9607_v20 = vpop.f32.mrf.mxu0  ;;  %v11857_v9 = vld [vmem:[#allocation3 + $0x1f9] sm:$0xff] }
 0x4f5   :  { %v24719_v17 = vadd.f32 %v19359_v40, %v8965_v57  ;;  %v8964_v46 = vadd.f32 %v8893_v32, %v26777_v34  ;;  %v11144_v32 = vld [vmem:[#allocation3 + $0x200] sm:$0xff] }
 0x4f6   :  { %v19378_v63 = vpop.f32.mrf.mxu1  ;;  %v19490_v59 = vpop.f32.mrf.mxu0  ;;  %19649 = vmatmul.mubr.msk.f32.gmra.mxu1 %vm6778_vm2, %v11142_v60  ;;  %19761 = vmatmul.mubr.msk.f32.gmra.mxu0 %vm6778_vm2, %v11856_v23  ;;  %v11858_v34 = vld [vmem:[#allocation3 + $0x201] sm:$0xff] }
 0x4f7   :  { %v24724_v16 = vadd.f32 %v9607_v20, %v8964_v46  ;;  %v10331_v7 = vadd.f32 %v19378_v63, %v24360_v53  ;;  %19651 = vmatprep.mubr.msk.f32.mxu1 %vm6778_vm2, %v11143_v50  ;;  %19763 = vmatprep.mubr.msk.f32.mxu0 %vm6778_vm2, %v11857_v9  ;;  %v11145_v20 = vld [vmem:[#allocation3 + $0x210] sm:$0xff] }
 0x4f8   :  { %v10011_v40 = vpop.f32.mrf.mxu1  ;;  %v10725_v35 = vpop.f32.mrf.mxu0  ;;  %v11859_v53 = vld [vmem:[#allocation3 + $0x211] sm:$0xff] }
 0x4f9   :  { %v24729_v61 = vadd.f32 %v19490_v59, %v10331_v7  ;;  %v10330_v57 = vadd.f32 %v10011_v40, %v24365_v27  ;;  %v11146_v7 = vld [vmem:[#allocation3 + $0x218] sm:$0xff] }
 0x4fa   :  { %v19381_v60 = vpop.f32.mrf.mxu1  ;;  %v19493_v23 = vpop.f32.mrf.mxu0  ;;  %19652 = vmatmul.mubr.msk.f32.gmra.mxu1 %vm6778_vm2, %v11144_v32  ;;  %19764 = vmatmul.mubr.msk.f32.gmra.mxu0 %vm6778_vm2, %v11858_v34  ;;  %v11860_v40 = vld [vmem:[#allocation3 + $0x219] sm:$0xff] }
 0x4fb   :  { %v24734_v63 = vadd.f32 %v10725_v35, %v10330_v57  ;;  %v10333_v46 = vadd.f32 %v19381_v60, %v24371_v56  ;;  %19654 = vmatprep.mubr.msk.f32.mxu1 %vm6778_vm2, %v11145_v20  ;;  %19766 = vmatprep.mubr.msk.f32.mxu0 %vm6778_vm2, %v11859_v53  ;;  %v11147_v35 = vld [vmem:[#allocation3 + $0x228] sm:$0xff] }
 0x4fc   :  { %v10021_v59 = vpop.f32.mrf.mxu1  ;;  %v10735_v27 = vpop.f32.mrf.mxu0  ;;  %v11861_v56 = vld [vmem:[#allocation3 + $0x229] sm:$0xff] }
 0x4fd   :  { %v24739_v50 = vadd.f32 %v19493_v23, %v10333_v46  ;;  %v10332_v9 = vadd.f32 %v10021_v59, %v24377_v6  ;;  %v11148_v46 = vld [vmem:[#allocation3 + $0x230] sm:$0xff] }
 0x4fe   :  { %v19384_v32 = vpop.f32.mrf.mxu1  ;;  %v19496_v34 = vpop.f32.mrf.mxu0  ;;  %19655 = vmatmul.mubr.msk.f32.gmra.mxu1 %vm6778_vm2, %v11146_v7  ;;  %19767 = vmatmul.mubr.msk.f32.gmra.mxu0 %vm6778_vm2, %v11860_v40  ;;  %v11862_v59 = vld [vmem:[#allocation3 + $0x231] sm:$0xff] }
 0x4ff   :  { %v24744_v57 = vadd.f32 %v10735_v27, %v10332_v9  ;;  %v10335_v60 = vadd.f32 %v19384_v32, %v24383_v14  ;;  %19657 = vmatprep.mubr.msk.f32.mxu1 %vm6778_vm2, %v11147_v35  ;;  %19769 = vmatprep.mubr.msk.f32.mxu0 %vm6778_vm2, %v11861_v56  ;;  %v11149_v27 = vld [vmem:[#allocation3 + $0x240] sm:$0xff] }
 0x500   :  { %v10031_v23 = vpop.f32.mrf.mxu1  ;;  %v10745_v6 = vpop.f32.mrf.mxu0  ;;  %v11863_v14 = vld [vmem:[#allocation3 + $0x241] sm:$0xff] }
 0x501   :  { %v24749_v20 = vadd.f32 %v19496_v34, %v10335_v60  ;;  %v10334_v53 = vadd.f32 %v10031_v23, %v24389_v0  ;;  %v11150_v60 = vld [vmem:[#allocation3 + $0x248] sm:$0xff] }
 0x502   :  { %v19387_v7 = vpop.f32.mrf.mxu1  ;;  %v19499_v40 = vpop.f32.mrf.mxu0  ;;  %19658 = vmatmul.mubr.msk.f32.gmra.mxu1 %vm6778_vm2, %v11148_v46  ;;  %19770 = vmatmul.mubr.msk.f32.gmra.mxu0 %vm6778_vm2, %v11862_v59  ;;  %v11864_v23 = vld [vmem:[#allocation3 + $0x249] sm:$0xff] }
 0x503   :  { %v24754_v9 = vadd.f32 %v10745_v6, %v10334_v53  ;;  %v10337_v32 = vadd.f32 %v19387_v7, %v24395_v21  ;;  %19660 = vmatprep.mubr.msk.f32.mxu1 %vm6778_vm2, %v11149_v27  ;;  %19772 = vmatprep.mubr.msk.f32.mxu0 %vm6778_vm2, %v11863_v14  ;;  %v11151_v6 = vld [vmem:[#allocation3 + $0x258] sm:$0xff] }
 0x504   :  { %v10041_v34 = vpop.f32.mrf.mxu1  ;;  %v10755_v0 = vpop.f32.mrf.mxu0  ;;  %v11865_v21 = vld [vmem:[#allocation3 + $0x259] sm:$0xff] }
 0x505   :  { %v24759_v35 = vadd.f32 %v19499_v40, %v10337_v32  ;;  %v10336_v56 = vadd.f32 %v10041_v34, %v24401_v51  ;;  %v11152_v32 = vld [vmem:[#allocation3 + $0x260] sm:$0xff] }
 0x506   :  { %v19390_v46 = vpop.f32.mrf.mxu1  ;;  %v19502_v59 = vpop.f32.mrf.mxu0  ;;  %19661 = vmatmul.mubr.msk.f32.gmra.mxu1 %vm6778_vm2, %v11150_v60  ;;  %19773 = vmatmul.mubr.msk.f32.gmra.mxu0 %vm6778_vm2, %v11864_v23  ;;  %v11866_v34 = vld [vmem:[#allocation3 + $0x261] sm:$0xff] }
 0x507   :  { %v24764_v53 = vadd.f32 %v10755_v0, %v10336_v56  ;;  %v10339_v7 = vadd.f32 %v19390_v46, %v24407_v13  ;;  %19663 = vmatprep.mubr.msk.f32.mxu1 %vm6778_vm2, %v11151_v6  ;;  %19775 = vmatprep.mubr.msk.f32.mxu0 %vm6778_vm2, %v11865_v21  ;;  %v11153_v0 = vld [vmem:[#allocation3 + $0x270] sm:$0xff] }
 0x508   :  { %v10051_v40 = vpop.f32.mrf.mxu1  ;;  %v10765_v51 = vpop.f32.mrf.mxu0  ;;  %v11867_v13 = vld [vmem:[#allocation3 + $0x271] sm:$0xff] }
 0x509   :  { %v24769_v27 = vadd.f32 %v19502_v59, %v10339_v7  ;;  %v10338_v14 = vadd.f32 %v10051_v40, %v24413_v5  ;;  %v11154_v7 = vld [vmem:[#allocation3 + $0x278] sm:$0xff] }
 0x50a   :  { %v19393_v60 = vpop.f32.mrf.mxu1  ;;  %v19505_v23 = vpop.f32.mrf.mxu0  ;;  %19664 = vmatmul.mubr.msk.f32.gmra.mxu1 %vm6778_vm2, %v11152_v32  ;;  %19776 = vmatmul.mubr.msk.f32.gmra.mxu0 %vm6778_vm2, %v11866_v34  ;;  %v11868_v40 = vld [vmem:[#allocation3 + $0x279] sm:$0xff] }
 0x50b   :  { %v24774_v56 = vadd.f32 %v10765_v51, %v10338_v14  ;;  %v10341_v46 = vadd.f32 %v19393_v60, %v24419_v41  ;;  %19666 = vmatprep.mubr.msk.f32.mxu1 %vm6778_vm2, %v11153_v0  ;;  %19778 = vmatprep.mubr.msk.f32.mxu0 %vm6778_vm2, %v11867_v13  ;;  %v11155_v51 = vld [vmem:[#allocation3 + $0x288] sm:$0xff] }
 0x50c   :  { %v10061_v59 = vpop.f32.mrf.mxu1  ;;  %v10775_v5 = vpop.f32.mrf.mxu0  ;;  %v11869_v41 = vld [vmem:[#allocation3 + $0x289] sm:$0xff] }
 0x50d   :  { %v24779_v6 = vadd.f32 %v19505_v23, %v10341_v46  ;;  %v10340_v21 = vadd.f32 %v10061_v59, %v24425_v22  ;;  %v11156_v46 = vld [vmem:[#allocation3 + $0x290] sm:$0xff] }
 0x50e   :  { %v19396_v32 = vpop.f32.mrf.mxu1  ;;  %v19508_v34 = vpop.f32.mrf.mxu0  ;;  %19667 = vmatmul.mubr.msk.f32.gmra.mxu1 %vm6778_vm2, %v11154_v7  ;;  %19779 = vmatmul.mubr.msk.f32.gmra.mxu0 %vm6778_vm2, %v11868_v40  ;;  %v11870_v59 = vld [vmem:[#allocation3 + $0x291] sm:$0xff] }
 0x50f   :  { %v24784_v14 = vadd.f32 %v10775_v5, %v10340_v21  ;;  %v10343_v60 = vadd.f32 %v19396_v32, %v24431_v42  ;;  %19669 = vmatprep.mubr.msk.f32.mxu1 %vm6778_vm2, %v11155_v51  ;;  %19781 = vmatprep.mubr.msk.f32.mxu0 %vm6778_vm2, %v11869_v41  ;;  %v11157_v5 = vld [vmem:[#allocation3 + $0x2a0] sm:$0xff] }
 0x510   :  { %v10071_v23 = vpop.f32.mrf.mxu1  ;;  %v10785_v22 = vpop.f32.mrf.mxu0  ;;  %v11871_v42 = vld [vmem:[#allocation3 + $0x2a1] sm:$0xff] }
 0x511   :  { %v24789_v0 = vadd.f32 %v19508_v34, %v10343_v60  ;;  %v10342_v13 = vadd.f32 %v10071_v23, %v24437_v55  ;;  %v11158_v60 = vld [vmem:[#allocation3 + $0x2a8] sm:$0xff] }
 0x512   :  { %v19399_v7 = vpop.f32.mrf.mxu1  ;;  %v19511_v40 = vpop.f32.mrf.mxu0  ;;  %19670 = vmatmul.mubr.msk.f32.gmra.mxu1 %vm6778_vm2, %v11156_v46  ;;  %19782 = vmatmul.mubr.msk.f32.gmra.mxu0 %vm6778_vm2, %v11870_v59  ;;  %v11872_v23 = vld [vmem:[#allocation3 + $0x2a9] sm:$0xff] }
 0x513   :  { %v24794_v21 = vadd.f32 %v10785_v22, %v10342_v13  ;;  %v10345_v32 = vadd.f32 %v19399_v7, %v24443_v11  ;;  %19672 = vmatprep.mubr.msk.f32.mxu1 %vm6778_vm2, %v11157_v5  ;;  %19784 = vmatprep.mubr.msk.f32.mxu0 %vm6778_vm2, %v11871_v42  ;;  %v11159_v22 = vld [vmem:[#allocation3 + $0x2b8] sm:$0xff] }
 0x514   :  { %v10081_v34 = vpop.f32.mrf.mxu1  ;;  %v10795_v55 = vpop.f32.mrf.mxu0  ;;  %v11873_v11 = vld [vmem:[#allocation3 + $0x2b9] sm:$0xff] }
 0x515   :  { %v24799_v51 = vadd.f32 %v19511_v40, %v10345_v32  ;;  %v10344_v41 = vadd.f32 %v10081_v34, %v24449_v30  ;;  %v11160_v32 = vld [vmem:[#allocation3 + $0x2c0] sm:$0xff] }
 0x516   :  { %v19402_v46 = vpop.f32.mrf.mxu1  ;;  %v19514_v59 = vpop.f32.mrf.mxu0  ;;  %19673 = vmatmul.mubr.msk.f32.gmra.mxu1 %vm6778_vm2, %v11158_v60  ;;  %19785 = vmatmul.mubr.msk.f32.gmra.mxu0 %vm6778_vm2, %v11872_v23  ;;  %v11874_v34 = vld [vmem:[#allocation3 + $0x2c1] sm:$0xff] }
 0x517   :  { %v24804_v13 = vadd.f32 %v10795_v55, %v10344_v41  ;;  %v10347_v7 = vadd.f32 %v19402_v46, %v24455_v43  ;;  %19675 = vmatprep.mubr.msk.f32.mxu1 %vm6778_vm2, %v11159_v22  ;;  %19787 = vmatprep.mubr.msk.f32.mxu0 %vm6778_vm2, %v11873_v11  ;;  %v11161_v55 = vld [vmem:[#allocation3 + $0x2d0] sm:$0xff] }
 0x518   :  { %v10091_v40 = vpop.f32.mrf.mxu1  ;;  %v10805_v30 = vpop.f32.mrf.mxu0  ;;  %v11875_v43 = vld [vmem:[#allocation3 + $0x2d1] sm:$0xff] }
 0x519   :  { %v24809_v5 = vadd.f32 %v19514_v59, %v10347_v7  ;;  %v10346_v42 = vadd.f32 %v10091_v40, %v24461_v62  ;;  %v11162_v7 = vld [vmem:[#allocation3 + $0x2d8] sm:$0xff] }
 0x51a   :  { %v19405_v60 = vpop.f32.mrf.mxu1  ;;  %v19517_v23 = vpop.f32.mrf.mxu0  ;;  %19676 = vmatmul.mubr.msk.f32.gmra.mxu1 %vm6778_vm2, %v11160_v32  ;;  %19788 = vmatmul.mubr.msk.f32.gmra.mxu0 %vm6778_vm2, %v11874_v34  ;;  %v11876_v40 = vld [vmem:[#allocation3 + $0x2d9] sm:$0xff] }
 0x51b   :  { %v24814_v41 = vadd.f32 %v10805_v30, %v10346_v42  ;;  %v10349_v46 = vadd.f32 %v19405_v60, %v24467_v38  ;;  %19678 = vmatprep.mubr.msk.f32.mxu1 %vm6778_vm2, %v11161_v55  ;;  %19790 = vmatprep.mubr.msk.f32.mxu0 %vm6778_vm2, %v11875_v43  ;;  %v11163_v30 = vld [vmem:[#allocation3 + $0x2e8] sm:$0xff]  ;;  %v26781_v43 = vld [vmem:[#allocation49_spill] sm:$0xff] }
 0x51c   :  { %v10101_v59 = vpop.f32.mrf.mxu1  ;;  %v10815_v62 = vpop.f32.mrf.mxu0  ;;  %v11877_v38 = vld [vmem:[#allocation3 + $0x2e9] sm:$0xff] }
 0x51d   :  { %v24819_v22 = vadd.f32 %v19517_v23, %v10349_v46  ;;  %v10348_v11 = vadd.f32 %v10101_v59, %v24473_v2  ;;  %v11164_v59 = vld [vmem:[#allocation3 + $0x2f0] sm:$0xff] }
 0x51e   :  { %v19408_v32 = vpop.f32.mrf.mxu1  ;;  %v19520_v34 = vpop.f32.mrf.mxu0  ;;  %19679 = vmatmul.mubr.msk.f32.gmra.mxu1 %vm6778_vm2, %v11162_v7  ;;  %19791 = vmatmul.mubr.msk.f32.gmra.mxu0 %vm6778_vm2, %v11876_v40  ;;  %v11878_v7 = vld [vmem:[#allocation3 + $0x2f1] sm:$0xff] }
 0x51f   :  { %26778 = vst [vmem:[#allocation86_spill] sm:$0xff] %v24819_v22  ;;  %v24824_v42 = vadd.f32 %v10815_v62, %v10348_v11  ;;  %v10351_v60 = vadd.f32 %v19408_v32, %v24479_v33  ;;  %19681 = vmatprep.mubr.msk.f32.mxu1 %vm6778_vm2, %v11163_v30  ;;  %19793 = vmatprep.mubr.msk.f32.mxu0 %vm6778_vm2, %v11877_v38  ;;  %v11165_v62 = vld [vmem:[#allocation3 + $0x300] sm:$0xff]  ;;  %v26783_v32 = vld [vmem:[#allocation14_spill] sm:$0xff] }
 0x520   :  { %v10111_v23 = vpop.f32.mrf.mxu1  ;;  %v10825_v2 = vpop.f32.mrf.mxu0  ;;  %v11879_v33 = vld [vmem:[#allocation3 + $0x301] sm:$0xff] }
 0x521   :  { %26779 = vst [vmem:[#allocation21_spill] sm:$0xff] %v24824_v42  ;;  %v24829_v55 = vadd.f32 %v19520_v34, %v10351_v60  ;;  %v10350_v46 = vadd.f32 %v10111_v23, %v26781_v43  ;;  %v11166_v43 = vld [vmem:[#allocation3 + $0x308] sm:$0xff] }
 0x522   :  { %v19411_v22 = vpop.f32.mrf.mxu1  ;;  %v19523_v40 = vpop.f32.mrf.mxu0  ;;  %19682 = vmatmul.mubr.msk.f32.gmra.mxu1 %vm6778_vm2, %v11164_v59  ;;  %19794 = vmatmul.mubr.msk.f32.gmra.mxu0 %vm6778_vm2, %v11878_v7  ;;  %v11880_v59 = vld [vmem:[#allocation3 + $0x309] sm:$0xff] }
 0x523   :  { %26780 = vst [vmem:[#allocation20_spill] sm:$0xff] %v24829_v55  ;;  %v24834_v11 = vadd.f32 %v10825_v2, %v10350_v46  ;;  %v10353_v30 = vadd.f32 %v19411_v22, %v26783_v32  ;;  %19684 = vmatprep.mubr.msk.f32.mxu1 %vm6778_vm2, %v11165_v62  ;;  %19796 = vmatprep.mubr.msk.f32.mxu0 %vm6778_vm2, %v11879_v33  ;;  %v11167_v2 = vld [vmem:[#allocation3 + $0x318] sm:$0xff]  ;;  %v26786_v62 = vld [vmem:[#allocation81_spill] sm:$0xff] }
 0x524   :  { %v10121_v34 = vpop.f32.mrf.mxu1  ;;  %v10835_v38 = vpop.f32.mrf.mxu0  ;;  %v11881_v22 = vld [vmem:[#allocation3 + $0x319] sm:$0xff] }
 0x525   :  { %26782 = vst [vmem:[#allocation85_spill] sm:$0xff] %v24834_v11  ;;  %v24839_v60 = vadd.f32 %v19523_v40, %v10353_v30  ;;  %v10352_v23 = vadd.f32 %v10121_v34, %v24497_v47  ;;  %v26788_v30 = vld [vmem:[#allocation48_spill] sm:$0xff] }
 0x526   :  { %v19414_v55 = vpop.f32.mrf.mxu1  ;;  %v19526_v7 = vpop.f32.mrf.mxu0  ;;  %19685 = vmatmul.mubr.msk.f32.gmra.mxu1 %vm6778_vm2, %v11166_v43  ;;  %19797 = vmatmul.mubr.msk.f32.gmra.mxu0 %vm6778_vm2, %v11880_v59  ;;  %v11882_v43 = vld [vmem:[#allocation3 + $0x321] sm:$0xff] }
 0x527   :  { %26784 = vst [vmem:[#allocation88_spill] sm:$0xff] %v24839_v60  ;;  %v24844_v46 = vadd.f32 %v10835_v38, %v10352_v23  ;;  %v10355_v33 = vadd.f32 %v19414_v55, %v26786_v62  ;;  %19687 = vmatprep.mubr.msk.f32.mxu1 %vm6778_vm2, %v11167_v2  ;;  %19799 = vmatprep.mubr.msk.f32.mxu0 %vm6778_vm2, %v11881_v22  ;;  %v11168_v60 = vld [vmem:[#allocation3 + $0x320] sm:$0xff]  ;;  %v11169_v38 = vld [vmem:[#allocation3 + $0x330] sm:$0xff] }
 0x528   :  { %v10131_v40 = vpop.f32.mrf.mxu1  ;;  %v10845_v47 = vpop.f32.mrf.mxu0  ;;  %v11883_v55 = vld [vmem:[#allocation3 + $0x331] sm:$0xff]  ;;  %v26789_v2 = vld [vmem:[#allocation51_spill] sm:$0xff] }
 0x529   :  { %26785 = vst [vmem:[#allocation23_spill] sm:$0xff] %v24844_v46  ;;  %v24849_v32 = vadd.f32 %v19526_v7, %v10355_v33  ;;  %v10354_v34 = vadd.f32 %v10131_v40, %v26788_v30  ;;  %v11171_v33 = vld [vmem:[#allocation3 + $0x348] sm:$0xff] }
 0x52a   :  { %v19417_v11 = vpop.f32.mrf.mxu1  ;;  %v19529_v59 = vpop.f32.mrf.mxu0  ;;  %19688 = vmatmul.mubr.msk.f32.gmra.mxu1 %vm6778_vm2, %v11168_v60  ;;  %19800 = vmatmul.mubr.msk.f32.gmra.mxu0 %vm6778_vm2, %v11882_v43  ;;  %v11885_v40 = vld [vmem:[#allocation3 + $0x349] sm:$0xff]  ;;  %v11884_v43 = vld [vmem:[#allocation3 + $0x339] sm:$0xff] }
 0x52b   :  { %26787 = vst [vmem:[#allocation22_spill] sm:$0xff] %v24849_v32  ;;  %v24854_v23 = vadd.f32 %v10845_v47, %v10354_v34  ;;  %v10357_v22 = vadd.f32 %v19417_v11, %v26789_v2  ;;  %19690 = vmatprep.mubr.msk.f32.mxu1 %vm6778_vm2, %v11169_v38  ;;  %19802 = vmatprep.mubr.msk.f32.mxu0 %vm6778_vm2, %v11883_v55  ;;  %v11170_v32 = vld [vmem:[#allocation3 + $0x338] sm:$0xff]  ;;  %v11172_v34 = vld [vmem:[#allocation3 + $0x350] sm:$0xff] }
 0x52c   :  { %v10141_v7 = vpop.f32.mrf.mxu1  ;;  %v10855_v62 = vpop.f32.mrf.mxu0 }
 0x52d   :  { %v24859_v30 = vadd.f32 %v19529_v59, %v10357_v22  ;;  %v10356_v60 = vadd.f32 %v10141_v7, %v24521_v31  ;;  %v11886_v59 = vld [vmem:[#allocation3 + $0x351] sm:$0xff] }
 0x52e   :  { %v19420_v46 = vpop.f32.mrf.mxu1  ;;  %v19532_v42 = vpop.f32.mrf.mxu0  ;;  %19691 = vmatmul.mubr.msk.f32.gmra.mxu1 %vm6778_vm2, %v11170_v32  ;;  %19803 = vmatmul.mubr.msk.f32.gmra.mxu0 %vm6778_vm2, %v11884_v43  ;;  %v12537_v7 = vld [vmem:[#allocation3 + $0x32] sm:$0xff] }
 0x52f   :  { %v24864_v11 = vadd.f32 %v10855_v62, %v10356_v60  ;;  %v10359_v47 = vadd.f32 %v19420_v46, %v24526_v36  ;;  %19693 = vmatprep.mubr.msk.f32.mxu1 %vm6778_vm2, %v11171_v33  ;;  %19805 = vmatprep.mubr.msk.f32.mxu0 %vm6778_vm2, %v11885_v40 }
 0x530   :  { %v10151_v38 = vpop.f32.mrf.mxu1  ;;  %v10865_v31 = vpop.f32.mrf.mxu0 }
 0x531   :  { %v24869_v55 = vadd.f32 %v19532_v42, %v10359_v47  ;;  %v10358_v2 = vadd.f32 %v10151_v38, %v24531_v25  ;;  %v12538_v25 = vld [vmem:[#allocation3 + $0x3a] sm:$0xff]  ;;  %v12539_v47 = vld [vmem:[#allocation3 + $0x4a] sm:$0xff] }
 0x532   :  { %v19423_v22 = vpop.f32.mrf.mxu1  ;;  %v19535_v32 = vpop.f32.mrf.mxu0  ;;  %19694 = vmatmul.mubr.msk.f32.gmra.mxu1 %vm6778_vm2, %v11172_v34  ;;  %19806 = vmatmul.mubr.msk.f32.gmra.mxu0 %vm6778_vm2, %v11886_v59 }
 0x533   :  { %v24874_v36 = vadd.f32 %v10865_v31, %v10358_v2  ;;  %v10361_v46 = vadd.f32 %v19423_v22, %v24537_v4  ;;  %19824 = vmatprep.mubr.msk.f32.mxu1 %vm6778_vm2, %v12537_v7  ;;  %v12540_v22 = vld [vmem:[#allocation3 + $0x52] sm:$0xff]  ;;  %v12541_v7 = vld [vmem:[#allocation3 + $0x62] sm:$0xff] }
 0x534   :  { %v10161_v62 = vpop.f32.mrf.mxu1  ;;  %v10875_v33 = vpop.f32.mrf.mxu0 }
 0x535   :  { %v24878_v40 = vadd.f32 %v19535_v32, %v10361_v46  ;;  %v10360_v42 = vadd.f32 %v10161_v62, %v24545_v29 }
 0x536   :  { %v19426_v60 = vpop.f32.mrf.mxu1  ;;  %v19538_v43 = vpop.f32.mrf.mxu0  ;;  %19825 = vmatmul.mubr.msk.f32.vlgmr.msra.gmra.mxu1 %vm6778_vm2, %v12538_v25 }
 0x537   :  { %v24882_v34 = vadd.f32 %v10875_v33, %v10360_v42  ;;  %v10363_v59 = vadd.f32 %v19426_v60, %v24551_v12  ;;  %19827 = vmatprep.mubr.msk.f32.mxu1 %vm6778_vm2, %v12539_v47  ;;  %v12542_v60 = vld [vmem:[#allocation3 + $0x6a] sm:$0xff]  ;;  %v12543_v47 = vld [vmem:[#allocation3 + $0x7a] sm:$0xff] }
 0x538   :  { %v10171_v4 = vpop.f32.mrf.mxu1  ;;  %v10885_v38 = vpop.f32.mrf.mxu0 }
 0x539   :  { %v24886_v31 = vadd.f32 %v19538_v43, %v10363_v59  ;;  %v10362_v2 = vadd.f32 %v10171_v4, %v24559_v37 }
 0x53a   :  { %v19429_v29 = vpop.f32.mrf.mxu1  ;;  %v19541_v32 = vpop.f32.mrf.mxu0  ;;  %19828 = vmatmul.mubr.msk.f32.gmra.mxu1 %vm6778_vm2, %v12540_v22 }
 0x53b   :  { %v24890_v46 = vadd.f32 %v10885_v38, %v10362_v2  ;;  %v10365_v62 = vadd.f32 %v19429_v29, %v24564_v1  ;;  %19830 = vmatprep.mubr.msk.f32.mxu1 %vm6778_vm2, %v12541_v7  ;;  %v12544_v29 = vld [vmem:[#allocation3 + $0x82] sm:$0xff]  ;;  %v12545_v7 = vld [vmem:[#allocation3 + $0x92] sm:$0xff] }
 0x53c   :  { %v10181_v12 = vpop.f32.mrf.mxu1  ;;  %v10895_v33 = vpop.f32.mrf.mxu0 }
 0x53d   :  { %v24894_v42 = vadd.f32 %v19541_v32, %v10365_v62  ;;  %v10364_v25 = vadd.f32 %v10181_v12, %v24572_v8 }
 0x53e   :  { %v19432_v37 = vpop.f32.mrf.mxu1  ;;  %v19544_v43 = vpop.f32.mrf.mxu0  ;;  %19831 = vmatmul.mubr.msk.f32.gmra.mxu1 %vm6778_vm2, %v12542_v60 }
 0x53f   :  { %v24898_v59 = vadd.f32 %v10895_v33, %v10364_v25  ;;  %v10367_v4 = vadd.f32 %v19432_v37, %v24577_v58  ;;  %19833 = vmatprep.mubr.msk.f32.mxu1 %vm6778_vm2, %v12543_v47  ;;  %v12546_v37 = vld [vmem:[#allocation3 + $0x9a] sm:$0xff]  ;;  %v12547_v47 = vld [vmem:[#allocation3 + $0xaa] sm:$0xff] }
 0x540   :  { %v10191_v1 = vpop.f32.mrf.mxu1  ;;  %v10905_v38 = vpop.f32.mrf.mxu0 }
 0x541   :  { %v24902_v2 = vadd.f32 %v19544_v43, %v10367_v4  ;;  %v10366_v22 = vadd.f32 %v10191_v1, %v24585_v45 }
 0x542   :  { %v19435_v8 = vpop.f32.mrf.mxu1  ;;  %v19547_v32 = vpop.f32.mrf.mxu0  ;;  %19834 = vmatmul.mubr.msk.f32.gmra.mxu1 %vm6778_vm2, %v12544_v29 }
 0x543   :  { %v24906_v62 = vadd.f32 %v10905_v38, %v10366_v22  ;;  %v10369_v12 = vadd.f32 %v19435_v8, %v24590_v54  ;;  %19836 = vmatprep.mubr.msk.f32.mxu1 %vm6778_vm2, %v12545_v7  ;;  %v12548_v8 = vld [vmem:[#allocation3 + $0xb2] sm:$0xff]  ;;  %v12549_v7 = vld [vmem:[#allocation3 + $0xc2] sm:$0xff] }
 0x544   :  { %v10201_v58 = vpop.f32.mrf.mxu1  ;;  %v10915_v33 = vpop.f32.mrf.mxu0 }
 0x545   :  { %v24910_v25 = vadd.f32 %v19547_v32, %v10369_v12  ;;  %v10368_v60 = vadd.f32 %v10201_v58, %v24598_v28 }
 0x546   :  { %v19438_v45 = vpop.f32.mrf.mxu1  ;;  %v19550_v43 = vpop.f32.mrf.mxu0  ;;  %19837 = vmatmul.mubr.msk.f32.gmra.mxu1 %vm6778_vm2, %v12546_v37 }
 0x547   :  { %v24914_v4 = vadd.f32 %v10915_v33, %v10368_v60  ;;  %v10371_v1 = vadd.f32 %v19438_v45, %v24603_v52  ;;  %19839 = vmatprep.mubr.msk.f32.mxu1 %vm6778_vm2, %v12547_v47  ;;  %v12550_v45 = vld [vmem:[#allocation3 + $0xca] sm:$0xff]  ;;  %v12551_v47 = vld [vmem:[#allocation3 + $0xda] sm:$0xff] }
 0x548   :  { %v10211_v54 = vpop.f32.mrf.mxu1  ;;  %v10925_v38 = vpop.f32.mrf.mxu0 }
 0x549   :  { %v24918_v22 = vadd.f32 %v19550_v43, %v10371_v1  ;;  %v10370_v29 = vadd.f32 %v10211_v54, %v24611_v49 }
 0x54a   :  { %v19441_v28 = vpop.f32.mrf.mxu1  ;;  %v19553_v32 = vpop.f32.mrf.mxu0  ;;  %19840 = vmatmul.mubr.msk.f32.gmra.mxu1 %vm6778_vm2, %v12548_v8 }
 0x54b   :  { %v24922_v12 = vadd.f32 %v10925_v38, %v10370_v29  ;;  %v10373_v58 = vadd.f32 %v19441_v28, %v24616_v24  ;;  %19842 = vmatprep.mubr.msk.f32.mxu1 %vm6778_vm2, %v12549_v7  ;;  %v12552_v28 = vld [vmem:[#allocation3 + $0xe2] sm:$0xff]  ;;  %v12553_v7 = vld [vmem:[#allocation3 + $0xf2] sm:$0xff] }
 0x54c   :  { %v10221_v52 = vpop.f32.mrf.mxu1  ;;  %v10935_v33 = vpop.f32.mrf.mxu0 }
 0x54d   :  { %v24926_v60 = vadd.f32 %v19553_v32, %v10373_v58  ;;  %v10372_v37 = vadd.f32 %v10221_v52, %v24624_v10 }
 0x54e   :  { %v19444_v49 = vpop.f32.mrf.mxu1  ;;  %v19556_v43 = vpop.f32.mrf.mxu0  ;;  %19843 = vmatmul.mubr.msk.f32.gmra.mxu1 %vm6778_vm2, %v12550_v45 }
 0x54f   :  { %v24930_v1 = vadd.f32 %v10935_v33, %v10372_v37  ;;  %v10375_v54 = vadd.f32 %v19444_v49, %v24629_v19  ;;  %19845 = vmatprep.mubr.msk.f32.mxu1 %vm6778_vm2, %v12551_v47  ;;  %v12554_v49 = vld [vmem:[#allocation3 + $0xfa] sm:$0xff]  ;;  %v12555_v47 = vld [vmem:[#allocation3 + $0x10a] sm:$0xff] }
 0x550   :  { %v10231_v24 = vpop.f32.mrf.mxu1  ;;  %v10945_v38 = vpop.f32.mrf.mxu0 }
 0x551   :  { %v24934_v29 = vadd.f32 %v19556_v43, %v10375_v54  ;;  %v10374_v8 = vadd.f32 %v10231_v24, %v24634_v39 }
 0x552   :  { %v19447_v10 = vpop.f32.mrf.mxu1  ;;  %v19559_v32 = vpop.f32.mrf.mxu0  ;;  %19846 = vmatmul.mubr.msk.f32.gmra.mxu1 %vm6778_vm2, %v12552_v28  ;;  %v26791_v28 = vld [vmem:[#allocation15_spill] sm:$0xff] }
 0x553   :  { %v24938_v58 = vadd.f32 %v10945_v38, %v10374_v8  ;;  %v10377_v52 = vadd.f32 %v19447_v10, %v24639_v48  ;;  %19848 = vmatprep.mubr.msk.f32.mxu1 %vm6778_vm2, %v12553_v7 }
 0x554   :  { %v10241_v19 = vpop.f32.mrf.mxu1  ;;  %v10955_v33 = vpop.f32.mrf.mxu0 }
 0x555   :  { %v24942_v37 = vadd.f32 %v19559_v32, %v10377_v52  ;;  %v10376_v45 = vadd.f32 %v10241_v19, %v24644_v44  ;;  %v12556_v32 = vld [vmem:[#allocation3 + $0x112] sm:$0xff]  ;;  %v12557_v52 = vld [vmem:[#allocation3 + $0x122] sm:$0xff] }
 0x556   :  { %v19450_v39 = vpop.f32.mrf.mxu1  ;;  %v19562_v43 = vpop.f32.mrf.mxu0  ;;  %19849 = vmatmul.mubr.msk.f32.gmra.mxu1 %vm6778_vm2, %v12554_v49 }
 0x557   :  { %v24946_v54 = vadd.f32 %v10955_v33, %v10376_v45  ;;  %v10379_v24 = vadd.f32 %v19450_v39, %v24649_v18  ;;  %19851 = vmatprep.mubr.msk.f32.mxu1 %vm6778_vm2, %v12555_v47  ;;  %v26793_v33 = vld [vmem:[#allocation13_spill] sm:$0xff] }
 0x558   :  { %v10251_v48 = vpop.f32.mrf.mxu1  ;;  %v10965_v38 = vpop.f32.mrf.mxu0 }
 0x559   :  { %v24950_v8 = vadd.f32 %v19562_v43, %v10379_v24  ;;  %v10378_v10 = vadd.f32 %v10251_v48, %v26791_v28  ;;  %v26795_v43 = vld [vmem:[#allocation50_spill] sm:$0xff]  ;;  %v12558_v24 = vld [vmem:[#allocation3 + $0x12a] sm:$0xff] }
 0x55a   :  { %v19453_v44 = vpop.f32.mrf.mxu1  ;;  %v19565_v7 = vpop.f32.mrf.mxu0  ;;  %19852 = vmatmul.mubr.msk.f32.gmra.mxu1 %vm6778_vm2, %v12556_v32 }
 0x55b   :  { %26790 = vst [vmem:[#allocation87_spill] sm:$0xff] %v24950_v8  ;;  %v24954_v19 = vadd.f32 %v10965_v38, %v10378_v10  ;;  %v10381_v45 = vadd.f32 %v19453_v44, %v26793_v33  ;;  %19854 = vmatprep.mubr.msk.f32.mxu1 %vm6778_vm2, %v12557_v52  ;;  %v12559_v8 = vld [vmem:[#allocation3 + $0x13a] sm:$0xff]  ;;  %v26797_v38 = vld [vmem:[#allocation53_spill] sm:$0xff] }
 0x55c   :  { %v10261_v18 = vpop.f32.mrf.mxu1  ;;  %v10975_v49 = vpop.f32.mrf.mxu0 }
 0x55d   :  { %26792 = vst [vmem:[#allocation90_spill] sm:$0xff] %v24954_v19  ;;  %v24958_v39 = vadd.f32 %v19565_v7, %v10381_v45  ;;  %v10380_v47 = vadd.f32 %v10261_v18, %v26795_v43  ;;  %v26799_v7 = vld [vmem:[#allocation17_spill] sm:$0xff] }
 0x55e   :  { %v19456_v48 = vpop.f32.mrf.mxu1  ;;  %v19568_v28 = vpop.f32.mrf.mxu0  ;;  %19855 = vmatmul.mubr.msk.f32.gmra.mxu1 %vm6778_vm2, %v12558_v24  ;;  %v12561_v19 = vld [vmem:[#allocation3 + $0x152] sm:$0xff] }
 0x55f   :  { %26794 = vst [vmem:[#allocation25_spill] sm:$0xff] %v24958_v39  ;;  %v24962_v32 = vadd.f32 %v10975_v49, %v10380_v47  ;;  %v10383_v10 = vadd.f32 %v19456_v48, %v26797_v38  ;;  %19857 = vmatprep.mubr.msk.f32.mxu1 %vm6778_vm2, %v12559_v8  ;;  %v12560_v39 = vld [vmem:[#allocation3 + $0x142] sm:$0xff] }
 0x560   :  { %v10271_v44 = vpop.f32.mrf.mxu1  ;;  %v10985_v52 = vpop.f32.mrf.mxu0  ;;  %v26800_v49 = vld [vmem:[#allocation16_spill] sm:$0xff] }
 0x561   :  { %26796 = vst [vmem:[#allocation24_spill] sm:$0xff] %v24962_v32  ;;  %v24966_v33 = vadd.f32 %v19568_v28, %v10383_v10  ;;  %v10382_v45 = vadd.f32 %v10271_v44, %v26799_v7  ;;  %v26802_v28 = vld [vmem:[#allocation52_spill] sm:$0xff] }
 0x562   :  { %v19459_v18 = vpop.f32.mrf.mxu1  ;;  %v19571_v43 = vpop.f32.mrf.mxu0  ;;  %19858 = vmatmul.mubr.msk.f32.gmra.mxu1 %vm6778_vm2, %v12560_v39  ;;  %v12563_v32 = vld [vmem:[#allocation3 + $0x16a] sm:$0xff] }
 0x563   :  { %26798 = vst [vmem:[#allocation89_spill] sm:$0xff] %v24966_v33  ;;  %v24970_v24 = vadd.f32 %v10985_v52, %v10382_v45  ;;  %v10385_v47 = vadd.f32 %v19459_v18, %v26800_v49  ;;  %19860 = vmatprep.mubr.msk.f32.mxu1 %vm6778_vm2, %v12561_v19  ;;  %v12562_v33 = vld [vmem:[#allocation3 + $0x15a] sm:$0xff] }
 0x564   :  { %v10281_v48 = vpop.f32.mrf.mxu1  ;;  %v10995_v8 = vpop.f32.mrf.mxu0  ;;  %v26804_v52 = vld [vmem:[#allocation19_spill] sm:$0xff] }
 0x565   :  { %v24974_v38 = vadd.f32 %v19571_v43, %v10385_v47  ;;  %v10384_v10 = vadd.f32 %v10281_v48, %v26802_v28  ;;  %v12564_v47 = vld [vmem:[#allocation3 + $0x172] sm:$0xff] }
 0x566   :  { %v19462_v44 = vpop.f32.mrf.mxu1  ;;  %v19574_v7 = vpop.f32.mrf.mxu0  ;;  %19861 = vmatmul.mubr.msk.f32.gmra.mxu1 %vm6778_vm2, %v12562_v33 }
 0x567   :  { %26801 = vst [vmem:[#allocation92_spill] sm:$0xff] %v24974_v38  ;;  %v24978_v39 = vadd.f32 %v10995_v8, %v10384_v10  ;;  %v10387_v45 = vadd.f32 %v19462_v44, %v26804_v52  ;;  %19863 = vmatprep.mubr.msk.f32.mxu1 %vm6778_vm2, %v12563_v32  ;;  %v12565_v38 = vld [vmem:[#allocation3 + $0x182] sm:$0xff]  ;;  %v26806_v8 = vld [vmem:[#allocation18_spill] sm:$0xff] }
 0x568   :  { %v10291_v18 = vpop.f32.mrf.mxu1  ;;  %v11005_v19 = vpop.f32.mrf.mxu0  ;;  %v12567_v52 = vld [vmem:[#allocation3 + $0x19a] sm:$0xff] }
 0x569   :  { %26803 = vst [vmem:[#allocation26_spill] sm:$0xff] %v24978_v39  ;;  %v24982_v49 = vadd.f32 %v19574_v7, %v10387_v45  ;;  %v10386_v43 = vadd.f32 %v10291_v18, %v24694_v26  ;;  %v12566_v26 = vld [vmem:[#allocation3 + $0x18a] sm:$0xff] }
 0x56a   :  { %v19465_v48 = vpop.f32.mrf.mxu1  ;;  %v19577_v28 = vpop.f32.mrf.mxu0  ;;  %19864 = vmatmul.mubr.msk.f32.gmra.mxu1 %vm6778_vm2, %v12564_v47 }
 0x56b   :  { %v24986_v33 = vadd.f32 %v11005_v19, %v10386_v43  ;;  %v10389_v10 = vadd.f32 %v19465_v48, %v26806_v8  ;;  %19866 = vmatprep.mubr.msk.f32.mxu1 %vm6778_vm2, %v12565_v38  ;;  %v26808_v19 = vld [vmem:[#allocation84_spill] sm:$0xff] }
 0x56c   :  { %v10301_v44 = vpop.f32.mrf.mxu1  ;;  %v11015_v32 = vpop.f32.mrf.mxu0  ;;  %v12568_v48 = vld [vmem:[#allocation3 + $0x1a2] sm:$0xff] }
 0x56d   :  { %26805 = vst [vmem:[#allocation27_spill] sm:$0xff] %v24986_v33  ;;  %v24990_v39 = vadd.f32 %v19577_v28, %v10389_v10  ;;  %v10388_v7 = vadd.f32 %v10301_v44, %v24704_v15  ;;  %v12569_v44 = vld [vmem:[#allocation3 + $0x1e2] sm:$0xff] }
 0x56e   :  { %v19468_v45 = vpop.f32.mrf.mxu1  ;;  %v19580_v18 = vpop.f32.mrf.mxu0  ;;  %19867 = vmatmul.mubr.msk.f32.gmra.mxu1 %vm6778_vm2, %v12566_v26 }
 0x56f   :  { %26807 = vst [vmem:[#allocation91_spill] sm:$0xff] %v24990_v39  ;;  %v24994_v47 = vadd.f32 %v11015_v32, %v10388_v7  ;;  %v10391_v43 = vadd.f32 %v19468_v45, %v26808_v19  ;;  %19869 = vmatprep.mubr.msk.f32.mxu1 %vm6778_vm2, %v12567_v52 }
 0x570   :  { %v10311_v38 = vpop.f32.mrf.mxu1  ;;  %v11025_v8 = vpop.f32.mrf.mxu0 }
 0x571   :  { %v24998_v33 = vadd.f32 %v19580_v18, %v10391_v43  ;;  %v10390_v28 = vadd.f32 %v10311_v38, %v24714_v3  ;;  %v12570_v18 = vld [vmem:[#allocation3 + $0x1ea] sm:$0xff]  ;;  %v12571_v43 = vld [vmem:[#allocation3 + $0x1fa] sm:$0xff] }
 0x572   :  { %v19471_v10 = vpop.f32.mrf.mxu1  ;;  %v19583_v15 = vpop.f32.mrf.mxu0  ;;  %19870 = vmatmul.mubr.msk.f32.gmra.mxu1 %vm6778_vm2, %v12568_v48 }
 0x573   :  { %v25002_v39 = vadd.f32 %v11025_v8, %v10390_v28  ;;  %v10393_v32 = vadd.f32 %v19471_v10, %v24719_v17  ;;  %19872 = vmatprep.mubr.msk.f32.mxu1 %vm6778_vm2, %v12569_v44  ;;  %v12573_v44 = vld [vmem:[#allocation3 + $0x212] sm:$0xff] }
 0x574   :  { %v10321_v7 = vpop.f32.mrf.mxu1  ;;  %v11035_v52 = vpop.f32.mrf.mxu0 }
 0x575   :  { %v25006_v26 = vadd.f32 %v19583_v15, %v10393_v32  ;;  %v10392_v45 = vadd.f32 %v10321_v7, %v24724_v16  ;;  %v12572_v16 = vld [vmem:[#allocation3 + $0x202] sm:$0xff] }
 0x576   :  { %v19602_v19 = vpop.f32.mrf.mxu1  ;;  %v25009_v3 = vpop.f32.mrf.mxu0  ;;  %19873 = vmatmul.mubr.msk.f32.gmra.mxu1 %vm6778_vm2, %v12570_v18 }
 0x577   :  { %26809 = vst [vmem:[#allocation94_spill] sm:$0xff] %v25006_v26  ;;  %v25012_v48 = vadd.f32 %v11035_v52, %v10392_v45  ;;  %v25015_v38 = vadd.f32 %v19602_v19, %v24729_v61  ;;  %19875 = vmatprep.mubr.msk.f32.mxu1 %vm6778_vm2, %v12571_v43  ;;  %v12575_v19 = vld [vmem:[#allocation3 + $0x22a] sm:$0xff]  ;;  %v12579_v26 = vld [vmem:[#allocation3 + $0x25a] sm:$0xff] }
 0x578   :  { %v11440_v17 = vpop.f32.mrf.mxu1  ;;  %v25018_v8 = vpop.f32.mrf.mxu0 }
 0x579   :  { %26810 = vst [vmem:[#allocation82_spill] sm:$0xff] %v25012_v48  ;;  %v25021_v28 = vadd.f32 %v11440_v17, %v24734_v63  ;;  %v12574_v63 = vld [vmem:[#allocation3 + $0x21a] sm:$0xff] }
 0x57a   :  { %v19605_v10 = vpop.f32.mrf.mxu1  ;;  %v25023_v15 = vpop.f32.mrf.mxu0  ;;  %19876 = vmatmul.mubr.msk.f32.gmra.mxu1 %vm6778_vm2, %v12572_v16 }
 0x57b   :  { %v25027_v32 = vadd.f32 %v19605_v10, %v24739_v50  ;;  %19878 = vmatprep.mubr.msk.f32.mxu1 %vm6778_vm2, %v12573_v44 }
 0x57c   :  { %v11450_v61 = vpop.f32.mrf.mxu1  ;;  %v25030_v7 = vpop.f32.mrf.mxu0 }
 0x57d   :  { %v25033_v52 = vadd.f32 %v11450_v61, %v24744_v57  ;;  %v12576_v57 = vld [vmem:[#allocation3 + $0x232] sm:$0xff]  ;;  %v12577_v61 = vld [vmem:[#allocation3 + $0x242] sm:$0xff] }
 0x57e   :  { %v19608_v45 = vpop.f32.mrf.mxu1  ;;  %v25035_v18 = vpop.f32.mrf.mxu0  ;;  %19879 = vmatmul.mubr.msk.f32.gmra.mxu1 %vm6778_vm2, %v12574_v63 }
 0x57f   :  { %v25039_v43 = vadd.f32 %v19608_v45, %v24749_v20  ;;  %19881 = vmatprep.mubr.msk.f32.mxu1 %vm6778_vm2, %v12575_v19 }
 0x580   :  { %v11460_v50 = vpop.f32.mrf.mxu1  ;;  %v25042_v17 = vpop.f32.mrf.mxu0 }
 0x581   :  { %v25045_v16 = vadd.f32 %v11460_v50, %v24754_v9  ;;  %v12578_v9 = vld [vmem:[#allocation3 + $0x24a] sm:$0xff] }
 0x582   :  { %v19611_v10 = vpop.f32.mrf.mxu1  ;;  %v25047_v44 = vpop.f32.mrf.mxu0  ;;  %19882 = vmatmul.mubr.msk.f32.gmra.mxu1 %vm6778_vm2, %v12576_v57 }
 0x583   :  { %v25051_v63 = vadd.f32 %v19611_v10, %v24759_v35  ;;  %19884 = vmatprep.mubr.msk.f32.mxu1 %vm6778_vm2, %v12577_v61 }
 0x584   :  { %v11470_v20 = vpop.f32.mrf.mxu1  ;;  %v25054_v45 = vpop.f32.mrf.mxu0 }
 0x585   :  { %26811 = vst [vmem:[#allocation28_spill] sm:$0xff] %v25054_v45  ;;  %v25057_v19 = vadd.f32 %v11470_v20, %v24764_v53  ;;  %v12580_v53 = vld [vmem:[#allocation3 + $0x262] sm:$0xff] }
 0x586   :  { %v19614_v50 = vpop.f32.mrf.mxu1  ;;  %v25059_v48 = vpop.f32.mrf.mxu0  ;;  %19885 = vmatmul.mubr.msk.f32.gmra.mxu1 %vm6778_vm2, %v12578_v9 }
 0x587   :  { %26812 = vst [vmem:[#allocation93_spill] sm:$0xff] %v25059_v48  ;;  %v25063_v57 = vadd.f32 %v19614_v50, %v24769_v27  ;;  %19887 = vmatprep.mubr.msk.f32.mxu1 %vm6778_vm2, %v12579_v26  ;;  %v12581_v48 = vld [vmem:[#allocation3 + $0x272] sm:$0xff] }
 0x588   :  { %v11480_v35 = vpop.f32.mrf.mxu1  ;;  %v25066_v10 = vpop.f32.mrf.mxu0 }
 0x589   :  { %26813 = vst [vmem:[#allocation96_spill] sm:$0xff] %v25066_v10  ;;  %v25069_v61 = vadd.f32 %v11480_v35, %v24774_v56  ;;  %v12582_v56 = vld [vmem:[#allocation3 + $0x27a] sm:$0xff] }
 0x58a   :  { %v19617_v20 = vpop.f32.mrf.mxu1  ;;  %v25071_v45 = vpop.f32.mrf.mxu0  ;;  %19888 = vmatmul.mubr.msk.f32.gmra.mxu1 %vm6778_vm2, %v12580_v53 }
 0x58b   :  { %26814 = vst [vmem:[#allocation95_spill] sm:$0xff] %v25071_v45  ;;  %v25075_v9 = vadd.f32 %v19617_v20, %v24779_v6  ;;  %19890 = vmatprep.mubr.msk.f32.mxu1 %vm6778_vm2, %v12581_v48  ;;  %v12583_v45 = vld [vmem:[#allocation3 + $0x28a] sm:$0xff] }
 0x58c   :  { %v11490_v27 = vpop.f32.mrf.mxu1  ;;  %v25078_v26 = vpop.f32.mrf.mxu0 }
 0x58d   :  { %26815 = vst [vmem:[#allocation54_spill] sm:$0xff] %v25078_v26  ;;  %v25081_v50 = vadd.f32 %v11490_v27, %v24784_v14  ;;  %v12584_v14 = vld [vmem:[#allocation3 + $0x292] sm:$0xff] }
 0x58e   :  { %v19620_v35 = vpop.f32.mrf.mxu1  ;;  %v25083_v10 = vpop.f32.mrf.mxu0  ;;  %19891 = vmatmul.mubr.msk.f32.gmra.mxu1 %vm6778_vm2, %v12582_v56 }
 0x58f   :  { %26816 = vst [vmem:[#allocation57_spill] sm:$0xff] %v25083_v10  ;;  %v25087_v53 = vadd.f32 %v19620_v35, %v24789_v0  ;;  %19893 = vmatprep.mubr.msk.f32.mxu1 %vm6778_vm2, %v12583_v45  ;;  %v12585_v10 = vld [vmem:[#allocation3 + $0x2a2] sm:$0xff] }
 0x590   :  { %v11500_v6 = vpop.f32.mrf.mxu1  ;;  %v25090_v48 = vpop.f32.mrf.mxu0 }
 0x591   :  { %26817 = vst [vmem:[#allocation56_spill] sm:$0xff] %v25090_v48  ;;  %v25093_v20 = vadd.f32 %v11500_v6, %v24794_v21  ;;  %v12586_v21 = vld [vmem:[#allocation3 + $0x2aa] sm:$0xff] }
 0x592   :  { %v19623_v27 = vpop.f32.mrf.mxu1  ;;  %v25095_v26 = vpop.f32.mrf.mxu0  ;;  %19894 = vmatmul.mubr.msk.f32.gmra.mxu1 %vm6778_vm2, %v12584_v14 }
 0x593   :  { %26818 = vst [vmem:[#allocation29_spill] sm:$0xff] %v25095_v26  ;;  %v25099_v56 = vadd.f32 %v19623_v27, %v24799_v51  ;;  %19896 = vmatprep.mubr.msk.f32.mxu1 %vm6778_vm2, %v12585_v10  ;;  %v12587_v26 = vld [vmem:[#allocation3 + $0x2ba] sm:$0xff] }
 0x594   :  { %v11510_v0 = vpop.f32.mrf.mxu1  ;;  %v25102_v45 = vpop.f32.mrf.mxu0 }
 0x595   :  { %26819 = vst [vmem:[#allocation31_spill] sm:$0xff] %v25102_v45  ;;  %v25105_v35 = vadd.f32 %v11510_v0, %v24804_v13  ;;  %v12588_v13 = vld [vmem:[#allocation3 + $0x2c2] sm:$0xff] }
 0x596   :  { %v19626_v6 = vpop.f32.mrf.mxu1  ;;  %v25107_v48 = vpop.f32.mrf.mxu0  ;;  %19897 = vmatmul.mubr.msk.f32.gmra.mxu1 %vm6778_vm2, %v12586_v21  ;;  %v26826_v21 = vld [vmem:[#allocation86_spill] sm:$0xff] }
 0x597   :  { %26820 = vst [vmem:[#allocation83_spill] sm:$0xff] %v25105_v35  ;;  %26821 = vst [vmem:[#allocation59_spill] sm:$0xff] %v25107_v48  ;;  %v25111_v14 = vadd.f32 %v19626_v6, %v24809_v5  ;;  %19899 = vmatprep.mubr.msk.f32.mxu1 %vm6778_vm2, %v12587_v26  ;;  %v12589_v48 = vld [vmem:[#allocation3 + $0x2d2] sm:$0xff] }
 0x598   :  { %v11520_v51 = vpop.f32.mrf.mxu1  ;;  %v25114_v10 = vpop.f32.mrf.mxu0  ;;  %v26829_v6 = vld [vmem:[#allocation21_spill] sm:$0xff] }
 0x599   :  { %26822 = vst [vmem:[#allocation58_spill] sm:$0xff] %v25111_v14  ;;  %26823 = vst [vmem:[#allocation55_spill] sm:$0xff] %v25114_v10  ;;  %v25117_v27 = vadd.f32 %v11520_v51, %v24814_v41  ;;  %v12590_v41 = vld [vmem:[#allocation3 + $0x2da] sm:$0xff] }
 0x59a   :  { %v19629_v0 = vpop.f32.mrf.mxu1  ;;  %v25119_v45 = vpop.f32.mrf.mxu0  ;;  %19900 = vmatmul.mubr.msk.f32.gmra.mxu1 %vm6778_vm2, %v12588_v13  ;;  %v26832_v13 = vld [vmem:[#allocation20_spill] sm:$0xff] }
 0x59b   :  { %26824 = vst [vmem:[#allocation32_spill] sm:$0xff] %v25117_v27  ;;  %26825 = vst [vmem:[#allocation61_spill] sm:$0xff] %v25119_v45  ;;  %v25123_v35 = vadd.f32 %v19629_v0, %v26826_v21  ;;  %19902 = vmatprep.mubr.msk.f32.mxu1 %vm6778_vm2, %v12589_v48  ;;  %v12591_v45 = vld [vmem:[#allocation3 + $0x2ea] sm:$0xff] }
 0x59c   :  { %v11530_v5 = vpop.f32.mrf.mxu1  ;;  %v25126_v26 = vpop.f32.mrf.mxu0  ;;  %v26835_v21 = vld [vmem:[#allocation85_spill] sm:$0xff] }
 0x59d   :  { %26827 = vst [vmem:[#allocation60_spill] sm:$0xff] %v25123_v35  ;;  %26828 = vst [vmem:[#allocation30_spill] sm:$0xff] %v25126_v26  ;;  %v25129_v10 = vadd.f32 %v11530_v5, %v26829_v6  ;;  %v12592_v5 = vld [vmem:[#allocation3 + $0x2f2] sm:$0xff] }
 0x59e   :  { %v19632_v51 = vpop.f32.mrf.mxu1  ;;  %v25131_v27 = vpop.f32.mrf.mxu0  ;;  %19903 = vmatmul.mubr.msk.f32.gmra.mxu1 %vm6778_vm2, %v12590_v41  ;;  %v26838_v41 = vld [vmem:[#allocation88_spill] sm:$0xff] }
 0x59f   :  { %26830 = vst [vmem:[#allocation35_spill] sm:$0xff] %v25129_v10  ;;  %26831 = vst [vmem:[#allocation63_spill] sm:$0xff] %v25131_v27  ;;  %v25135_v14 = vadd.f32 %v19632_v51, %v26832_v13  ;;  %19905 = vmatprep.mubr.msk.f32.mxu1 %vm6778_vm2, %v12591_v45  ;;  %v12593_v27 = vld [vmem:[#allocation3 + $0x302] sm:$0xff] }
 0x5a0   :  { %v11540_v0 = vpop.f32.mrf.mxu1  ;;  %v25138_v48 = vpop.f32.mrf.mxu0  ;;  %v26840_v13 = vld [vmem:[#allocation23_spill] sm:$0xff] }
 0x5a1   :  { %26833 = vst [vmem:[#allocation62_spill] sm:$0xff] %v25135_v14  ;;  %26834 = vst [vmem:[#allocation33_spill] sm:$0xff] %v25138_v48  ;;  %v25141_v26 = vadd.f32 %v11540_v0, %v26835_v21  ;;  %v12594_v0 = vld [vmem:[#allocation3 + $0x30a] sm:$0xff] }
 0x5a2   :  { %v19635_v6 = vpop.f32.mrf.mxu1  ;;  %v25143_v10 = vpop.f32.mrf.mxu0  ;;  %19906 = vmatmul.mubr.msk.f32.gmra.mxu1 %vm6778_vm2, %v12592_v5  ;;  %v26842_v5 = vld [vmem:[#allocation22_spill] sm:$0xff] }
 0x5a3   :  { %26836 = vst [vmem:[#allocation7_spill] sm:$0xff] %v25141_v26  ;;  %26837 = vst [vmem:[#allocation65_spill] sm:$0xff] %v25143_v10  ;;  %v25147_v35 = vadd.f32 %v19635_v6, %v26838_v41  ;;  %19908 = vmatprep.mubr.msk.f32.mxu1 %vm6778_vm2, %v12593_v27  ;;  %v12595_v10 = vld [vmem:[#allocation3 + $0x31a] sm:$0xff] }
 0x5a4   :  { %v11550_v51 = vpop.f32.mrf.mxu1  ;;  %v25150_v45 = vpop.f32.mrf.mxu0 }
 0x5a5   :  { %26839 = vst [vmem:[#allocation64_spill] sm:$0xff] %v25150_v45  ;;  %v25153_v48 = vadd.f32 %v11550_v51, %v26840_v13  ;;  %v12596_v51 = vld [vmem:[#allocation3 + $0x322] sm:$0xff] }
 0x5a6   :  { %v19638_v21 = vpop.f32.mrf.mxu1  ;;  %v25155_v26 = vpop.f32.mrf.mxu0  ;;  %19909 = vmatmul.mubr.msk.f32.gmra.mxu1 %vm6778_vm2, %v12594_v0 }
 0x5a7   :  { %26841 = vst [vmem:[#allocation34_spill] sm:$0xff] %v25155_v26  ;;  %v25159_v14 = vadd.f32 %v19638_v21, %v26842_v5  ;;  %19911 = vmatprep.mubr.msk.f32.mxu1 %vm6778_vm2, %v12595_v10  ;;  %v12597_v26 = vld [vmem:[#allocation3 + $0x332] sm:$0xff]  ;;  %v12599_v5 = vld [vmem:[#allocation3 + $0x34a] sm:$0xff] }
 0x5a8   :  { %v11560_v6 = vpop.f32.mrf.mxu1  ;;  %v25162_v27 = vpop.f32.mrf.mxu0 }
 0x5a9   :  { %26843 = vst [vmem:[#allocation37_spill] sm:$0xff] %v25162_v27  ;;  %v25165_v41 = vadd.f32 %v11560_v6, %v24854_v23  ;;  %v12598_v23 = vld [vmem:[#allocation3 + $0x33a] sm:$0xff] }
 0x5aa   :  { %v19641_v13 = vpop.f32.mrf.mxu1  ;;  %v25167_v45 = vpop.f32.mrf.mxu0  ;;  %19912 = vmatmul.mubr.msk.f32.gmra.mxu1 %vm6778_vm2, %v12596_v51 }
 0x5ab   :  { %26844 = vst [vmem:[#allocation67_spill] sm:$0xff] %v25165_v41  ;;  %v25171_v0 = vadd.f32 %v19641_v13, %v24859_v30  ;;  %19914 = vmatprep.mubr.msk.f32.mxu1 %vm6778_vm2, %v12597_v26  ;;  %v12600_v30 = vld [vmem:[#allocation3 + $0x352] sm:$0xff] }
 0x5ac   :  { %v11570_v21 = vpop.f32.mrf.mxu1  ;;  %v25174_v10 = vpop.f32.mrf.mxu0 }
 0x5ad   :  { %26845 = vst [vmem:[#allocation66_spill] sm:$0xff] %v25174_v10  ;;  %v25177_v27 = vadd.f32 %v11570_v21, %v24864_v11 }
 0x5ae   :  { %v19644_v6 = vpop.f32.mrf.mxu1  ;;  %v25179_v41 = vpop.f32.mrf.mxu0  ;;  %19915 = vmatmul.mubr.msk.f32.gmra.mxu1 %vm6778_vm2, %v12598_v23 }
 0x5af   :  { %26846 = vst [vmem:[#allocation36_spill] sm:$0xff] %v25179_v41  ;;  %v25183_v51 = vadd.f32 %v19644_v6, %v24869_v55  ;;  %19917 = vmatprep.mubr.msk.f32.mxu1 %vm6778_vm2, %v12599_v5 }
 0x5b0   :  { %v11580_v26 = vpop.f32.mrf.mxu1  ;;  %v25186_v13 = vpop.f32.mrf.mxu0 }
 0x5b1   :  { %26847 = vst [vmem:[#allocation9_spill] sm:$0xff] %v25183_v51  ;;  %26848 = vst [vmem:[#allocation69_spill] sm:$0xff] %v25186_v13  ;;  %v25189_v10 = vadd.f32 %v11580_v26, %v24874_v36 }
 0x5b2   :  { %v19647_v11 = vpop.f32.mrf.mxu1  ;;  %v25191_v21 = vpop.f32.mrf.mxu0  ;;  %19918 = vmatmul.mubr.msk.f32.gmra.mxu1 %vm6778_vm2, %v12600_v30 }
 0x5b3   :  { %v25195_v41 = vadd.f32 %v19647_v11, %v24878_v40 }
 0x5b4   :  { %v11590_v23 = vpop.f32.mrf.mxu1  ;;  %v25197_v55 = vpop.f32.mrf.mxu0 }
 0x5b5   :  { %26849 = vst [vmem:[#allocation68_spill] sm:$0xff] %v25197_v55  ;;  %v25200_v5 = vadd.f32 %v11590_v23, %v24882_v34 }
 0x5b6   :  { %v19650_v6 = vpop.f32.mrf.mxu1  ;;  %v25202_v51 = vpop.f32.mrf.mxu0 }
 0x5b7   :  { %26850 = vst [vmem:[#allocation8_spill] sm:$0xff] %v25202_v51  ;;  %v25205_v36 = vadd.f32 %v19650_v6, %v24886_v31 }
 0x5b8   :  { %v11600_v26 = vpop.f32.mrf.mxu1  ;;  %v25207_v13 = vpop.f32.mrf.mxu0 }
 0x5b9   :  { %26851 = vst [vmem:[#allocation70_spill] sm:$0xff] %v25207_v13  ;;  %v25210_v30 = vadd.f32 %v11600_v26, %v24890_v46 }
 0x5ba   :  { %v19653_v40 = vpop.f32.mrf.mxu1  ;;  %v25212_v11 = vpop.f32.mrf.mxu0 }
 0x5bb   :  { %26852 = vst [vmem:[#allocation11_spill] sm:$0xff] %v25212_v11  ;;  %v25215_v55 = vadd.f32 %v19653_v40, %v24894_v42 }
 0x5bc   :  { %v11610_v34 = vpop.f32.mrf.mxu1  ;;  %v25217_v23 = vpop.f32.mrf.mxu0 }
 0x5bd   :  { %26853 = vst [vmem:[#allocation38_spill] sm:$0xff] %v25217_v23  ;;  %v25220_v51 = vadd.f32 %v11610_v34, %v24898_v59 }
 0x5be   :  { %v19656_v31 = vpop.f32.mrf.mxu1  ;;  %v25222_v6 = vpop.f32.mrf.mxu0 }
 0x5bf   :  { %26854 = vst [vmem:[#allocation71_spill] sm:$0xff] %v25222_v6  ;;  %v25225_v13 = vadd.f32 %v19656_v31, %v24902_v2 }
 0x5c0   :  { %v11620_v46 = vpop.f32.mrf.mxu1  ;;  %v25227_v26 = vpop.f32.mrf.mxu0 }
 0x5c1   :  { %26855 = vst [vmem:[#allocation73_spill] sm:$0xff] %v25225_v13  ;;  %26856 = vst [vmem:[#allocation10_spill] sm:$0xff] %v25227_v26  ;;  %v25230_v11 = vadd.f32 %v11620_v46, %v24906_v62 }
 0x5c2   :  { %v19659_v42 = vpop.f32.mrf.mxu1  ;;  %v25232_v40 = vpop.f32.mrf.mxu0 }
 0x5c3   :  { %26857 = vst [vmem:[#allocation42_spill] sm:$0xff] %v25232_v40  ;;  %v25235_v23 = vadd.f32 %v19659_v42, %v24910_v25 }
 0x5c4   :  { %v11630_v59 = vpop.f32.mrf.mxu1  ;;  %v25240_v6 = vpop.f32.mrf.mxu0 }
 0x5c5   :  { %v25238_v34 = vadd.f32 %v11630_v59, %v24914_v4 }
 0x5c6   :  { %v19662_v2 = vpop.f32.mrf.mxu1  ;;  %v25245_v13 = vpop.f32.mrf.mxu0 }
 0x5c7   :  { %v25243_v31 = vadd.f32 %v19662_v2, %v24918_v22 }
 0x5c8   :  { %v11640_v26 = vpop.f32.mrf.mxu1  ;;  %v25253_v40 = vpop.f32.mrf.mxu0 }
 0x5c9   :  { %26858 = vst [vmem:[#allocation72_spill] sm:$0xff] %v25243_v31  ;;  %v25248_v62 = vadd.f32 %v11640_v26, %v24922_v12 }
 0x5ca   :  { %v19665_v46 = vpop.f32.mrf.mxu1  ;;  %v25261_v31 = vpop.f32.mrf.mxu0 }
 0x5cb   :  { %v25251_v25 = vadd.f32 %v19665_v46, %v24926_v60  ;;  %26862 = vst [vmem:[#allocation75_spill] sm:$0xff] %v25261_v31  ;;  %v26869_v31 = vld [vmem:[#allocation90_spill] sm:$0xff] }
 0x5cc   :  { %v11650_v42 = vpop.f32.mrf.mxu1 }
 0x5cd   :  { %26859 = vst [vmem:[#allocation39_spill] sm:$0xff] %v25251_v25  ;;  %v25256_v4 = vadd.f32 %v11650_v42, %v24930_v1  ;;  %v25269_v25 = vpop.f32.mrf.mxu0 }
 0x5ce   :  { %v19668_v59 = vpop.f32.mrf.mxu1  ;;  %26865 = vst [vmem:[#allocation76_spill] sm:$0xff] %v25269_v25  ;;  %v26874_v25 = vld [vmem:[#allocation24_spill] sm:$0xff] }
 0x5cf   :  { %26860 = vst [vmem:[#allocation40_spill] sm:$0xff] %v25256_v4  ;;  %v25259_v22 = vadd.f32 %v19668_v59, %v24934_v29  ;;  %v26867_v4 = vld [vmem:[#allocation87_spill] sm:$0xff] }
 0x5d0   :  { %v11660_v2 = vpop.f32.mrf.mxu1 }
 0x5d1   :  { %26861 = vst [vmem:[#allocation74_spill] sm:$0xff] %v25259_v22  ;;  %v25264_v12 = vadd.f32 %v11660_v2, %v24938_v58  ;;  %v25277_v22 = vpop.f32.mrf.mxu0 }
 0x5d2   :  { %v19671_v26 = vpop.f32.mrf.mxu1 }
 0x5d3   :  { %26863 = vst [vmem:[#allocation43_spill] sm:$0xff] %v25264_v12  ;;  %v25267_v60 = vadd.f32 %v19671_v26, %v24942_v37  ;;  %v26871_v12 = vld [vmem:[#allocation25_spill] sm:$0xff] }
 0x5d4   :  { %v11670_v46 = vpop.f32.mrf.mxu1 }
 0x5d5   :  { %26864 = vst [vmem:[#allocation77_spill] sm:$0xff] %v25267_v60  ;;  %v25272_v1 = vadd.f32 %v11670_v46, %v24946_v54  ;;  %v25285_v60 = vpop.f32.mrf.mxu0 }
 0x5d6   :  { %v19674_v42 = vpop.f32.mrf.mxu1  ;;  %26873 = vst [vmem:[#allocation44_spill] sm:$0xff] %v25285_v60  ;;  %v26883_v60 = vld [vmem:[#allocation26_spill] sm:$0xff] }
 0x5d7   :  { %26866 = vst [vmem:[#allocation41_spill] sm:$0xff] %v25272_v1  ;;  %v25275_v29 = vadd.f32 %v19674_v42, %v26867_v4  ;;  %v26876_v1 = vld [vmem:[#allocation89_spill] sm:$0xff] }
 0x5d8   :  { %v11680_v59 = vpop.f32.mrf.mxu1 }
 0x5d9   :  { %26868 = vst [vmem:[#allocation46_spill] sm:$0xff] %v25275_v29  ;;  %v25280_v58 = vadd.f32 %v11680_v59, %v26869_v31  ;;  %v25293_v29 = vpop.f32.mrf.mxu0 }
 0x5da   :  { %v19677_v2 = vpop.f32.mrf.mxu1  ;;  %26878 = vst [vmem:[#allocation79_spill] sm:$0xff] %v25293_v29 }
 0x5db   :  { %26870 = vst [vmem:[#allocation78_spill] sm:$0xff] %v25280_v58  ;;  %v25283_v37 = vadd.f32 %v19677_v2, %v26871_v12  ;;  %v26880_v58 = vld [vmem:[#allocation92_spill] sm:$0xff] }
 0x5dc   :  { %v11690_v26 = vpop.f32.mrf.mxu1 }
 0x5dd   :  { %26872 = vst [vmem:[#allocation12_spill] sm:$0xff] %v25283_v37  ;;  %v25288_v54 = vadd.f32 %v11690_v26, %v26874_v25  ;;  %v25301_v37 = vpop.f32.mrf.mxu0 }
 0x5de   :  { %v19680_v46 = vpop.f32.mrf.mxu1  ;;  %26882 = vst [vmem:[#allocation14_spill] sm:$0xff] %v25301_v37 }
 0x5df   :  { %26875 = vst [vmem:[#allocation47_spill] sm:$0xff] %v25288_v54  ;;  %v25291_v4 = vadd.f32 %v19680_v46, %v26876_v1  ;;  %v26886_v54 = vld [vmem:[#allocation27_spill] sm:$0xff] }
 0x5e0   :  { %v11700_v42 = vpop.f32.mrf.mxu1 }
 0x5e1   :  { %26877 = vst [vmem:[#allocation80_spill] sm:$0xff] %v25291_v4  ;;  %v25296_v31 = vadd.f32 %v11700_v42, %v24970_v24  ;;  %v25309_v4 = vpop.f32.mrf.mxu0 }
 0x5e2   :  { %v19683_v59 = vpop.f32.mrf.mxu1 }
 0x5e3   :  { %26879 = vst [vmem:[#allocation45_spill] sm:$0xff] %v25296_v31  ;;  %v25299_v12 = vadd.f32 %v19683_v59, %v26880_v58  ;;  %v19966_v31 = vmov 1983009808   ;;  %v13454_v59 = vlaneseq }
 0x5e4   :  { %v11710_v2 = vpop.f32.mrf.mxu1  ;;  %v13452_v58 = vunpack.c.l.s4 %v19966_v31 }
 0x5e5   :  { %26881 = vst [vmem:[#allocation49_spill] sm:$0xff] %v25299_v12  ;;  %v25304_v25 = vadd.f32 %v11710_v2, %v26883_v60  ;;  %v26888_v12 = vld [vmem:[#allocation91_spill] sm:$0xff]  ;;  %v25317_v60 = vpop.f32.mrf.mxu0 }
 0x5e6   :  { %v19686_v26 = vpop.f32.mrf.mxu1 }
 0x5e7   :  { %26884 = vst [vmem:[#allocation81_spill] sm:$0xff] %v25304_v25  ;;  %v25307_v1 = vadd.f32 %v19686_v26, %v24982_v49  ;;  %v13453_v26 = vunpack.c.0.s8 %v13452_v58 }
 0x5e8   :  { %v11720_v46 = vpop.f32.mrf.mxu1 }
 0x5e9   :  { %26885 = vst [vmem:[#allocation48_spill] sm:$0xff] %v25307_v1  ;;  %v25312_v24 = vadd.f32 %v11720_v46, %v26886_v54  ;;  %v13455_v1 = vshrl.u32 %v13454_v59, 7  ;;  %v12474_v54 = vadd.f32 %v25009_v3, %v25015_v38  ;;  %v12476_v46 = vadd.f32 %v25023_v15, %v25027_v32  ;;  %v26893_v15 = vld [vmem:[#allocation28_spill] sm:$0xff] }
 0x5ea   :  { %v19689_v42 = vpop.f32.mrf.mxu1  ;;  %v25344_v3 = vadd.f32 %v25042_v17, %v25045_v16  ;;  %v25348_v38 = vadd.f32 %v25047_v44, %v25051_v63  ;;  %v25354_v32 = vadd.f32 %v26893_v15, %v25057_v19  ;;  %v26898_v16 = vld [vmem:[#allocation95_spill] sm:$0xff]  ;;  %v26899_v63 = vld [vmem:[#allocation54_spill] sm:$0xff]  ;;  %v26900_v19 = vld [vmem:[#allocation57_spill] sm:$0xff] }
 0x5eb   :  { %26887 = vst [vmem:[#allocation51_spill] sm:$0xff] %v25312_v24  ;;  %v25315_v29 = vadd.f32 %v19689_v42, %v26888_v12  ;;  %v12473_v12 = vadd.f32 %v25018_v8, %v25021_v28  ;;  %v25350_v28 = vsub.s32 %v13453_v26, %v13455_v1  ;;  %v25369_v44 = vadd.f32 %v26898_v16, %v25075_v9  ;;  %v26903_v9 = vld [vmem:[#allocation83_spill] sm:$0xff] }
 0x5ec   :  { %v11730_v37 = vpop.f32.mrf.mxu1  ;;  %v25373_v58 = vadd.f32 %v26899_v63, %v25081_v50  ;;  %v25377_v59 = vadd.f32 %v26900_v19, %v25087_v53  ;;  %v26904_v15 = vld [vmem:[#allocation31_spill] sm:$0xff]  ;;  %v26907_v53 = vld [vmem:[#allocation58_spill] sm:$0xff]  ;;  %v26909_v63 = vld [vmem:[#allocation32_spill] sm:$0xff] }
 0x5ed   :  { %26889 = vst [vmem:[#allocation15_spill] sm:$0xff] %v25315_v29  ;;  %v25320_v2 = vadd.f32 %v11730_v37, %v24994_v47  ;;  %v12475_v47 = vadd.f32 %v25030_v7, %v25033_v52  ;;  %v25333_v37 = vpop.f32.mrf.mxu0  ;;  %v26895_v52 = vld [vmem:[#allocation96_spill] sm:$0xff]  ;;  %v26908_v16 = vld [vmem:[#allocation59_spill] sm:$0xff] }
 0x5ee   :  { %v19692_v49 = vpop.f32.mrf.mxu1  ;;  %v26910_v19 = vld [vmem:[#allocation55_spill] sm:$0xff] }
 0x5ef   :  { %26890 = vst [vmem:[#allocation13_spill] sm:$0xff] %v25320_v2  ;;  %v25323_v25 = vadd.f32 %v19692_v49, %v24998_v33  ;;  %v25340_v33 = vadd.f32 %v25035_v18, %v25039_v43  ;;  %v25362_v18 = vadd.f32 %v26895_v52, %v25069_v61  ;;  %v26896_v43 = vld [vmem:[#allocation94_spill] sm:$0xff]  ;;  %v25379_v49 = vsub.s32 0, %v13455_v1  ;;  %v26901_v61 = vld [vmem:[#allocation56_spill] sm:$0xff]  ;;  %v12404_v50 = vpop.f32.mrf.mxu0  ;;  %v26922_v29 = vld [vmem:[#allocation67_spill] sm:$0xff] }
 0x5f0   :  { %v11740_v31 = vpop.f32.mrf.mxu1  ;;  %v25383_v26 = vadd.f32 %v26901_v61, %v25093_v20  ;;  %v26905_v52 = vld [vmem:[#allocation82_spill] sm:$0xff]  ;;  %v25398_v1 = vadd.f32 %v26908_v16, %v26907_v53  ;;  %v25402_v20 = vadd.f32 %v26910_v19, %v26909_v63  ;;  %v26911_v61 = vld [vmem:[#allocation60_spill] sm:$0xff]  ;;  %v26918_v53 = vld [vmem:[#allocation33_spill] sm:$0xff] }
 0x5f1   :  { %26891 = vst [vmem:[#allocation50_spill] sm:$0xff] %v25323_v25  ;;  %v25336_v42 = vadd.f32 %v11740_v31, %v25002_v39  ;;  %v26894_v39 = vld [vmem:[#allocation93_spill] sm:$0xff]  ;;  %v26915_v25 = vld [vmem:[#allocation62_spill] sm:$0xff] }
 0x5f2   :  { %v19695_v8 = vpop.f32.mrf.mxu1  ;;  %v25358_v7 = vadd.f32 %v26894_v39, %v25063_v57  ;;  %v26902_v31 = vld [vmem:[#allocation29_spill] sm:$0xff]  ;;  %v25391_v39 = vadd.f32 %v26904_v15, %v26903_v9 }
 0x5f3   :  { %26892 = vst [vmem:[#allocation53_spill] sm:$0xff] %v25336_v42  ;;  %v25365_v17 = vadd.f32 %v19695_v8, %v26896_v43  ;;  %v25387_v8 = vadd.f32 %v26902_v31, %v25099_v56  ;;  %v26912_v42 = vld [vmem:[#allocation61_spill] sm:$0xff]  ;;  %v26913_v31 = vld [vmem:[#allocation35_spill] sm:$0xff] }
 0x5f4   :  { %v11750_v57 = vpop.f32.mrf.mxu1  ;;  %v25406_v56 = vadd.f32 %v26912_v42, %v26911_v61  ;;  %v26919_v63 = vld [vmem:[#allocation65_spill] sm:$0xff]  ;;  %v26920_v42 = vld [vmem:[#allocation64_spill] sm:$0xff] }
 0x5f5   :  { %26897 = vst [vmem:[#allocation17_spill] sm:$0xff] %v25365_v17  ;;  %v25394_v43 = vadd.f32 %v11750_v57, %v26905_v52  ;;  %v26914_v17 = vld [vmem:[#allocation30_spill] sm:$0xff]  ;;  %v26916_v57 = vld [vmem:[#allocation63_spill] sm:$0xff]  ;;  %v25422_v19 = vadd.f32 %v26919_v63, %v25147_v35  ;;  %v25426_v61 = vadd.f32 %v26920_v42, %v25153_v48 }
 0x5f6   :  { %v25410_v9 = vadd.f32 %v26914_v17, %v26913_v31  ;;  %v19826_v15 = vpop.f32.mrf.mxu1  ;;  %v25414_v52 = vadd.f32 %v26916_v57, %v26915_v25  ;;  %v26921_v17 = vld [vmem:[#allocation34_spill] sm:$0xff]  ;;  %v26923_v25 = vld [vmem:[#allocation37_spill] sm:$0xff]  ;;  %v25443_v35 = vld [vmem:[%s26167_s6] ss:$0 sm:$0xff] }
 0x5f7   :  { %26906 = vst [vmem:[#allocation16_spill] sm:$0xff] %v25394_v43  ;;  %v26917_v43 = vld [vmem:[#allocation7_spill] sm:$0xff]  ;;  %v13188_v2 = vadd.f32 %v19826_v15, %v12474_v54  ;;  %v25430_v31 = vadd.f32 %v26921_v17, %v25159_v14  ;;  %v25434_v57 = vadd.f32 %v26923_v25, %v26922_v29  ;;  %v26924_v48 = vld [vmem:[#allocation66_spill] sm:$0xff]  ;;  %v26925_v14 = vld [vmem:[#allocation9_spill] sm:$0xff]  ;;  %v25459_v17 = vadd.f32 %v25191_v21, %v25195_v41 }
 0x5f8   :  { %v25418_v16 = vadd.f32 %v26918_v53, %v26917_v43  ;;  %v25438_v43 = vadd.f32 %v25167_v45, %v25171_v0  ;;  %v12868_v54 = vpop.f32.mrf.mxu1  ;;  %v25447_v15 = vadd.f32 %v26924_v48, %v25177_v27  ;;  %v26926_v53 = vld [vmem:[#allocation36_spill] sm:$0xff]  ;;  %v26927_v29 = vld [vmem:[#allocation69_spill] sm:$0xff]  ;;  %v19792_v45 = vpop.f32.mrf.mxu0  ;;  %v26934_v41 = vld [vmem:[#allocation38_spill] sm:$0xff] }
 0x5f9   :  { %v25451_v63 = vadd.f32 %v26926_v53, %v26925_v14  ;;  %v25455_v42 = vadd.f32 %v26927_v29, %v25189_v10  ;;  %v13187_v0 = vadd.f32 %v12868_v54, %v12473_v12  ;;  %v26928_v25 = vld [vmem:[#allocation68_spill] sm:$0xff]  ;;  %v26931_v14 = vld [vmem:[#allocation70_spill] sm:$0xff]  ;;  %v26933_v29 = vld [vmem:[#allocation11_spill] sm:$0xff]  ;;  %v25479_v21 = vadd.f32 %v26934_v41, %v25220_v51 }
 0x5fa   :  { %v25463_v24 = vadd.f32 %v26928_v25, %v25200_v5  ;;  %v26930_v27 = vld [vmem:[#allocation8_spill] sm:$0xff]  ;;  %v25471_v53 = vadd.f32 %v26931_v14, %v25210_v30  ;;  %v19829_v10 = vpop.f32.mrf.mxu1  ;;  %v25475_v12 = vadd.f32 %v26933_v29, %v25215_v55  ;;  %v13259_v5 = vadd.f32 %v25443_v35, %v13188_v2  ;;  %v26935_v25 = vld [vmem:[#allocation73_spill] sm:$0xff]  ;;  %v26938_v14 = vld [vmem:[#allocation42_spill] sm:$0xff] }
 0x5fb   :  { %v25467_v48 = vadd.f32 %v26930_v27, %v25205_v36  ;;  %v13190_v54 = vadd.f32 %v19829_v10, %v12476_v46  ;;  %v26937_v27 = vld [vmem:[#allocation10_spill] sm:$0xff]  ;;  %v25496_v55 = vadd.f32 %v25240_v6, %v25238_v34  ;;  %v26941_v29 = vld [vmem:[#allocation72_spill] sm:$0xff]  ;;  %v12414_v46 = vpop.f32.mrf.mxu0  ;;  %v25506_v41 = vadd.f32 %v25253_v40, %v25248_v62  ;;  %v26952_v62 = vld [vmem:[#allocation43_spill] sm:$0xff] }
 0x5fc   :  { %26929 = vst [vmem:[#allocation52_spill] sm:$0xff] %v25463_v24  ;;  %26932 = vst [vmem:[#allocation19_spill] sm:$0xff] %v25471_v53  ;;  %v26936_v24 = vld [vmem:[#allocation71_spill] sm:$0xff]  ;;  %v25488_v30 = vadd.f32 %v26937_v27, %v25230_v11  ;;  %v25492_v53 = vadd.f32 %v26938_v14, %v25235_v23  ;;  %v12878_v51 = vpop.f32.mrf.mxu1  ;;  %v25500_v2 = vadd.f32 %v25245_v13, %v26941_v29  ;;  %v26947_v6 = vld [vmem:[#allocation40_spill] sm:$0xff] }
 0x5fd   :  { %v25484_v36 = vadd.f32 %v26936_v24, %v26935_v25  ;;  %26940 = vst [vmem:[#allocation84_spill] sm:$0xff] %v25496_v55  ;;  %v13258_v24 = vadd.f32 %v25443_v35, %v13187_v0  ;;  %v13261_v10 = vadd.f32 %v25443_v35, %v13190_v54  ;;  %v13189_v11 = vadd.f32 %v12878_v51, %v12475_v47  ;;  %v26944_v23 = vld [vmem:[#allocation39_spill] sm:$0xff]  ;;  %v26948_v34 = vld [vmem:[#allocation76_spill] sm:$0xff]  ;;  %v26950_v13 = vld [vmem:[#allocation74_spill] sm:$0xff] }
 0x5fe   :  { %26939 = vst [vmem:[#allocation18_spill] sm:$0xff] %v25492_v53  ;;  %26942 = vst [vmem:[#allocation86_spill] sm:$0xff] %v25500_v2  ;;  %v26945_v25 = vld [vmem:[#allocation75_spill] sm:$0xff]  ;;  %v25514_v14 = vadd.f32 %v26948_v34, %v26947_v6  ;;  %v25518_v29 = vadd.f32 %v25277_v22, %v26950_v13  ;;  %v19832_v0 = vpop.f32.mrf.mxu1  ;;  %v13323_v2 = vmax.f32 %v13259_v5, 0.0  ;;  %v26953_v51 = vld [vmem:[#allocation44_spill] sm:$0xff] }
 0x5ff   :  { %26943 = vst [vmem:[#allocation21_spill] sm:$0xff] %v25506_v41  ;;  %v25510_v27 = vadd.f32 %v26945_v25, %v26944_v23  ;;  %v13325_v54 = vmax.f32 %v13261_v10, 0.0  ;;  %v13260_v47 = vadd.f32 %v25443_v35, %v13189_v11  ;;  %v13192_v40 = vadd.f32 %v19832_v0, %v25340_v33  ;;  %v26955_v23 = vld [vmem:[#allocation77_spill] sm:$0xff]  ;;  %v26956_v25 = vld [vmem:[#allocation79_spill] sm:$0xff]  ;;  %v26959_v34 = vld [vmem:[#allocation14_spill] sm:$0xff]  ;;  %v19795_v11 = vpop.f32.mrf.mxu0 }
 0x600   :  { %26949 = vst [vmem:[#allocation85_spill] sm:$0xff] %v25514_v14  ;;  %26951 = vst [vmem:[#allocation88_spill] sm:$0xff] %v25518_v29  ;;  %v25524_v41 = vadd.f32 %v26953_v51, %v26952_v62  ;;  %v26958_v6 = vld [vmem:[#allocation41_spill] sm:$0xff]  ;;  %v26961_v22 = vld [vmem:[#allocation46_spill] sm:$0xff]  ;;  %v12888_v10 = vpop.f32.mrf.mxu1  ;;  %v13322_v13 = vmax.f32 %v13258_v24, 0.0 }
 0x601   :  { %26946 = vst [vmem:[#allocation20_spill] sm:$0xff] %v25510_v27  ;;  %v25528_v27 = vadd.f32 %v26956_v25, %v26955_v23  ;;  %v25532_v14 = vadd.f32 %v26959_v34, %v26958_v6  ;;  %v25536_v5 = vadd.f32 %v25309_v4, %v26961_v22  ;;  %v13387_v33 = vmax.f32 %v13323_v2, %v13325_v54  ;;  %v26963_v51 = vld [vmem:[#allocation78_spill] sm:$0xff]  ;;  %v26965_v23 = vld [vmem:[#allocation12_spill] sm:$0xff]  ;;  %v26967_v6 = vld [vmem:[#allocation47_spill] sm:$0xff] }
 0x602   :  { %26954 = vst [vmem:[#allocation23_spill] sm:$0xff] %v25524_v41  ;;  %v13324_v0 = vmax.f32 %v13260_v47, 0.0  ;;  %v13191_v62 = vadd.f32 %v12888_v10, %v25344_v3  ;;  %v25541_v41 = vadd.f32 %v25317_v60, %v26963_v51  ;;  %v25545_v25 = vadd.f32 %v25333_v37, %v26965_v23  ;;  %v19835_v22 = vpop.f32.mrf.mxu1  ;;  %v26971_v47 = vld [vmem:[#allocation45_spill] sm:$0xff]  ;;  %v12424_v23 = vpop.f32.mrf.mxu0 }
 0x603   :  { %26957 = vst [vmem:[#allocation22_spill] sm:$0xff] %v25528_v27  ;;  %26960 = vst [vmem:[#allocation87_spill] sm:$0xff] %v25532_v14  ;;  %v25548_v34 = vadd.f32 %v12404_v50, %v26967_v6  ;;  %v13263_v4 = vadd.f32 %v25443_v35, %v13192_v40  ;;  %v13467_v2 = vcombine.high %v13387_v33, %v13387_v33  ;;  %v26973_v10 = vld [vmem:[#allocation49_spill] sm:$0xff] }
 0x604   :  { %26962 = vst [vmem:[#allocation90_spill] sm:$0xff] %v25536_v5  ;;  %26964 = vst [vmem:[#allocation25_spill] sm:$0xff] %v25541_v41  ;;  %v26969_v5 = vld [vmem:[#allocation80_spill] sm:$0xff]  ;;  %v13474_v3 = vrot.slane %v13387_v33, %v25350_v28  ;;  %v13386_v54 = vmax.f32 %v13322_v13, %v13324_v0  ;;  %v25556_v60 = vadd.f32 %v12414_v46, %v26971_v47  ;;  %v12898_v40 = vpop.f32.mrf.mxu1  ;;  %v26975_v13 = vld [vmem:[#allocation81_spill] sm:$0xff] }
 0x605   :  { %26966 = vst [vmem:[#allocation24_spill] sm:$0xff] %v25545_v25  ;;  %26968 = vst [vmem:[#allocation89_spill] sm:$0xff] %v25548_v34  ;;  %v25552_v24 = vadd.f32 %v19792_v45, %v26969_v5  ;;  %v25559_v51 = vadd.f32 %v19795_v11, %v26973_v10  ;;  %v25562_v37 = vadd.f32 %v25443_v35, %v13191_v62  ;;  %v13327_v11 = vmax.f32 %v13263_v4, 0.0 }
 0x606   :  { %26972 = vst [vmem:[#allocation26_spill] sm:$0xff] %v25556_v60  ;;  %v13194_v50 = vadd.f32 %v19835_v22, %v25348_v38  ;;  %v13481_v45 = vrot.slane %v13467_v2, %v25350_v28  ;;  %v13482_v5 = vcombine.high %v13474_v3, %v13474_v3  ;;  %v16673_v6 = vrot.slane %v13474_v3, 9  ;;  %v19838_v62 = vpop.f32.mrf.mxu1 }
 0x607   :  { %26970 = vst [vmem:[#allocation92_spill] sm:$0xff] %v25552_v24  ;;  %26974 = vst [vmem:[#allocation27_spill] sm:$0xff] %v25559_v51  ;;  %v13450_v24 = vcombine.high %v13386_v54, %v13386_v54  ;;  %v25567_v33 = vadd.f32 %v12424_v23, %v26975_v13  ;;  %v13457_v46 = vrot.slane %v13386_v54, %v25350_v28  ;;  %v13326_v4 = vmax.f32 %v25562_v37, 0.0 }
 0x608   :  { %v13265_v0 = vadd.f32 %v25443_v35, %v13194_v50  ;;  %v13483_v47 = vcombine.high %v13481_v45, %v13481_v45  ;;  %v16674_v38 = vrot.slane %v13482_v5, 9  ;;  %v16675_v22 = vrot.slane %v13481_v45, 9  ;;  %v12908_v23 = vpop.f32.mrf.mxu1 }
 0x609   :  { %26976 = vst [vmem:[#allocation91_spill] sm:$0xff] %v25567_v33  ;;  %v14510_v10 = vmax.f32 %v13474_v3, %v16673_v6  ;;  %v13464_v2 = vrot.slane %v13450_v24, %v25350_v28  ;;  %v13465_v60 = vcombine.high %v13457_v46, %v13457_v46  ;;  %v16669_v51 = vrot.slane %v13457_v46, 9 }
 0x60a   :  { %v13329_v34 = vmax.f32 %v13265_v0, 0.0  ;;  %v16676_v13 = vrot.slane %v13483_v47, 9  ;;  %v14511_v33 = vmax.f32 %v13482_v5, %v16674_v38  ;;  %v13193_v54 = vadd.f32 %v12898_v40, %v25354_v32  ;;  %v19841_v3 = vpop.f32.mrf.mxu1 }
 0x60b   :  { %v13466_v50 = vcombine.high %v13464_v2, %v13464_v2  ;;  %v16670_v25 = vrot.slane %v13465_v60, 9  ;;  %v16671_v41 = vrot.slane %v13464_v2, 9  ;;  %v14506_v14 = vmax.f32 %v13457_v46, %v16669_v51 }
 0x60c   :  { %v14512_v6 = vmax.f32 %v13481_v45, %v16675_v22  ;;  %v14513_v24 = vmax.f32 %v13483_v47, %v16676_v13  ;;  %v14781_v27 = vrot.slane %v14510_v10, %v25379_v49  ;;  %v13389_v0 = vmax.f32 %v13327_v11, %v13329_v34  ;;  %v12918_v37 = vpop.f32.mrf.mxu1 }
 0x60d   :  { %v14785_v29 = vrot.slane %v14511_v33, %v25379_v49  ;;  %v16672_v5 = vrot.slane %v13466_v50, 9  ;;  %v14507_v38 = vmax.f32 %v13465_v60, %v16670_v25  ;;  %v14508_v55 = vmax.f32 %v13464_v2, %v16671_v41 }
 0x60e   :  { %v14765_v32 = vrot.slane %v14506_v14, %v25379_v49  ;;  %v13501_v40 = vcombine.high %v13389_v0, %v13389_v0  ;;  %v13508_v53 = vrot.slane %v13389_v0, %v25350_v28  ;;  %v13264_v51 = vadd.f32 %v25443_v35, %v13193_v54  ;;  %v19844_v11 = vpop.f32.mrf.mxu1 }
 0x60f   :  { %v14509_v46 = vmax.f32 %v13466_v50, %v16672_v5  ;;  %v14769_v45 = vrot.slane %v14507_v38, %v25379_v49  ;;  %v14773_v47 = vrot.slane %v14508_v55, %v25379_v49  ;;  %v13196_v34 = vadd.f32 %v19838_v62, %v25358_v7 }
 0x610   :  { %v13515_v33 = vrot.slane %v13501_v40, %v25350_v28  ;;  %v13516_v25 = vcombine.high %v13508_v53, %v13508_v53  ;;  %v16681_v41 = vrot.slane %v13508_v53, 9  ;;  %v13328_v60 = vmax.f32 %v13264_v51, 0.0  ;;  %v12928_v13 = vpop.f32.mrf.mxu1 }
 0x611   :  { %v14789_v14 = vrot.slane %v14512_v6, %v25379_v49  ;;  %v14777_v22 = vrot.slane %v14509_v46, %v25379_v49  ;;  %v15275_v10 = vsel %vm15274_vm4, %v14769_v45, %v14765_v32  ;;  %v13267_v2 = vadd.f32 %v25443_v35, %v13196_v34 }
 0x612   :  { %v15277_v54 = vsel %vm15276_vm5, %v14773_v47, %v15275_v10  ;;  %v13517_v55 = vcombine.high %v13515_v33, %v13515_v33  ;;  %v16682_v50 = vrot.slane %v13516_v25, 9  ;;  %v16683_v7 = vrot.slane %v13515_v33, 9  ;;  %v19847_v6 = vpop.f32.mrf.mxu1 }
 0x613   :  { %v14793_v62 = vrot.slane %v14513_v24, %v25379_v49  ;;  %v15279_v0 = vsel %vm15278_vm6, %v14777_v22, %v15277_v54  ;;  %v25590_v5 = vmax.f32 %v13508_v53, %v16681_v41  ;;  %v13388_v38 = vmax.f32 %v13326_v4, %v13328_v60 }
 0x614   :  { %v15281_v40 = vsel %vm15280_vm7, %v14781_v27, %v15279_v0  ;;  %v16684_v51 = vrot.slane %v13517_v55, 9  ;;  %v25593_v32 = vmax.f32 %v13516_v25, %v16682_v50  ;;  %v13195_v46 = vadd.f32 %v12908_v23, %v25362_v18  ;;  %v25598_v24 = vpop.f32.mrf.mxu1 }
 0x615   :  { %v15283_v45 = vsel %vm15282_vm8, %v14785_v29, %v15281_v40  ;;  %v13484_v47 = vcombine.high %v13388_v38, %v13388_v38  ;;  %v13491_v34 = vrot.slane %v13388_v38, %v25350_v28  ;;  %v13331_v10 = vmax.f32 %v13267_v2, 0.0 }
 0x616   :  { %v15285_v53 = vsel %vm15284_vm9, %v14789_v14, %v15283_v45  ;;  %v25601_v41 = vmax.f32 %v13515_v33, %v16683_v7  ;;  %v25603_v4 = vmax.f32 %v13517_v55, %v16684_v51  ;;  %v14813_v27 = vrot.slane %v25590_v5, %v25379_v49  ;;  %v25609_v60 = vpop.f32.mrf.mxu1 }
 0x617   :  { %v15287_v25 = vsel %vm15286_vm10, %v14793_v62, %v15285_v53  ;;  %v13498_v18 = vrot.slane %v13484_v47, %v25350_v28  ;;  %v13499_v29 = vcombine.high %v13491_v34, %v13491_v34  ;;  %v16677_v23 = vrot.slane %v13491_v34, 9 }
 0x618   :  { %15409 = vst.msk [vmem:[#allocation4] sm:$0xff] %vm6778_vm2, %v15287_v25  ;;  %v14817_v14 = vrot.slane %v25593_v32, %v25379_v49  ;;  %v13266_v33 = vadd.f32 %v25443_v35, %v13195_v46  ;;  %v13198_v22 = vadd.f32 %v19841_v3, %v25369_v44  ;;  %v13197_v2 = vadd.f32 %v12918_v37, %v25373_v58  ;;  %v25617_v62 = vpop.f32.mrf.mxu1 }
 0x619   :  { %v13500_v54 = vcombine.high %v13498_v18, %v13498_v18  ;;  %v16678_v55 = vrot.slane %v13499_v29, 9  ;;  %v16679_v50 = vrot.slane %v13498_v18, 9  ;;  %v14514_v7 = vmax.f32 %v13491_v34, %v16677_v23 }
 0x61a   :  { %v13330_v0 = vmax.f32 %v13266_v33, 0.0  ;;  %v13269_v5 = vadd.f32 %v25443_v35, %v13198_v22  ;;  %v13268_v38 = vadd.f32 %v25443_v35, %v13197_v2  ;;  %v13200_v40 = vadd.f32 %v19844_v11, %v25377_v59  ;;  %v25623_v3 = vpop.f32.mrf.mxu1 }
 0x61b   :  { %v16680_v51 = vrot.slane %v13500_v54, 9  ;;  %v14515_v32 = vmax.f32 %v13499_v29, %v16678_v55  ;;  %v14516_v46 = vmax.f32 %v13498_v18, %v16679_v50  ;;  %v14797_v44 = vrot.slane %v14514_v7, %v25379_v49 }
 0x61c   :  { %v13333_v58 = vmax.f32 %v13269_v5, 0.0  ;;  %v13332_v37 = vmax.f32 %v13268_v38, 0.0  ;;  %v13271_v45 = vadd.f32 %v25443_v35, %v13200_v40  ;;  %v13199_v47 = vadd.f32 %v12928_v13, %v25383_v26  ;;  %v25630_v11 = vpop.f32.mrf.mxu1 }
 0x61d   :  { %v14517_v34 = vmax.f32 %v13500_v54, %v16680_v51  ;;  %v14801_v53 = vrot.slane %v14515_v32, %v25379_v49  ;;  %v14805_v25 = vrot.slane %v14516_v46, %v25379_v49  ;;  %v13202_v59 = vadd.f32 %v19847_v6, %v25387_v8 }
 0x61e   :  { %v14821_v18 = vrot.slane %v25601_v41, %v25379_v49  ;;  %v14825_v29 = vrot.slane %v25603_v4, %v25379_v49  ;;  %v13391_v23 = vmax.f32 %v13331_v10, %v13333_v58  ;;  %v13390_v33 = vmax.f32 %v13330_v0, %v13332_v37  ;;  %v25639_v54 = vpop.f32.mrf.mxu1 }
 0x61f   :  { %v14809_v22 = vrot.slane %v14517_v34, %v25379_v49  ;;  %v15288_v26 = vsel %vm15274_vm4, %v14801_v53, %v14797_v44  ;;  %v13335_v13 = vmax.f32 %v13271_v45, 0.0  ;;  %v13273_v2 = vadd.f32 %v25443_v35, %v13202_v59 }
 0x620   :  { %v15289_v8 = vsel %vm15276_vm5, %v14805_v25, %v15288_v26  ;;  %v13535_v6 = vcombine.high %v13391_v23, %v13391_v23  ;;  %v13542_v55 = vrot.slane %v13391_v23, %v25350_v28  ;;  %v13518_v41 = vcombine.high %v13390_v33, %v13390_v33  ;;  %v25646_v0 = vpop.f32.mrf.mxu1 }
 0x621   :  { %v15290_v50 = vsel %vm15278_vm6, %v14809_v22, %v15289_v8  ;;  %v13525_v10 = vrot.slane %v13390_v33, %v25350_v28  ;;  %v13270_v4 = vadd.f32 %v25443_v35, %v13199_v47  ;;  %v13337_v7 = vmax.f32 %v13273_v2, 0.0 }
 0x622   :  { %v15291_v5 = vsel %vm15280_vm7, %v14813_v27, %v15290_v50  ;;  %v13549_v38 = vrot.slane %v13535_v6, %v25350_v28  ;;  %v13550_v40 = vcombine.high %v13542_v55, %v13542_v55  ;;  %v16689_v51 = vrot.slane %v13542_v55, 9  ;;  %v25652_v37 = vpop.f32.mrf.mxu1 }
 0x623   :  { %v15292_v32 = vsel %vm15282_vm8, %v14817_v14, %v15291_v5  ;;  %v13532_v46 = vrot.slane %v13518_v41, %v25350_v28  ;;  %v13533_v44 = vcombine.high %v13525_v10, %v13525_v10  ;;  %v16685_v58 = vrot.slane %v13525_v10, 9 }
 0x624   :  { %v15293_v45 = vsel %vm15284_vm9, %v14821_v18, %v15292_v32  ;;  %v13551_v47 = vcombine.high %v13549_v38, %v13549_v38  ;;  %v16690_v34 = vrot.slane %v13550_v40, 9  ;;  %v16691_v53 = vrot.slane %v13549_v38, 9  ;;  %v25656_v33 = vpop.f32.mrf.mxu1 }
 0x625   :  { %v15294_v25 = vsel %vm15286_vm10, %v14825_v29, %v15293_v45  ;;  %v14526_v27 = vmax.f32 %v13542_v55, %v16689_v51  ;;  %v13534_v59 = vcombine.high %v13532_v46, %v13532_v46  ;;  %v16686_v23 = vrot.slane %v13533_v44, 9 }
 0x626   :  { %15410 = vst.msk [vmem:[#allocation4 + $0x8] sm:$0xff] %vm6778_vm2, %v15294_v25  ;;  %v16692_v14 = vrot.slane %v13551_v47, 9  ;;  %v14527_v22 = vmax.f32 %v13550_v40, %v16690_v34  ;;  %v16687_v26 = vrot.slane %v13532_v46, 9  ;;  %v13201_v2 = vadd.f32 %v25598_v24, %v25391_v39  ;;  %v25661_v50 = vpop.f32.mrf.mxu1 }
 0x627   :  { %v16688_v8 = vrot.slane %v13534_v59, 9  ;;  %v14522_v18 = vmax.f32 %v13525_v10, %v16685_v58  ;;  %v14523_v6 = vmax.f32 %v13533_v44, %v16686_v23  ;;  %v13334_v41 = vmax.f32 %v13270_v4, 0.0 }
 0x628   :  { %v14528_v29 = vmax.f32 %v13549_v38, %v16691_v53  ;;  %v14529_v55 = vmax.f32 %v13551_v47, %v16692_v14  ;;  %v14845_v5 = vrot.slane %v14526_v27, %v25379_v49  ;;  %v14524_v51 = vmax.f32 %v13532_v46, %v16687_v26  ;;  %v25674_v58 = vpop.f32.mrf.mxu1 }
 0x629   :  { %v14525_v32 = vmax.f32 %v13534_v59, %v16688_v8  ;;  %v14829_v45 = vrot.slane %v14522_v18, %v25379_v49  ;;  %v14833_v40 = vrot.slane %v14523_v6, %v25379_v49  ;;  %v13393_v34 = vmax.f32 %v13335_v13, %v13337_v7 }
 0x62a   :  { %v14849_v25 = vrot.slane %v14527_v22, %v25379_v49  ;;  %v14837_v39 = vrot.slane %v14524_v51, %v25379_v49  ;;  %v13272_v24 = vadd.f32 %v25443_v35, %v13201_v2  ;;  %v13204_v10 = vadd.f32 %v25609_v60, %v25398_v1 }
 0x62b   :  { %v14841_v4 = vrot.slane %v14525_v32, %v25379_v49  ;;  %v15295_v38 = vsel %vm15274_vm4, %v14833_v40, %v14829_v45  ;;  %v13569_v46 = vcombine.high %v13393_v34, %v13393_v34  ;;  %v13576_v44 = vrot.slane %v13393_v34, %v25350_v28 }
 0x62c   :  { %v14853_v13 = vrot.slane %v14528_v29, %v25379_v49  ;;  %v14857_v7 = vrot.slane %v14529_v55, %v25379_v49  ;;  %v15296_v47 = vsel %vm15276_vm5, %v14837_v39, %v15295_v38  ;;  %v13336_v53 = vmax.f32 %v13272_v24, 0.0  ;;  %v25686_v29 = vpop.f32.mrf.mxu1 }
 0x62d   :  { %v15297_v27 = vsel %vm15278_vm6, %v14841_v4, %v15296_v47  ;;  %v13583_v1 = vrot.slane %v13569_v46, %v25350_v28  ;;  %v13584_v60 = vcombine.high %v13576_v44, %v13576_v44  ;;  %v16697_v59 = vrot.slane %v13576_v44, 9 }
 0x62e   :  { %v15298_v23 = vsel %vm15280_vm7, %v14845_v5, %v15297_v27  ;;  %v13392_v14 = vmax.f32 %v13334_v41, %v13336_v53  ;;  %v13275_v22 = vadd.f32 %v25443_v35, %v13204_v10  ;;  %v13203_v26 = vadd.f32 %v25617_v62, %v25402_v20  ;;  %v25696_v46 = vpop.f32.mrf.mxu1 }
 0x62f   :  { %v15299_v2 = vsel %vm15282_vm8, %v14849_v25, %v15298_v23  ;;  %v13585_v8 = vcombine.high %v13583_v1, %v13583_v1  ;;  %v16698_v18 = vrot.slane %v13584_v60, 9  ;;  %v16699_v6 = vrot.slane %v13583_v1, 9 }
 0x630   :  { %v15300_v55 = vsel %vm15284_vm9, %v14853_v13, %v15299_v2  ;;  %v14534_v51 = vmax.f32 %v13576_v44, %v16697_v59  ;;  %v13552_v32 = vcombine.high %v13392_v14, %v13392_v14  ;;  %v13559_v45 = vrot.slane %v13392_v14, %v25350_v28 }
 0x631   :  { %v15301_v41 = vsel %vm15286_vm10, %v14857_v7, %v15300_v55  ;;  %v16700_v5 = vrot.slane %v13585_v8, 9  ;;  %v14535_v40 = vmax.f32 %v13584_v60, %v16698_v18  ;;  %v14536_v34 = vmax.f32 %v13583_v1, %v16699_v6 }
 0x632   :  { %15411 = vst.msk [vmem:[#allocation4 + $0x10] sm:$0xff] %vm6778_vm2, %v15301_v41  ;;  %v13566_v20 = vrot.slane %v13552_v32, %v25350_v28  ;;  %v13567_v62 = vcombine.high %v13559_v45, %v13559_v45  ;;  %v16693_v25 = vrot.slane %v13559_v45, 9  ;;  %v13339_v39 = vmax.f32 %v13275_v22, 0.0 }
 0x633   :  { %v14537_v24 = vmax.f32 %v13585_v8, %v16700_v5  ;;  %v14877_v10 = vrot.slane %v14534_v51, %v25379_v49  ;;  %v14881_v4 = vrot.slane %v14535_v40, %v25379_v49  ;;  %v13274_v38 = vadd.f32 %v25443_v35, %v13203_v26 }
 0x634   :  { %v13568_v44 = vcombine.high %v13566_v20, %v13566_v20  ;;  %v16694_v13 = vrot.slane %v13567_v62, 9  ;;  %v16695_v7 = vrot.slane %v13566_v20, 9  ;;  %v14530_v47 = vmax.f32 %v13559_v45, %v16693_v25 }
 0x635   :  { %v14885_v53 = vrot.slane %v14536_v34, %v25379_v49  ;;  %v13206_v27 = vadd.f32 %v25623_v3, %v25406_v56  ;;  %v13205_v1 = vadd.f32 %v25630_v11, %v25410_v9  ;;  %v13208_v60 = vadd.f32 %v25639_v54, %v25414_v52  ;;  %v25711_v3 = vpop.f32.mrf.mxu1 }
 0x636   :  { %v16696_v59 = vrot.slane %v13568_v44, 9  ;;  %v14531_v23 = vmax.f32 %v13567_v62, %v16694_v13  ;;  %v14532_v14 = vmax.f32 %v13566_v20, %v16695_v7  ;;  %v14861_v22 = vrot.slane %v14530_v47, %v25379_v49 }
 0x637   :  { %v13277_v26 = vadd.f32 %v25443_v35, %v13206_v27  ;;  %v13276_v2 = vadd.f32 %v25443_v35, %v13205_v1  ;;  %v13279_v8 = vadd.f32 %v25443_v35, %v13208_v60  ;;  %v13207_v56 = vadd.f32 %v25646_v0, %v25418_v16 }
 0x638   :  { %v14533_v9 = vmax.f32 %v13568_v44, %v16696_v59  ;;  %v14865_v11 = vrot.slane %v14531_v23, %v25379_v49  ;;  %v14869_v52 = vrot.slane %v14532_v14, %v25379_v49  ;;  %v13210_v54 = vadd.f32 %v25652_v37, %v25422_v19  ;;  %v25725_v37 = vpop.f32.mrf.mxu1 }
 0x639   :  { %v13338_v18 = vmax.f32 %v13274_v38, 0.0  ;;  %v13341_v6 = vmax.f32 %v13277_v26, 0.0  ;;  %v13340_v55 = vmax.f32 %v13276_v2, 0.0  ;;  %v13278_v51 = vadd.f32 %v25443_v35, %v13207_v56 }
 0x63a   :  { %v14873_v32 = vrot.slane %v14533_v9, %v25379_v49  ;;  %v15302_v45 = vsel %vm15274_vm4, %v14865_v11, %v14861_v22  ;;  %v13281_v16 = vadd.f32 %v25443_v35, %v13210_v54  ;;  %v13209_v0 = vadd.f32 %v25656_v33, %v25426_v61  ;;  %v25735_v59 = vpop.f32.mrf.mxu1 }
 0x63b   :  { %v14889_v41 = vrot.slane %v14537_v24, %v25379_v49  ;;  %v15303_v5 = vsel %vm15276_vm5, %v14869_v52, %v15302_v45  ;;  %v13395_v40 = vmax.f32 %v13339_v39, %v13341_v6  ;;  %v13394_v19 = vmax.f32 %v13338_v18, %v13340_v55 }
 0x63c   :  { %v15304_v34 = vsel %vm15278_vm6, %v14873_v32, %v15303_v5  ;;  %v13343_v20 = vmax.f32 %v13279_v8, 0.0  ;;  %v13342_v62 = vmax.f32 %v13278_v51, 0.0  ;;  %v13345_v25 = vmax.f32 %v13281_v16, 0.0  ;;  %v25740_v55 = vpop.f32.mrf.mxu1 }
 0x63d   :  { %v15305_v38 = vsel %vm15280_vm7, %v14877_v10, %v15304_v34  ;;  %v13603_v44 = vcombine.high %v13395_v40, %v13395_v40  ;;  %v13610_v13 = vrot.slane %v13395_v40, %v25350_v28  ;;  %v13586_v7 = vcombine.high %v13394_v19, %v13394_v19 }
 0x63e   :  { %v15306_v61 = vsel %vm15282_vm8, %v14881_v4, %v15305_v38  ;;  %v13593_v33 = vrot.slane %v13394_v19, %v25350_v28  ;;  %v13397_v24 = vmax.f32 %v13343_v20, %v13345_v25  ;;  %v13280_v39 = vadd.f32 %v25443_v35, %v13209_v0 }
 0x63f   :  { %v15307_v47 = vsel %vm15284_vm9, %v14885_v53, %v15306_v61  ;;  %v13617_v27 = vrot.slane %v13603_v44, %v25350_v28  ;;  %v13618_v1 = vcombine.high %v13610_v13, %v13610_v13  ;;  %v16705_v60 = vrot.slane %v13610_v13, 9 }
 0x640   :  { %v15308_v10 = vsel %vm15286_vm10, %v14889_v41, %v15307_v47  ;;  %v13600_v23 = vrot.slane %v13586_v7, %v25350_v28  ;;  %v13601_v14 = vcombine.high %v13593_v33, %v13593_v33  ;;  %v16701_v22 = vrot.slane %v13593_v33, 9 }
 0x641   :  { %15412 = vst.msk [vmem:[#allocation4 + $0x18] sm:$0xff] %vm6778_vm2, %v15308_v10  ;;  %v13619_v4 = vcombine.high %v13617_v27, %v13617_v27  ;;  %v16706_v26 = vrot.slane %v13618_v1, 9  ;;  %v16707_v2 = vrot.slane %v13617_v27, 9  ;;  %v14542_v8 = vmax.f32 %v13610_v13, %v16705_v60 }
 0x642   :  { %v13602_v56 = vcombine.high %v13600_v23, %v13600_v23  ;;  %v16702_v53 = vrot.slane %v13601_v14, 9  ;;  %v16703_v9 = vrot.slane %v13600_v23, 9  ;;  %v14538_v11 = vmax.f32 %v13593_v33, %v16701_v22 }
 0x643   :  { %v16708_v52 = vrot.slane %v13619_v4, 9  ;;  %v14543_v54 = vmax.f32 %v13618_v1, %v16706_v26  ;;  %v14544_v18 = vmax.f32 %v13617_v27, %v16707_v2  ;;  %v13344_v6 = vmax.f32 %v13280_v39, 0.0 }
 0x644   :  { %v16704_v51 = vrot.slane %v13602_v56, 9  ;;  %v14539_v32 = vmax.f32 %v13601_v14, %v16702_v53  ;;  %v14540_v45 = vmax.f32 %v13600_v23, %v16703_v9  ;;  %v13212_v16 = vadd.f32 %v25661_v50, %v25430_v31  ;;  %v25752_v50 = vpop.f32.mrf.mxu1 }
 0x645   :  { %v14545_v0 = vmax.f32 %v13619_v4, %v16708_v52  ;;  %v14909_v41 = vrot.slane %v14542_v8, %v25379_v49  ;;  %v14893_v5 = vrot.slane %v14538_v11, %v25379_v49  ;;  %v13637_v40 = vcombine.high %v13397_v24, %v13397_v24 }
 0x646   :  { %v14541_v19 = vmax.f32 %v13602_v56, %v16704_v51  ;;  %v14897_v34 = vrot.slane %v14539_v32, %v25379_v49  ;;  %v14901_v20 = vrot.slane %v14540_v45, %v25379_v49  ;;  %v13644_v25 = vrot.slane %v13397_v24, %v25350_v28  ;;  %v25761_v8 = vpop.f32.mrf.mxu1  ;;  %v26977_v56 = vld [vmem:[#allocation48_spill] sm:$0xff] }
 0x647   :  { %v14913_v38 = vrot.slane %v14543_v54, %v25379_v49  ;;  %v14917_v44 = vrot.slane %v14544_v18, %v25379_v49  ;;  %v13651_v13 = vrot.slane %v13637_v40, %v25350_v28  ;;  %v13396_v31 = vmax.f32 %v13342_v62, %v13344_v6  ;;  %v19798_v62 = vpop.f32.mrf.mxu0 }
 0x648   :  { %v14905_v7 = vrot.slane %v14541_v19, %v25379_v49  ;;  %v15309_v61 = vsel %vm15274_vm4, %v14897_v34, %v14893_v5  ;;  %v13652_v33 = vcombine.high %v13644_v25, %v13644_v25  ;;  %v16713_v39 = vrot.slane %v13644_v25, 9 }
 0x649   :  { %v15310_v47 = vsel %vm15276_vm5, %v14901_v20, %v15309_v61  ;;  %v13653_v27 = vcombine.high %v13651_v13, %v13651_v13  ;;  %v16715_v1 = vrot.slane %v13651_v13, 9  ;;  %v13620_v24 = vcombine.high %v13396_v31, %v13396_v31  ;;  %v25774_v20 = vpop.f32.mrf.mxu1 }
 0x64a   :  { %v15311_v60 = vsel %vm15278_vm6, %v14905_v7, %v15310_v47  ;;  %v16714_v10 = vrot.slane %v13652_v33, 9  ;;  %v14550_v23 = vmax.f32 %v13644_v25, %v16713_v39  ;;  %v13627_v14 = vrot.slane %v13396_v31, %v25350_v28 }
 0x64b   :  { %v15312_v22 = vsel %vm15280_vm7, %v14909_v41, %v15311_v60  ;;  %v16716_v4 = vrot.slane %v13653_v27, 9  ;;  %v14552_v26 = vmax.f32 %v13651_v13, %v16715_v1  ;;  %v13634_v2 = vrot.slane %v13620_v24, %v25350_v28 }
 0x64c   :  { %v25764_v53 = vadd.f32 %v19798_v62, %v26977_v56  ;;  %v14921_v9 = vrot.slane %v14545_v0, %v25379_v49  ;;  %v15313_v11 = vsel %vm15282_vm8, %v14913_v38, %v15312_v22  ;;  %v13635_v52 = vcombine.high %v13627_v14, %v13627_v14 }
 0x64d   :  { %v15314_v54 = vsel %vm15284_vm9, %v14917_v44, %v15313_v11  ;;  %v14551_v18 = vmax.f32 %v13652_v33, %v16714_v10  ;;  %v13636_v6 = vcombine.high %v13634_v2, %v13634_v2  ;;  %v13283_v51 = vadd.f32 %v25443_v35, %v13212_v16 }
 0x64e   :  { %v15315_v32 = vsel %vm15286_vm10, %v14921_v9, %v15314_v54  ;;  %v14941_v45 = vrot.slane %v14550_v23, %v25379_v49  ;;  %v16709_v41 = vrot.slane %v13627_v14, 9  ;;  %v16710_v5 = vrot.slane %v13635_v52, 9 }
 0x64f   :  { %15413 = vst.msk [vmem:[#allocation4 + $0x20] sm:$0xff] %vm6778_vm2, %v15315_v32  ;;  %v14553_v40 = vmax.f32 %v13653_v27, %v16716_v4  ;;  %v14949_v0 = vrot.slane %v14552_v26, %v25379_v49  ;;  %v16711_v19 = vrot.slane %v13634_v2, 9  ;;  %v16712_v34 = vrot.slane %v13636_v6, 9 }
 0x650   :  { %v14546_v25 = vmax.f32 %v13627_v14, %v16709_v41  ;;  %v14547_v38 = vmax.f32 %v13635_v52, %v16710_v5  ;;  %v13211_v16 = vadd.f32 %v25674_v58, %v25434_v57  ;;  %v13214_v44 = vadd.f32 %v25686_v29, %v25438_v43 }
 0x651   :  { %v14548_v13 = vmax.f32 %v13634_v2, %v16711_v19  ;;  %v14549_v31 = vmax.f32 %v13636_v6, %v16712_v34  ;;  %v13213_v7 = vadd.f32 %v25696_v46, %v25447_v15  ;;  %v13216_v61 = vadd.f32 %v25711_v3, %v25451_v63  ;;  %v25792_v15 = vpop.f32.mrf.mxu1 }
 0x652   :  { %v14925_v33 = vrot.slane %v14546_v25, %v25379_v49  ;;  %v14929_v39 = vrot.slane %v14547_v38, %v25379_v49  ;;  %v13282_v47 = vadd.f32 %v25443_v35, %v13211_v16  ;;  %v13285_v27 = vadd.f32 %v25443_v35, %v13214_v44 }
 0x653   :  { %v14933_v57 = vrot.slane %v14548_v13, %v25379_v49  ;;  %v14937_v43 = vrot.slane %v14549_v31, %v25379_v49  ;;  %v13284_v58 = vadd.f32 %v25443_v35, %v13213_v7  ;;  %v13287_v29 = vadd.f32 %v25443_v35, %v13216_v61 }
 0x654   :  { %v15316_v63 = vsel %vm15274_vm4, %v14929_v39, %v14925_v33  ;;  %v13347_v46 = vmax.f32 %v13283_v51, 0.0  ;;  %v13349_v3 = vmax.f32 %v13285_v27, 0.0  ;;  %v13215_v1 = vadd.f32 %v25725_v37, %v25455_v42  ;;  %v25805_v37 = vpop.f32.mrf.mxu1 }
 0x655   :  { %v15317_v24 = vsel %vm15276_vm5, %v14933_v57, %v15316_v63  ;;  %v13346_v60 = vmax.f32 %v13282_v47, 0.0  ;;  %v13348_v10 = vmax.f32 %v13284_v58, 0.0  ;;  %v13218_v23 = vadd.f32 %v25735_v59, %v25459_v17  ;;  %v26978_v47 = vld [vmem:[#allocation52_spill] sm:$0xff] }
 0x656   :  { %v14945_v14 = vrot.slane %v14551_v18, %v25379_v49  ;;  %v14953_v62 = vrot.slane %v14553_v40, %v25379_v49  ;;  %v15318_v22 = vsel %vm15278_vm6, %v14937_v43, %v15317_v24  ;;  %v13399_v4 = vmax.f32 %v13347_v46, %v13349_v3  ;;  %v25816_v25 = vpop.f32.mrf.mxu1 }
 0x657   :  { %v15319_v26 = vsel %vm15280_vm7, %v14941_v45, %v15318_v22  ;;  %v13398_v2 = vmax.f32 %v13346_v60, %v13348_v10  ;;  %v13351_v56 = vmax.f32 %v13287_v29, 0.0  ;;  %v13289_v42 = vadd.f32 %v25443_v35, %v13218_v23 }
 0x658   :  { %v15320_v9 = vsel %vm15282_vm8, %v14945_v14, %v15319_v26  ;;  %v13671_v11 = vcombine.high %v13399_v4, %v13399_v4  ;;  %v13678_v17 = vrot.slane %v13399_v4, %v25350_v28  ;;  %v13286_v59 = vadd.f32 %v25443_v35, %v13215_v1  ;;  %v25822_v46 = vpop.f32.mrf.mxu1 }
 0x659   :  { %v15321_v52 = vsel %vm15284_vm9, %v14949_v0, %v15320_v9  ;;  %v13654_v54 = vcombine.high %v13398_v2, %v13398_v2  ;;  %v13661_v18 = vrot.slane %v13398_v2, %v25350_v28  ;;  %v13353_v6 = vmax.f32 %v13289_v42, 0.0 }
 0x65a   :  { %v15322_v51 = vsel %vm15286_vm10, %v14953_v62, %v15321_v52  ;;  %v13685_v32 = vrot.slane %v13671_v11, %v25350_v28  ;;  %v13686_v45 = vcombine.high %v13678_v17, %v13678_v17  ;;  %v16721_v41 = vrot.slane %v13678_v17, 9  ;;  %v25834_v42 = vpop.f32.mrf.mxu1 }
 0x65b   :  { %15414 = vst.msk [vmem:[#allocation4 + $0x28] sm:$0xff] %vm6778_vm2, %v15322_v51  ;;  %v13668_v5 = vrot.slane %v13654_v54, %v25350_v28  ;;  %v13669_v40 = vcombine.high %v13661_v18, %v13661_v18  ;;  %v16717_v19 = vrot.slane %v13661_v18, 9  ;;  %v13401_v34 = vmax.f32 %v13351_v56, %v13353_v6 }
 0x65c   :  { %v13687_v0 = vcombine.high %v13685_v32, %v13685_v32  ;;  %v16722_v38 = vrot.slane %v13686_v45, 9  ;;  %v16723_v16 = vrot.slane %v13685_v32, 9  ;;  %v14558_v44 = vmax.f32 %v13678_v17, %v16721_v41 }
 0x65d   :  { %v13670_v13 = vcombine.high %v13668_v5, %v13668_v5  ;;  %v16718_v31 = vrot.slane %v13669_v40, 9  ;;  %v16719_v7 = vrot.slane %v13668_v5, 9  ;;  %v14554_v61 = vmax.f32 %v13661_v18, %v16717_v19 }
 0x65e   :  { %v16724_v33 = vrot.slane %v13687_v0, 9  ;;  %v13350_v39 = vmax.f32 %v13286_v59, 0.0  ;;  %v13217_v27 = vadd.f32 %v25740_v55, %v26978_v47  ;;  %v13220_v57 = vadd.f32 %v25752_v50, %v25467_v48 }
 0x65f   :  { %v14559_v43 = vmax.f32 %v13686_v45, %v16722_v38  ;;  %v16720_v58 = vrot.slane %v13670_v13, 9  ;;  %v14555_v29 = vmax.f32 %v13669_v40, %v16718_v31  ;;  %v14556_v63 = vmax.f32 %v13668_v5, %v16719_v7  ;;  %v25847_v38 = vpop.f32.mrf.mxu1 }
 0x660   :  { %v14560_v3 = vmax.f32 %v13685_v32, %v16723_v16  ;;  %v14973_v1 = vrot.slane %v14558_v44, %v25379_v49  ;;  %v14957_v24 = vrot.slane %v14554_v61, %v25379_v49  ;;  %v13705_v60 = vcombine.high %v13401_v34, %v13401_v34 }
 0x661   :  { %v14557_v10 = vmax.f32 %v13670_v13, %v16720_v58  ;;  %v14961_v23 = vrot.slane %v14555_v29, %v25379_v49  ;;  %v14965_v55 = vrot.slane %v14556_v63, %v25379_v49  ;;  %v13712_v14 = vrot.slane %v13401_v34, %v25350_v28  ;;  %v26979_v34 = vld [vmem:[#allocation19_spill] sm:$0xff] }
 0x662   :  { %v14561_v48 = vmax.f32 %v13687_v0, %v16724_v33  ;;  %v13719_v50 = vrot.slane %v13705_v60, %v25350_v28  ;;  %v13288_v62 = vadd.f32 %v25443_v35, %v13217_v27  ;;  %v13291_v22 = vadd.f32 %v25443_v35, %v13220_v57 }
 0x663   :  { %v14969_v4 = vrot.slane %v14557_v10, %v25379_v49  ;;  %v15323_v26 = vsel %vm15274_vm4, %v14961_v23, %v14957_v24  ;;  %v13720_v2 = vcombine.high %v13712_v14, %v13712_v14  ;;  %v16729_v56 = vrot.slane %v13712_v14, 9  ;;  %v25874_v24 = vld [vmem:[%s26167_s6] ss:$0 sm:$0xff]  ;;  %s19967_s6 = smov [#allocation4]  }
 0x664   :  { %v15324_v9 = vsel %vm15276_vm5, %v14965_v55, %v15323_v26  ;;  %v13721_v11 = vcombine.high %v13719_v50, %v13719_v50  ;;  %v16731_v17 = vrot.slane %v13719_v50, 9  ;;  %v13352_v59 = vmax.f32 %v13288_v62, 0.0  ;;  %s15430_s14 = sshll.u32 %s19967_s6, 4  ;;  %s15431_s14 = int_to_ptr.vmem [resolvable:$true] %s15430_s14 }
 0x665   :  { %v14977_v52 = vrot.slane %v14559_v43, %v25379_v49  ;;  %v15325_v54 = vsel %vm15278_vm6, %v14969_v4, %v15324_v9  ;;  %v16730_v18 = vrot.slane %v13720_v2, 9  ;;  %v25839_v6 = vmax.f32 %v13712_v14, %v16729_v56  ;;  %s19943_s4 = scalar_lea.vmem %s15431_s14, 2048  ;;  %p19948_p1 = scmp.lt.s32.totalorder %s15431_s14, %s15431_s14 }
 0x666   :  { %v14981_v51 = vrot.slane %v14560_v3, %v25379_v49  ;;  %v15326_v32 = vsel %vm15280_vm7, %v14973_v1, %v15325_v54  ;;  %v16732_v45 = vrot.slane %v13721_v11, 9  ;;  %v13400_v41 = vmax.f32 %v13350_v39, %v13352_v59  ;;  %v25869_v3 = vpop.f32.mrf.mxu1  ;;  %p19944_p0 = scmp.ne.s32.totalorder %s15431_s14, %s19943_s4  ;;  %p19949_p2 = scmp.lt.s32.totalorder %s19943_s4, %s19943_s4 }
 0x667   :  { %v14985_v5 = vrot.slane %v14561_v48, %v25379_v49  ;;  %v15327_v40 = vsel %vm15282_vm8, %v14977_v52, %v15326_v32  ;;  %v13355_v19 = vmax.f32 %v13291_v22, 0.0  ;;  %v13219_v0 = vadd.f32 %v25761_v8, %v26979_v34 }
 0x668   :  { %v15328_v16 = vsel %vm15284_vm9, %v14981_v51, %v15327_v40  ;;  %v25850_v44 = vmax.f32 %v13720_v2, %v16730_v18  ;;  %v25852_v13 = vmax.f32 %v13719_v50, %v16731_v17  ;;  %v13688_v31 = vcombine.high %v13400_v41, %v13400_v41  ;;  %v25889_v22 = vpop.f32.mrf.mxu1  ;;  %v26980_v51 = vld [vmem:[#allocation18_spill] sm:$0xff]  ;;  %p19950_p3 = por %p19949_p2, %p19948_p1 }
 0x669   :  { %v15329_v7 = vsel %vm15286_vm10, %v14985_v5, %v15328_v16  ;;  %v15005_v61 = vrot.slane %v25839_v6, %v25379_v49  ;;  %v13695_v33 = vrot.slane %v13400_v41, %v25350_v28  ;;  %v13290_v39 = vadd.f32 %v25443_v35, %v13219_v0 }
 0x66a   :  { %15415 = vst.msk [vmem:[#allocation4 + $0x30] sm:$0xff] %vm6778_vm2, %v15329_v7  ;;  %v25860_v8 = vmax.f32 %v13721_v11, %v16732_v45  ;;  %v13702_v47 = vrot.slane %v13688_v31, %v25350_v28  ;;  %v13222_v27 = vadd.f32 %v25774_v20, %v25475_v12  ;;  %v13221_v57 = vadd.f32 %v25792_v15, %v25479_v21  ;;  %v26981_v45 = vld [vmem:[#allocation84_spill] sm:$0xff]  ;;  %v25904_v5 = vpop.f32.mrf.mxu1  ;;  %p19951_p4 = pnand %p19950_p3, %p19944_p0 }
 0x66b   :  { %v13703_v43 = vcombine.high %v13695_v33, %v13695_v33  ;;  %v16725_v58 = vrot.slane %v13695_v33, 9  ;;  %v13354_v29 = vmax.f32 %v13290_v39, 0.0  ;;  %v13224_v63 = vadd.f32 %v25805_v37, %v25484_v36 }
 0x66c   :  { %v13704_v35 = vcombine.high %v13702_v47, %v13702_v47  ;;  %v16727_v1 = vrot.slane %v13702_v47, 9  ;;  %v13293_v12 = vadd.f32 %v25874_v24, %v13222_v27  ;;  %v13292_v20 = vadd.f32 %v25874_v24, %v13221_v57  ;;  %v25913_v57 = vpop.f32.mrf.mxu1 }
 0x66d   :  { %v16726_v21 = vrot.slane %v13703_v43, 9  ;;  %v14562_v15 = vmax.f32 %v13695_v33, %v16725_v58  ;;  %v25879_v60 = vadd.f32 %v25874_v24, %v13224_v63  ;;  %v13223_v36 = vadd.f32 %v25816_v25, %v25488_v30 }
 0x66e   :  { %v16728_v37 = vrot.slane %v13704_v35, 9  ;;  %v14564_v10 = vmax.f32 %v13702_v47, %v16727_v1  ;;  %v13357_v23 = vmax.f32 %v13293_v12, 0.0  ;;  %v13356_v55 = vmax.f32 %v13292_v20, 0.0 }
 0x66f   :  { %v15009_v14 = vrot.slane %v25850_v44, %v25379_v49  ;;  %v15013_v48 = vrot.slane %v25852_v13, %v25379_v49  ;;  %v15017_v50 = vrot.slane %v25860_v8, %v25379_v49  ;;  %v14563_v62 = vmax.f32 %v13703_v43, %v16726_v21 }
 0x670   :  { %v14565_v4 = vmax.f32 %v13704_v35, %v16728_v37  ;;  %v14997_v26 = vrot.slane %v14564_v10, %v25379_v49  ;;  %v13403_v30 = vmax.f32 %v13355_v19, %v13357_v23  ;;  %v13402_v25 = vmax.f32 %v13354_v29, %v13356_v55  ;;  %v25919_v55 = vpop.f32.mrf.mxu1 }
 0x671   :  { %v14989_v2 = vrot.slane %v14562_v15, %v25379_v49  ;;  %v14993_v56 = vrot.slane %v14563_v62, %v25379_v49  ;;  %v13359_v9 = vmax.f32 %v25879_v60, 0.0  ;;  %v13294_v11 = vadd.f32 %v25874_v24, %v13223_v36  ;;  %v26982_v62 = vld [vmem:[#allocation86_spill] sm:$0xff] }
 0x672   :  { %v15001_v17 = vrot.slane %v14565_v4, %v25379_v49  ;;  %v13739_v59 = vcombine.high %v13403_v30, %v13403_v30  ;;  %v13746_v52 = vrot.slane %v13403_v30, %v25350_v28  ;;  %v13722_v54 = vcombine.high %v13402_v25, %v13402_v25 }
 0x673   :  { %v15330_v18 = vsel %vm15274_vm4, %v14993_v56, %v14989_v2  ;;  %v13729_v6 = vrot.slane %v13402_v25, %v25350_v28  ;;  %v13226_v32 = vadd.f32 %v25822_v46, %v26980_v51  ;;  %v13225_v41 = vadd.f32 %v25834_v42, %v26981_v45  ;;  %v26983_v45 = vld [vmem:[#allocation21_spill] sm:$0xff] }
 0x674   :  { %v15331_v40 = vsel %vm15276_vm5, %v14997_v26, %v15330_v18  ;;  %v13753_v19 = vrot.slane %v13739_v59, %v25350_v28  ;;  %v13754_v34 = vcombine.high %v13746_v52, %v13746_v52  ;;  %v16737_v0 = vrot.slane %v13746_v52, 9 }
 0x675   :  { %v15332_v16 = vsel %vm15278_vm6, %v15001_v17, %v15331_v40  ;;  %v13736_v44 = vrot.slane %v13722_v54, %v25350_v28  ;;  %v13737_v13 = vcombine.high %v13729_v6, %v13729_v6  ;;  %v16733_v31 = vrot.slane %v13729_v6, 9 }
 0x676   :  { %v15333_v7 = vsel %vm15280_vm7, %v15005_v61, %v15332_v16  ;;  %v13755_v46 = vcombine.high %v13753_v19, %v13753_v19  ;;  %v16738_v33 = vrot.slane %v13754_v34, 9  ;;  %v16739_v39 = vrot.slane %v13753_v19, 9 }
 0x677   :  { %v15334_v42 = vsel %vm15282_vm8, %v15009_v14, %v15333_v7  ;;  %v13738_v8 = vcombine.high %v13736_v44, %v13736_v44  ;;  %v16734_v47 = vrot.slane %v13737_v13, 9  ;;  %v13297_v27 = vadd.f32 %v25874_v24, %v13226_v32 }
 0x678   :  { %v15335_v43 = vsel %vm15284_vm9, %v15013_v48, %v15334_v42  ;;  %v16740_v58 = vrot.slane %v13755_v46, 9  ;;  %v14574_v29 = vmax.f32 %v13746_v52, %v16737_v0  ;;  %v13296_v63 = vadd.f32 %v25874_v24, %v13225_v41 }
 0x679   :  { %v15336_v35 = vsel %vm15286_vm10, %v15017_v50, %v15335_v43  ;;  %v16735_v61 = vrot.slane %v13736_v44, 9  ;;  %v16736_v1 = vrot.slane %v13738_v8, 9  ;;  %v13358_v12 = vmax.f32 %v13294_v11, 0.0 }
 0x67a   :  { %15416 = vst.msk [vmem:[#allocation4 + $0x38] sm:$0xff] %vm6778_vm2, %v15336_v35  ;;  %v14575_v20 = vmax.f32 %v13754_v34, %v16738_v33  ;;  %v14576_v21 = vmax.f32 %v13753_v19, %v16739_v39  ;;  %v14577_v15 = vmax.f32 %v13755_v46, %v16740_v58  ;;  %v14570_v60 = vmax.f32 %v13729_v6, %v16733_v31  ;;  %v19895_v6 = vpop.f32.mrf.mxu1  ;;  %v26985_v35 = vld [vmem:[#allocation85_spill] sm:$0xff] }
 0x67b   :  { %v14571_v36 = vmax.f32 %v13737_v13, %v16734_v47  ;;  %v14572_v37 = vmax.f32 %v13736_v44, %v16735_v61  ;;  %v14573_v10 = vmax.f32 %v13738_v8, %v16736_v1  ;;  %v13361_v23 = vmax.f32 %v13297_v27, 0.0 }
 0x67c   :  { %v15037_v14 = vrot.slane %v14574_v29, %v25379_v49  ;;  %v15021_v48 = vrot.slane %v14570_v60, %v25379_v49  ;;  %v13360_v50 = vmax.f32 %v13296_v63, 0.0  ;;  %v13228_v4 = vadd.f32 %v25847_v38, %v26982_v62  ;;  %v13098_v42 = vpop.f32.mrf.mxu1  ;;  %v26984_v29 = vld [vmem:[#allocation20_spill] sm:$0xff] }
 0x67d   :  { %v15025_v26 = vrot.slane %v14571_v36, %v25379_v49  ;;  %v15029_v30 = vrot.slane %v14572_v37, %v25379_v49  ;;  %v15033_v25 = vrot.slane %v14573_v10, %v25379_v49  ;;  %v13405_v2 = vmax.f32 %v13359_v9, %v13361_v23 }
 0x67e   :  { %v15041_v56 = vrot.slane %v14575_v20, %v25379_v49  ;;  %v15045_v11 = vrot.slane %v14576_v21, %v25379_v49  ;;  %v15049_v17 = vrot.slane %v14577_v15, %v25379_v49  ;;  %v13404_v59 = vmax.f32 %v13358_v12, %v13360_v50  ;;  %v25951_v10 = vpop.f32.mrf.mxu1 }
 0x67f   :  { %v15337_v52 = vsel %vm15274_vm4, %v15025_v26, %v15021_v48  ;;  %v13773_v54 = vcombine.high %v13405_v2, %v13405_v2  ;;  %v13780_v18 = vrot.slane %v13405_v2, %v25350_v28  ;;  %v13299_v38 = vadd.f32 %v25874_v24, %v13228_v4  ;;  %v26986_v2 = vld [vmem:[#allocation88_spill] sm:$0xff] }
 0x680   :  { %v15338_v51 = vsel %vm15276_vm5, %v15029_v30, %v15337_v52  ;;  %v13756_v32 = vcombine.high %v13404_v59, %v13404_v59  ;;  %v13763_v9 = vrot.slane %v13404_v59, %v25350_v28  ;;  %v13227_v41 = vadd.f32 %v25869_v3, %v26983_v45 }
 0x681   :  { %v15339_v40 = vsel %vm15278_vm6, %v15033_v25, %v15338_v51  ;;  %v13787_v19 = vrot.slane %v13773_v54, %v25350_v28  ;;  %v13788_v34 = vcombine.high %v13780_v18, %v13780_v18  ;;  %v16745_v0 = vrot.slane %v13780_v18, 9  ;;  %v25964_v54 = vpop.f32.mrf.mxu1 }
 0x682   :  { %v15340_v16 = vsel %vm15280_vm7, %v15037_v14, %v15339_v40  ;;  %v13770_v44 = vrot.slane %v13756_v32, %v25350_v28  ;;  %v13771_v13 = vcombine.high %v13763_v9, %v13763_v9  ;;  %v16741_v31 = vrot.slane %v13763_v9, 9  ;;  %v26987_v32 = vld [vmem:[#allocation22_spill] sm:$0xff] }
 0x683   :  { %v15341_v7 = vsel %vm15282_vm8, %v15041_v56, %v15340_v16  ;;  %v13789_v46 = vcombine.high %v13787_v19, %v13787_v19  ;;  %v16746_v33 = vrot.slane %v13788_v34, 9  ;;  %v16747_v39 = vrot.slane %v13787_v19, 9 }
 0x684   :  { %v15342_v3 = vsel %vm15284_vm9, %v15045_v11, %v15341_v7  ;;  %v14582_v8 = vmax.f32 %v13780_v18, %v16745_v0  ;;  %v13772_v47 = vcombine.high %v13770_v44, %v13770_v44  ;;  %v16742_v27 = vrot.slane %v13771_v13, 9 }
 0x685   :  { %v15343_v43 = vsel %vm15286_vm10, %v15049_v17, %v15342_v3  ;;  %v16748_v58 = vrot.slane %v13789_v46, 9  ;;  %v13230_v63 = vadd.f32 %v25889_v22, %v26984_v29  ;;  %v13229_v61 = vadd.f32 %v25904_v5, %v26985_v35 }
 0x686   :  { %15417 = vst.msk [vmem:[#allocation4 + $0x40] sm:$0xff] %vm6778_vm2, %v15343_v43  ;;  %v14583_v1 = vmax.f32 %v13788_v34, %v16746_v33  ;;  %v16743_v12 = vrot.slane %v13770_v44, 9  ;;  %v16744_v20 = vrot.slane %v13772_v47, 9  ;;  %v14578_v21 = vmax.f32 %v13763_v9, %v16741_v31  ;;  %v26988_v34 = vld [vmem:[#allocation23_spill] sm:$0xff]  ;;  %v25979_v33 = vpop.f32.mrf.mxu1 }
 0x687   :  { %v14584_v15 = vmax.f32 %v13787_v19, %v16747_v39  ;;  %v15069_v60 = vrot.slane %v14582_v8, %v25379_v49  ;;  %v14579_v36 = vmax.f32 %v13771_v13, %v16742_v27  ;;  %v13363_v37 = vmax.f32 %v13299_v38, 0.0  ;;  %v12434_v39 = vpop.f32.mrf.mxu0 }
 0x688   :  { %v14585_v23 = vmax.f32 %v13789_v46, %v16748_v58  ;;  %v14580_v14 = vmax.f32 %v13770_v44, %v16743_v12  ;;  %v14581_v48 = vmax.f32 %v13772_v47, %v16744_v20  ;;  %v13298_v22 = vadd.f32 %v25874_v24, %v13227_v41  ;;  %v26989_v44 = vld [vmem:[#allocation87_spill] sm:$0xff] }
 0x689   :  { %v15053_v5 = vrot.slane %v14578_v21, %v25379_v49  ;;  %v15057_v50 = vrot.slane %v14579_v36, %v25379_v49  ;;  %v13301_v62 = vadd.f32 %v25874_v24, %v13230_v63  ;;  %v13300_v4 = vadd.f32 %v25874_v24, %v13229_v61  ;;  %v19801_v36 = vpop.f32.mrf.mxu0 }
 0x68a   :  { %v15073_v26 = vrot.slane %v14583_v1, %v25379_v49  ;;  %v15061_v30 = vrot.slane %v14580_v14, %v25379_v49  ;;  %v15065_v25 = vrot.slane %v14581_v48, %v25379_v49  ;;  %v13232_v56 = vadd.f32 %v25913_v57, %v26986_v2  ;;  %v26990_v1 = vld [vmem:[#allocation51_spill] sm:$0xff] }
 0x68b   :  { %v15344_v11 = vsel %vm15274_vm4, %v15057_v50, %v15053_v5  ;;  %v13362_v17 = vmax.f32 %v13298_v22, 0.0  ;;  %v13365_v59 = vmax.f32 %v13301_v62, 0.0  ;;  %v13364_v52 = vmax.f32 %v13300_v4, 0.0  ;;  %v26991_v22 = vld [vmem:[#allocation15_spill] sm:$0xff] }
 0x68c   :  { %v15077_v18 = vrot.slane %v14584_v15, %v25379_v49  ;;  %v15345_v38 = vsel %vm15276_vm5, %v15061_v30, %v15344_v11  ;;  %v13303_v51 = vadd.f32 %v25874_v24, %v13232_v56  ;;  %v13234_v9 = vadd.f32 %v19895_v6, %v26987_v32 }
 0x68d   :  { %v15081_v45 = vrot.slane %v14585_v23, %v25379_v49  ;;  %v15346_v41 = vsel %vm15278_vm6, %v15065_v25, %v15345_v38  ;;  %v13407_v57 = vmax.f32 %v13363_v37, %v13365_v59  ;;  %v13406_v40 = vmax.f32 %v13362_v17, %v13364_v52 }
 0x68e   :  { %v15347_v19 = vsel %vm15280_vm7, %v15069_v60, %v15346_v41  ;;  %v13231_v0 = vadd.f32 %v25919_v55, %v26988_v34  ;;  %v13305_v16 = vadd.f32 %v25874_v24, %v13234_v9  ;;  %v13233_v13 = vadd.f32 %v13098_v42, %v26989_v44  ;;  %v25990_v60 = vpop.f32.mrf.mxu1 }
 0x68f   :  { %v15348_v31 = vsel %vm15282_vm8, %v15073_v26, %v15347_v19  ;;  %v13807_v7 = vcombine.high %v13407_v57, %v13407_v57  ;;  %v13814_v6 = vrot.slane %v13407_v57, %v25350_v28  ;;  %v13790_v46 = vcombine.high %v13406_v40, %v13406_v40 }
 0x690   :  { %v15349_v3 = vsel %vm15284_vm9, %v15077_v18, %v15348_v31  ;;  %v13797_v8 = vrot.slane %v13406_v40, %v25350_v28  ;;  %v13367_v47 = vmax.f32 %v13303_v51, 0.0  ;;  %v13369_v27 = vmax.f32 %v13305_v16, 0.0  ;;  %v19904_v52 = vpop.f32.mrf.mxu1  ;;  %v26992_v31 = vld [vmem:[#allocation90_spill] sm:$0xff] }
 0x691   :  { %v15350_v55 = vsel %vm15286_vm10, %v15081_v45, %v15349_v3  ;;  %v13821_v43 = vrot.slane %v13807_v7, %v25350_v28  ;;  %v13822_v42 = vcombine.high %v13814_v6, %v13814_v6  ;;  %v16753_v58 = vrot.slane %v13814_v6, 9 }
 0x692   :  { %15418 = vst.msk [vmem:[#allocation4 + $0x48] sm:$0xff] %vm6778_vm2, %v15350_v55  ;;  %v13804_v29 = vrot.slane %v13790_v46, %v25350_v28  ;;  %v13805_v63 = vcombine.high %v13797_v8, %v13797_v8  ;;  %v16749_v35 = vrot.slane %v13797_v8, 9  ;;  %v13409_v61 = vmax.f32 %v13367_v47, %v13369_v27  ;;  %v12444_v47 = vpop.f32.mrf.mxu0 }
 0x693   :  { %v25988_v12 = vadd.f32 %v12434_v39, %v26990_v1  ;;  %v13823_v20 = vcombine.high %v13821_v43, %v13821_v43  ;;  %v16754_v21 = vrot.slane %v13822_v42, 9  ;;  %v16755_v15 = vrot.slane %v13821_v43, 9 }
 0x694   :  { %v13806_v37 = vcombine.high %v13804_v29, %v13804_v29  ;;  %v16750_v23 = vrot.slane %v13805_v63, 9  ;;  %v16751_v14 = vrot.slane %v13804_v29, 9  ;;  %v14586_v48 = vmax.f32 %v13797_v8, %v16749_v35 }
 0x695   :  { %v25993_v5 = vadd.f32 %v19801_v36, %v26991_v22  ;;  %v14590_v50 = vmax.f32 %v13814_v6, %v16753_v58  ;;  %v13302_v62 = vadd.f32 %v25874_v24, %v13231_v0  ;;  %v13304_v4 = vadd.f32 %v25874_v24, %v13233_v13  ;;  %v26008_v6 = vpop.f32.mrf.mxu1  ;;  %v26993_v58 = vld [vmem:[#allocation13_spill] sm:$0xff] }
 0x696   :  { %v16756_v26 = vrot.slane %v13823_v20, 9  ;;  %v16752_v30 = vrot.slane %v13806_v37, 9  ;;  %v14587_v25 = vmax.f32 %v13805_v63, %v16750_v23  ;;  %v14588_v2 = vmax.f32 %v13804_v29, %v16751_v14 }
 0x697   :  { %v14591_v56 = vmax.f32 %v13822_v42, %v16754_v21  ;;  %v14592_v11 = vmax.f32 %v13821_v43, %v16755_v15  ;;  %v15085_v17 = vrot.slane %v14586_v48, %v25379_v49  ;;  %v13841_v59 = vcombine.high %v13409_v61, %v13409_v61  ;;  %v19907_v15 = vpop.f32.mrf.mxu1 }
 0x698   :  { %v14589_v18 = vmax.f32 %v13806_v37, %v16752_v30  ;;  %v15089_v38 = vrot.slane %v14587_v25, %v25379_v49  ;;  %v15093_v51 = vrot.slane %v14588_v2, %v25379_v49  ;;  %v13848_v32 = vrot.slane %v13409_v61, %v25350_v28  ;;  %v26994_v30 = vld [vmem:[#allocation25_spill] sm:$0xff]  ;;  %v26995_v2 = vld [vmem:[#allocation24_spill] sm:$0xff] }
 0x699   :  { %v15101_v9 = vrot.slane %v14590_v50, %v25379_v49  ;;  %v13366_v45 = vmax.f32 %v13302_v62, 0.0  ;;  %v13855_v41 = vrot.slane %v13841_v59, %v25350_v28  ;;  %v13368_v57 = vmax.f32 %v13304_v4, 0.0 }
 0x69a   :  { %v14593_v40 = vmax.f32 %v13823_v20, %v16756_v26  ;;  %v15097_v19 = vrot.slane %v14589_v18, %v25379_v49  ;;  %v15351_v34 = vsel %vm15274_vm4, %v15089_v38, %v15085_v17  ;;  %v13856_v0 = vcombine.high %v13848_v32, %v13848_v32  ;;  %v26996_v18 = vld [vmem:[#allocation89_spill] sm:$0xff] }
 0x69b   :  { %v15352_v16 = vsel %vm15276_vm5, %v15093_v51, %v15351_v34  ;;  %v16761_v44 = vrot.slane %v13848_v32, 9  ;;  %v13408_v13 = vmax.f32 %v13366_v45, %v13368_v57  ;;  %v13236_v7 = vadd.f32 %v25951_v10, %v26992_v31  ;;  %v13138_v51 = vpop.f32.mrf.mxu1 }
 0x69c   :  { %v15105_v46 = vrot.slane %v14591_v56, %v25379_v49  ;;  %v15109_v39 = vrot.slane %v14592_v11, %v25379_v49  ;;  %v15353_v3 = vsel %vm15278_vm6, %v15097_v19, %v15352_v16  ;;  %v13857_v8 = vcombine.high %v13855_v41, %v13855_v41 }
 0x69d   :  { %v15354_v27 = vsel %vm15280_vm7, %v15101_v9, %v15353_v3  ;;  %v16762_v55 = vrot.slane %v13856_v0, 9  ;;  %v16763_v43 = vrot.slane %v13855_v41, 9  ;;  %v13824_v42 = vcombine.high %v13408_v13, %v13408_v13 }
 0x69e   :  { %v26015_v29 = vadd.f32 %v12444_v47, %v26993_v58  ;;  %v15113_v10 = vrot.slane %v14593_v40, %v25379_v49  ;;  %v15355_v63 = vsel %vm15282_vm8, %v15105_v46, %v15354_v27  ;;  %v13831_v35 = vrot.slane %v13408_v13, %v25350_v28 }
 0x69f   :  { %v15356_v61 = vsel %vm15284_vm9, %v15109_v39, %v15355_v63  ;;  %v14598_v1 = vmax.f32 %v13848_v32, %v16761_v44  ;;  %v13838_v20 = vrot.slane %v13824_v42, %v25350_v28  ;;  %v13307_v21 = vadd.f32 %v25874_v24, %v13236_v7  ;;  %v26998_v7 = vld [vmem:[#allocation27_spill] sm:$0xff]  ;;  %v19910_v39 = vpop.f32.mrf.mxu1 }
 0x6a0   :  { %v15357_v36 = vsel %vm15286_vm10, %v15113_v10, %v15356_v61  ;;  %v16764_v37 = vrot.slane %v13857_v8, 9  ;;  %v13839_v23 = vcombine.high %v13831_v35, %v13831_v35  ;;  %v16757_v14 = vrot.slane %v13831_v35, 9 }
 0x6a1   :  { %15419 = vst.msk [vmem:[#allocation4 + $0x50] sm:$0xff] %vm6778_vm2, %v15357_v36  ;;  %v14599_v48 = vmax.f32 %v13856_v0, %v16762_v55  ;;  %v14600_v22 = vmax.f32 %v13855_v41, %v16763_v43  ;;  %v13840_v50 = vcombine.high %v13838_v20, %v13838_v20  ;;  %v16759_v62 = vrot.slane %v13838_v20, 9  ;;  %v13148_v36 = vpop.f32.mrf.mxu1 }
 0x6a2   :  { %v16758_v4 = vrot.slane %v13839_v23, 9  ;;  %v14594_v26 = vmax.f32 %v13831_v35, %v16757_v14  ;;  %v13235_v25 = vadd.f32 %v25964_v54, %v26994_v30  ;;  %v13238_v56 = vadd.f32 %v25979_v33, %v26995_v2  ;;  %v26997_v33 = vld [vmem:[#allocation92_spill] sm:$0xff]  ;;  %v26999_v35 = vld [vmem:[#allocation26_spill] sm:$0xff] }
 0x6a3   :  { %v15133_v11 = vrot.slane %v14598_v1, %v25379_v49  ;;  %v16760_v17 = vrot.slane %v13840_v50, 9  ;;  %v14596_v59 = vmax.f32 %v13838_v20, %v16759_v62  ;;  %v13237_v38 = vadd.f32 %v25990_v60, %v26996_v18 }
 0x6a4   :  { %v14601_v32 = vmax.f32 %v13857_v8, %v16764_v37  ;;  %v14595_v9 = vmax.f32 %v13839_v23, %v16758_v4  ;;  %v13306_v45 = vadd.f32 %v25874_v24, %v13235_v25  ;;  %v13309_v41 = vadd.f32 %v25874_v24, %v13238_v56 }
 0x6a5   :  { %v14597_v57 = vmax.f32 %v13840_v50, %v16760_v17  ;;  %v15125_v54 = vrot.slane %v14596_v59, %v25379_v49  ;;  %v13308_v40 = vadd.f32 %v25874_v24, %v13237_v38  ;;  %v13240_v19 = vadd.f32 %v19904_v52, %v26997_v33  ;;  %v19913_v59 = vpop.f32.mrf.mxu1  ;;  %v19804_v33 = vpop.f32.mrf.mxu0 }
 0x6a6   :  { %v15117_v34 = vrot.slane %v14594_v26, %v25379_v49  ;;  %v15121_v0 = vrot.slane %v14595_v9, %v25379_v49  ;;  %v13371_v16 = vmax.f32 %v13307_v21, 0.0  ;;  %v13373_v60 = vmax.f32 %v13309_v41, 0.0  ;;  %v27000_v9 = vld [vmem:[#allocation91_spill] sm:$0xff] }
 0x6a7   :  { %v15129_v44 = vrot.slane %v14597_v57, %v25379_v49  ;;  %v13370_v13 = vmax.f32 %v13306_v45, 0.0  ;;  %v13372_v31 = vmax.f32 %v13308_v40, 0.0  ;;  %v13242_v46 = vadd.f32 %v19907_v15, %v26998_v7  ;;  %v13158_v7 = vpop.f32.mrf.mxu1 }
 0x6a8   :  { %v15137_v3 = vrot.slane %v14599_v48, %v25379_v49  ;;  %v15141_v8 = vrot.slane %v14600_v22, %v25379_v49  ;;  %v15358_v47 = vsel %vm15274_vm4, %v15121_v0, %v15117_v34  ;;  %v13411_v52 = vmax.f32 %v13371_v16, %v13373_v60 }
 0x6a9   :  { %v15145_v27 = vrot.slane %v14601_v32, %v25379_v49  ;;  %v15359_v55 = vsel %vm15276_vm5, %v15125_v54, %v15358_v47  ;;  %v13410_v43 = vmax.f32 %v13370_v13, %v13372_v31  ;;  %v13311_v42 = vadd.f32 %v25874_v24, %v13240_v19 }
 0x6aa   :  { %v15360_v58 = vsel %vm15278_vm6, %v15129_v44, %v15359_v55  ;;  %v13875_v10 = vcombine.high %v13411_v52, %v13411_v52  ;;  %v13882_v63 = vrot.slane %v13411_v52, %v25350_v28  ;;  %v13239_v61 = vadd.f32 %v26008_v6, %v26999_v35 }
 0x6ab   :  { %v15361_v1 = vsel %vm15280_vm7, %v15133_v11, %v15360_v58  ;;  %v13858_v20 = vcombine.high %v13410_v43, %v13410_v43  ;;  %v13865_v21 = vrot.slane %v13410_v43, %v25350_v28  ;;  %v13313_v15 = vadd.f32 %v25874_v24, %v13242_v46  ;;  %v26070_v43 = vpop.f32.mrf.mxu0 }
 0x6ac   :  { %v15362_v37 = vsel %vm15282_vm8, %v15137_v3, %v15361_v1  ;;  %v13889_v23 = vrot.slane %v13875_v10, %v25350_v28  ;;  %v13890_v14 = vcombine.high %v13882_v63, %v13882_v63  ;;  %v16769_v48 = vrot.slane %v13882_v63, 9  ;;  %v19916_v1 = vpop.f32.mrf.mxu1 }
 0x6ad   :  { %v15363_v22 = vsel %vm15284_vm9, %v15141_v8, %v15362_v37  ;;  %v13872_v50 = vrot.slane %v13858_v20, %v25350_v28  ;;  %v13873_v62 = vcombine.high %v13865_v21, %v13865_v21  ;;  %v16765_v6 = vrot.slane %v13865_v21, 9  ;;  %v19807_v20 = vpop.f32.mrf.mxu0 }
 0x6ae   :  { %v15364_v4 = vsel %vm15286_vm10, %v15145_v27, %v15363_v22  ;;  %v13891_v26 = vcombine.high %v13889_v23, %v13889_v23  ;;  %v16770_v30 = vrot.slane %v13890_v14, 9  ;;  %v16771_v25 = vrot.slane %v13889_v23, 9 }
 0x6af   :  { %15420 = vst.msk [vmem:[#allocation4 + $0x58] sm:$0xff] %vm6778_vm2, %v15364_v4  ;;  %v13874_v2 = vcombine.high %v13872_v50, %v13872_v50  ;;  %v16766_v56 = vrot.slane %v13873_v62, 9  ;;  %v16767_v11 = vrot.slane %v13872_v50, 9  ;;  %v13377_v17 = vmax.f32 %v13313_v15, 0.0 }
 0x6b0   :  { %v16772_v18 = vrot.slane %v13891_v26, 9  ;;  %v14602_v38 = vmax.f32 %v13865_v21, %v16765_v6  ;;  %v13310_v32 = vadd.f32 %v25874_v24, %v13239_v61  ;;  %v13241_v45 = vadd.f32 %v13138_v51, %v27000_v9 }
 0x6b1   :  { %v16768_v41 = vrot.slane %v13874_v2, 9  ;;  %v14603_v57 = vmax.f32 %v13873_v62, %v16766_v56  ;;  %v14604_v54 = vmax.f32 %v13872_v50, %v16767_v11  ;;  %v13375_v40 = vmax.f32 %v13311_v42, 0.0  ;;  %v27001_v62 = vld [vmem:[#allocation50_spill] sm:$0xff] }
 0x6b2   :  { %v14606_v19 = vmax.f32 %v13882_v63, %v16769_v48  ;;  %v14607_v34 = vmax.f32 %v13890_v14, %v16770_v30  ;;  %v14608_v0 = vmax.f32 %v13889_v23, %v16771_v25  ;;  %v15149_v16 = vrot.slane %v14602_v38, %v25379_v49  ;;  %v27002_v25 = vld [vmem:[#allocation17_spill] sm:$0xff] }
 0x6b3   :  { %v14605_v60 = vmax.f32 %v13874_v2, %v16768_v41  ;;  %v15153_v44 = vrot.slane %v14603_v57, %v25379_v49  ;;  %v15157_v13 = vrot.slane %v14604_v54, %v25379_v49  ;;  %v13413_v31 = vmax.f32 %v13375_v40, %v13377_v17 }
 0x6b4   :  { %v14609_v46 = vmax.f32 %v13891_v26, %v16772_v18  ;;  %v13374_v3 = vmax.f32 %v13310_v32, 0.0  ;;  %v13312_v51 = vadd.f32 %v25874_v24, %v13241_v45  ;;  %v13244_v8 = vadd.f32 %v19910_v39, %v25764_v53  ;;  %v13168_v18 = vpop.f32.mrf.mxu1 }
 0x6b5   :  { %v15161_v47 = vrot.slane %v14605_v60, %v25379_v49  ;;  %v15365_v52 = vsel %vm15274_vm4, %v15153_v44, %v15149_v16  ;;  %v13909_v27 = vcombine.high %v13413_v31, %v13413_v31  ;;  %v13916_v55 = vrot.slane %v13413_v31, %v25350_v28 }
 0x6b6   :  { %v15165_v42 = vrot.slane %v14606_v19, %v25379_v49  ;;  %v15169_v58 = vrot.slane %v14607_v34, %v25379_v49  ;;  %v15366_v10 = vsel %vm15276_vm5, %v15157_v13, %v15365_v52  ;;  %v13376_v63 = vmax.f32 %v13312_v51, 0.0  ;;  %v19919_v16 = vpop.f32.mrf.mxu1 }
 0x6b7   :  { %v15173_v35 = vrot.slane %v14608_v0, %v25379_v49  ;;  %v15367_v53 = vsel %vm15278_vm6, %v15161_v47, %v15366_v10  ;;  %v13923_v39 = vrot.slane %v13909_v27, %v25350_v28  ;;  %v13924_v61 = vcombine.high %v13916_v55, %v13916_v55 }
 0x6b8   :  { %v15177_v21 = vrot.slane %v14609_v46, %v25379_v49  ;;  %v15368_v15 = vsel %vm15280_vm7, %v15165_v42, %v15367_v53  ;;  %v13412_v37 = vmax.f32 %v13374_v3, %v13376_v63  ;;  %v13315_v23 = vadd.f32 %v25874_v24, %v13244_v8 }
 0x6b9   :  { %v15369_v14 = vsel %vm15282_vm8, %v15169_v58, %v15368_v15  ;;  %v16777_v48 = vrot.slane %v13916_v55, 9  ;;  %v13243_v22 = vadd.f32 %v13148_v36, %v25988_v12  ;;  %v13246_v50 = vadd.f32 %v19913_v59, %v25993_v5 }
 0x6ba   :  { %v12534_v6 = vadd.f32 %v19804_v33, %v27001_v62  ;;  %v15370_v4 = vsel %vm15284_vm9, %v15173_v35, %v15369_v14  ;;  %v13892_v26 = vcombine.high %v13412_v37, %v13412_v37  ;;  %v13899_v30 = vrot.slane %v13412_v37, %v25350_v28  ;;  %v12464_v62 = vpop.f32.mrf.mxu0 }
 0x6bb   :  { %v12536_v2 = vadd.f32 %v19807_v20, %v27002_v25  ;;  %v15371_v56 = vsel %vm15286_vm10, %v15177_v21, %v15370_v4  ;;  %v13925_v11 = vcombine.high %v13923_v39, %v13923_v39  ;;  %v16778_v17 = vrot.slane %v13924_v61, 9 }
 0x6bc   :  { %15421 = vst.msk [vmem:[#allocation4 + $0x60] sm:$0xff] %vm6778_vm2, %v15371_v56  ;;  %v16779_v38 = vrot.slane %v13923_v39, 9  ;;  %v13906_v12 = vrot.slane %v13892_v26, %v25350_v28  ;;  %v13907_v5 = vcombine.high %v13899_v30, %v13899_v30  ;;  %v16773_v36 = vrot.slane %v13899_v30, 9 }
 0x6bd   :  { %v14614_v59 = vmax.f32 %v13916_v55, %v16777_v48  ;;  %v13379_v32 = vmax.f32 %v13315_v23, 0.0  ;;  %v13314_v9 = vadd.f32 %v25874_v24, %v13243_v22  ;;  %v13317_v45 = vadd.f32 %v25874_v24, %v13246_v50 }
 0x6be   :  { %v13908_v41 = vcombine.high %v13906_v12, %v13906_v12  ;;  %v16774_v57 = vrot.slane %v13907_v5, 9  ;;  %v16775_v54 = vrot.slane %v13906_v12, 9  ;;  %v14610_v40 = vmax.f32 %v13899_v30, %v16773_v36  ;;  %v27004_v36 = vld [vmem:[#allocation16_spill] sm:$0xff] }
 0x6bf   :  { %v16780_v33 = vrot.slane %v13925_v11, 9  ;;  %v14615_v19 = vmax.f32 %v13924_v61, %v16778_v17  ;;  %v13381_v34 = vmax.f32 %v13317_v45, 0.0  ;;  %v13245_v0 = vadd.f32 %v13158_v7, %v26015_v29 }
 0x6c0   :  { %v14616_v60 = vmax.f32 %v13923_v39, %v16779_v38  ;;  %v16776_v44 = vrot.slane %v13908_v41, 9  ;;  %v14611_v13 = vmax.f32 %v13907_v5, %v16774_v57  ;;  %v14612_v31 = vmax.f32 %v13906_v12, %v16775_v54  ;;  %v27003_v39 = vld [vmem:[#allocation53_spill] sm:$0xff]  ;;  %v13178_v5 = vpop.f32.mrf.mxu1 }
 0x6c1   :  { %v15181_v46 = vrot.slane %v14610_v40, %v25379_v49  ;;  %v13415_v3 = vmax.f32 %v13379_v32, %v13381_v34  ;;  %v13316_v51 = vadd.f32 %v25874_v24, %v13245_v0  ;;  %v13248_v8 = vadd.f32 %v19916_v1, %v12534_v6 }
 0x6c2   :  { %v14613_v47 = vmax.f32 %v13908_v41, %v16776_v44  ;;  %v15185_v52 = vrot.slane %v14611_v13, %v25379_v49  ;;  %v15189_v27 = vrot.slane %v14612_v31, %v25379_v49  ;;  %v13250_v55 = vadd.f32 %v19919_v16, %v12536_v2 }
 0x6c3   :  { %v14617_v42 = vmax.f32 %v13925_v11, %v16780_v33  ;;  %v13943_v58 = vcombine.high %v13415_v3, %v13415_v3  ;;  %v13950_v29 = vrot.slane %v13415_v3, %v25350_v28  ;;  %v13380_v7 = vmax.f32 %v13316_v51, 0.0 }
 0x6c4   :  { %v15193_v10 = vrot.slane %v14613_v47, %v25379_v49  ;;  %v15372_v63 = vsel %vm15274_vm4, %v15185_v52, %v15181_v46  ;;  %v13378_v35 = vmax.f32 %v13314_v9, 0.0  ;;  %v13321_v53 = vadd.f32 %v25874_v24, %v13250_v55 }
 0x6c5   :  { %v12533_v61 = vadd.f32 %v26070_v43, %v27003_v39  ;;  %v15197_v1 = vrot.slane %v14614_v59, %v25379_v49  ;;  %v15373_v20 = vsel %vm15276_vm5, %v15189_v27, %v15372_v63  ;;  %v13319_v21 = vadd.f32 %v25874_v24, %v13248_v8 }
 0x6c6   :  { %v15201_v15 = vrot.slane %v14615_v19, %v25379_v49  ;;  %v15374_v37 = vsel %vm15278_vm6, %v15193_v10, %v15373_v20  ;;  %v13957_v23 = vrot.slane %v13943_v58, %v25350_v28  ;;  %v13414_v14 = vmax.f32 %v13378_v35, %v13380_v7 }
 0x6c7   :  { %v15205_v48 = vrot.slane %v14616_v60, %v25379_v49  ;;  %v15209_v22 = vrot.slane %v14617_v42, %v25379_v49  ;;  %v15375_v50 = vsel %vm15280_vm7, %v15197_v1, %v15374_v37  ;;  %v13958_v43 = vcombine.high %v13950_v29, %v13950_v29 }
 0x6c8   :  { %v15376_v6 = vsel %vm15282_vm8, %v15201_v15, %v15375_v50  ;;  %v13926_v4 = vcombine.high %v13414_v14, %v13414_v14  ;;  %v13933_v26 = vrot.slane %v13414_v14, %v25350_v28  ;;  %v13385_v30 = vmax.f32 %v13321_v53, 0.0 }
 0x6c9   :  { %v15377_v25 = vsel %vm15284_vm9, %v15205_v48, %v15376_v6  ;;  %v13383_v2 = vmax.f32 %v13319_v21, 0.0  ;;  %v13247_v56 = vadd.f32 %v13168_v18, %v12533_v61  ;;  %v13959_v17 = vcombine.high %v13957_v23, %v13957_v23 }
 0x6ca   :  { %v15378_v11 = vsel %vm15286_vm10, %v15209_v22, %v15377_v25  ;;  %v13940_v38 = vrot.slane %v13926_v4, %v25350_v28  ;;  %v13941_v12 = vcombine.high %v13933_v26, %v13933_v26  ;;  %v12535_v59 = vadd.f32 %v12464_v62, %v27004_v36 }
 0x6cb   :  { %15422 = vst.msk [vmem:[#allocation4 + $0x68] sm:$0xff] %vm6778_vm2, %v15378_v11  ;;  %v16785_v32 = vrot.slane %v13950_v29, 9  ;;  %v16786_v9 = vrot.slane %v13958_v43, 9  ;;  %v16781_v45 = vrot.slane %v13933_v26, 9  ;;  %v13417_v40 = vmax.f32 %v13383_v2, %v13385_v30 }
 0x6cc   :  { %v13942_v41 = vcombine.high %v13940_v38, %v13940_v38  ;;  %v16782_v57 = vrot.slane %v13941_v12, 9  ;;  %v16783_v54 = vrot.slane %v13940_v38, 9  ;;  %v16787_v33 = vrot.slane %v13957_v23, 9 }
 0x6cd   :  { %v14618_v18 = vmax.f32 %v13933_v26, %v16781_v45  ;;  %v13318_v19 = vadd.f32 %v25874_v24, %v13247_v56  ;;  %v13249_v34 = vadd.f32 %v13178_v5, %v12535_v59  ;;  %v16788_v0 = vrot.slane %v13959_v17, 9 }
 0x6ce   :  { %v16784_v16 = vrot.slane %v13942_v41, 9  ;;  %v14619_v60 = vmax.f32 %v13941_v12, %v16782_v57  ;;  %v14620_v44 = vmax.f32 %v13940_v38, %v16783_v54  ;;  %v14622_v13 = vmax.f32 %v13950_v29, %v16785_v32 }
 0x6cf   :  { %v14623_v31 = vmax.f32 %v13958_v43, %v16786_v9  ;;  %v13977_v46 = vcombine.high %v13417_v40, %v13417_v40  ;;  %v13320_v3 = vadd.f32 %v25874_v24, %v13249_v34  ;;  %v15213_v8 = vrot.slane %v14618_v18, %v25379_v49 }
 0x6d0   :  { %v14621_v51 = vmax.f32 %v13942_v41, %v16784_v16  ;;  %v15217_v47 = vrot.slane %v14619_v60, %v25379_v49  ;;  %v15221_v52 = vrot.slane %v14620_v44, %v25379_v49  ;;  %v14624_v27 = vmax.f32 %v13957_v23, %v16787_v33 }
 0x6d1   :  { %v13382_v55 = vmax.f32 %v13318_v19, 0.0  ;;  %v13384_v42 = vmax.f32 %v13320_v3, 0.0  ;;  %v14625_v58 = vmax.f32 %v13959_v17, %v16788_v0  ;;  %v13984_v29 = vrot.slane %v13417_v40, %v25350_v28 }
 0x6d2   :  { %v15225_v7 = vrot.slane %v14621_v51, %v25379_v49  ;;  %v15379_v10 = vsel %vm15274_vm4, %v15217_v47, %v15213_v8  ;;  %v15229_v63 = vrot.slane %v14622_v13, %v25379_v49  ;;  %v15233_v53 = vrot.slane %v14623_v31, %v25379_v49 }
 0x6d3   :  { %v15380_v24 = vsel %vm15276_vm5, %v15221_v52, %v15379_v10  ;;  %v13416_v35 = vmax.f32 %v13382_v55, %v13384_v42  ;;  %v13991_v61 = vrot.slane %v13977_v46, %v25350_v28  ;;  %v15237_v1 = vrot.slane %v14624_v27, %v25379_v49 }
 0x6d4   :  { %v15381_v39 = vsel %vm15278_vm6, %v15225_v7, %v15380_v24  ;;  %v15241_v15 = vrot.slane %v14625_v58, %v25379_v49  ;;  %v13992_v23 = vcombine.high %v13984_v29, %v13984_v29  ;;  %v16793_v4 = vrot.slane %v13984_v29, 9 }
 0x6d5   :  { %v15382_v20 = vsel %vm15280_vm7, %v15229_v63, %v15381_v39  ;;  %v13960_v21 = vcombine.high %v13416_v35, %v13416_v35  ;;  %v13967_v14 = vrot.slane %v13416_v35, %v25350_v28  ;;  %v13993_v43 = vcombine.high %v13991_v61, %v13991_v61 }
 0x6d6   :  { %v15383_v37 = vsel %vm15282_vm8, %v15233_v53, %v15382_v20  ;;  %v16794_v25 = vrot.slane %v13992_v23, 9  ;;  %v16795_v11 = vrot.slane %v13991_v61, 9  ;;  %v14630_v36 = vmax.f32 %v13984_v29, %v16793_v4 }
 0x6d7   :  { %v15384_v48 = vsel %vm15284_vm9, %v15237_v1, %v15383_v37  ;;  %v13974_v22 = vrot.slane %v13960_v21, %v25350_v28  ;;  %v13975_v62 = vcombine.high %v13967_v14, %v13967_v14  ;;  %v16789_v6 = vrot.slane %v13967_v14, 9 }
 0x6d8   :  { %v15385_v50 = vsel %vm15286_vm10, %v15241_v15, %v15384_v48  ;;  %v16796_v12 = vrot.slane %v13993_v43, 9  ;;  %v14631_v32 = vmax.f32 %v13992_v23, %v16794_v25  ;;  %v14632_v41 = vmax.f32 %v13991_v61, %v16795_v11 }
 0x6d9   :  { %15423 = vst.msk [vmem:[#allocation4 + $0x70] sm:$0xff] %vm6778_vm2, %v15385_v50  ;;  %v13976_v26 = vcombine.high %v13974_v22, %v13974_v22  ;;  %v16791_v30 = vrot.slane %v13974_v22, 9  ;;  %v16790_v2 = vrot.slane %v13975_v62, 9  ;;  %v14626_v56 = vmax.f32 %v13967_v14, %v16789_v6 }
 0x6da   :  { %v14633_v54 = vmax.f32 %v13993_v43, %v16796_v12  ;;  %v15261_v33 = vrot.slane %v14630_v36, %v25379_v49  ;;  %v15265_v19 = vrot.slane %v14631_v32, %v25379_v49  ;;  %v15269_v0 = vrot.slane %v14632_v41, %v25379_v49 }
 0x6db   :  { %v16792_v17 = vrot.slane %v13976_v26, 9  ;;  %v14628_v38 = vmax.f32 %v13974_v22, %v16791_v30  ;;  %v14627_v5 = vmax.f32 %v13975_v62, %v16790_v2  ;;  %v15245_v9 = vrot.slane %v14626_v56, %v25379_v49 }
 0x6dc   :  { %v15273_v60 = vrot.slane %v14633_v54, %v25379_v49 }
 0x6dd   :  { %v14629_v28 = vmax.f32 %v13976_v26, %v16792_v17  ;;  %v15253_v59 = vrot.slane %v14628_v38, %v25379_v49  ;;  %v15249_v45 = vrot.slane %v14627_v5, %v25379_v49 }
 0x6df   :  { %v15257_v57 = vrot.slane %v14629_v28, %v25379_v49  ;;  %v15386_v40 = vsel %vm15274_vm4, %v15249_v45, %v15245_v9 }
 0x6e0   :  { %v15387_v18 = vsel %vm15276_vm5, %v15253_v59, %v15386_v40 }
 0x6e1   :  { %v15388_v34 = vsel %vm15278_vm6, %v15257_v57, %v15387_v18 }
 0x6e2   :  { %v15389_v16 = vsel %vm15280_vm7, %v15261_v33, %v15388_v34 }
 0x6e3   :  { %v15390_v44 = vsel %vm15282_vm8, %v15265_v19, %v15389_v16 }
 0x6e4   :  { %v15391_v13 = vsel %vm15284_vm9, %v15269_v0, %v15390_v44 }
 0x6e5   :  { %v15392_v31 = vsel %vm15286_vm10, %v15273_v60, %v15391_v13 }
 0x6e6   :  { %15424 = vst.msk [vmem:[#allocation4 + $0x78] sm:$0xff] %vm6778_vm2, %v15392_v31 }
 0x6e7   :  { %19954 = shalt.err (!%p19951_p4)
}
 0x6e8   :  { %s19968_s15 = smov 128   ;;  %s19969_s16 = smov 8  }
 0x6e9   :  { %15436 = dma.vmem_to_hbm [thread:$0]  %s15431_s14, 2048, %s26168_s7, [#allocation5], %s19968_s15, %s19968_s15, %s19969_s16  }
 0x6ea   :  { %19963 = dma.done.wait [#allocation5], 2048  }
 0x6eb   :  { %19964 = vsyncadd [#allocation5], 4294965248 }
 0x6ec   :  { %15440 = vsyncpa [#allocation5], 1 }

</bundles_post_ra>
